<compile_context>
chip_gen: v7x
topology: tpu7x:2x2x1
jax: 0.10.0
libtpu: 0.0.40
codegen_flags: <defaults>
</compile_context>

<pallas_src>
import jax
import jax.numpy as jnp
from jax.experimental import pallas as pl
from jax.experimental.pallas import tpu as pltpu

IN_DIM = 15360
EMB_DIM = 768
CONTEXT_TOKENS = 4                      # Config.CONTEXT_TOKENS (synthetic, small)
OUT_DIM = EMB_DIM * CONTEXT_TOKENS      # 3072


# ----------------------------------------------------------------------------
# Tiling heuristics
# ----------------------------------------------------------------------------
def _default_tn(N):
    """Full-N tile on single-TC chips; two N blocks on v7x so both
    TensorCores pull on HBM.  Falls back to tn=N if detection fails."""
    try:
        kind = jax.devices()[0].device_kind.lower()
    except Exception:  # pragma: no cover - defensive
        kind = ""
    two_tensorcores = ("v7" in kind) or ("7x" in kind)
    if two_tensorcores and N % 2 == 0 and (N // 2) % 128 == 0:
        # NOTE(perf review): verify with xprof that the size-2 "parallel" axis
        # really shards across both TensorCores; if not, switch that axis to
        # pltpu.CORE_PARALLEL.
        return N // 2
    return N


def _pick_tk(K, tn, itemsize, *, target_steps=12, weight_buffers=2,
             weight_vmem_budget=20 * 1024 * 1024):
    """Largest tk that (a) divides K, (b) is a multiple of 128, (c) yields at
    least `target_steps` reduction steps (bounds the exposed prologue DMA),
    and (d) keeps the multi-buffered weight tile under `weight_vmem_budget`."""
    best = 128
    wb = max(weight_buffers, 2)
    for tk in range(128, K + 1, 128):
        if K % tk:
            continue
        if K // tk < target_steps:
            break
        if wb * tk * tn * itemsize > weight_vmem_budget:
            continue
        best = tk
    return best


def _vmem_limit_bytes(B, tk, tn, itemsize, out_itemsize, weight_buffers):
    wb = max(weight_buffers, 2)
    need = (wb * tk * tn * itemsize          # weight multi-buffer (dominant)
            + 2 * B * tk * itemsize          # x double buffer
            + 2 * tn * 4                     # bias double buffer
            + 2 * B * tn * out_itemsize      # output double buffer
            + B * tn * 4)                    # f32 accumulator scratch
    limit = int(need * 1.25) + (4 << 20)     # headroom for compiler scratch
    return int(min(max(limit, 16 << 20), 100 << 20))


# ----------------------------------------------------------------------------
# Kernel
# ----------------------------------------------------------------------------
def _fusion_kernel(x_ref, w_ref, b_ref, o_ref, acc_ref):
    # grid = (N // tn, K // tk); K (reduction) is the last, "arbitrary" axis.
    k = pl.program_id(1)

    @pl.when(k == 0)
    def _():
        acc_ref[...] = jnp.zeros_like(acc_ref)

    # bf16 (or f32) inputs, f32 accumulation on the MXU.
    acc_ref[...] += jnp.dot(
        x_ref[...], w_ref[...], preferred_element_type=jnp.float32
    )

    @pl.when(k == pl.num_programs(1) - 1)
    def _():
        # bias + tanh epilogue in f32, then cast to the output dtype.
        o_ref[...] = jnp.tanh(acc_ref[...] + b_ref[...]).astype(o_ref.dtype)


# ----------------------------------------------------------------------------
# Wrapper
# ----------------------------------------------------------------------------
def prepare_params(weight, bias, compute_dtype=jnp.bfloat16):
    """Convert parameters ONCE (cache the result).  Passing the pre-converted
    weight to simple_fusion avoids a per-call f32->bf16 cast that would read
    the full 189 MB f32 weight and write a 94 MB bf16 copy every call."""
    return weight.astype(compute_dtype), bias.astype(jnp.float32).reshape(1, -1)


def simple_fusion(video_emb, weight, bias, *, context_tokens=CONTEXT_TOKENS,
                  compute_dtype=jnp.bfloat16, tn=None, tk=None,
                  weight_buffers=2):
    """
    video_emb: (B, 15360) or (B, F, 768) with F*768 == 15360
    weight:    (15360, 768*context_tokens), ideally already in compute_dtype
               [transpose of nn.Linear.weight]
    bias:      (768*context_tokens,) or (1, 768*context_tokens)
    returns:   (B, context_tokens, 768) in video_emb.dtype
    """
    if video_emb.ndim == 3:
        B, F, E = video_emb.shape
        x = video_emb.reshape(B, F * E)
    elif video_emb.ndim == 2:
        x = video_emb
    else:
        raise ValueError("Unexpected shape for video_emb.")

    B, K = x.shape
    N = weight.shape[1]
    assert K == weight.shape[0] == IN_DIM
    assert N == EMB_DIM * context_tokens

    out_dtype = video_emb.dtype
    itemsize = jnp.dtype(compute_dtype).itemsize

    if tn is None:
        tn = _default_tn(N)
    if tk is None:
        tk = _pick_tk(K, tn, itemsize, weight_buffers=weight_buffers)
    assert N % tn == 0 and K % tk == 0
    assert tn % 128 == 0 and tk % 128 == 0

    # Only cast when the caller did NOT pre-convert (prefer prepare_params()).
    ww = weight if weight.dtype == compute_dtype else weight.astype(compute_dtype)
    xw = x if x.dtype == compute_dtype else x.astype(compute_dtype)
    bias2d = (bias if bias.ndim == 2 else bias.reshape(1, N))
    if bias2d.dtype != jnp.float32:
        bias2d = bias2d.astype(jnp.float32)

    cost = pl.CostEstimate(
        flops=2 * B * K * N,
        transcendentals=B * N,
        bytes_accessed=(K * N * itemsize                        # weight stream
                        + B * K * itemsize                      # activations
                        + B * N * jnp.dtype(out_dtype).itemsize # output
                        + N * 4),                               # bias
    )

    # Weight BlockSpec: optionally deeper-buffered (perf review suggestion;
    # only worth enabling if xprof shows inter-DMA gaps).
    if weight_buffers and weight_buffers != 2:
        w_spec = pl.BlockSpec((tk, tn), lambda j, k: (k, j),
                              pipeline_mode=pl.Buffered(weight_buffers))
    else:
        w_spec = pl.BlockSpec((tk, tn), lambda j, k: (k, j))

    out = pl.pallas_call(
        _fusion_kernel,
        out_shape=jax.ShapeDtypeStruct((B, N), out_dtype),
        grid_spec=pltpu.PrefetchScalarGridSpec(
            num_scalar_prefetch=0,
            grid=(N // tn, K // tk),
            in_specs=[
                # x re-DMA per step is ~B*tk*itemsize (a few KB) -- noise next
                # to the weight stream, and keeps lowering simple/robust.
                pl.BlockSpec((B, tk), lambda j, k: (0, k)),   # x tile
                w_spec,                                       # W tile (dominant)
                pl.BlockSpec((1, tn), lambda j, k: (0, j)),   # bias tile
            ],
            out_specs=pl.BlockSpec((B, tn), lambda j, k: (0, j)),
            scratch_shapes=[pltpu.VMEM((B, tn), jnp.float32)],
        ),
        compiler_params=pltpu.CompilerParams(
            dimension_semantics=("parallel", "arbitrary"),
            vmem_limit_bytes=_vmem_limit_bytes(
                B, tk, tn, itemsize, jnp.dtype(out_dtype).itemsize,
                weight_buffers),
        ),
        cost_estimate=cost,
    )(xw, ww, bias2d)

    return out.reshape(B, context_tokens, EMB_DIM)


# ----------------------------------------------------------------------------
# Reference + self-test
# ----------------------------------------------------------------------------
def _reference(video_emb, weight, bias, context_tokens=CONTEXT_TOKENS,
               compute_dtype=None):
    if video_emb.ndim == 3:
        x = video_emb.reshape(video_emb.shape[0], -1)
    else:
        x = video_emb
    if compute_dtype is None:
        z = x @ weight
    else:
        z = jnp.dot(x.astype(compute_dtype), weight.astype(compute_dtype),
                    preferred_element_type=jnp.float32)
    out = jnp.tanh(z + bias.astype(jnp.float32)).astype(video_emb.dtype)
    return out.reshape(x.shape[0], context_tokens, EMB_DIM)


if __name__ == "__main__":
    key = jax.random.PRNGKey(0)
    k_x, k_w, k_b = jax.random.split(key, 3)

    B = 2
    # Deterministic parameter init (synthetic; stands in for nn.Linear's init).
    weight_f32 = (jax.random.normal(k_w, (IN_DIM, OUT_DIM), jnp.float32)
                  * (1.0 / jnp.sqrt(IN_DIM)))
    bias_f32 = jax.random.normal(k_b, (OUT_DIM,), jnp.float32) * 0.01

    # C3D-style input: (B, 15360)
    x = jax.random.normal(k_x, (B, IN_DIM), jnp.float32)

    # Convert the weight ONCE, outside the hot path (perf-review fix #1).
    w_bf16, bias_prep = prepare_params(weight_f32, bias_f32, jnp.bfloat16)
    w_bf16 = jax.block_until_ready(w_bf16)

    ref_f32 = _reference(x, weight_f32, bias_f32)
    ref_bf16 = _reference(x, weight_f32, bias_f32, compute_dtype=jnp.bfloat16)

    # Default (bf16-stream) kernel with a pre-converted weight.
    out = jax.block_until_ready(simple_fusion(x, w_bf16, bias_prep))
    assert out.shape == (B, CONTEXT_TOKENS, EMB_DIM), out.shape
    # Tight check vs a bf16-input / f32-accumulate reference ...
    assert jnp.allclose(out, ref_bf16, atol=2e-3, rtol=0)
    # ... and a loose check vs the full-f32 reference (bf16 weight rounding).
    assert jnp.allclose(out, ref_f32, atol=3e-2, rtol=3e-2)

    # CLIP-style input: (B, F, 768) with F = 20 so F*768 == 15360.
    x3 = x.reshape(B, IN_DIM // EMB_DIM, EMB_DIM)
    out3 = jax.block_until_ready(simple_fusion(x3, w_bf16, bias_prep))
    assert jnp.allclose(out3, ref_bf16, atol=2e-3, rtol=0)

    # Full-precision path (exact PyTorch semantics) still works.
    out_f32 = jax.block_until_ready(
        simple_fusion(x, weight_f32, bias_f32, compute_dtype=jnp.float32))
    assert jnp.allclose(out_f32, ref_f32, atol=2e-5, rtol=2e-5)

    print("KERNEL_OK")
</pallas_src>

<mosaic_0001>
module attributes {stable_mosaic.version = 11 : i64} {
  func.func @_fusion_kernel(%arg0: i32, %arg1: i32, %arg2: memref<2x1280xbf16, #tpu.memory_space<vmem>>, %arg3: memref<1280x3072xbf16, #tpu.memory_space<vmem>>, %arg4: memref<1x3072xf32, #tpu.memory_space<vmem>>, %arg5: memref<2x3072xf32, #tpu.memory_space<vmem>>, %arg6: memref<2x3072xf32, #tpu.memory_space<vmem>>) attributes {dimension_semantics = [#tpu.dimension_semantics<parallel>, #tpu.dimension_semantics<arbitrary>], iteration_bounds = array<i64: 1, 12>, scalar_prefetch = 0 : i64, scratch_operands = 1 : i64, tpu.core_type = #tpu.core_type<tc>, window_params = [{transform_indices = @transform_0, window_bounds = array<i64: 2, 1280>}, {transform_indices = @transform_1, window_bounds = array<i64: 1280, 3072>}, {transform_indices = @transform_2, window_bounds = array<i64: 1, 3072>}, {transform_indices = @transform_3, window_bounds = array<i64: 2, 3072>}]} {
    %c0_i32 = arith.constant 0 : i32
    %0 = arith.cmpi eq, %arg1, %c0_i32 : i32
    %1 = arith.extui %0 : i1 to i32
    %c0_i32_0 = arith.constant 0 : i32
    %2 = arith.cmpi ne, %1, %c0_i32_0 : i32
    scf.if %2 {
      %cst_9 = arith.constant 0.000000e+00 : f32
      %12 = vector.broadcast %cst_9 : f32 to vector<2x3072xf32>
      %c0_10 = arith.constant 0 : index
      %c0_11 = arith.constant 0 : index
      %13 = vector.load %arg6[%c0_10, %c0_11] : memref<2x3072xf32, #tpu.memory_space<vmem>>, vector<2x3072xf32>
      tpu.vector_store %arg6[%c0_10, %c0_11], %12 {strides = array<i32>} : memref<2x3072xf32, #tpu.memory_space<vmem>>, vector<2x3072xf32>,
    } else {
    }
    %c0 = arith.constant 0 : index
    %c0_1 = arith.constant 0 : index
    %3 = vector.load %arg6[%c0, %c0_1] : memref<2x3072xf32, #tpu.memory_space<vmem>>, vector<2x3072xf32>
    %c0_2 = arith.constant 0 : index
    %c0_3 = arith.constant 0 : index
    %4 = vector.load %arg2[%c0_2, %c0_3] : memref<2x1280xbf16, #tpu.memory_space<vmem>>, vector<2x1280xbf16>
    %c0_4 = arith.constant 0 : index
    %c0_5 = arith.constant 0 : index
    %5 = vector.load %arg3[%c0_4, %c0_5] : memref<1280x3072xbf16, #tpu.memory_space<vmem>>, vector<1280x3072xbf16>
    %cst = arith.constant dense<0.000000e+00> : vector<2x3072xf32>
    %6 = tpu.matmul %4, %5, %cst {dimension_numbers = #tpu.dot_dimension_numbers<[1], [0], [0], [1], [0, 0, 1, 1], [], []>} : vector<2x1280xbf16>, vector<1280x3072xbf16>, vector<2x3072xf32> -> vector<2x3072xf32>
    %7 = arith.addf %3, %6 : vector<2x3072xf32>
    %c0_6 = arith.constant 0 : index
    %c0_7 = arith.constant 0 : index
    %8 = vector.load %arg6[%c0_6, %c0_7] : memref<2x3072xf32, #tpu.memory_space<vmem>>, vector<2x3072xf32>
    tpu.vector_store %arg6[%c0_6, %c0_7], %7 {strides = array<i32>} : memref<2x3072xf32, #tpu.memory_space<vmem>>, vector<2x3072xf32>,
    %c11_i32 = arith.constant 11 : i32
    %9 = arith.cmpi eq, %arg1, %c11_i32 : i32
    %10 = arith.extui %9 : i1 to i32
    %c0_i32_8 = arith.constant 0 : i32
    %11 = arith.cmpi ne, %10, %c0_i32_8 : i32
    scf.if %11 {
      %c0_9 = arith.constant 0 : index
      %c0_10 = arith.constant 0 : index
      %12 = vector.load %arg6[%c0_9, %c0_10] : memref<2x3072xf32, #tpu.memory_space<vmem>>, vector<2x3072xf32>
      %c0_11 = arith.constant 0 : index
      %c0_12 = arith.constant 0 : index
      %13 = vector.load %arg4[%c0_11, %c0_12] : memref<1x3072xf32, #tpu.memory_space<vmem>>, vector<1x3072xf32>
      %14 = vector.broadcast %13 : vector<1x3072xf32> to vector<2x3072xf32>
      %15 = arith.addf %12, %14 : vector<2x3072xf32>
      %16 = math.tanh %15 : vector<2x3072xf32>
      %c0_13 = arith.constant 0 : index
      %c0_14 = arith.constant 0 : index
      %17 = vector.load %arg5[%c0_13, %c0_14] : memref<2x3072xf32, #tpu.memory_space<vmem>>, vector<2x3072xf32>
      tpu.vector_store %arg5[%c0_13, %c0_14], %16 {strides = array<i32>} : memref<2x3072xf32, #tpu.memory_space<vmem>>, vector<2x3072xf32>,
    } else {
    }
    return
  }
  func.func @transform_0(%arg0: i32, %arg1: i32) -> (i32, i32) {
    %c0_i32 = arith.constant 0 : i32
    %c0_i32_0 = arith.constant 0 : i32
    return %c0_i32, %arg1 : i32, i32
  }
  func.func @transform_1(%arg0: i32, %arg1: i32) -> (i32, i32) {
    %c0_i32 = arith.constant 0 : i32
    return %arg1, %arg0 : i32, i32
  }
  func.func @transform_2(%arg0: i32, %arg1: i32) -> (i32, i32) {
    %c0_i32 = arith.constant 0 : i32
    %c0_i32_0 = arith.constant 0 : i32
    return %c0_i32, %arg0 : i32, i32
  }
  func.func @transform_3(%arg0: i32, %arg1: i32) -> (i32, i32) {
    %c0_i32 = arith.constant 0 : i32
    %c0_i32_0 = arith.constant 0 : i32
    return %c0_i32, %arg0 : i32, i32
  }
}

</mosaic_0001>

<bundles_post_ra>
// kernel: tpu_custom_call.1
= control target key start
LH: loop header
LB: loop body
LE: loop exit
PB: predicated region body
PF: predicated region fallthrough
CT: control target
= control target key end

     0   :  { %8 = vsyncpa [#allocation4], 0  ;;  %s19674_s0 = inlined_call_operand.hbm [shape: bf16[2,15360], index: 0, kind: input, shape index: {}]   ;;  %s19675_s1 = inlined_call_operand.hbm [shape: bf16[15360,3072], index: 1, kind: input, shape index: {}]   ;;  %s19676_s2 = inlined_call_operand.hbm [shape: f32[1,3072], index: 2, kind: input, shape index: {}]   ;;  %s19677_s3 = inlined_call_operand.hbm [shape: f32[2,3072], index: 3, kind: output, shape index: {}]  }
   0x1   :  { %10 = vsyncpa [#allocation4 + $0x1], 0 }
   0x2   :  { %11 = vsyncpa [#allocation7], 0 }
   0x3   :  { %13 = vsyncpa [#allocation7 + $0x1], 0 }
   0x4   :  { %14 = vsyncpa [#allocation5], 0  ;;  %s17270_s12 = smov 0   ;;  %s17272_s13 = smov 0  }
   0x5   :  { %s17274_s14 = smov 0   ;;  %s17276_s15 = smov 0  }
   0x6   :  { %s17278_s16 = smov 0   ;;  %s17280_s17 = smov 0  }
   0x7 LB: > { %s17299_s18 = sadd.s32 4294967295, %s17239_s17   ;;  %s39_s19 = sadd.s32 1, %s17227_s14  ;;  %s17239_s17 = sphi %s17280_s17, %s20_s17   ;;  %s17235_s16 = sphi %s17278_s16, %s19698_s16   ;;  %s17231_s15 = sphi %s17276_s15, %s19697_s15   ;;  %s17227_s14 = sphi %s17274_s14, %s19696_s14   ;;  %s17223_s13 = sphi %s17272_s13, %s19695_s13   ;;  %s17219_s12 = sphi %s17270_s12, %s19694_s12  }
   0x8   : > { %p46_p0 = scmp.ne.s32.totalorder %s17227_s14, %s17223_s13  ;;  %p52_p1 = scmp.ne.s32.totalorder %s17223_s13, %s17219_s12 }
   0x9   : > { %p19678_p2 = scmp.eq.s32.totalorder %s17299_s18, 0  ;;  %p14834_p3 = scmp.ge.s32.totalorder %s17239_s17, 1 }
   0xa   : > { %p143_p4 = scmp.lt.s32.totalorder %s17239_s17, 13  ;;  %s17241_s22 = smov [#allocation8]  }
   0xb   : > { %p17310_p5 = por %p19678_p2, %p52_p1  ;;  %s159_s23 = sshll.u32 %s17241_s22, 4  ;;  %s160_s23 = int_to_ptr.vmem [resolvable:$true] %s159_s23 }
   0xc   : > { %p17314_p6 = pnand %p14834_p3, %p143_p4  ;;  %p47_p8 = scmp.eq.s32.totalorder %s17239_s17, 0 }
   0xd   : > { %s19681_s20 = scalar_select %p17310_p5, 1, 0 }
   0xe   : > { %s19682_s21 = scalar_select %p17314_p6, 1, 0 }
   0xf   : > { %p16978_p7 = pneg %p17314_p6  ;;  %s29_s25 = sadd.s32 1, %s17235_s16 }
  0x10   : > { %p17328_p10 = scmp.ge.s32.totalorder %s29_s25, 12  ;;  %p17335_p11 = por %p47_p8, %p46_p0 }
  0x11   : > { %p17323_p9 = pnand %p16978_p7, %p19678_p2  ;;  %s17063_s30 = scalar_lea.hbm %s19676_s2, 384 }
  0x12   : > { %s19684_s26 = scalar_select %p17328_p10, 1, 0 }
  0x13   : > { %s19685_s27 = scalar_select %p17335_p11, 1, 0 }
  0x14   : > { %p17064_p13 = scmp.ne.s32.totalorder %s19676_s2, %s17063_s30  ;;  %p17065_p1 = pneg %p17323_p9 }
  0x15   : > { %p17070_p0 = scmp.lt.u32.totalorder %s17063_s30, %s19676_s2 }
  0x16   : > { %p17066_p3 = pnand %p17065_p1, %p17064_p13 }
  0x18   : > { %p17067_p4 = pneg %p17066_p3 }
  0x1a   : > { %p17072_p7 = pnand %p17070_p0, %p17067_p4 }
  0x1c   : > { %17075 = shalt.err (!%p17072_p7)
}
  0x1d   : > { %s17076_s8 = scalar_lea.vmem %s160_s23, 384  ;;  %p17084_p5 = scmp.lt.s32.totalorder %s160_s23, %s160_s23 }
  0x1e   : > { %p17077_p8 = scmp.ne.s32.totalorder %s160_s23, %s17076_s8  ;;  %p17085_p6 = scmp.lt.s32.totalorder %s17076_s8, %s17076_s8 }
  0x20   : > { %p17079_p2 = pnand %p17077_p8, %p17065_p1  ;;  %p17086_p11 = por %p17085_p6, %p17084_p5 }
  0x22   : > { %p17080_p12 = pneg %p17079_p2 }
  0x24   : > { %p17087_p10 = pnand %p17086_p11, %p17080_p12 }
  0x26   : > { %17090 = shalt.err (!%p17087_p10)
}
  0x27   : > { %16981 = dma.hbm_to_vmem [thread:$0]  (!%p17323_p9), %s19676_s2, 384, %s160_s23, [#allocation7]  }
  0x28   : > { %p19686_p2 = scmp.ne.s32.totalorder %s19684_s26, 0  ;;  %s17361_s11 = sand.u32 1, %s17227_s14  }
  0x29   : > { %s16768_s12 = smul.u32 160, %s17235_s16  ;;  %p19687_p6 = scmp.ne.s32.totalorder %s19685_s27, 0 }
  0x2a   : > { %s19700_s25 = smov (%p19686_p2, %s29_s25), 0  ;;  %s16961_s24 = smul.u32 10, %s17361_s11 }
  0x2b   : > { %s36_s22 = ssub.s32 %s17235_s16, %s19700_s25  ;;  %s17370_s30 = scalar_lea.hbm %s19674_s0, %s16768_s12 }
  0x2c   : > { %p37_p5 = scmp.eq.s32.totalorder %s36_s22, 0  ;;  %p19688_p9 = scmp.lt.s32.totalorder %s17239_s17, 12 }
  0x2d   : > { %s174_s4 = scalar_lea.vmem [#allocation3], %s16961_s24  ;;  %s16962_s6 = smul.u32 15360, %s17361_s11 }
  0x2e   : > { %p17376_p10 = pnand %p19688_p9, %p19687_p6  ;;  %s182_s5 = sshll.u32 %s174_s4, 4  ;;  %s17386_s5 = int_to_ptr.vmem [resolvable:$true] %s182_s5 }
  0x2f   : > { %s17383_s26 = scalar_select %p37_p5, %s17227_s14, %s39_s19  }
  0x30   : > { %s16991_s27 = smul.u32 245760, %s17235_s16  ;;  %s171_s7 = scalar_lea.sflag [#allocation4], %s17361_s11 }
  0x31   : > { %s17091_s8 = scalar_lea.hbm %s17370_s30, 160  ;;  %p17093_p12 = pneg %p17376_p10 }
  0x32   : > { %p17092_p11 = scmp.ne.s32.totalorder %s17370_s30, %s17091_s8  ;;  %s17096_s19 = scalar_lea.hbm %s19674_s0, 1920 }
  0x33   : > { %p17097_p3 = scmp.lt.u32.totalorder %s17370_s30, %s19674_s0  ;;  %p17098_p4 = scmp.lt.u32.totalorder %s17096_s19, %s17091_s8 }
  0x34   : > { %p17094_p13 = pnand %p17093_p12, %p17092_p11  ;;  %p17100_p7 = scmp.lt.u32.totalorder %s17091_s8, %s17370_s30 }
  0x35   : > { %p17099_p0 = por %p17098_p4, %p17097_p3 }
  0x36   : > { %p17095_p1 = pneg %p17094_p13 }
  0x37   : > { %p17101_p8 = por %p17100_p7, %p17099_p0 }
  0x39   : > { %p17102_p2 = pnand %p17101_p8, %p17095_p1 }
  0x3b   : > { %17105 = shalt.err (!%p17102_p2)
}
  0x3c   : > { %s17106_s24 = scalar_lea.vmem %s17386_s5, 160  ;;  %s17242_s28 = smov [#allocation3]  }
  0x3d   : > { %p17107_p5 = scmp.ne.s32.totalorder %s17386_s5, %s17106_s24  ;;  %s17111_s29 = sshll.u32 %s17242_s28, 4  ;;  %s17112_s29 = int_to_ptr.vmem [resolvable:$false] %s17111_s29 }
  0x3e   : > { %s17113_s4 = scalar_lea.vmem %s17112_s29, 320  ;;  %p17114_p11 = scmp.lt.s32.totalorder %s17386_s5, %s17112_s29 }
  0x3f   : > { %p17109_p6 = pnand %p17107_p5, %p17093_p12  ;;  %p17115_p13 = scmp.lt.s32.totalorder %s17113_s4, %s17106_s24 }
  0x41   : > { %p17110_p9 = pneg %p17109_p6  ;;  %p17116_p3 = por %p17115_p13, %p17114_p11 }
  0x43   : > { %p17117_p4 = pnand %p17116_p3, %p17110_p9 }
  0x45   : > { %17120 = shalt.err (!%p17117_p4)
}
  0x46   : > { %16985 = dma.hbm_to_vmem [thread:$0]  (!%p17376_p10), %s17370_s30, 160, %s17386_s5, %s171_s7  }
  0x47   : > { %s189_s8 = sand.u32 1, %s17239_s17   ;;  %s193_s9 = scalar_lea.vmem [#allocation6], %s16962_s6 }
  0x48   : > { %s203_s10 = sshll.u32 %s193_s9, 4  ;;  %s17425_s22 = scalar_lea.hbm %s19675_s1, %s16991_s27  ;;  %s17418_s10 = int_to_ptr.vmem [resolvable:$true] %s203_s10 }
  0x49   : > { %s17427_s24 = scalar_lea.sflag [#allocation7], %s189_s8  ;;  %s17121_s28 = scalar_lea.hbm %s17425_s22, 245760 }
  0x4a   : > { %p17122_p1 = scmp.ne.s32.totalorder %s17425_s22, %s17121_s28  ;;  %s17126_s5 = scalar_lea.hbm %s19675_s1, 2949120 }
  0x4b   : > { %p17127_p8 = scmp.lt.u32.totalorder %s17425_s22, %s19675_s1  ;;  %p17128_p2 = scmp.lt.u32.totalorder %s17126_s5, %s17121_s28 }
  0x4c   : > { %p17124_p0 = pnand %p17122_p1, %p17093_p12  ;;  %p17130_p6 = scmp.lt.u32.totalorder %s17121_s28, %s17425_s22 }
  0x4d   : > { %p17129_p5 = por %p17128_p2, %p17127_p8 }
  0x4e   : > { %p17125_p7 = pneg %p17124_p0 }
  0x4f   : > { %p17131_p9 = por %p17130_p6, %p17129_p5 }
  0x51   : > { %p17132_p11 = pnand %p17131_p9, %p17125_p7 }
  0x53   : > { %17135 = shalt.err (!%p17132_p11)
}
  0x54   : > { %s17136_s27 = scalar_lea.vmem %s17418_s10, 245760  ;;  %s17243_s29 = smov [#allocation6]  }
  0x55   : > { %p17137_p13 = scmp.ne.s32.totalorder %s17418_s10, %s17136_s27  ;;  %s17141_s4 = sshll.u32 %s17243_s29, 4  ;;  %s17142_s4 = int_to_ptr.vmem [resolvable:$false] %s17141_s4 }
  0x56   : > { %s17143_s8 = scalar_lea.vmem %s17142_s4, 491520  ;;  %p17144_p1 = scmp.lt.s32.totalorder %s17418_s10, %s17142_s4 }
  0x57   : > { %p17139_p3 = pnand %p17137_p13, %p17093_p12  ;;  %p17145_p0 = scmp.lt.s32.totalorder %s17143_s8, %s17136_s27 }
  0x59   : > { %p17140_p4 = pneg %p17139_p3  ;;  %p17146_p8 = por %p17145_p0, %p17144_p1 }
  0x5b   : > { %p17147_p2 = pnand %p17146_p8, %p17140_p4 }
  0x5d   : > { %17150 = shalt.err (!%p17147_p2)
}
  0x5e   : > { %s17244_s9 = smov 1536   ;;  %s17245_s19 = smov 96  }
  0x5f   : > { %16988 = dma.hbm_to_vmem [thread:$0]  (!%p17376_p10), %s17425_s22, 245760, %s17418_s10, %s17427_s24, %s17244_s9, %s17244_s9, %s17245_s19  }
  0x60   : > { %p19690_p12 = scmp.ne.s32.totalorder %s19682_s21, 0 }
  0x61   : > { %s217_s12 = sand.u32 (!%p19690_p12), 1, %s17223_s13   ;;  %p19691_p7 = scmp.ne.s32.totalorder (!%p19690_p12), %s19681_s20, 0 }
  0x62   : > { %215 = sbr.rel (%p19690_p12) target bundleno = 2314 (0x90a), region = 32  ;;  %s218_s11 = scalar_lea.sflag (!%p19690_p12), [#allocation4], %s217_s12 }
  0x63   : > { %s16964_s28 = smul.u32 (!%p19690_p12), 10, %s217_s12 }
  0x65   : > { %s17456_s30 = scalar_lea.vmem (!%p19690_p12), [#allocation3], %s16964_s28 }
  0x69   : > { %17202 = dma.done.wait (%p19691_p7), %s218_s11, 160  }
  0x6a   : > { %17204 = vsyncadd (%p19691_p7), %s218_s11, 4294967136  ;;  %s226_s5 = sand.u32 1, %s17299_s18   ;;  %s16965_s23 = smul.u32 15360, %s217_s12 }
  0x6b   : > { %s227_s10 = scalar_lea.sflag [#allocation7], %s226_s5 }
  0x6c   : > { %s17463_s22 = scalar_lea.vmem [#allocation6], %s16965_s23 }
  0x6d   : > { %17206 = dma.done.wait (%p19691_p7), %s227_s10, 245760  }
  0x6e   : > { %17208 = vsyncadd (%p19691_p7), %s227_s10, 4294721536  ;;  %p19692_p10 = scmp.eq.s32.totalorder %s17299_s18, 0 }
  0x70   : > { %17210 = dma.done.wait (%p19692_p10), [#allocation7], 384   ;;  %p19693_p5 = pmov %p19692_p10 }
  0x71   : > { %p14841_p6 = scmp.ne.s32.totalorder %s17231_s15, 0 }
  0x72   : > { %17212 = vsyncadd (%p19693_p5), [#allocation7], 4294966912  ;;  %v17246_v0 = vmov (!%p14841_p6), 0.0  }
  0x73   : > { %265 = sbr.rel (%p14841_p6) target bundleno = 122 (0x7a), region = 48  ;;  %266 = vst [vmem:[#allocation2] sm:$0xff] (!%p14841_p6), %v17246_v0  ;;  %267 = vst [vmem:[#allocation2 + $0x8] sm:$0xff] (!%p14841_p6), %v17246_v0 }
  0x74   : > { %268 = vst [vmem:[#allocation2 + $0x10] sm:$0xff] (!%p14841_p6), %v17246_v0  ;;  %269 = vst [vmem:[#allocation2 + $0x18] sm:$0xff] (!%p14841_p6), %v17246_v0 }
  0x75   : > { %270 = vst [vmem:[#allocation2 + $0x20] sm:$0xff] (!%p14841_p6), %v17246_v0  ;;  %271 = vst [vmem:[#allocation2 + $0x28] sm:$0xff] (!%p14841_p6), %v17246_v0 }
  0x7a PF: > { %v280_v1 = vld [vmem:[%s17463_s22] sm:$0xff]  ;;  %v281_v3 = vld [vmem:[%s17463_s22 + $0x8] sm:$0xff]  ;;  %v17247_v33 = vmov 1966171168   ;;  %v2206_v35 = vlaneseq  ;;  %p16763_p9 = scmp.ne.s32.totalorder %s17231_s15, 11 }
  0x7b   : > { %v292_v2 = vld [vmem:[%s17463_s22 + $0x60] sm:$0xff]  ;;  %v293_v5 = vld [vmem:[%s17463_s22 + $0x68] sm:$0xff]  ;;  %v2204_v34 = vunpack.c.l.s4 %v17247_v33 }
  0x7c   : > { %v14844_v4 = vcombine.high %v280_v1, %v292_v2  ;;  %v14843_v6 = vcombine.low %v280_v1, %v292_v2  ;;  %v304_v7 = vld [vmem:[%s17463_s22 + $0xc0] sm:$0xff]  ;;  %v14846_v9 = vcombine.high %v281_v3, %v293_v5  ;;  %v14845_v10 = vcombine.low %v281_v3, %v293_v5  ;;  %v305_v12 = vld [vmem:[%s17463_s22 + $0xc8] sm:$0xff] }
  0x7d   : > { %v316_v8 = vld [vmem:[%s17463_s22 + $0x120] sm:$0xff]  ;;  %v317_v13 = vld [vmem:[%s17463_s22 + $0x128] sm:$0xff]  ;;  %v2205_v44 = vunpack.c.0.s8 %v2204_v34  ;;  %v17496_v45 = vshrl.u32 %v2206_v35, 7 }
  0x7e   : > { %v14868_v11 = vcombine.high %v304_v7, %v316_v8  ;;  %v328_v14 = vld [vmem:[%s17463_s22 + $0x180] sm:$0xff]  ;;  %11883 = vmatprep.subr.bf16.mxu0 %v14844_v4  ;;  %v14870_v15 = vcombine.high %v305_v12, %v317_v13  ;;  %v329_v17 = vld [vmem:[%s17463_s22 + $0x188] sm:$0xff]  ;;  %12088 = vmatprep.subr.bf16.mxu1 %v14846_v9  ;;  %v14867_v19 = vcombine.low %v304_v7, %v316_v8 }
  0x7f   : > { %v340_v16 = vld [vmem:[%s17463_s22 + $0x1e0] sm:$0xff]  ;;  %v341_v18 = vld [vmem:[%s17463_s22 + $0x1e8] sm:$0xff]  ;;  %11884 = vmatpush1.bf16.msra.mxu0 %v14843_v6  ;;  %12089 = vmatpush1.bf16.msra.mxu1 %v14845_v10  ;;  %v14869_v20 = vcombine.low %v305_v12, %v317_v13  ;;  %v17503_v54 = vsub.s32 %v2205_v44, %v17496_v45 }
  0x80   : > { %11885 = vmatprep.subr.bf16.mxu0 %v14868_v11  ;;  %v14892_v21 = vcombine.high %v328_v14, %v340_v16  ;;  %12090 = vmatprep.subr.bf16.mxu1 %v14870_v15  ;;  %v14894_v22 = vcombine.high %v329_v17, %v341_v18  ;;  %v352_v23 = vld [vmem:[%s17463_s22 + $0x240] sm:$0xff]  ;;  %v353_v25 = vld [vmem:[%s17463_s22 + $0x248] sm:$0xff]  ;;  %v14891_v27 = vcombine.low %v328_v14, %v340_v16 }
  0x81   : > { %v364_v24 = vld [vmem:[%s17463_s22 + $0x2a0] sm:$0xff]  ;;  %v365_v26 = vld [vmem:[%s17463_s22 + $0x2a8] sm:$0xff]  ;;  %v14893_v28 = vcombine.low %v329_v17, %v341_v18 }
  0x82   : > { %v14916_v29 = vcombine.high %v352_v23, %v364_v24  ;;  %v14918_v30 = vcombine.high %v353_v25, %v365_v26  ;;  %v376_v31 = vld [vmem:[%s17463_s22 + $0x300] sm:$0xff]  ;;  %v377_v36 = vld [vmem:[%s17463_s22 + $0x308] sm:$0xff]  ;;  %v14915_v38 = vcombine.low %v352_v23, %v364_v24  ;;  %v14917_v39 = vcombine.low %v353_v25, %v365_v26 }
  0x83   : > { %11886 = vmatpush1.bf16.msra.mxu0 %v14867_v19  ;;  %12091 = vmatpush1.bf16.msra.mxu1 %v14869_v20  ;;  %v388_v32 = vld [vmem:[%s17463_s22 + $0x360] sm:$0xff]  ;;  %v389_v37 = vld [vmem:[%s17463_s22 + $0x368] sm:$0xff] }
  0x84   : > { %11887 = vmatprep.subr.bf16.mxu0 %v14892_v21  ;;  %12092 = vmatprep.subr.bf16.mxu1 %v14894_v22  ;;  %v14940_v40 = vcombine.high %v376_v31, %v388_v32  ;;  %v14942_v41 = vcombine.high %v377_v36, %v389_v37  ;;  %v400_v42 = vld [vmem:[%s17463_s22 + $0x3c0] sm:$0xff]  ;;  %v401_v46 = vld [vmem:[%s17463_s22 + $0x3c8] sm:$0xff]  ;;  %v14939_v48 = vcombine.low %v376_v31, %v388_v32 }
  0x85   : > { %v412_v43 = vld [vmem:[%s17463_s22 + $0x420] sm:$0xff]  ;;  %v413_v47 = vld [vmem:[%s17463_s22 + $0x428] sm:$0xff]  ;;  %v14941_v49 = vcombine.low %v377_v36, %v389_v37 }
  0x86   : > { %v14964_v50 = vcombine.high %v400_v42, %v412_v43  ;;  %v14966_v51 = vcombine.high %v401_v46, %v413_v47  ;;  %v424_v52 = vld [vmem:[%s17463_s22 + $0x480] sm:$0xff]  ;;  %v425_v55 = vld [vmem:[%s17463_s22 + $0x488] sm:$0xff]  ;;  %v14963_v57 = vcombine.low %v400_v42, %v412_v43  ;;  %v14965_v58 = vcombine.low %v401_v46, %v413_v47 }
  0x87   : > { %11888 = vmatpush1.bf16.msra.mxu0 %v14891_v27  ;;  %12093 = vmatpush1.bf16.msra.mxu1 %v14893_v28  ;;  %v436_v53 = vld [vmem:[%s17463_s22 + $0x4e0] sm:$0xff]  ;;  %v437_v56 = vld [vmem:[%s17463_s22 + $0x4e8] sm:$0xff] }
  0x88   : > { %11889 = vmatprep.subr.bf16.mxu0 %v14916_v29  ;;  %12094 = vmatprep.subr.bf16.mxu1 %v14918_v30  ;;  %v14988_v59 = vcombine.high %v424_v52, %v436_v53  ;;  %v17508_v60 = vld [vmem:[%s17456_s30] sm:$0xff]  ;;  %v14990_v61 = vcombine.high %v425_v55, %v437_v56  ;;  %v448_v62 = vld [vmem:[%s17463_s22 + $0x540] sm:$0xff]  ;;  %v14987_v3 = vcombine.low %v424_v52, %v436_v53 }
  0x89   : > { %v460_v63 = vld [vmem:[%s17463_s22 + $0x5a0] sm:$0xff]  ;;  %v17514_v0 = vrot.slane %v17508_v60, %v17503_v54  ;;  %v449_v1 = vld [vmem:[%s17463_s22 + $0x548] sm:$0xff]  ;;  %v14989_v5 = vcombine.low %v425_v55, %v437_v56 }
  0x8a   : > { %v461_v2 = vld [vmem:[%s17463_s22 + $0x5a8] sm:$0xff]  ;;  %v15012_v6 = vcombine.high %v448_v62, %v460_v63  ;;  %v472_v8 = vld [vmem:[%s17463_s22 + $0x600] sm:$0xff]  ;;  %v15011_v13 = vcombine.low %v448_v62, %v460_v63 }
  0x8b   : > { %11890 = vmatpush1.bf16.msra.mxu0 %v14915_v38  ;;  %12095 = vmatpush1.bf16.msra.mxu1 %v14917_v39  ;;  %v2217_v4 = vcombine.high %v17514_v0, %v17514_v0  ;;  %v15014_v7 = vcombine.high %v449_v1, %v461_v2  ;;  %v484_v9 = vld [vmem:[%s17463_s22 + $0x660] sm:$0xff]  ;;  %v473_v11 = vld [vmem:[%s17463_s22 + $0x608] sm:$0xff]  ;;  %v15013_v14 = vcombine.low %v449_v1, %v461_v2 }
  0x8c   : > { %11891 = vmatprep.subr.bf16.mxu0 %v14940_v40  ;;  %12096 = vmatprep.subr.bf16.mxu1 %v14942_v41  ;;  %v485_v12 = vld [vmem:[%s17463_s22 + $0x668] sm:$0xff]  ;;  %v15036_v15 = vcombine.high %v472_v8, %v484_v9  ;;  %v496_v17 = vld [vmem:[%s17463_s22 + $0x6c0] sm:$0xff]  ;;  %v15035_v21 = vcombine.low %v472_v8, %v484_v9 }
  0x8d   : > { %v17523_v10 = vrot.slane %v2217_v4, %v17503_v54  ;;  %v15038_v16 = vcombine.high %v473_v11, %v485_v12  ;;  %v508_v18 = vld [vmem:[%s17463_s22 + $0x720] sm:$0xff]  ;;  %v497_v19 = vld [vmem:[%s17463_s22 + $0x6c8] sm:$0xff]  ;;  %v15037_v22 = vcombine.low %v473_v11, %v485_v12 }
  0x8e   : > { %v509_v20 = vld [vmem:[%s17463_s22 + $0x728] sm:$0xff]  ;;  %v15060_v23 = vcombine.high %v496_v17, %v508_v18  ;;  %v520_v25 = vld [vmem:[%s17463_s22 + $0x780] sm:$0xff]  ;;  %v15059_v29 = vcombine.low %v496_v17, %v508_v18 }
  0x8f   : > { %11892 = vmatpush1.bf16.msra.mxu0 %v14939_v48  ;;  %12097 = vmatpush1.bf16.msra.mxu1 %v14941_v49  ;;  %v15062_v24 = vcombine.high %v497_v19, %v509_v20  ;;  %v532_v26 = vld [vmem:[%s17463_s22 + $0x7e0] sm:$0xff]  ;;  %v521_v27 = vld [vmem:[%s17463_s22 + $0x788] sm:$0xff]  ;;  %v15061_v30 = vcombine.low %v497_v19, %v509_v20 }
  0x90   : > { %11893 = vmatprep.subr.bf16.mxu0 %v14964_v50  ;;  %12098 = vmatprep.subr.bf16.mxu1 %v14966_v51  ;;  %v533_v28 = vld [vmem:[%s17463_s22 + $0x7e8] sm:$0xff]  ;;  %v15084_v31 = vcombine.high %v520_v25, %v532_v26  ;;  %v544_v33 = vld [vmem:[%s17463_s22 + $0x840] sm:$0xff]  ;;  %v15083_v37 = vcombine.low %v520_v25, %v532_v26 }
  0x91   : > { %11915 = vmatprep.mubr.bf16.mxu0 %v17523_v10  ;;  %12120 = vmatprep.mubr.bf16.mxu1 %v17523_v10  ;;  %v15086_v32 = vcombine.high %v521_v27, %v533_v28  ;;  %v556_v34 = vld [vmem:[%s17463_s22 + $0x8a0] sm:$0xff]  ;;  %v545_v35 = vld [vmem:[%s17463_s22 + $0x848] sm:$0xff]  ;;  %v15085_v38 = vcombine.low %v521_v27, %v533_v28 }
  0x92   : > { %v557_v36 = vld [vmem:[%s17463_s22 + $0x8a8] sm:$0xff]  ;;  %v15108_v39 = vcombine.high %v544_v33, %v556_v34  ;;  %v568_v41 = vld [vmem:[%s17463_s22 + $0x900] sm:$0xff]  ;;  %v15107_v46 = vcombine.low %v544_v33, %v556_v34  ;;  %v17573_v33 = vcombine.high %v17523_v10, %v17523_v10 }
  0x93   : > { %11894 = vmatpush1.bf16.msra.mxu0 %v14963_v57  ;;  %12099 = vmatpush1.bf16.msra.mxu1 %v14965_v58  ;;  %v15110_v40 = vcombine.high %v545_v35, %v557_v36  ;;  %v580_v42 = vld [vmem:[%s17463_s22 + $0x960] sm:$0xff]  ;;  %v569_v43 = vld [vmem:[%s17463_s22 + $0x908] sm:$0xff]  ;;  %v15109_v47 = vcombine.low %v545_v35, %v557_v36 }
  0x94   : > { %11895 = vmatprep.subr.bf16.mxu0 %v14988_v59  ;;  %12100 = vmatprep.subr.bf16.mxu1 %v14990_v61  ;;  %v581_v44 = vld [vmem:[%s17463_s22 + $0x968] sm:$0xff]  ;;  %v15132_v48 = vcombine.high %v568_v41, %v580_v42  ;;  %v592_v50 = vld [vmem:[%s17463_s22 + $0x9c0] sm:$0xff]  ;;  %v15131_v55 = vcombine.low %v568_v41, %v580_v42 }
  0x95   : > { %v15134_v49 = vcombine.high %v569_v43, %v581_v44  ;;  %v604_v51 = vld [vmem:[%s17463_s22 + $0xa20] sm:$0xff]  ;;  %v593_v52 = vld [vmem:[%s17463_s22 + $0x9c8] sm:$0xff]  ;;  %v15133_v56 = vcombine.low %v569_v43, %v581_v44 }
  0x96   : > { %v605_v53 = vld [vmem:[%s17463_s22 + $0xa28] sm:$0xff]  ;;  %v15156_v57 = vcombine.high %v592_v50, %v604_v51  ;;  %v616_v59 = vld [vmem:[%s17463_s22 + $0xa80] sm:$0xff]  ;;  %v15155_v1 = vcombine.low %v592_v50, %v604_v51 }
  0x97   : > { %11896 = vmatpush1.bf16.msra.mxu0 %v14987_v3  ;;  %12101 = vmatpush1.bf16.msra.mxu1 %v14989_v5  ;;  %v15158_v58 = vcombine.high %v593_v52, %v605_v53  ;;  %v628_v61 = vld [vmem:[%s17463_s22 + $0xae0] sm:$0xff]  ;;  %v617_v62 = vld [vmem:[%s17463_s22 + $0xa88] sm:$0xff]  ;;  %v15157_v2 = vcombine.low %v593_v52, %v605_v53 }
  0x98   : > { %11897 = vmatprep.subr.bf16.mxu0 %v15012_v6  ;;  %12102 = vmatprep.subr.bf16.mxu1 %v15014_v7  ;;  %v629_v63 = vld [vmem:[%s17463_s22 + $0xae8] sm:$0xff]  ;;  %v15180_v3 = vcombine.high %v616_v59, %v628_v61  ;;  %v640_v5 = vld [vmem:[%s17463_s22 + $0xb40] sm:$0xff]  ;;  %v15179_v9 = vcombine.low %v616_v59, %v628_v61 }
  0x99   : > { %v15182_v4 = vcombine.high %v617_v62, %v629_v63  ;;  %v652_v6 = vld [vmem:[%s17463_s22 + $0xba0] sm:$0xff]  ;;  %v641_v7 = vld [vmem:[%s17463_s22 + $0xb48] sm:$0xff]  ;;  %v15181_v11 = vcombine.low %v617_v62, %v629_v63 }
  0x9a   : > { %v653_v8 = vld [vmem:[%s17463_s22 + $0xba8] sm:$0xff]  ;;  %v15204_v12 = vcombine.high %v640_v5, %v652_v6  ;;  %v15203_v18 = vcombine.low %v640_v5, %v652_v6 }
  0x9b   : > { %11898 = vmatpush1.bf16.msra.mxu0 %v15011_v13  ;;  %12103 = vmatpush1.bf16.msra.mxu1 %v15013_v14  ;;  %v15206_v13 = vcombine.high %v641_v7, %v653_v8  ;;  %v664_v14 = vld [vmem:[%s17463_s22 + $0xc00] sm:$0xff]  ;;  %v677_v17 = vld [vmem:[%s17463_s22 + $0xc68] sm:$0xff]  ;;  %v15205_v19 = vcombine.low %v641_v7, %v653_v8 }
  0x9c   : > { %11899 = vmatprep.subr.bf16.mxu0 %v15036_v15  ;;  %12104 = vmatprep.subr.bf16.mxu1 %v15038_v16  ;;  %v676_v15 = vld [vmem:[%s17463_s22 + $0xc60] sm:$0xff]  ;;  %v665_v16 = vld [vmem:[%s17463_s22 + $0xc08] sm:$0xff] }
  0x9d   : > { %v15228_v20 = vcombine.high %v664_v14, %v676_v15  ;;  %v689_v25 = vld [vmem:[%s17463_s22 + $0xcc8] sm:$0xff]  ;;  %v15227_v27 = vcombine.low %v664_v14, %v676_v15  ;;  %v15229_v28 = vcombine.low %v665_v16, %v677_v17 }
  0x9e   : > { %v701_v26 = vld [vmem:[%s17463_s22 + $0xd28] sm:$0xff] }
  0x9f   : > { %11900 = vmatpush1.bf16.msra.mxu0 %v15035_v21  ;;  %12105 = vmatpush1.bf16.msra.mxu1 %v15037_v22  ;;  %v15230_v21 = vcombine.high %v665_v16, %v677_v17  ;;  %v688_v22 = vld [vmem:[%s17463_s22 + $0xcc0] sm:$0xff]  ;;  %v725_v34 = vld [vmem:[%s17463_s22 + $0xde8] sm:$0xff]  ;;  %v15253_v36 = vcombine.low %v689_v25, %v701_v26 }
  0xa0   : > { %11901 = vmatprep.subr.bf16.mxu0 %v15060_v23  ;;  %12106 = vmatprep.subr.bf16.mxu1 %v15062_v24  ;;  %v700_v23 = vld [vmem:[%s17463_s22 + $0xd20] sm:$0xff]  ;;  %v17565_v24 = vrot.slane %v17514_v0, %v17503_v54  ;;  %v713_v0 = vld [vmem:[%s17463_s22 + $0xd88] sm:$0xff] }
  0xa1   : > { %v15251_v35 = vcombine.low %v688_v22, %v700_v23  ;;  %v737_v41 = vld [vmem:[%s17463_s22 + $0xe48] sm:$0xff]  ;;  %v15277_v44 = vcombine.low %v713_v0, %v725_v34 }
  0xa2   : > { %v749_v42 = vld [vmem:[%s17463_s22 + $0xea8] sm:$0xff] }
  0xa3   : > { %11902 = vmatpush1.bf16.msra.mxu0 %v15059_v29  ;;  %12107 = vmatpush1.bf16.msra.mxu1 %v15061_v30  ;;  %v15252_v29 = vcombine.high %v688_v22, %v700_v23  ;;  %v15254_v30 = vcombine.high %v689_v25, %v701_v26  ;;  %v761_v50 = vld [vmem:[%s17463_s22 + $0xf08] sm:$0xff]  ;;  %v15301_v53 = vcombine.low %v737_v41, %v749_v42 }
  0xa4   : > { %11903 = vmatprep.subr.bf16.mxu0 %v15084_v31  ;;  %12108 = vmatprep.subr.bf16.mxu1 %v15086_v32  ;;  %v712_v31 = vld [vmem:[%s17463_s22 + $0xd80] sm:$0xff]  ;;  %v773_v51 = vld [vmem:[%s17463_s22 + $0xf68] sm:$0xff] }
  0xa5   : > { %v724_v32 = vld [vmem:[%s17463_s22 + $0xde0] sm:$0xff]  ;;  %v785_v59 = vld [vmem:[%s17463_s22 + $0xfc8] sm:$0xff]  ;;  %v15325_v63 = vcombine.low %v761_v50, %v773_v51 }
  0xa6   : > { %v15275_v43 = vcombine.low %v712_v31, %v724_v32  ;;  %v797_v61 = vld [vmem:[%s17463_s22 + $0x1028] sm:$0xff] }
  0xa7   : > { %11904 = vmatpush1.bf16.msra.mxu0 %v15083_v37  ;;  %12109 = vmatpush1.bf16.msra.mxu1 %v15085_v38  ;;  %v15276_v37 = vcombine.high %v712_v31, %v724_v32  ;;  %v15278_v38 = vcombine.high %v713_v0, %v725_v34  ;;  %v809_v5 = vld [vmem:[%s17463_s22 + $0x1088] sm:$0xff]  ;;  %v15349_v8 = vcombine.low %v785_v59, %v797_v61 }
  0xa8   : > { %11905 = vmatprep.subr.bf16.mxu0 %v15108_v39  ;;  %12110 = vmatprep.subr.bf16.mxu1 %v15110_v40  ;;  %v736_v39 = vld [vmem:[%s17463_s22 + $0xe40] sm:$0xff]  ;;  %v821_v6 = vld [vmem:[%s17463_s22 + $0x10e8] sm:$0xff] }
  0xa9   : > { %v748_v40 = vld [vmem:[%s17463_s22 + $0xea0] sm:$0xff]  ;;  %v833_v14 = vld [vmem:[%s17463_s22 + $0x1148] sm:$0xff]  ;;  %v15373_v17 = vcombine.low %v809_v5, %v821_v6 }
  0xaa   : > { %v15299_v52 = vcombine.low %v736_v39, %v748_v40  ;;  %v845_v15 = vld [vmem:[%s17463_s22 + $0x11a8] sm:$0xff] }
  0xab   : > { %11906 = vmatpush1.bf16.msra.mxu0 %v15107_v46  ;;  %12111 = vmatpush1.bf16.msra.mxu1 %v15109_v47  ;;  %v15300_v46 = vcombine.high %v736_v39, %v748_v40  ;;  %v15302_v47 = vcombine.high %v737_v41, %v749_v42  ;;  %v857_v22 = vld [vmem:[%s17463_s22 + $0x1208] sm:$0xff]  ;;  %v15397_v26 = vcombine.low %v833_v14, %v845_v15 }
  0xac   : > { %11907 = vmatprep.subr.bf16.mxu0 %v15132_v48  ;;  %12112 = vmatprep.subr.bf16.mxu1 %v15134_v49  ;;  %v760_v48 = vld [vmem:[%s17463_s22 + $0xf00] sm:$0xff]  ;;  %v869_v23 = vld [vmem:[%s17463_s22 + $0x1268] sm:$0xff] }
  0xad   : > { %v772_v49 = vld [vmem:[%s17463_s22 + $0xf60] sm:$0xff]  ;;  %v881_v31 = vld [vmem:[%s17463_s22 + $0x12c8] sm:$0xff]  ;;  %v15421_v34 = vcombine.low %v857_v22, %v869_v23 }
  0xae   : > { %v15323_v62 = vcombine.low %v760_v48, %v772_v49  ;;  %v893_v32 = vld [vmem:[%s17463_s22 + $0x1328] sm:$0xff] }
  0xaf   : > { %11908 = vmatpush1.bf16.msra.mxu0 %v15131_v55  ;;  %12113 = vmatpush1.bf16.msra.mxu1 %v15133_v56  ;;  %v15324_v55 = vcombine.high %v760_v48, %v772_v49  ;;  %v15326_v56 = vcombine.high %v761_v50, %v773_v51  ;;  %v905_v39 = vld [vmem:[%s17463_s22 + $0x1388] sm:$0xff]  ;;  %v15445_v42 = vcombine.low %v881_v31, %v893_v32 }
  0xb0   : > { %11909 = vmatprep.subr.bf16.mxu0 %v15156_v57  ;;  %12114 = vmatprep.subr.bf16.mxu1 %v15158_v58  ;;  %v784_v57 = vld [vmem:[%s17463_s22 + $0xfc0] sm:$0xff]  ;;  %v917_v40 = vld [vmem:[%s17463_s22 + $0x13e8] sm:$0xff] }
  0xb1   : > { %v796_v58 = vld [vmem:[%s17463_s22 + $0x1020] sm:$0xff]  ;;  %v929_v48 = vld [vmem:[%s17463_s22 + $0x1448] sm:$0xff]  ;;  %v15469_v51 = vcombine.low %v905_v39, %v917_v40 }
  0xb2   : > { %v15347_v7 = vcombine.low %v784_v57, %v796_v58  ;;  %v941_v49 = vld [vmem:[%s17463_s22 + $0x14a8] sm:$0xff] }
  0xb3   : > { %11910 = vmatpush1.bf16.msra.mxu0 %v15155_v1  ;;  %12115 = vmatpush1.bf16.msra.mxu1 %v15157_v2  ;;  %v15348_v1 = vcombine.high %v784_v57, %v796_v58  ;;  %v15350_v2 = vcombine.high %v785_v59, %v797_v61  ;;  %v953_v57 = vld [vmem:[%s17463_s22 + $0x1508] sm:$0xff]  ;;  %v15493_v61 = vcombine.low %v929_v48, %v941_v49 }
  0xb4   : > { %11911 = vmatprep.subr.bf16.mxu0 %v15180_v3  ;;  %12116 = vmatprep.subr.bf16.mxu1 %v15182_v4  ;;  %v808_v3 = vld [vmem:[%s17463_s22 + $0x1080] sm:$0xff]  ;;  %v965_v58 = vld [vmem:[%s17463_s22 + $0x1568] sm:$0xff] }
  0xb5   : > { %v820_v4 = vld [vmem:[%s17463_s22 + $0x10e0] sm:$0xff] }
  0xb6   : > { %v15371_v16 = vcombine.low %v808_v3, %v820_v4 }
  0xb7   : > { %11912 = vmatpush1.bf16.msra.mxu0 %v15179_v9  ;;  %12117 = vmatpush1.bf16.msra.mxu1 %v15181_v11  ;;  %v15372_v9 = vcombine.high %v808_v3, %v820_v4  ;;  %v15374_v11 = vcombine.high %v809_v5, %v821_v6  ;;  %v977_v3 = vld [vmem:[%s17463_s22 + $0x15c8] sm:$0xff]  ;;  %v15517_v6 = vcombine.low %v953_v57, %v965_v58 }
  0xb8   : > { %11913 = vmatprep.subr.bf16.mxu0 %v15204_v12  ;;  %12118 = vmatprep.subr.bf16.mxu1 %v15206_v13  ;;  %v832_v12 = vld [vmem:[%s17463_s22 + $0x1140] sm:$0xff]  ;;  %v989_v4 = vld [vmem:[%s17463_s22 + $0x1628] sm:$0xff] }
  0xb9   : > { %v844_v13 = vld [vmem:[%s17463_s22 + $0x11a0] sm:$0xff] }
  0xba   : > { %v15395_v25 = vcombine.low %v832_v12, %v844_v13 }
  0xbb   : > { %11914 = vmatpush1.bf16.msra.mxu0 %v15203_v18  ;;  %12119 = vmatpush1.bf16.msra.mxu1 %v15205_v19  ;;  %v15396_v18 = vcombine.high %v832_v12, %v844_v13  ;;  %v15398_v19 = vcombine.high %v833_v14, %v845_v15  ;;  %v1001_v12 = vld [vmem:[%s17463_s22 + $0x1688] sm:$0xff]  ;;  %v15541_v15 = vcombine.low %v977_v3, %v989_v4 }
  0xbc   : > { %11924 = vmatprep.subr.bf16.mxu0 %v15228_v20  ;;  %12129 = vmatprep.subr.bf16.mxu1 %v15230_v21  ;;  %v856_v20 = vld [vmem:[%s17463_s22 + $0x1200] sm:$0xff]  ;;  %v1013_v13 = vld [vmem:[%s17463_s22 + $0x16e8] sm:$0xff] }
  0xbd   : > { %v868_v21 = vld [vmem:[%s17463_s22 + $0x1260] sm:$0xff] }
  0xbe   : > { %11916 = vmatmul.mubr.bf16.vlgmr.msra.gmra.mrb[0].mxu0 %v17565_v24  ;;  %12121 = vmatmul.mubr.bf16.vlgmr.msra.gmra.mrb[0].mxu1 %v17565_v24  ;;  %v15419_v0 = vcombine.low %v856_v20, %v868_v21 }
  0xbf   : > { %11925 = vmatpush1.bf16.msra.mxu0 %v15227_v27  ;;  %12130 = vmatpush1.bf16.msra.mxu1 %v15229_v28  ;;  %v15420_v27 = vcombine.high %v856_v20, %v868_v21  ;;  %v15422_v28 = vcombine.high %v857_v22, %v869_v23  ;;  %v2202_v20 = vcombine.high %v17508_v60, %v17508_v60  ;;  %v1025_v21 = vld [vmem:[%s17463_s22 + $0x1748] sm:$0xff] }
  0xc0   : > { %11926 = vmatprep.subr.bf16.mxu0 %v15252_v29  ;;  %12131 = vmatprep.subr.bf16.mxu1 %v15254_v30  ;;  %v880_v29 = vld [vmem:[%s17463_s22 + $0x12c0] sm:$0xff]  ;;  %v1037_v22 = vld [vmem:[%s17463_s22 + $0x17a8] sm:$0xff] }
  0xc1   : > { %11956 = vmatprep.mubr.bf16.mxu0 %v17573_v33  ;;  %12161 = vmatprep.mubr.bf16.mxu1 %v17573_v33  ;;  %v892_v30 = vld [vmem:[%s17463_s22 + $0x1320] sm:$0xff]  ;;  %v1049_v60 = vld [vmem:[%s17463_s22 + $0x1808] sm:$0xff] }
  0xc2   : > { %v15443_v41 = vcombine.low %v880_v29, %v892_v30 }
  0xc3   : > { %11927 = vmatpush1.bf16.msra.mxu0 %v15251_v35  ;;  %12132 = vmatpush1.bf16.msra.mxu1 %v15253_v36  ;;  %v15444_v35 = vcombine.high %v880_v29, %v892_v30  ;;  %v15446_v36 = vcombine.high %v881_v31, %v893_v32  ;;  %v1060_v29 = vld [vmem:[%s17463_s22 + $0x1860] sm:$0xff]  ;;  %v17638_v30 = vrot.slane %v2202_v20, %v17503_v54  ;;  %v1061_v31 = vld [vmem:[%s17463_s22 + $0x1868] sm:$0xff] }
  0xc4   : > { %11928 = vmatprep.subr.bf16.mxu0 %v15276_v37  ;;  %12133 = vmatprep.subr.bf16.mxu1 %v15278_v38  ;;  %v904_v37 = vld [vmem:[%s17463_s22 + $0x1380] sm:$0xff] }
  0xc5   : > { %v916_v38 = vld [vmem:[%s17463_s22 + $0x13e0] sm:$0xff] }
  0xc6   : > { %v15467_v50 = vcombine.low %v904_v37, %v916_v38  ;;  %v1192_v20 = vld [vmem:[%s17463_s22 + $0x1c80] sm:$0xff] }
  0xc7   : > { %11929 = vmatpush1.bf16.msra.mxu0 %v15275_v43  ;;  %12134 = vmatpush1.bf16.msra.mxu1 %v15277_v44  ;;  %v15468_v43 = vcombine.high %v904_v37, %v916_v38  ;;  %v15470_v44 = vcombine.high %v905_v39, %v917_v40  ;;  %v1084_v37 = vld [vmem:[%s17463_s22 + $0x1920] sm:$0xff]  ;;  %v2218_v38 = vcombine.high %v17638_v30, %v17638_v30  ;;  %v1073_v40 = vld [vmem:[%s17463_s22 + $0x18c8] sm:$0xff] }
  0xc8   : > { %11930 = vmatprep.subr.bf16.mxu0 %v15300_v46  ;;  %12135 = vmatprep.subr.bf16.mxu1 %v15302_v47  ;;  %v928_v46 = vld [vmem:[%s17463_s22 + $0x1440] sm:$0xff]  ;;  %v17648_v39 = vcombine.high %v17565_v24, %v17565_v24 }
  0xc9   : > { %v940_v47 = vld [vmem:[%s17463_s22 + $0x14a0] sm:$0xff] }
  0xca   : > { %v15491_v59 = vcombine.low %v928_v46, %v940_v47 }
  0xcb   : > { %11931 = vmatpush1.bf16.msra.mxu0 %v15299_v52  ;;  %12136 = vmatpush1.bf16.msra.mxu1 %v15301_v53  ;;  %v15492_v52 = vcombine.high %v928_v46, %v940_v47  ;;  %v15494_v53 = vcombine.high %v929_v48, %v941_v49  ;;  %v1096_v47 = vld [vmem:[%s17463_s22 + $0x1980] sm:$0xff]  ;;  %v17655_v49 = vrot.slane %v2218_v38, %v17503_v54 }
  0xcc   : > { %11932 = vmatprep.subr.bf16.mxu0 %v15324_v55  ;;  %12137 = vmatprep.subr.bf16.mxu1 %v15326_v56  ;;  %v952_v55 = vld [vmem:[%s17463_s22 + $0x1500] sm:$0xff] }
  0xcd   : > { %v964_v56 = vld [vmem:[%s17463_s22 + $0x1560] sm:$0xff] }
  0xce   : > { %v15515_v5 = vcombine.low %v952_v55, %v964_v56  ;;  %v1108_v48 = vld [vmem:[%s17463_s22 + $0x19e0] sm:$0xff] }
  0xcf   : > { %11933 = vmatpush1.bf16.msra.mxu0 %v15323_v62  ;;  %12138 = vmatpush1.bf16.msra.mxu1 %v15325_v63  ;;  %v15516_v62 = vcombine.high %v952_v55, %v964_v56  ;;  %v15518_v63 = vcombine.high %v953_v57, %v965_v58  ;;  %v15660_v55 = vcombine.high %v1096_v47, %v1108_v48  ;;  %v1120_v57 = vld [vmem:[%s17463_s22 + $0x1a40] sm:$0xff] }
  0xd0   : > { %11934 = vmatprep.subr.bf16.mxu0 %v15348_v1  ;;  %12139 = vmatprep.subr.bf16.mxu1 %v15350_v2  ;;  %v976_v1 = vld [vmem:[%s17463_s22 + $0x15c0] sm:$0xff] }
  0xd1   : > { %v988_v2 = vld [vmem:[%s17463_s22 + $0x1620] sm:$0xff] }
  0xd2   : > { %v15539_v14 = vcombine.low %v976_v1, %v988_v2  ;;  %v1132_v58 = vld [vmem:[%s17463_s22 + $0x1aa0] sm:$0xff] }
  0xd3   : > { %11935 = vmatpush1.bf16.msra.mxu0 %v15347_v7  ;;  %12140 = vmatpush1.bf16.msra.mxu1 %v15349_v8  ;;  %v15540_v7 = vcombine.high %v976_v1, %v988_v2  ;;  %v15542_v8 = vcombine.high %v977_v3, %v989_v4  ;;  %v15684_v1 = vcombine.high %v1120_v57, %v1132_v58  ;;  %v1144_v3 = vld [vmem:[%s17463_s22 + $0x1b00] sm:$0xff] }
  0xd4   : > { %11936 = vmatprep.subr.bf16.mxu0 %v15372_v9  ;;  %12141 = vmatprep.subr.bf16.mxu1 %v15374_v11  ;;  %v1000_v9 = vld [vmem:[%s17463_s22 + $0x1680] sm:$0xff] }
  0xd5   : > { %v1012_v11 = vld [vmem:[%s17463_s22 + $0x16e0] sm:$0xff] }
  0xd6   : > { %v15563_v23 = vcombine.low %v1000_v9, %v1012_v11  ;;  %v1156_v4 = vld [vmem:[%s17463_s22 + $0x1b60] sm:$0xff] }
  0xd7   : > { %11937 = vmatpush1.bf16.msra.mxu0 %v15371_v16  ;;  %12142 = vmatpush1.bf16.msra.mxu1 %v15373_v17  ;;  %v15564_v16 = vcombine.high %v1000_v9, %v1012_v11  ;;  %v15566_v17 = vcombine.high %v1001_v12, %v1013_v13  ;;  %v15708_v9 = vcombine.high %v1144_v3, %v1156_v4  ;;  %v1252_v38 = vld [vmem:[%s17463_s22 + $0x1e60] sm:$0xff] }
  0xd8   : > { %11938 = vmatprep.subr.bf16.mxu0 %v15396_v18  ;;  %12143 = vmatprep.subr.bf16.mxu1 %v15398_v19  ;;  %v1024_v18 = vld [vmem:[%s17463_s22 + $0x1740] sm:$0xff] }
  0xd9   : > { %v1036_v19 = vld [vmem:[%s17463_s22 + $0x17a0] sm:$0xff] }
  0xda   : > { %v15587_v32 = vcombine.low %v1024_v18, %v1036_v19 }
  0xdb   : > { %11939 = vmatpush1.bf16.msra.mxu0 %v15395_v25  ;;  %12144 = vmatpush1.bf16.msra.mxu1 %v15397_v26  ;;  %v15565_v25 = vcombine.low %v1001_v12, %v1013_v13  ;;  %v15588_v26 = vcombine.high %v1024_v18, %v1036_v19  ;;  %v1168_v12 = vld [vmem:[%s17463_s22 + $0x1bc0] sm:$0xff] }
  0xdc   : > { %11940 = vmatprep.subr.bf16.mxu0 %v15420_v27  ;;  %12145 = vmatprep.subr.bf16.mxu1 %v15422_v28  ;;  %v15590_v27 = vcombine.high %v1025_v21, %v1037_v22  ;;  %v1048_v28 = vld [vmem:[%s17463_s22 + $0x1800] sm:$0xff] }
  0xdd   : > { %v1180_v13 = vld [vmem:[%s17463_s22 + $0x1c20] sm:$0xff] }
  0xde   : > { %v15732_v18 = vcombine.high %v1168_v12, %v1180_v13 }
  0xdf   : > { %11941 = vmatpush1.bf16.msra.mxu0 %v15419_v0  ;;  %12146 = vmatpush1.bf16.msra.mxu1 %v15421_v34  ;;  %v15589_v0 = vcombine.low %v1025_v21, %v1037_v22  ;;  %v15612_v34 = vcombine.high %v1048_v28, %v1060_v29  ;;  %v1204_v21 = vld [vmem:[%s17463_s22 + $0x1ce0] sm:$0xff]  ;;  %v1193_v22 = vld [vmem:[%s17463_s22 + $0x1c88] sm:$0xff] }
  0xe0   : > { %11942 = vmatprep.subr.bf16.mxu0 %v15444_v35  ;;  %12147 = vmatprep.subr.bf16.mxu1 %v15446_v36  ;;  %v15614_v35 = vcombine.high %v1049_v60, %v1061_v31  ;;  %v1072_v36 = vld [vmem:[%s17463_s22 + $0x18c0] sm:$0xff] }
  0xe3   : > { %11943 = vmatpush1.bf16.msra.mxu0 %v15443_v41  ;;  %12148 = vmatpush1.bf16.msra.mxu1 %v15445_v42  ;;  %v1085_v41 = vld [vmem:[%s17463_s22 + $0x1928] sm:$0xff]  ;;  %v15611_v42 = vcombine.low %v1048_v28, %v1060_v29  ;;  %v1216_v29 = vld [vmem:[%s17463_s22 + $0x1d40] sm:$0xff] }
  0xe4   : > { %11944 = vmatprep.subr.bf16.mxu0 %v15468_v43  ;;  %12149 = vmatprep.subr.bf16.mxu1 %v15470_v44  ;;  %v15613_v43 = vcombine.low %v1049_v60, %v1061_v31  ;;  %v15636_v44 = vcombine.high %v1072_v36, %v1084_v37  ;;  %v15638_v46 = vcombine.high %v1073_v40, %v1085_v41  ;;  %v1228_v60 = vld [vmem:[%s17463_s22 + $0x1da0] sm:$0xff]  ;;  %v1217_v31 = vld [vmem:[%s17463_s22 + $0x1d48] sm:$0xff] }
  0xe7   : > { %11945 = vmatpush1.bf16.msra.mxu0 %v15467_v50  ;;  %12150 = vmatpush1.bf16.msra.mxu1 %v15469_v51  ;;  %v1097_v50 = vld [vmem:[%s17463_s22 + $0x1988] sm:$0xff] }
  0xe8   : > { %11946 = vmatprep.subr.bf16.mxu0 %v15492_v52  ;;  %12151 = vmatprep.subr.bf16.mxu1 %v15494_v53  ;;  %v1109_v51 = vld [vmem:[%s17463_s22 + $0x19e8] sm:$0xff]  ;;  %v15635_v52 = vcombine.low %v1072_v36, %v1084_v37  ;;  %v15637_v53 = vcombine.low %v1073_v40, %v1085_v41  ;;  %v1240_v37 = vld [vmem:[%s17463_s22 + $0x1e00] sm:$0xff] }
  0xe9   : > { %v15662_v56 = vcombine.high %v1097_v50, %v1109_v51  ;;  %v1241_v40 = vld [vmem:[%s17463_s22 + $0x1e08] sm:$0xff] }
  0xea   : > { %v1253_v41 = vld [vmem:[%s17463_s22 + $0x1e68] sm:$0xff] }
  0xeb   : > { %11947 = vmatpush1.bf16.msra.mxu0 %v15491_v59  ;;  %12152 = vmatpush1.bf16.msra.mxu1 %v15493_v61  ;;  %v1121_v59 = vld [vmem:[%s17463_s22 + $0x1a48] sm:$0xff] }
  0xec   : > { %11948 = vmatprep.subr.bf16.mxu0 %v15516_v62  ;;  %12153 = vmatprep.subr.bf16.mxu1 %v15518_v63  ;;  %v1133_v61 = vld [vmem:[%s17463_s22 + $0x1aa8] sm:$0xff]  ;;  %v15659_v62 = vcombine.low %v1096_v47, %v1108_v48  ;;  %v15661_v63 = vcombine.low %v1097_v50, %v1109_v51  ;;  %v1264_v47 = vld [vmem:[%s17463_s22 + $0x1ec0] sm:$0xff] }
  0xed   : > { %v15686_v2 = vcombine.high %v1121_v59, %v1133_v61  ;;  %v1276_v48 = vld [vmem:[%s17463_s22 + $0x1f20] sm:$0xff]  ;;  %v1265_v50 = vld [vmem:[%s17463_s22 + $0x1ec8] sm:$0xff] }
  0xee   : > { %v1277_v51 = vld [vmem:[%s17463_s22 + $0x1f28] sm:$0xff] }
  0xef   : > { %11949 = vmatpush1.bf16.msra.mxu0 %v15515_v5  ;;  %12154 = vmatpush1.bf16.msra.mxu1 %v15517_v6  ;;  %v1145_v5 = vld [vmem:[%s17463_s22 + $0x1b08] sm:$0xff] }
  0xf0   : > { %11950 = vmatprep.subr.bf16.mxu0 %v15540_v7  ;;  %12155 = vmatprep.subr.bf16.mxu1 %v15542_v8  ;;  %v1157_v6 = vld [vmem:[%s17463_s22 + $0x1b68] sm:$0xff]  ;;  %v15683_v7 = vcombine.low %v1120_v57, %v1132_v58  ;;  %v15685_v8 = vcombine.low %v1121_v59, %v1133_v61  ;;  %v1288_v57 = vld [vmem:[%s17463_s22 + $0x1f80] sm:$0xff] }
  0xf1   : > { %v15710_v11 = vcombine.high %v1145_v5, %v1157_v6  ;;  %v1300_v58 = vld [vmem:[%s17463_s22 + $0x1fe0] sm:$0xff]  ;;  %v1289_v59 = vld [vmem:[%s17463_s22 + $0x1f88] sm:$0xff] }
  0xf2   : > { %v1301_v61 = vld [vmem:[%s17463_s22 + $0x1fe8] sm:$0xff] }
  0xf3   : > { %11951 = vmatpush1.bf16.msra.mxu0 %v15539_v14  ;;  %12156 = vmatpush1.bf16.msra.mxu1 %v15541_v15  ;;  %v1169_v14 = vld [vmem:[%s17463_s22 + $0x1bc8] sm:$0xff] }
  0xf4   : > { %11952 = vmatprep.subr.bf16.mxu0 %v15564_v16  ;;  %12157 = vmatprep.subr.bf16.mxu1 %v15566_v17  ;;  %v1181_v15 = vld [vmem:[%s17463_s22 + $0x1c28] sm:$0xff]  ;;  %v15707_v16 = vcombine.low %v1144_v3, %v1156_v4  ;;  %v15709_v17 = vcombine.low %v1145_v5, %v1157_v6  ;;  %v1312_v3 = vld [vmem:[%s17463_s22 + $0x2040] sm:$0xff] }
  0xf5   : > { %v15734_v19 = vcombine.high %v1169_v14, %v1181_v15  ;;  %v1324_v4 = vld [vmem:[%s17463_s22 + $0x20a0] sm:$0xff]  ;;  %v1313_v5 = vld [vmem:[%s17463_s22 + $0x2048] sm:$0xff] }
  0xf6   : > { %v1325_v6 = vld [vmem:[%s17463_s22 + $0x20a8] sm:$0xff] }
  0xf7   : > { %11953 = vmatpush1.bf16.msra.mxu0 %v15563_v23  ;;  %12158 = vmatpush1.bf16.msra.mxu1 %v15565_v25  ;;  %v1205_v23 = vld [vmem:[%s17463_s22 + $0x1ce8] sm:$0xff]  ;;  %v15731_v25 = vcombine.low %v1168_v12, %v1180_v13  ;;  %v1336_v12 = vld [vmem:[%s17463_s22 + $0x2100] sm:$0xff] }
  0xf8   : > { %11954 = vmatprep.subr.bf16.mxu0 %v15588_v26  ;;  %12159 = vmatprep.subr.bf16.mxu1 %v15590_v27  ;;  %v15733_v26 = vcombine.low %v1169_v14, %v1181_v15  ;;  %v15756_v27 = vcombine.high %v1192_v20, %v1204_v21  ;;  %v15758_v28 = vcombine.high %v1193_v22, %v1205_v23  ;;  %v1348_v13 = vld [vmem:[%s17463_s22 + $0x2160] sm:$0xff]  ;;  %v1337_v14 = vld [vmem:[%s17463_s22 + $0x2108] sm:$0xff] }
  0xf9   : > { %v1349_v15 = vld [vmem:[%s17463_s22 + $0x2168] sm:$0xff] }
  0xfb   : > { %11955 = vmatpush1.bf16.msra.mxu0 %v15587_v32  ;;  %12160 = vmatpush1.bf16.msra.mxu1 %v15589_v0  ;;  %v1229_v32 = vld [vmem:[%s17463_s22 + $0x1da8] sm:$0xff]  ;;  %v15755_v0 = vcombine.low %v1192_v20, %v1204_v21  ;;  %v1360_v20 = vld [vmem:[%s17463_s22 + $0x21c0] sm:$0xff] }
  0xfc   : > { %11965 = vmatprep.subr.bf16.mxu0 %v15612_v34  ;;  %12170 = vmatprep.subr.bf16.mxu1 %v15614_v35  ;;  %v15757_v34 = vcombine.low %v1193_v22, %v1205_v23  ;;  %v15780_v35 = vcombine.high %v1216_v29, %v1228_v60  ;;  %v15782_v36 = vcombine.high %v1217_v31, %v1229_v32  ;;  %v1372_v21 = vld [vmem:[%s17463_s22 + $0x2220] sm:$0xff]  ;;  %v1361_v22 = vld [vmem:[%s17463_s22 + $0x21c8] sm:$0xff] }
  0xfd   : > { %v1373_v23 = vld [vmem:[%s17463_s22 + $0x2228] sm:$0xff] }
  0xfe   : > { %11957 = vmatmul.mubr.bf16.vlgmr.msra.gmra.mrb[0].mxu0 %v17648_v39  ;;  %12162 = vmatmul.mubr.bf16.vlgmr.msra.gmra.mrb[0].mxu1 %v17648_v39 }
  0xff   : > { %11966 = vmatpush1.bf16.msra.mxu0 %v15611_v42  ;;  %12171 = vmatpush1.bf16.msra.mxu1 %v15613_v43  ;;  %v15779_v42 = vcombine.low %v1216_v29, %v1228_v60  ;;  %v15781_v43 = vcombine.low %v1217_v31, %v1229_v32  ;;  %v1384_v29 = vld [vmem:[%s17463_s22 + $0x2280] sm:$0xff]  ;;  %v1385_v31 = vld [vmem:[%s17463_s22 + $0x2288] sm:$0xff] }
 0x100   : > { %11967 = vmatprep.subr.bf16.mxu0 %v15636_v44  ;;  %12172 = vmatprep.subr.bf16.mxu1 %v15638_v46  ;;  %v15804_v44 = vcombine.high %v1240_v37, %v1252_v38  ;;  %v15806_v46 = vcombine.high %v1241_v40, %v1253_v41  ;;  %v1396_v60 = vld [vmem:[%s17463_s22 + $0x22e0] sm:$0xff]  ;;  %v1397_v32 = vld [vmem:[%s17463_s22 + $0x22e8] sm:$0xff] }
 0x101   : > { %11997 = vmatprep.mubr.bf16.mxu0 %v17655_v49  ;;  %12202 = vmatprep.mubr.bf16.mxu1 %v17655_v49 }
 0x103   : > { %11968 = vmatpush1.bf16.msra.mxu0 %v15635_v52  ;;  %12173 = vmatpush1.bf16.msra.mxu1 %v15637_v53  ;;  %v15803_v52 = vcombine.low %v1240_v37, %v1252_v38  ;;  %v15805_v53 = vcombine.low %v1241_v40, %v1253_v41  ;;  %v1408_v37 = vld [vmem:[%s17463_s22 + $0x2340] sm:$0xff]  ;;  %v1409_v40 = vld [vmem:[%s17463_s22 + $0x2348] sm:$0xff] }
 0x104   : > { %11969 = vmatprep.subr.bf16.mxu0 %v15660_v55  ;;  %12174 = vmatprep.subr.bf16.mxu1 %v15662_v56  ;;  %v15828_v55 = vcombine.high %v1264_v47, %v1276_v48  ;;  %v15830_v56 = vcombine.high %v1265_v50, %v1277_v51  ;;  %v1420_v38 = vld [vmem:[%s17463_s22 + $0x23a0] sm:$0xff]  ;;  %v1421_v41 = vld [vmem:[%s17463_s22 + $0x23a8] sm:$0xff] }
 0x107   : > { %11970 = vmatpush1.bf16.msra.mxu0 %v15659_v62  ;;  %12175 = vmatpush1.bf16.msra.mxu1 %v15661_v63  ;;  %v15827_v62 = vcombine.low %v1264_v47, %v1276_v48  ;;  %v15829_v63 = vcombine.low %v1265_v50, %v1277_v51  ;;  %v1432_v47 = vld [vmem:[%s17463_s22 + $0x2400] sm:$0xff]  ;;  %v1433_v50 = vld [vmem:[%s17463_s22 + $0x2408] sm:$0xff] }
 0x108   : > { %11971 = vmatprep.subr.bf16.mxu0 %v15684_v1  ;;  %12176 = vmatprep.subr.bf16.mxu1 %v15686_v2  ;;  %v15852_v1 = vcombine.high %v1288_v57, %v1300_v58  ;;  %v15854_v2 = vcombine.high %v1289_v59, %v1301_v61  ;;  %v1444_v48 = vld [vmem:[%s17463_s22 + $0x2460] sm:$0xff]  ;;  %v1445_v51 = vld [vmem:[%s17463_s22 + $0x2468] sm:$0xff] }
 0x10b   : > { %11972 = vmatpush1.bf16.msra.mxu0 %v15683_v7  ;;  %12177 = vmatpush1.bf16.msra.mxu1 %v15685_v8  ;;  %v15851_v7 = vcombine.low %v1288_v57, %v1300_v58  ;;  %v15853_v8 = vcombine.low %v1289_v59, %v1301_v61  ;;  %v1456_v57 = vld [vmem:[%s17463_s22 + $0x24c0] sm:$0xff]  ;;  %v17723_v59 = vrot.slane %v17638_v30, %v17503_v54  ;;  %v1457_v61 = vld [vmem:[%s17463_s22 + $0x24c8] sm:$0xff] }
 0x10c   : > { %11973 = vmatprep.subr.bf16.mxu0 %v15708_v9  ;;  %12178 = vmatprep.subr.bf16.mxu1 %v15710_v11  ;;  %v15876_v9 = vcombine.high %v1312_v3, %v1324_v4  ;;  %v15878_v11 = vcombine.high %v1313_v5, %v1325_v6  ;;  %v1468_v58 = vld [vmem:[%s17463_s22 + $0x2520] sm:$0xff]  ;;  %v1481_v30 = vld [vmem:[%s17463_s22 + $0x2588] sm:$0xff] }
 0x10f   : > { %11974 = vmatpush1.bf16.msra.mxu0 %v15707_v16  ;;  %12179 = vmatpush1.bf16.msra.mxu1 %v15709_v17  ;;  %v15875_v16 = vcombine.low %v1312_v3, %v1324_v4  ;;  %v15877_v17 = vcombine.low %v1313_v5, %v1325_v6  ;;  %v1480_v4 = vld [vmem:[%s17463_s22 + $0x2580] sm:$0xff]  ;;  %v17731_v6 = vcombine.high %v17655_v49, %v17655_v49 }
 0x110   : > { %11975 = vmatprep.subr.bf16.mxu0 %v15732_v18  ;;  %12180 = vmatprep.subr.bf16.mxu1 %v15734_v19  ;;  %v15900_v18 = vcombine.high %v1336_v12, %v1348_v13  ;;  %v15902_v19 = vcombine.high %v1337_v14, %v1349_v15  ;;  %v1492_v5 = vld [vmem:[%s17463_s22 + $0x25e0] sm:$0xff] }
 0x113   : > { %11976 = vmatpush1.bf16.msra.mxu0 %v15731_v25  ;;  %12181 = vmatpush1.bf16.msra.mxu1 %v15733_v26  ;;  %v15899_v25 = vcombine.low %v1336_v12, %v1348_v13  ;;  %v15901_v26 = vcombine.low %v1337_v14, %v1349_v15  ;;  %v1504_v13 = vld [vmem:[%s17463_s22 + $0x2640] sm:$0xff]  ;;  %v1505_v15 = vld [vmem:[%s17463_s22 + $0x2648] sm:$0xff] }
 0x114   : > { %11977 = vmatprep.subr.bf16.mxu0 %v15756_v27  ;;  %12182 = vmatprep.subr.bf16.mxu1 %v15758_v28  ;;  %v15924_v27 = vcombine.high %v1360_v20, %v1372_v21  ;;  %v15926_v28 = vcombine.high %v1361_v22, %v1373_v23  ;;  %v1516_v14 = vld [vmem:[%s17463_s22 + $0x26a0] sm:$0xff] }
 0x117   : > { %11978 = vmatpush1.bf16.msra.mxu0 %v15755_v0  ;;  %12183 = vmatpush1.bf16.msra.mxu1 %v15757_v34  ;;  %v15923_v0 = vcombine.low %v1360_v20, %v1372_v21  ;;  %v15925_v34 = vcombine.low %v1361_v22, %v1373_v23  ;;  %v1528_v21 = vld [vmem:[%s17463_s22 + $0x2700] sm:$0xff]  ;;  %v1529_v23 = vld [vmem:[%s17463_s22 + $0x2708] sm:$0xff] }
 0x118   : > { %11979 = vmatprep.subr.bf16.mxu0 %v15780_v35  ;;  %12184 = vmatprep.subr.bf16.mxu1 %v15782_v36  ;;  %v15948_v35 = vcombine.high %v1384_v29, %v1396_v60  ;;  %v15950_v36 = vcombine.high %v1385_v31, %v1397_v32  ;;  %v1540_v22 = vld [vmem:[%s17463_s22 + $0x2760] sm:$0xff] }
 0x11b   : > { %11980 = vmatpush1.bf16.msra.mxu0 %v15779_v42  ;;  %12185 = vmatpush1.bf16.msra.mxu1 %v15781_v43  ;;  %v15947_v42 = vcombine.low %v1384_v29, %v1396_v60  ;;  %v15949_v43 = vcombine.low %v1385_v31, %v1397_v32  ;;  %v1552_v60 = vld [vmem:[%s17463_s22 + $0x27c0] sm:$0xff]  ;;  %v1553_v32 = vld [vmem:[%s17463_s22 + $0x27c8] sm:$0xff] }
 0x11c   : > { %11981 = vmatprep.subr.bf16.mxu0 %v15804_v44  ;;  %12186 = vmatprep.subr.bf16.mxu1 %v15806_v46  ;;  %v15972_v44 = vcombine.high %v1408_v37, %v1420_v38  ;;  %v15974_v46 = vcombine.high %v1409_v40, %v1421_v41  ;;  %v1564_v31 = vld [vmem:[%s17463_s22 + $0x2820] sm:$0xff] }
 0x11f   : > { %11982 = vmatpush1.bf16.msra.mxu0 %v15803_v52  ;;  %12187 = vmatpush1.bf16.msra.mxu1 %v15805_v53  ;;  %v15971_v52 = vcombine.low %v1408_v37, %v1420_v38  ;;  %v15973_v53 = vcombine.low %v1409_v40, %v1421_v41  ;;  %v1576_v38 = vld [vmem:[%s17463_s22 + $0x2880] sm:$0xff]  ;;  %v1577_v41 = vld [vmem:[%s17463_s22 + $0x2888] sm:$0xff] }
 0x120   : > { %11983 = vmatprep.subr.bf16.mxu0 %v15828_v55  ;;  %12188 = vmatprep.subr.bf16.mxu1 %v15830_v56  ;;  %v15996_v55 = vcombine.high %v1432_v47, %v1444_v48  ;;  %v15998_v56 = vcombine.high %v1433_v50, %v1445_v51  ;;  %v1588_v40 = vld [vmem:[%s17463_s22 + $0x28e0] sm:$0xff] }
 0x123   : > { %11984 = vmatpush1.bf16.msra.mxu0 %v15827_v62  ;;  %12189 = vmatpush1.bf16.msra.mxu1 %v15829_v63  ;;  %v1469_v62 = vld [vmem:[%s17463_s22 + $0x2528] sm:$0xff]  ;;  %v15995_v63 = vcombine.low %v1432_v47, %v1444_v48  ;;  %v1600_v48 = vld [vmem:[%s17463_s22 + $0x2940] sm:$0xff] }
 0x124   : > { %11985 = vmatprep.subr.bf16.mxu0 %v15852_v1  ;;  %12190 = vmatprep.subr.bf16.mxu1 %v15854_v2  ;;  %v15997_v1 = vcombine.low %v1433_v50, %v1445_v51  ;;  %v16020_v2 = vcombine.high %v1456_v57, %v1468_v58  ;;  %v16022_v3 = vcombine.high %v1457_v61, %v1469_v62  ;;  %v1612_v50 = vld [vmem:[%s17463_s22 + $0x29a0] sm:$0xff]  ;;  %v1601_v51 = vld [vmem:[%s17463_s22 + $0x2948] sm:$0xff] }
 0x127   : > { %11986 = vmatpush1.bf16.msra.mxu0 %v15851_v7  ;;  %12191 = vmatpush1.bf16.msra.mxu1 %v15853_v8  ;;  %v1493_v7 = vld [vmem:[%s17463_s22 + $0x25e8] sm:$0xff]  ;;  %v16019_v8 = vcombine.low %v1456_v57, %v1468_v58  ;;  %v1624_v58 = vld [vmem:[%s17463_s22 + $0x2a00] sm:$0xff] }
 0x128   : > { %11987 = vmatprep.subr.bf16.mxu0 %v15876_v9  ;;  %12192 = vmatprep.subr.bf16.mxu1 %v15878_v11  ;;  %v16021_v9 = vcombine.low %v1457_v61, %v1469_v62  ;;  %v16044_v11 = vcombine.high %v1480_v4, %v1492_v5  ;;  %v16046_v12 = vcombine.high %v1481_v30, %v1493_v7  ;;  %v1636_v61 = vld [vmem:[%s17463_s22 + $0x2a60] sm:$0xff]  ;;  %v1625_v62 = vld [vmem:[%s17463_s22 + $0x2a08] sm:$0xff] }
 0x12b   : > { %11988 = vmatpush1.bf16.msra.mxu0 %v15875_v16  ;;  %12193 = vmatpush1.bf16.msra.mxu1 %v15877_v17  ;;  %v1517_v16 = vld [vmem:[%s17463_s22 + $0x26a8] sm:$0xff]  ;;  %v16043_v17 = vcombine.low %v1480_v4, %v1492_v5  ;;  %v1648_v5 = vld [vmem:[%s17463_s22 + $0x2ac0] sm:$0xff] }
 0x12c   : > { %11989 = vmatprep.subr.bf16.mxu0 %v15900_v18  ;;  %12194 = vmatprep.subr.bf16.mxu1 %v15902_v19  ;;  %v16045_v18 = vcombine.low %v1481_v30, %v1493_v7  ;;  %v16068_v19 = vcombine.high %v1504_v13, %v1516_v14  ;;  %v16070_v20 = vcombine.high %v1505_v15, %v1517_v16  ;;  %v1660_v30 = vld [vmem:[%s17463_s22 + $0x2b20] sm:$0xff]  ;;  %v1649_v7 = vld [vmem:[%s17463_s22 + $0x2ac8] sm:$0xff] }
 0x12f   : > { %11990 = vmatpush1.bf16.msra.mxu0 %v15899_v25  ;;  %12195 = vmatpush1.bf16.msra.mxu1 %v15901_v26  ;;  %v1541_v25 = vld [vmem:[%s17463_s22 + $0x2768] sm:$0xff]  ;;  %v16067_v26 = vcombine.low %v1504_v13, %v1516_v14  ;;  %v1672_v14 = vld [vmem:[%s17463_s22 + $0x2b80] sm:$0xff] }
 0x130   : > { %11991 = vmatprep.subr.bf16.mxu0 %v15924_v27  ;;  %12196 = vmatprep.subr.bf16.mxu1 %v15926_v28  ;;  %v16069_v27 = vcombine.low %v1505_v15, %v1517_v16  ;;  %v16092_v28 = vcombine.high %v1528_v21, %v1540_v22  ;;  %v16094_v29 = vcombine.high %v1529_v23, %v1541_v25  ;;  %v1684_v15 = vld [vmem:[%s17463_s22 + $0x2be0] sm:$0xff]  ;;  %v1673_v16 = vld [vmem:[%s17463_s22 + $0x2b88] sm:$0xff] }
 0x133   : > { %11992 = vmatpush1.bf16.msra.mxu0 %v15923_v0  ;;  %12197 = vmatpush1.bf16.msra.mxu1 %v15925_v34  ;;  %v1565_v0 = vld [vmem:[%s17463_s22 + $0x2828] sm:$0xff]  ;;  %v16091_v34 = vcombine.low %v1528_v21, %v1540_v22  ;;  %v1696_v22 = vld [vmem:[%s17463_s22 + $0x2c40] sm:$0xff] }
 0x134   : > { %11993 = vmatprep.subr.bf16.mxu0 %v15948_v35  ;;  %12198 = vmatprep.subr.bf16.mxu1 %v15950_v36  ;;  %v16093_v35 = vcombine.low %v1529_v23, %v1541_v25  ;;  %v16116_v36 = vcombine.high %v1552_v60, %v1564_v31  ;;  %v16118_v37 = vcombine.high %v1553_v32, %v1565_v0  ;;  %v1708_v23 = vld [vmem:[%s17463_s22 + $0x2ca0] sm:$0xff]  ;;  %v1697_v25 = vld [vmem:[%s17463_s22 + $0x2c48] sm:$0xff] }
 0x137   : > { %11994 = vmatpush1.bf16.msra.mxu0 %v15947_v42  ;;  %12199 = vmatpush1.bf16.msra.mxu1 %v15949_v43  ;;  %v1589_v42 = vld [vmem:[%s17463_s22 + $0x28e8] sm:$0xff]  ;;  %v16115_v43 = vcombine.low %v1552_v60, %v1564_v31  ;;  %v1720_v31 = vld [vmem:[%s17463_s22 + $0x2d00] sm:$0xff] }
 0x138   : > { %11995 = vmatprep.subr.bf16.mxu0 %v15972_v44  ;;  %12200 = vmatprep.subr.bf16.mxu1 %v15974_v46  ;;  %v16117_v44 = vcombine.low %v1553_v32, %v1565_v0  ;;  %v16140_v46 = vcombine.high %v1576_v38, %v1588_v40  ;;  %v16142_v47 = vcombine.high %v1577_v41, %v1589_v42  ;;  %v1732_v32 = vld [vmem:[%s17463_s22 + $0x2d60] sm:$0xff]  ;;  %v1721_v0 = vld [vmem:[%s17463_s22 + $0x2d08] sm:$0xff] }
 0x13b   : > { %11996 = vmatpush1.bf16.msra.mxu0 %v15971_v52  ;;  %12201 = vmatpush1.bf16.msra.mxu1 %v15973_v53  ;;  %v1613_v52 = vld [vmem:[%s17463_s22 + $0x29a8] sm:$0xff]  ;;  %v16139_v53 = vcombine.low %v1576_v38, %v1588_v40  ;;  %v1744_v40 = vld [vmem:[%s17463_s22 + $0x2dc0] sm:$0xff] }
 0x13c   : > { %12006 = vmatprep.subr.bf16.mxu0 %v15996_v55  ;;  %12211 = vmatprep.subr.bf16.mxu1 %v15998_v56  ;;  %v16141_v55 = vcombine.low %v1577_v41, %v1589_v42  ;;  %v16164_v56 = vcombine.high %v1600_v48, %v1612_v50  ;;  %v16166_v57 = vcombine.high %v1601_v51, %v1613_v52  ;;  %v1756_v41 = vld [vmem:[%s17463_s22 + $0x2e20] sm:$0xff]  ;;  %v1745_v42 = vld [vmem:[%s17463_s22 + $0x2dc8] sm:$0xff] }
 0x13e   : > { %11998 = vmatmul.mubr.bf16.vlgmr.msra.gmra.mrb[0].mxu0 %v17723_v59  ;;  %12203 = vmatmul.mubr.bf16.vlgmr.msra.gmra.mrb[0].mxu1 %v17723_v59 }
 0x13f   : > { %12007 = vmatpush1.bf16.msra.mxu0 %v15995_v63  ;;  %12212 = vmatpush1.bf16.msra.mxu1 %v15997_v1  ;;  %v1637_v63 = vld [vmem:[%s17463_s22 + $0x2a68] sm:$0xff]  ;;  %v16163_v1 = vcombine.low %v1600_v48, %v1612_v50  ;;  %v1768_v50 = vld [vmem:[%s17463_s22 + $0x2e80] sm:$0xff] }
 0x140   : > { %12008 = vmatprep.subr.bf16.mxu0 %v16020_v2  ;;  %12213 = vmatprep.subr.bf16.mxu1 %v16022_v3  ;;  %v16165_v2 = vcombine.low %v1601_v51, %v1613_v52  ;;  %v16188_v3 = vcombine.high %v1624_v58, %v1636_v61  ;;  %v16190_v4 = vcombine.high %v1625_v62, %v1637_v63  ;;  %v1780_v51 = vld [vmem:[%s17463_s22 + $0x2ee0] sm:$0xff]  ;;  %v1769_v52 = vld [vmem:[%s17463_s22 + $0x2e88] sm:$0xff] }
 0x141   : > { %12038 = vmatprep.mubr.bf16.mxu0 %v17731_v6  ;;  %12243 = vmatprep.mubr.bf16.mxu1 %v17731_v6 }
 0x143   : > { %12009 = vmatpush1.bf16.msra.mxu0 %v16019_v8  ;;  %12214 = vmatpush1.bf16.msra.mxu1 %v16021_v9  ;;  %v1661_v8 = vld [vmem:[%s17463_s22 + $0x2b28] sm:$0xff]  ;;  %v16187_v9 = vcombine.low %v1624_v58, %v1636_v61  ;;  %v1792_v61 = vld [vmem:[%s17463_s22 + $0x2f40] sm:$0xff] }
 0x144   : > { %12010 = vmatprep.subr.bf16.mxu0 %v16044_v11  ;;  %12215 = vmatprep.subr.bf16.mxu1 %v16046_v12  ;;  %v16189_v11 = vcombine.low %v1625_v62, %v1637_v63  ;;  %v16212_v12 = vcombine.high %v1648_v5, %v1660_v30  ;;  %v16214_v13 = vcombine.high %v1649_v7, %v1661_v8  ;;  %v1804_v62 = vld [vmem:[%s17463_s22 + $0x2fa0] sm:$0xff]  ;;  %v1793_v63 = vld [vmem:[%s17463_s22 + $0x2f48] sm:$0xff] }
 0x147   : > { %12011 = vmatpush1.bf16.msra.mxu0 %v16043_v17  ;;  %12216 = vmatpush1.bf16.msra.mxu1 %v16045_v18  ;;  %v1685_v17 = vld [vmem:[%s17463_s22 + $0x2be8] sm:$0xff]  ;;  %v16211_v18 = vcombine.low %v1648_v5, %v1660_v30  ;;  %v1816_v30 = vld [vmem:[%s17463_s22 + $0x3000] sm:$0xff] }
 0x148   : > { %12012 = vmatprep.subr.bf16.mxu0 %v16068_v19  ;;  %12217 = vmatprep.subr.bf16.mxu1 %v16070_v20  ;;  %v16213_v19 = vcombine.low %v1649_v7, %v1661_v8  ;;  %v16236_v20 = vcombine.high %v1672_v14, %v1684_v15  ;;  %v16238_v21 = vcombine.high %v1673_v16, %v1685_v17  ;;  %v1828_v7 = vld [vmem:[%s17463_s22 + $0x3060] sm:$0xff]  ;;  %v1817_v8 = vld [vmem:[%s17463_s22 + $0x3008] sm:$0xff] }
 0x14b   : > { %12013 = vmatpush1.bf16.msra.mxu0 %v16067_v26  ;;  %12218 = vmatpush1.bf16.msra.mxu1 %v16069_v27  ;;  %v1709_v26 = vld [vmem:[%s17463_s22 + $0x2ca8] sm:$0xff]  ;;  %v16235_v27 = vcombine.low %v1672_v14, %v1684_v15  ;;  %v16380_v14 = vcombine.high %v1816_v30, %v1828_v7 }
 0x14c   : > { %12014 = vmatprep.subr.bf16.mxu0 %v16092_v28  ;;  %12219 = vmatprep.subr.bf16.mxu1 %v16094_v29  ;;  %v16237_v28 = vcombine.low %v1673_v16, %v1685_v17  ;;  %v16260_v29 = vcombine.high %v1696_v22, %v1708_v23  ;;  %v16262_v60 = vcombine.high %v1697_v25, %v1709_v26  ;;  %v1840_v16 = vld [vmem:[%s17463_s22 + $0x30c0] sm:$0xff] }
 0x14d   : > { %v1852_v17 = vld [vmem:[%s17463_s22 + $0x3120] sm:$0xff] }
 0x14f   : > { %12015 = vmatpush1.bf16.msra.mxu0 %v16091_v34  ;;  %12220 = vmatpush1.bf16.msra.mxu1 %v16093_v35  ;;  %v1733_v34 = vld [vmem:[%s17463_s22 + $0x2d68] sm:$0xff]  ;;  %v16259_v35 = vcombine.low %v1696_v22, %v1708_v23  ;;  %v16379_v22 = vcombine.low %v1816_v30, %v1828_v7 }
 0x150   : > { %12016 = vmatprep.subr.bf16.mxu0 %v16116_v36  ;;  %12221 = vmatprep.subr.bf16.mxu1 %v16118_v37  ;;  %v16261_v36 = vcombine.low %v1697_v25, %v1709_v26  ;;  %v16284_v37 = vcombine.high %v1720_v31, %v1732_v32  ;;  %v16286_v38 = vcombine.high %v1721_v0, %v1733_v34  ;;  %v1973_v30 = vld [vmem:[%s17463_s22 + $0x34e8] sm:$0xff] }
 0x151   : > { %v16404_v25 = vcombine.high %v1840_v16, %v1852_v17 }
 0x153   : > { %12017 = vmatpush1.bf16.msra.mxu0 %v16115_v43  ;;  %12222 = vmatpush1.bf16.msra.mxu1 %v16117_v44  ;;  %v1757_v43 = vld [vmem:[%s17463_s22 + $0x2e28] sm:$0xff]  ;;  %v16283_v44 = vcombine.low %v1720_v31, %v1732_v32  ;;  %v16403_v32 = vcombine.low %v1840_v16, %v1852_v17 }
 0x154   : > { %12018 = vmatprep.subr.bf16.mxu0 %v16140_v46  ;;  %12223 = vmatprep.subr.bf16.mxu1 %v16142_v47  ;;  %v16285_v46 = vcombine.low %v1721_v0, %v1733_v34  ;;  %v16308_v47 = vcombine.high %v1744_v40, %v1756_v41  ;;  %v16310_v48 = vcombine.high %v1745_v42, %v1757_v43  ;;  %v1877_v31 = vld [vmem:[%s17463_s22 + $0x31e8] sm:$0xff] }
 0x155   : > { %v1997_v16 = vld [vmem:[%s17463_s22 + $0x35a8] sm:$0xff] }
 0x157   : > { %12019 = vmatpush1.bf16.msra.mxu0 %v16139_v53  ;;  %12224 = vmatpush1.bf16.msra.mxu1 %v16141_v55  ;;  %v1781_v53 = vld [vmem:[%s17463_s22 + $0x2ee8] sm:$0xff]  ;;  %v16307_v55 = vcombine.low %v1744_v40, %v1756_v41 }
 0x158   : > { %12020 = vmatprep.subr.bf16.mxu0 %v16164_v56  ;;  %12225 = vmatprep.subr.bf16.mxu1 %v16166_v57  ;;  %v16309_v56 = vcombine.low %v1745_v42, %v1757_v43  ;;  %v16332_v57 = vcombine.high %v1768_v50, %v1780_v51  ;;  %v16334_v58 = vcombine.high %v1769_v52, %v1781_v53  ;;  %v1901_v40 = vld [vmem:[%s17463_s22 + $0x32a8] sm:$0xff] }
 0x15b   : > { %12021 = vmatpush1.bf16.msra.mxu0 %v16163_v1  ;;  %12226 = vmatpush1.bf16.msra.mxu1 %v16165_v2  ;;  %v1805_v1 = vld [vmem:[%s17463_s22 + $0x2fa8] sm:$0xff]  ;;  %v16331_v2 = vcombine.low %v1768_v50, %v1780_v51 }
 0x15c   : > { %12022 = vmatprep.subr.bf16.mxu0 %v16188_v3  ;;  %12227 = vmatprep.subr.bf16.mxu1 %v16190_v4  ;;  %v16333_v3 = vcombine.low %v1769_v52, %v1781_v53  ;;  %v16356_v4 = vcombine.high %v1792_v61, %v1804_v62  ;;  %v16358_v5 = vcombine.high %v1793_v63, %v1805_v1  ;;  %v1925_v50 = vld [vmem:[%s17463_s22 + $0x3368] sm:$0xff] }
 0x15f   : > { %12023 = vmatpush1.bf16.msra.mxu0 %v16187_v9  ;;  %12228 = vmatpush1.bf16.msra.mxu1 %v16189_v11  ;;  %v1829_v9 = vld [vmem:[%s17463_s22 + $0x3068] sm:$0xff]  ;;  %v17796_v11 = vld.sshfl [vmem:[%s17456_s30 + $0x8] sm:$0x11 pattern:$0x75316420] }
 0x160   : > { %12024 = vmatprep.subr.bf16.mxu0 %v16212_v12  ;;  %12229 = vmatprep.subr.bf16.mxu1 %v16214_v13  ;;  %v16355_v12 = vcombine.low %v1792_v61, %v1804_v62  ;;  %v16357_v13 = vcombine.low %v1793_v63, %v1805_v1  ;;  %v16382_v15 = vcombine.high %v1817_v8, %v1829_v9  ;;  %v1949_v61 = vld [vmem:[%s17463_s22 + $0x3428] sm:$0xff] }
 0x161   : > { %v16381_v23 = vcombine.low %v1817_v8, %v1829_v9 }
 0x163   : > { %12025 = vmatpush1.bf16.msra.mxu0 %v16211_v18  ;;  %12230 = vmatpush1.bf16.msra.mxu1 %v16213_v19  ;;  %v2258_v18 = vcombine.high %v17796_v11, %v17796_v11  ;;  %v17804_v19 = vcombine.high %v17723_v59, %v17723_v59 }
 0x164   : > { %12026 = vmatprep.subr.bf16.mxu0 %v16236_v20  ;;  %12231 = vmatprep.subr.bf16.mxu1 %v16238_v21  ;;  %v1841_v20 = vld [vmem:[%s17463_s22 + $0x30c8] sm:$0xff] }
 0x165   : > { %v1853_v21 = vld [vmem:[%s17463_s22 + $0x3128] sm:$0xff] }
 0x166   : > { %v16406_v26 = vcombine.high %v1841_v20, %v1853_v21  ;;  %v16405_v0 = vcombine.low %v1841_v20, %v1853_v21 }
 0x167   : > { %12027 = vmatpush1.bf16.msra.mxu0 %v16235_v27  ;;  %12232 = vmatpush1.bf16.msra.mxu1 %v16237_v28  ;;  %v1864_v27 = vld [vmem:[%s17463_s22 + $0x3180] sm:$0xff] }
 0x168   : > { %12028 = vmatprep.subr.bf16.mxu0 %v16260_v29  ;;  %12233 = vmatprep.subr.bf16.mxu1 %v16262_v60  ;;  %v1876_v28 = vld [vmem:[%s17463_s22 + $0x31e0] sm:$0xff]  ;;  %v17811_v29 = vrot.slane %v2258_v18, %v17503_v54  ;;  %v1865_v60 = vld [vmem:[%s17463_s22 + $0x3188] sm:$0xff] }
 0x169   : > { %v16428_v34 = vcombine.high %v1864_v27, %v1876_v28  ;;  %v16427_v41 = vcombine.low %v1864_v27, %v1876_v28  ;;  %v16429_v42 = vcombine.low %v1865_v60, %v1877_v31 }
 0x16b   : > { %12029 = vmatpush1.bf16.msra.mxu0 %v16259_v35  ;;  %12234 = vmatpush1.bf16.msra.mxu1 %v16261_v36  ;;  %v16430_v35 = vcombine.high %v1865_v60, %v1877_v31  ;;  %v1888_v36 = vld [vmem:[%s17463_s22 + $0x3240] sm:$0xff] }
 0x16c   : > { %12030 = vmatprep.subr.bf16.mxu0 %v16284_v37  ;;  %12235 = vmatprep.subr.bf16.mxu1 %v16286_v38  ;;  %v1900_v37 = vld [vmem:[%s17463_s22 + $0x32a0] sm:$0xff]  ;;  %v1889_v38 = vld [vmem:[%s17463_s22 + $0x3248] sm:$0xff] }
 0x16d   : > { %v16452_v43 = vcombine.high %v1888_v36, %v1900_v37  ;;  %v16451_v51 = vcombine.low %v1888_v36, %v1900_v37  ;;  %v16453_v52 = vcombine.low %v1889_v38, %v1901_v40 }
 0x16f   : > { %12031 = vmatpush1.bf16.msra.mxu0 %v16283_v44  ;;  %12236 = vmatpush1.bf16.msra.mxu1 %v16285_v46  ;;  %v16454_v44 = vcombine.high %v1889_v38, %v1901_v40  ;;  %v1912_v46 = vld [vmem:[%s17463_s22 + $0x3300] sm:$0xff] }
 0x170   : > { %12032 = vmatprep.subr.bf16.mxu0 %v16308_v47  ;;  %12237 = vmatprep.subr.bf16.mxu1 %v16310_v48  ;;  %v1924_v47 = vld [vmem:[%s17463_s22 + $0x3360] sm:$0xff]  ;;  %v1913_v48 = vld [vmem:[%s17463_s22 + $0x3308] sm:$0xff] }
 0x171   : > { %v16476_v53 = vcombine.high %v1912_v46, %v1924_v47  ;;  %v16475_v62 = vcombine.low %v1912_v46, %v1924_v47  ;;  %v16477_v63 = vcombine.low %v1913_v48, %v1925_v50 }
 0x173   : > { %12033 = vmatpush1.bf16.msra.mxu0 %v16307_v55  ;;  %12238 = vmatpush1.bf16.msra.mxu1 %v16309_v56  ;;  %v16478_v55 = vcombine.high %v1913_v48, %v1925_v50  ;;  %v1936_v56 = vld [vmem:[%s17463_s22 + $0x33c0] sm:$0xff] }
 0x174   : > { %12034 = vmatprep.subr.bf16.mxu0 %v16332_v57  ;;  %12239 = vmatprep.subr.bf16.mxu1 %v16334_v58  ;;  %v1948_v57 = vld [vmem:[%s17463_s22 + $0x3420] sm:$0xff]  ;;  %v1937_v58 = vld [vmem:[%s17463_s22 + $0x33c8] sm:$0xff] }
 0x175   : > { %v16500_v1 = vcombine.high %v1936_v56, %v1948_v57  ;;  %v16499_v7 = vcombine.low %v1936_v56, %v1948_v57  ;;  %v16501_v8 = vcombine.low %v1937_v58, %v1949_v61 }
 0x177   : > { %12035 = vmatpush1.bf16.msra.mxu0 %v16331_v2  ;;  %12240 = vmatpush1.bf16.msra.mxu1 %v16333_v3  ;;  %v16502_v2 = vcombine.high %v1937_v58, %v1949_v61  ;;  %v1960_v3 = vld [vmem:[%s17463_s22 + $0x3480] sm:$0xff] }
 0x178   : > { %12036 = vmatprep.subr.bf16.mxu0 %v16356_v4  ;;  %12241 = vmatprep.subr.bf16.mxu1 %v16358_v5  ;;  %v1972_v4 = vld [vmem:[%s17463_s22 + $0x34e0] sm:$0xff]  ;;  %v1961_v5 = vld [vmem:[%s17463_s22 + $0x3488] sm:$0xff] }
 0x179   : > { %v16524_v9 = vcombine.high %v1960_v3, %v1972_v4  ;;  %v16523_v17 = vcombine.low %v1960_v3, %v1972_v4  ;;  %v16525_v18 = vcombine.low %v1961_v5, %v1973_v30 }
 0x17b   : > { %12037 = vmatpush1.bf16.msra.mxu0 %v16355_v12  ;;  %12242 = vmatpush1.bf16.msra.mxu1 %v16357_v13  ;;  %v16526_v12 = vcombine.high %v1961_v5, %v1973_v30  ;;  %v1984_v13 = vld [vmem:[%s17463_s22 + $0x3540] sm:$0xff] }
 0x17c   : > { %12047 = vmatprep.subr.bf16.mxu0 %v16380_v14  ;;  %12252 = vmatprep.subr.bf16.mxu1 %v16382_v15  ;;  %v1996_v14 = vld [vmem:[%s17463_s22 + $0x35a0] sm:$0xff]  ;;  %v1985_v15 = vld [vmem:[%s17463_s22 + $0x3548] sm:$0xff] }
 0x17d   : > { %v16548_v20 = vcombine.high %v1984_v13, %v1996_v14  ;;  %v16550_v21 = vcombine.high %v1985_v15, %v1997_v16  ;;  %v16547_v27 = vcombine.low %v1984_v13, %v1996_v14  ;;  %v16549_v28 = vcombine.low %v1985_v15, %v1997_v16 }
 0x17e   : > { %12039 = vmatmul.mubr.bf16.vlgmr.msra.gmra.mrb[0].mxu0 %v17804_v19  ;;  %12244 = vmatmul.mubr.bf16.vlgmr.msra.gmra.mrb[0].mxu1 %v17804_v19 }
 0x17f   : > { %12048 = vmatpush1.bf16.msra.mxu0 %v16379_v22  ;;  %12253 = vmatpush1.bf16.msra.mxu1 %v16381_v23  ;;  %v2008_v22 = vld [vmem:[%s17463_s22 + $0x3600] sm:$0xff] }
 0x180   : > { %12049 = vmatprep.subr.bf16.mxu0 %v16404_v25  ;;  %12254 = vmatprep.subr.bf16.mxu1 %v16406_v26  ;;  %v2020_v23 = vld [vmem:[%s17463_s22 + $0x3660] sm:$0xff]  ;;  %v2009_v25 = vld [vmem:[%s17463_s22 + $0x3608] sm:$0xff] }
 0x181   : > { %12079 = vmatprep.mubr.bf16.mxu0 %v17811_v29  ;;  %12284 = vmatprep.mubr.bf16.mxu1 %v17811_v29  ;;  %v2021_v26 = vld [vmem:[%s17463_s22 + $0x3668] sm:$0xff]  ;;  %v16572_v60 = vcombine.high %v2008_v22, %v2020_v23  ;;  %v16571_v36 = vcombine.low %v2008_v22, %v2020_v23 }
 0x182   : > { %v16574_v31 = vcombine.high %v2009_v25, %v2021_v26  ;;  %v16573_v37 = vcombine.low %v2009_v25, %v2021_v26 }
 0x183   : > { %12050 = vmatpush1.bf16.msra.mxu0 %v16403_v32  ;;  %12255 = vmatpush1.bf16.msra.mxu1 %v16405_v0  ;;  %v2032_v32 = vld [vmem:[%s17463_s22 + $0x36c0] sm:$0xff] }
 0x184   : > { %12051 = vmatprep.subr.bf16.mxu0 %v16428_v34  ;;  %12256 = vmatprep.subr.bf16.mxu1 %v16430_v35  ;;  %v2044_v0 = vld [vmem:[%s17463_s22 + $0x3720] sm:$0xff]  ;;  %v2033_v34 = vld [vmem:[%s17463_s22 + $0x36c8] sm:$0xff] }
 0x185   : > { %v2045_v35 = vld [vmem:[%s17463_s22 + $0x3728] sm:$0xff]  ;;  %v16596_v38 = vcombine.high %v2032_v32, %v2044_v0  ;;  %v16595_v46 = vcombine.low %v2032_v32, %v2044_v0 }
 0x186   : > { %v16598_v40 = vcombine.high %v2033_v34, %v2045_v35  ;;  %v16597_v47 = vcombine.low %v2033_v34, %v2045_v35 }
 0x187   : > { %12052 = vmatpush1.bf16.msra.mxu0 %v16427_v41  ;;  %12257 = vmatpush1.bf16.msra.mxu1 %v16429_v42  ;;  %v2056_v41 = vld [vmem:[%s17463_s22 + $0x3780] sm:$0xff] }
 0x188   : > { %12053 = vmatprep.subr.bf16.mxu0 %v16452_v43  ;;  %12258 = vmatprep.subr.bf16.mxu1 %v16454_v44  ;;  %v2068_v42 = vld [vmem:[%s17463_s22 + $0x37e0] sm:$0xff]  ;;  %v2057_v43 = vld [vmem:[%s17463_s22 + $0x3788] sm:$0xff] }
 0x189   : > { %v2069_v44 = vld [vmem:[%s17463_s22 + $0x37e8] sm:$0xff]  ;;  %v16620_v48 = vcombine.high %v2056_v41, %v2068_v42  ;;  %v16619_v56 = vcombine.low %v2056_v41, %v2068_v42 }
 0x18a   : > { %v16622_v50 = vcombine.high %v2057_v43, %v2069_v44  ;;  %v16621_v57 = vcombine.low %v2057_v43, %v2069_v44 }
 0x18b   : > { %12054 = vmatpush1.bf16.msra.mxu0 %v16451_v51  ;;  %12259 = vmatpush1.bf16.msra.mxu1 %v16453_v52  ;;  %v2080_v51 = vld [vmem:[%s17463_s22 + $0x3840] sm:$0xff] }
 0x18c   : > { %12055 = vmatprep.subr.bf16.mxu0 %v16476_v53  ;;  %12260 = vmatprep.subr.bf16.mxu1 %v16478_v55  ;;  %v2092_v52 = vld [vmem:[%s17463_s22 + $0x38a0] sm:$0xff]  ;;  %v2081_v53 = vld [vmem:[%s17463_s22 + $0x3848] sm:$0xff] }
 0x18d   : > { %v2093_v55 = vld [vmem:[%s17463_s22 + $0x38a8] sm:$0xff]  ;;  %v16644_v58 = vcombine.high %v2080_v51, %v2092_v52  ;;  %v16643_v3 = vcombine.low %v2080_v51, %v2092_v52  ;;  %v319_v51 = vld [vmem:[%s17463_s22 + $0x138] sm:$0xff] }
 0x18e   : > { %v16646_v61 = vcombine.high %v2081_v53, %v2093_v55  ;;  %v16645_v4 = vcombine.low %v2081_v53, %v2093_v55 }
 0x18f   : > { %12056 = vmatpush1.bf16.msra.mxu0 %v16475_v62  ;;  %12261 = vmatpush1.bf16.msra.mxu1 %v16477_v63  ;;  %v2104_v62 = vld [vmem:[%s17463_s22 + $0x3900] sm:$0xff] }
 0x190   : > { %12057 = vmatprep.subr.bf16.mxu0 %v16500_v1  ;;  %12262 = vmatprep.subr.bf16.mxu1 %v16502_v2  ;;  %v2116_v63 = vld [vmem:[%s17463_s22 + $0x3960] sm:$0xff]  ;;  %v2105_v1 = vld [vmem:[%s17463_s22 + $0x3908] sm:$0xff] }
 0x191   : > { %v2117_v2 = vld [vmem:[%s17463_s22 + $0x3968] sm:$0xff]  ;;  %v16668_v5 = vcombine.high %v2104_v62, %v2116_v63  ;;  %v16667_v13 = vcombine.low %v2104_v62, %v2116_v63 }
 0x192   : > { %v16670_v30 = vcombine.high %v2105_v1, %v2117_v2  ;;  %v16669_v14 = vcombine.low %v2105_v1, %v2117_v2  ;;  %v354_v2 = vld [vmem:[%s17463_s22 + $0x250] sm:$0xff] }
 0x193   : > { %12058 = vmatpush1.bf16.msra.mxu0 %v16499_v7  ;;  %12263 = vmatpush1.bf16.msra.mxu1 %v16501_v8  ;;  %v2128_v7 = vld [vmem:[%s17463_s22 + $0x39c0] sm:$0xff] }
 0x194   : > { %12059 = vmatprep.subr.bf16.mxu0 %v16524_v9  ;;  %12264 = vmatprep.subr.bf16.mxu1 %v16526_v12  ;;  %v2140_v8 = vld [vmem:[%s17463_s22 + $0x3a20] sm:$0xff]  ;;  %v2129_v9 = vld [vmem:[%s17463_s22 + $0x39c8] sm:$0xff] }
 0x195   : > { %v2141_v12 = vld [vmem:[%s17463_s22 + $0x3a28] sm:$0xff]  ;;  %v16692_v15 = vcombine.high %v2128_v7, %v2140_v8  ;;  %v16691_v22 = vcombine.low %v2128_v7, %v2140_v8 }
 0x196   : > { %v16694_v16 = vcombine.high %v2129_v9, %v2141_v12  ;;  %v16693_v23 = vcombine.low %v2129_v9, %v2141_v12  ;;  %v378_v12 = vld [vmem:[%s17463_s22 + $0x310] sm:$0xff] }
 0x197   : > { %12060 = vmatpush1.bf16.msra.mxu0 %v16523_v17  ;;  %12265 = vmatpush1.bf16.msra.mxu1 %v16525_v18  ;;  %v2152_v17 = vld [vmem:[%s17463_s22 + $0x3a80] sm:$0xff] }
 0x198   : > { %12061 = vmatprep.subr.bf16.mxu0 %v16548_v20  ;;  %12266 = vmatprep.subr.bf16.mxu1 %v16550_v21  ;;  %v2164_v18 = vld [vmem:[%s17463_s22 + $0x3ae0] sm:$0xff]  ;;  %v2153_v20 = vld [vmem:[%s17463_s22 + $0x3a88] sm:$0xff] }
 0x199   : > { %v2165_v21 = vld [vmem:[%s17463_s22 + $0x3ae8] sm:$0xff]  ;;  %v16716_v25 = vcombine.high %v2152_v17, %v2164_v18  ;;  %v16715_v32 = vcombine.low %v2152_v17, %v2164_v18 }
 0x19a   : > { %v16718_v26 = vcombine.high %v2153_v20, %v2165_v21  ;;  %v16717_v0 = vcombine.low %v2153_v20, %v2165_v21  ;;  %v402_v21 = vld [vmem:[%s17463_s22 + $0x3d0] sm:$0xff] }
 0x19b   : > { %12062 = vmatpush1.bf16.msra.mxu0 %v16547_v27  ;;  %12267 = vmatpush1.bf16.msra.mxu1 %v16549_v28  ;;  %v2176_v27 = vld [vmem:[%s17463_s22 + $0x3b40] sm:$0xff] }
 0x19c   : > { %12063 = vmatprep.subr.bf16.mxu0 %v16572_v60  ;;  %12268 = vmatprep.subr.bf16.mxu1 %v16574_v31  ;;  %v2188_v28 = vld [vmem:[%s17463_s22 + $0x3ba0] sm:$0xff]  ;;  %v2177_v60 = vld [vmem:[%s17463_s22 + $0x3b48] sm:$0xff] }
 0x19d   : > { %v2189_v31 = vld [vmem:[%s17463_s22 + $0x3ba8] sm:$0xff]  ;;  %v16740_v34 = vcombine.high %v2176_v27, %v2188_v28  ;;  %v16739_v41 = vcombine.low %v2176_v27, %v2188_v28 }
 0x19e   : > { %v16742_v35 = vcombine.high %v2177_v60, %v2189_v31  ;;  %v16741_v42 = vcombine.low %v2177_v60, %v2189_v31  ;;  %v426_v31 = vld [vmem:[%s17463_s22 + $0x490] sm:$0xff] }
 0x19f   : > { %12064 = vmatpush1.bf16.msra.mxu0 %v16571_v36  ;;  %12269 = vmatpush1.bf16.msra.mxu1 %v16573_v37  ;;  %v282_v36 = vld [vmem:[%s17463_s22 + $0x10] sm:$0xff] }
 0x1a0   : > { %12065 = vmatprep.subr.bf16.mxu0 %v16596_v38  ;;  %12270 = vmatprep.subr.bf16.mxu1 %v16598_v40  ;;  %v294_v37 = vld [vmem:[%s17463_s22 + $0x70] sm:$0xff]  ;;  %v283_v38 = vld [vmem:[%s17463_s22 + $0x18] sm:$0xff] }
 0x1a1   : > { %v295_v40 = vld [vmem:[%s17463_s22 + $0x78] sm:$0xff]  ;;  %v14848_v43 = vcombine.high %v282_v36, %v294_v37  ;;  %v14847_v52 = vcombine.low %v282_v36, %v294_v37 }
 0x1a2   : > { %v14850_v44 = vcombine.high %v283_v38, %v295_v40  ;;  %v14849_v53 = vcombine.low %v283_v38, %v295_v40  ;;  %v450_v40 = vld [vmem:[%s17463_s22 + $0x550] sm:$0xff] }
 0x1a3   : > { %12066 = vmatpush1.bf16.msra.mxu0 %v16595_v46  ;;  %12271 = vmatpush1.bf16.msra.mxu1 %v16597_v47  ;;  %v306_v46 = vld [vmem:[%s17463_s22 + $0xd0] sm:$0xff] }
 0x1a4   : > { %12067 = vmatprep.subr.bf16.mxu0 %v16620_v48  ;;  %12272 = vmatprep.subr.bf16.mxu1 %v16622_v50  ;;  %v318_v47 = vld [vmem:[%s17463_s22 + $0x130] sm:$0xff]  ;;  %v17879_v48 = vrot.slane %v17796_v11, %v17503_v54  ;;  %v307_v50 = vld [vmem:[%s17463_s22 + $0xd8] sm:$0xff] }
 0x1a5   : > { %v14872_v55 = vcombine.high %v306_v46, %v318_v47  ;;  %v331_v54 = vld [vmem:[%s17463_s22 + $0x198] sm:$0xff]  ;;  %v14873_v62 = vcombine.low %v307_v50, %v319_v51 }
 0x1a6   : > { %v343_v11 = vld [vmem:[%s17463_s22 + $0x1f8] sm:$0xff] }
 0x1a7   : > { %12068 = vmatpush1.bf16.msra.mxu0 %v16619_v56  ;;  %12273 = vmatpush1.bf16.msra.mxu1 %v16621_v57  ;;  %v14874_v56 = vcombine.high %v307_v50, %v319_v51  ;;  %v330_v57 = vld [vmem:[%s17463_s22 + $0x190] sm:$0xff]  ;;  %v14898_v1 = vcombine.high %v331_v54, %v343_v11  ;;  %v14897_v7 = vcombine.low %v331_v54, %v343_v11 }
 0x1a8   : > { %12069 = vmatprep.subr.bf16.mxu0 %v16644_v58  ;;  %12274 = vmatprep.subr.bf16.mxu1 %v16646_v61  ;;  %v342_v58 = vld [vmem:[%s17463_s22 + $0x1f0] sm:$0xff]  ;;  %v14871_v61 = vcombine.low %v306_v46, %v318_v47 }
 0x1a9   : > { %v14896_v63 = vcombine.high %v330_v57, %v342_v58  ;;  %v474_v51 = vld [vmem:[%s17463_s22 + $0x610] sm:$0xff] }
 0x1aa   : > { %v498_v11 = vld [vmem:[%s17463_s22 + $0x6d0] sm:$0xff] }
 0x1ab   : > { %12070 = vmatpush1.bf16.msra.mxu0 %v16643_v3  ;;  %12275 = vmatpush1.bf16.msra.mxu1 %v16645_v4  ;;  %v366_v3 = vld [vmem:[%s17463_s22 + $0x2b0] sm:$0xff]  ;;  %v355_v4 = vld [vmem:[%s17463_s22 + $0x258] sm:$0xff] }
 0x1ac   : > { %12071 = vmatprep.subr.bf16.mxu0 %v16668_v5  ;;  %12276 = vmatprep.subr.bf16.mxu1 %v16670_v30  ;;  %v367_v5 = vld [vmem:[%s17463_s22 + $0x2b8] sm:$0xff]  ;;  %v14895_v30 = vcombine.low %v330_v57, %v342_v58  ;;  %v14920_v8 = vcombine.high %v354_v2, %v366_v3 }
 0x1ad   : > { %v14922_v9 = vcombine.high %v355_v4, %v367_v5  ;;  %v14921_v17 = vcombine.low %v355_v4, %v367_v5  ;;  %v522_v5 = vld [vmem:[%s17463_s22 + $0x790] sm:$0xff] }
 0x1af   : > { %12072 = vmatpush1.bf16.msra.mxu0 %v16667_v13  ;;  %12277 = vmatpush1.bf16.msra.mxu1 %v16669_v14  ;;  %v390_v13 = vld [vmem:[%s17463_s22 + $0x370] sm:$0xff]  ;;  %v379_v14 = vld [vmem:[%s17463_s22 + $0x318] sm:$0xff] }
 0x1b0   : > { %12073 = vmatprep.subr.bf16.mxu0 %v16692_v15  ;;  %12278 = vmatprep.subr.bf16.mxu1 %v16694_v16  ;;  %v391_v15 = vld [vmem:[%s17463_s22 + $0x378] sm:$0xff]  ;;  %v14919_v16 = vcombine.low %v354_v2, %v366_v3  ;;  %v14944_v18 = vcombine.high %v378_v12, %v390_v13 }
 0x1b1   : > { %v14946_v20 = vcombine.high %v379_v14, %v391_v15  ;;  %v14945_v27 = vcombine.low %v379_v14, %v391_v15  ;;  %v546_v15 = vld [vmem:[%s17463_s22 + $0x850] sm:$0xff] }
 0x1b3   : > { %12074 = vmatpush1.bf16.msra.mxu0 %v16691_v22  ;;  %12279 = vmatpush1.bf16.msra.mxu1 %v16693_v23  ;;  %v414_v22 = vld [vmem:[%s17463_s22 + $0x430] sm:$0xff]  ;;  %v403_v23 = vld [vmem:[%s17463_s22 + $0x3d8] sm:$0xff] }
 0x1b4   : > { %12075 = vmatprep.subr.bf16.mxu0 %v16716_v25  ;;  %12280 = vmatprep.subr.bf16.mxu1 %v16718_v26  ;;  %v415_v25 = vld [vmem:[%s17463_s22 + $0x438] sm:$0xff]  ;;  %v14943_v26 = vcombine.low %v378_v12, %v390_v13  ;;  %v14968_v28 = vcombine.high %v402_v21, %v414_v22 }
 0x1b5   : > { %v14970_v60 = vcombine.high %v403_v23, %v415_v25  ;;  %v14969_v36 = vcombine.low %v403_v23, %v415_v25  ;;  %v570_v25 = vld [vmem:[%s17463_s22 + $0x910] sm:$0xff] }
 0x1b7   : > { %12076 = vmatpush1.bf16.msra.mxu0 %v16715_v32  ;;  %12281 = vmatpush1.bf16.msra.mxu1 %v16717_v0  ;;  %v438_v32 = vld [vmem:[%s17463_s22 + $0x4f0] sm:$0xff]  ;;  %v427_v0 = vld [vmem:[%s17463_s22 + $0x498] sm:$0xff] }
 0x1b8   : > { %12077 = vmatprep.subr.bf16.mxu0 %v16740_v34  ;;  %12282 = vmatprep.subr.bf16.mxu1 %v16742_v35  ;;  %v439_v34 = vld [vmem:[%s17463_s22 + $0x4f8] sm:$0xff]  ;;  %v14967_v35 = vcombine.low %v402_v21, %v414_v22  ;;  %v14992_v37 = vcombine.high %v426_v31, %v438_v32 }
 0x1b9   : > { %v14994_v38 = vcombine.high %v427_v0, %v439_v34  ;;  %v14993_v46 = vcombine.low %v427_v0, %v439_v34  ;;  %v594_v34 = vld [vmem:[%s17463_s22 + $0x9d0] sm:$0xff] }
 0x1bb   : > { %12078 = vmatpush1.bf16.msra.mxu0 %v16739_v41  ;;  %12283 = vmatpush1.bf16.msra.mxu1 %v16741_v42  ;;  %v462_v41 = vld [vmem:[%s17463_s22 + $0x5b0] sm:$0xff]  ;;  %v451_v42 = vld [vmem:[%s17463_s22 + $0x558] sm:$0xff] }
 0x1bc   : > { %12293 = vmatprep.subr.bf16.mxu0 %v14848_v43  ;;  %12498 = vmatprep.subr.bf16.mxu1 %v14850_v44  ;;  %v463_v43 = vld [vmem:[%s17463_s22 + $0x5b8] sm:$0xff]  ;;  %v14991_v44 = vcombine.low %v426_v31, %v438_v32  ;;  %v15016_v47 = vcombine.high %v450_v40, %v462_v41 }
 0x1bd   : > { %v15018_v50 = vcombine.high %v451_v42, %v463_v43  ;;  %v15017_v57 = vcombine.low %v451_v42, %v463_v43  ;;  %v618_v43 = vld [vmem:[%s17463_s22 + $0xa90] sm:$0xff] }
 0x1be   : > { %12080 = vmatmul.mubr.bf16.vlgmr.msra.gmra.mrb[0].mxu0 %v17879_v48  ;;  %12285 = vmatmul.mubr.bf16.vlgmr.msra.gmra.mrb[0].mxu1 %v17879_v48 }
 0x1bf   : > { %12294 = vmatpush1.bf16.msra.mxu0 %v14847_v52  ;;  %12499 = vmatpush1.bf16.msra.mxu1 %v14849_v53  ;;  %v486_v52 = vld [vmem:[%s17463_s22 + $0x670] sm:$0xff]  ;;  %v475_v53 = vld [vmem:[%s17463_s22 + $0x618] sm:$0xff] }
 0x1c0   : > { %12295 = vmatprep.subr.bf16.mxu0 %v14872_v55  ;;  %12500 = vmatprep.subr.bf16.mxu1 %v14874_v56  ;;  %v487_v55 = vld [vmem:[%s17463_s22 + $0x678] sm:$0xff]  ;;  %v15015_v56 = vcombine.low %v450_v40, %v462_v41  ;;  %v15040_v58 = vcombine.high %v474_v51, %v486_v52 }
 0x1c1   : > { %12325 = vmatprep.mubr.bf16.mxu0 %v17523_v10  ;;  %12530 = vmatprep.mubr.bf16.mxu1 %v17523_v10  ;;  %v15042_v54 = vcombine.high %v475_v53, %v487_v55  ;;  %v15041_v2 = vcombine.low %v475_v53, %v487_v55  ;;  %v642_v55 = vld [vmem:[%s17463_s22 + $0xb50] sm:$0xff] }
 0x1c3   : > { %12296 = vmatpush1.bf16.msra.mxu0 %v14871_v61  ;;  %12501 = vmatpush1.bf16.msra.mxu1 %v14873_v62  ;;  %v510_v61 = vld [vmem:[%s17463_s22 + $0x730] sm:$0xff]  ;;  %v499_v62 = vld [vmem:[%s17463_s22 + $0x6d8] sm:$0xff] }
 0x1c4   : > { %12297 = vmatprep.subr.bf16.mxu0 %v14896_v63  ;;  %12502 = vmatprep.subr.bf16.mxu1 %v14898_v1  ;;  %v511_v63 = vld [vmem:[%s17463_s22 + $0x738] sm:$0xff]  ;;  %v15039_v1 = vcombine.low %v474_v51, %v486_v52  ;;  %v15064_v3 = vcombine.high %v498_v11, %v510_v61 }
 0x1c5   : > { %v15066_v4 = vcombine.high %v499_v62, %v511_v63  ;;  %v15065_v12 = vcombine.low %v499_v62, %v511_v63  ;;  %v666_v63 = vld [vmem:[%s17463_s22 + $0xc10] sm:$0xff] }
 0x1c7   : > { %12298 = vmatpush1.bf16.msra.mxu0 %v14895_v30  ;;  %12503 = vmatpush1.bf16.msra.mxu1 %v14897_v7  ;;  %v534_v30 = vld [vmem:[%s17463_s22 + $0x7f0] sm:$0xff]  ;;  %v523_v7 = vld [vmem:[%s17463_s22 + $0x798] sm:$0xff] }
 0x1c8   : > { %12299 = vmatprep.subr.bf16.mxu0 %v14920_v8  ;;  %12504 = vmatprep.subr.bf16.mxu1 %v14922_v9  ;;  %v535_v8 = vld [vmem:[%s17463_s22 + $0x7f8] sm:$0xff]  ;;  %v15063_v9 = vcombine.low %v498_v11, %v510_v61  ;;  %v15088_v13 = vcombine.high %v522_v5, %v534_v30 }
 0x1c9   : > { %v15090_v14 = vcombine.high %v523_v7, %v535_v8  ;;  %v15089_v21 = vcombine.low %v523_v7, %v535_v8  ;;  %v690_v8 = vld [vmem:[%s17463_s22 + $0xcd0] sm:$0xff] }
 0x1cb   : > { %12300 = vmatpush1.bf16.msra.mxu0 %v14919_v16  ;;  %12505 = vmatpush1.bf16.msra.mxu1 %v14921_v17  ;;  %v558_v16 = vld [vmem:[%s17463_s22 + $0x8b0] sm:$0xff]  ;;  %v547_v17 = vld [vmem:[%s17463_s22 + $0x858] sm:$0xff] }
 0x1cc   : > { %12301 = vmatprep.subr.bf16.mxu0 %v14944_v18  ;;  %12506 = vmatprep.subr.bf16.mxu1 %v14946_v20  ;;  %v559_v18 = vld [vmem:[%s17463_s22 + $0x8b8] sm:$0xff]  ;;  %v15087_v20 = vcombine.low %v522_v5, %v534_v30  ;;  %v15112_v22 = vcombine.high %v546_v15, %v558_v16 }
 0x1cd   : > { %v15114_v23 = vcombine.high %v547_v17, %v559_v18  ;;  %v15113_v31 = vcombine.low %v547_v17, %v559_v18  ;;  %v714_v18 = vld [vmem:[%s17463_s22 + $0xd90] sm:$0xff] }
 0x1cf   : > { %12302 = vmatpush1.bf16.msra.mxu0 %v14943_v26  ;;  %12507 = vmatpush1.bf16.msra.mxu1 %v14945_v27  ;;  %v582_v26 = vld [vmem:[%s17463_s22 + $0x970] sm:$0xff]  ;;  %v571_v27 = vld [vmem:[%s17463_s22 + $0x918] sm:$0xff] }
 0x1d0   : > { %12303 = vmatprep.subr.bf16.mxu0 %v14968_v28  ;;  %12508 = vmatprep.subr.bf16.mxu1 %v14970_v60  ;;  %v583_v28 = vld [vmem:[%s17463_s22 + $0x978] sm:$0xff]  ;;  %v15111_v60 = vcombine.low %v546_v15, %v558_v16  ;;  %v15136_v32 = vcombine.high %v570_v25, %v582_v26 }
 0x1d1   : > { %v15138_v0 = vcombine.high %v571_v27, %v583_v28  ;;  %v15137_v40 = vcombine.low %v571_v27, %v583_v28  ;;  %v738_v28 = vld [vmem:[%s17463_s22 + $0xe50] sm:$0xff] }
 0x1d3   : > { %12304 = vmatpush1.bf16.msra.mxu0 %v14967_v35  ;;  %12509 = vmatpush1.bf16.msra.mxu1 %v14969_v36  ;;  %v606_v35 = vld [vmem:[%s17463_s22 + $0xa30] sm:$0xff]  ;;  %v595_v36 = vld [vmem:[%s17463_s22 + $0x9d8] sm:$0xff] }
 0x1d4   : > { %12305 = vmatprep.subr.bf16.mxu0 %v14992_v37  ;;  %12510 = vmatprep.subr.bf16.mxu1 %v14994_v38  ;;  %v607_v37 = vld [vmem:[%s17463_s22 + $0xa38] sm:$0xff]  ;;  %v15135_v38 = vcombine.low %v570_v25, %v582_v26  ;;  %v15160_v41 = vcombine.high %v594_v34, %v606_v35 }
 0x1d5   : > { %v15162_v42 = vcombine.high %v595_v36, %v607_v37  ;;  %v15161_v51 = vcombine.low %v595_v36, %v607_v37  ;;  %v762_v37 = vld [vmem:[%s17463_s22 + $0xf10] sm:$0xff] }
 0x1d7   : > { %12306 = vmatpush1.bf16.msra.mxu0 %v14991_v44  ;;  %12511 = vmatpush1.bf16.msra.mxu1 %v14993_v46  ;;  %v630_v44 = vld [vmem:[%s17463_s22 + $0xaf0] sm:$0xff]  ;;  %v619_v46 = vld [vmem:[%s17463_s22 + $0xa98] sm:$0xff] }
 0x1d8   : > { %12307 = vmatprep.subr.bf16.mxu0 %v15016_v47  ;;  %12512 = vmatprep.subr.bf16.mxu1 %v15018_v50  ;;  %v631_v47 = vld [vmem:[%s17463_s22 + $0xaf8] sm:$0xff]  ;;  %v15159_v50 = vcombine.low %v594_v34, %v606_v35  ;;  %v15184_v52 = vcombine.high %v618_v43, %v630_v44 }
 0x1d9   : > { %v15186_v53 = vcombine.high %v619_v46, %v631_v47  ;;  %v15185_v11 = vcombine.low %v619_v46, %v631_v47  ;;  %v786_v47 = vld [vmem:[%s17463_s22 + $0xfd0] sm:$0xff] }
 0x1db   : > { %12308 = vmatpush1.bf16.msra.mxu0 %v15015_v56  ;;  %12513 = vmatpush1.bf16.msra.mxu1 %v15017_v57  ;;  %v654_v56 = vld [vmem:[%s17463_s22 + $0xbb0] sm:$0xff]  ;;  %v643_v57 = vld [vmem:[%s17463_s22 + $0xb58] sm:$0xff] }
 0x1dc   : > { %12309 = vmatprep.subr.bf16.mxu0 %v15040_v58  ;;  %12514 = vmatprep.subr.bf16.mxu1 %v15042_v54  ;;  %v655_v58 = vld [vmem:[%s17463_s22 + $0xbb8] sm:$0xff]  ;;  %v15183_v54 = vcombine.low %v618_v43, %v630_v44  ;;  %v15208_v61 = vcombine.high %v642_v55, %v654_v56 }
 0x1dd   : > { %v15210_v62 = vcombine.high %v643_v57, %v655_v58  ;;  %v15209_v5 = vcombine.low %v643_v57, %v655_v58  ;;  %v810_v58 = vld [vmem:[%s17463_s22 + $0x1090] sm:$0xff] }
 0x1df   : > { %12310 = vmatpush1.bf16.msra.mxu0 %v15039_v1  ;;  %12515 = vmatpush1.bf16.msra.mxu1 %v15041_v2  ;;  %v678_v1 = vld [vmem:[%s17463_s22 + $0xc70] sm:$0xff]  ;;  %v667_v2 = vld [vmem:[%s17463_s22 + $0xc18] sm:$0xff] }
 0x1e0   : > { %12311 = vmatprep.subr.bf16.mxu0 %v15064_v3  ;;  %12516 = vmatprep.subr.bf16.mxu1 %v15066_v4  ;;  %v679_v3 = vld [vmem:[%s17463_s22 + $0xc78] sm:$0xff]  ;;  %v15207_v4 = vcombine.low %v642_v55, %v654_v56  ;;  %v15232_v30 = vcombine.high %v666_v63, %v678_v1 }
 0x1e1   : > { %v15234_v7 = vcombine.high %v667_v2, %v679_v3  ;;  %v15233_v15 = vcombine.low %v667_v2, %v679_v3  ;;  %v834_v3 = vld [vmem:[%s17463_s22 + $0x1150] sm:$0xff] }
 0x1e3   : > { %12312 = vmatpush1.bf16.msra.mxu0 %v15063_v9  ;;  %12517 = vmatpush1.bf16.msra.mxu1 %v15065_v12  ;;  %v702_v9 = vld [vmem:[%s17463_s22 + $0xd30] sm:$0xff]  ;;  %v691_v12 = vld [vmem:[%s17463_s22 + $0xcd8] sm:$0xff] }
 0x1e4   : > { %12313 = vmatprep.subr.bf16.mxu0 %v15088_v13  ;;  %12518 = vmatprep.subr.bf16.mxu1 %v15090_v14  ;;  %v703_v13 = vld [vmem:[%s17463_s22 + $0xd38] sm:$0xff]  ;;  %v15231_v14 = vcombine.low %v666_v63, %v678_v1  ;;  %v15256_v16 = vcombine.high %v690_v8, %v702_v9 }
 0x1e5   : > { %v15258_v17 = vcombine.high %v691_v12, %v703_v13  ;;  %v15257_v25 = vcombine.low %v691_v12, %v703_v13  ;;  %v858_v13 = vld [vmem:[%s17463_s22 + $0x1210] sm:$0xff] }
 0x1e7   : > { %12314 = vmatpush1.bf16.msra.mxu0 %v15087_v20  ;;  %12519 = vmatpush1.bf16.msra.mxu1 %v15089_v21  ;;  %v726_v20 = vld [vmem:[%s17463_s22 + $0xdf0] sm:$0xff]  ;;  %v715_v21 = vld [vmem:[%s17463_s22 + $0xd98] sm:$0xff] }
 0x1e8   : > { %12315 = vmatprep.subr.bf16.mxu0 %v15112_v22  ;;  %12520 = vmatprep.subr.bf16.mxu1 %v15114_v23  ;;  %v727_v22 = vld [vmem:[%s17463_s22 + $0xdf8] sm:$0xff]  ;;  %v15255_v23 = vcombine.low %v690_v8, %v702_v9  ;;  %v15280_v26 = vcombine.high %v714_v18, %v726_v20 }
 0x1e9   : > { %v15282_v27 = vcombine.high %v715_v21, %v727_v22  ;;  %v15281_v34 = vcombine.low %v715_v21, %v727_v22  ;;  %v882_v22 = vld [vmem:[%s17463_s22 + $0x12d0] sm:$0xff] }
 0x1eb   : > { %12316 = vmatpush1.bf16.msra.mxu0 %v15111_v60  ;;  %12521 = vmatpush1.bf16.msra.mxu1 %v15113_v31  ;;  %v750_v60 = vld [vmem:[%s17463_s22 + $0xeb0] sm:$0xff]  ;;  %v739_v31 = vld [vmem:[%s17463_s22 + $0xe58] sm:$0xff] }
 0x1ec   : > { %12317 = vmatprep.subr.bf16.mxu0 %v15136_v32  ;;  %12522 = vmatprep.subr.bf16.mxu1 %v15138_v0  ;;  %v751_v32 = vld [vmem:[%s17463_s22 + $0xeb8] sm:$0xff]  ;;  %v15279_v0 = vcombine.low %v714_v18, %v726_v20  ;;  %v15304_v35 = vcombine.high %v738_v28, %v750_v60 }
 0x1ed   : > { %v15306_v36 = vcombine.high %v739_v31, %v751_v32  ;;  %v15305_v43 = vcombine.low %v739_v31, %v751_v32  ;;  %v906_v32 = vld [vmem:[%s17463_s22 + $0x1390] sm:$0xff] }
 0x1ef   : > { %12318 = vmatpush1.bf16.msra.mxu0 %v15135_v38  ;;  %12523 = vmatpush1.bf16.msra.mxu1 %v15137_v40  ;;  %v774_v38 = vld [vmem:[%s17463_s22 + $0xf70] sm:$0xff]  ;;  %v763_v40 = vld [vmem:[%s17463_s22 + $0xf18] sm:$0xff] }
 0x1f0   : > { %12319 = vmatprep.subr.bf16.mxu0 %v15160_v41  ;;  %12524 = vmatprep.subr.bf16.mxu1 %v15162_v42  ;;  %v775_v41 = vld [vmem:[%s17463_s22 + $0xf78] sm:$0xff]  ;;  %v15303_v42 = vcombine.low %v738_v28, %v750_v60  ;;  %v15328_v44 = vcombine.high %v762_v37, %v774_v38 }
 0x1f1   : > { %v15330_v46 = vcombine.high %v763_v40, %v775_v41  ;;  %v15329_v55 = vcombine.low %v763_v40, %v775_v41  ;;  %v930_v41 = vld [vmem:[%s17463_s22 + $0x1450] sm:$0xff] }
 0x1f3   : > { %12320 = vmatpush1.bf16.msra.mxu0 %v15159_v50  ;;  %12525 = vmatpush1.bf16.msra.mxu1 %v15161_v51  ;;  %v798_v50 = vld [vmem:[%s17463_s22 + $0x1030] sm:$0xff]  ;;  %v787_v51 = vld [vmem:[%s17463_s22 + $0xfd8] sm:$0xff] }
 0x1f4   : > { %12321 = vmatprep.subr.bf16.mxu0 %v15184_v52  ;;  %12526 = vmatprep.subr.bf16.mxu1 %v15186_v53  ;;  %v799_v52 = vld [vmem:[%s17463_s22 + $0x1038] sm:$0xff]  ;;  %v15327_v53 = vcombine.low %v762_v37, %v774_v38  ;;  %v15352_v56 = vcombine.high %v786_v47, %v798_v50 }
 0x1f5   : > { %v15354_v57 = vcombine.high %v787_v51, %v799_v52  ;;  %v15353_v63 = vcombine.low %v787_v51, %v799_v52  ;;  %v954_v52 = vld [vmem:[%s17463_s22 + $0x1510] sm:$0xff] }
 0x1f7   : > { %12322 = vmatpush1.bf16.msra.mxu0 %v15183_v54  ;;  %12527 = vmatpush1.bf16.msra.mxu1 %v15185_v11  ;;  %v822_v54 = vld [vmem:[%s17463_s22 + $0x10f0] sm:$0xff]  ;;  %v811_v11 = vld [vmem:[%s17463_s22 + $0x1098] sm:$0xff] }
 0x1f8   : > { %12323 = vmatprep.subr.bf16.mxu0 %v15208_v61  ;;  %12528 = vmatprep.subr.bf16.mxu1 %v15210_v62  ;;  %v823_v61 = vld [vmem:[%s17463_s22 + $0x10f8] sm:$0xff]  ;;  %v15351_v62 = vcombine.low %v786_v47, %v798_v50  ;;  %v15376_v1 = vcombine.high %v810_v58, %v822_v54 }
 0x1f9   : > { %v15378_v2 = vcombine.high %v811_v11, %v823_v61  ;;  %v15377_v8 = vcombine.low %v811_v11, %v823_v61  ;;  %v978_v61 = vld [vmem:[%s17463_s22 + $0x15d0] sm:$0xff] }
 0x1fb   : > { %12324 = vmatpush1.bf16.msra.mxu0 %v15207_v4  ;;  %12529 = vmatpush1.bf16.msra.mxu1 %v15209_v5  ;;  %v846_v4 = vld [vmem:[%s17463_s22 + $0x11b0] sm:$0xff]  ;;  %v835_v5 = vld [vmem:[%s17463_s22 + $0x1158] sm:$0xff] }
 0x1fc   : > { %12334 = vmatprep.subr.bf16.mxu0 %v15232_v30  ;;  %12539 = vmatprep.subr.bf16.mxu1 %v15234_v7  ;;  %v847_v30 = vld [vmem:[%s17463_s22 + $0x11b8] sm:$0xff]  ;;  %v15375_v7 = vcombine.low %v810_v58, %v822_v54  ;;  %v15400_v9 = vcombine.high %v834_v3, %v846_v4 }
 0x1fd   : > { %v15402_v12 = vcombine.high %v835_v5, %v847_v30  ;;  %v15401_v18 = vcombine.low %v835_v5, %v847_v30  ;;  %v1002_v30 = vld [vmem:[%s17463_s22 + $0x1690] sm:$0xff] }
 0x1fe   : > { %12326 = vmatmul.mubr.bf16.vlgmr.msra.gmra.mrb[4].mxu0 %v17565_v24  ;;  %12531 = vmatmul.mubr.bf16.vlgmr.msra.gmra.mrb[4].mxu1 %v17565_v24 }
 0x1ff   : > { %12335 = vmatpush1.bf16.msra.mxu0 %v15231_v14  ;;  %12540 = vmatpush1.bf16.msra.mxu1 %v15233_v15  ;;  %v870_v14 = vld [vmem:[%s17463_s22 + $0x1270] sm:$0xff]  ;;  %v859_v15 = vld [vmem:[%s17463_s22 + $0x1218] sm:$0xff] }
 0x200   : > { %12336 = vmatprep.subr.bf16.mxu0 %v15256_v16  ;;  %12541 = vmatprep.subr.bf16.mxu1 %v15258_v17  ;;  %v871_v16 = vld [vmem:[%s17463_s22 + $0x1278] sm:$0xff]  ;;  %v15399_v17 = vcombine.low %v834_v3, %v846_v4  ;;  %v15424_v20 = vcombine.high %v858_v13, %v870_v14 }
 0x201   : > { %12366 = vmatprep.mubr.bf16.mxu0 %v17573_v33  ;;  %12571 = vmatprep.mubr.bf16.mxu1 %v17573_v33  ;;  %v15426_v21 = vcombine.high %v859_v15, %v871_v16  ;;  %v15425_v28 = vcombine.low %v859_v15, %v871_v16  ;;  %v1026_v16 = vld [vmem:[%s17463_s22 + $0x1750] sm:$0xff] }
 0x203   : > { %12337 = vmatpush1.bf16.msra.mxu0 %v15255_v23  ;;  %12542 = vmatpush1.bf16.msra.mxu1 %v15257_v25  ;;  %v894_v23 = vld [vmem:[%s17463_s22 + $0x1330] sm:$0xff]  ;;  %v883_v25 = vld [vmem:[%s17463_s22 + $0x12d8] sm:$0xff] }
 0x204   : > { %12338 = vmatprep.subr.bf16.mxu0 %v15280_v26  ;;  %12543 = vmatprep.subr.bf16.mxu1 %v15282_v27  ;;  %v895_v26 = vld [vmem:[%s17463_s22 + $0x1338] sm:$0xff]  ;;  %v15423_v27 = vcombine.low %v858_v13, %v870_v14  ;;  %v15448_v60 = vcombine.high %v882_v22, %v894_v23 }
 0x205   : > { %v15450_v31 = vcombine.high %v883_v25, %v895_v26  ;;  %v15449_v37 = vcombine.low %v883_v25, %v895_v26  ;;  %v1050_v26 = vld [vmem:[%s17463_s22 + $0x1810] sm:$0xff] }
 0x207   : > { %12339 = vmatpush1.bf16.msra.mxu0 %v15279_v0  ;;  %12544 = vmatpush1.bf16.msra.mxu1 %v15281_v34  ;;  %v918_v0 = vld [vmem:[%s17463_s22 + $0x13f0] sm:$0xff]  ;;  %v907_v34 = vld [vmem:[%s17463_s22 + $0x1398] sm:$0xff] }
 0x208   : > { %12340 = vmatprep.subr.bf16.mxu0 %v15304_v35  ;;  %12545 = vmatprep.subr.bf16.mxu1 %v15306_v36  ;;  %v919_v35 = vld [vmem:[%s17463_s22 + $0x13f8] sm:$0xff]  ;;  %v15447_v36 = vcombine.low %v882_v22, %v894_v23  ;;  %v15472_v38 = vcombine.high %v906_v32, %v918_v0 }
 0x209   : > { %v15474_v40 = vcombine.high %v907_v34, %v919_v35  ;;  %v15473_v47 = vcombine.low %v907_v34, %v919_v35  ;;  %v1074_v35 = vld [vmem:[%s17463_s22 + $0x18d0] sm:$0xff] }
 0x20b   : > { %12341 = vmatpush1.bf16.msra.mxu0 %v15303_v42  ;;  %12546 = vmatpush1.bf16.msra.mxu1 %v15305_v43  ;;  %v942_v42 = vld [vmem:[%s17463_s22 + $0x14b0] sm:$0xff]  ;;  %v931_v43 = vld [vmem:[%s17463_s22 + $0x1458] sm:$0xff] }
 0x20c   : > { %12342 = vmatprep.subr.bf16.mxu0 %v15328_v44  ;;  %12547 = vmatprep.subr.bf16.mxu1 %v15330_v46  ;;  %v943_v44 = vld [vmem:[%s17463_s22 + $0x14b8] sm:$0xff]  ;;  %v15471_v46 = vcombine.low %v906_v32, %v918_v0  ;;  %v15496_v50 = vcombine.high %v930_v41, %v942_v42 }
 0x20d   : > { %v15498_v51 = vcombine.high %v931_v43, %v943_v44  ;;  %v15497_v58 = vcombine.low %v931_v43, %v943_v44  ;;  %v1098_v44 = vld [vmem:[%s17463_s22 + $0x1990] sm:$0xff] }
 0x20f   : > { %12343 = vmatpush1.bf16.msra.mxu0 %v15327_v53  ;;  %12548 = vmatpush1.bf16.msra.mxu1 %v15329_v55  ;;  %v966_v53 = vld [vmem:[%s17463_s22 + $0x1570] sm:$0xff]  ;;  %v955_v55 = vld [vmem:[%s17463_s22 + $0x1518] sm:$0xff] }
 0x210   : > { %12344 = vmatprep.subr.bf16.mxu0 %v15352_v56  ;;  %12549 = vmatprep.subr.bf16.mxu1 %v15354_v57  ;;  %v967_v56 = vld [vmem:[%s17463_s22 + $0x1578] sm:$0xff]  ;;  %v15495_v57 = vcombine.low %v930_v41, %v942_v42  ;;  %v15520_v54 = vcombine.high %v954_v52, %v966_v53 }
 0x211   : > { %v15522_v11 = vcombine.high %v955_v55, %v967_v56  ;;  %v15521_v3 = vcombine.low %v955_v55, %v967_v56  ;;  %v1122_v56 = vld [vmem:[%s17463_s22 + $0x1a50] sm:$0xff] }
 0x213   : > { %12345 = vmatpush1.bf16.msra.mxu0 %v15351_v62  ;;  %12550 = vmatpush1.bf16.msra.mxu1 %v15353_v63  ;;  %v990_v62 = vld [vmem:[%s17463_s22 + $0x1630] sm:$0xff]  ;;  %v979_v63 = vld [vmem:[%s17463_s22 + $0x15d8] sm:$0xff] }
 0x214   : > { %12346 = vmatprep.subr.bf16.mxu0 %v15376_v1  ;;  %12551 = vmatprep.subr.bf16.mxu1 %v15378_v2  ;;  %v991_v1 = vld [vmem:[%s17463_s22 + $0x1638] sm:$0xff]  ;;  %v15519_v2 = vcombine.low %v954_v52, %v966_v53  ;;  %v15544_v4 = vcombine.high %v978_v61, %v990_v62 }
 0x215   : > { %v15546_v5 = vcombine.high %v979_v63, %v991_v1  ;;  %v15545_v13 = vcombine.low %v979_v63, %v991_v1  ;;  %v1146_v1 = vld [vmem:[%s17463_s22 + $0x1b10] sm:$0xff] }
 0x217   : > { %12347 = vmatpush1.bf16.msra.mxu0 %v15375_v7  ;;  %12552 = vmatpush1.bf16.msra.mxu1 %v15377_v8  ;;  %v1014_v7 = vld [vmem:[%s17463_s22 + $0x16f0] sm:$0xff]  ;;  %v1003_v8 = vld [vmem:[%s17463_s22 + $0x1698] sm:$0xff] }
 0x218   : > { %12348 = vmatprep.subr.bf16.mxu0 %v15400_v9  ;;  %12553 = vmatprep.subr.bf16.mxu1 %v15402_v12  ;;  %v1015_v9 = vld [vmem:[%s17463_s22 + $0x16f8] sm:$0xff]  ;;  %v15543_v12 = vcombine.low %v978_v61, %v990_v62  ;;  %v15568_v14 = vcombine.high %v1002_v30, %v1014_v7 }
 0x219   : > { %v15570_v15 = vcombine.high %v1003_v8, %v1015_v9  ;;  %v15569_v22 = vcombine.low %v1003_v8, %v1015_v9  ;;  %v1170_v9 = vld [vmem:[%s17463_s22 + $0x1bd0] sm:$0xff] }
 0x21b   : > { %12349 = vmatpush1.bf16.msra.mxu0 %v15399_v17  ;;  %12554 = vmatpush1.bf16.msra.mxu1 %v15401_v18  ;;  %v1038_v17 = vld [vmem:[%s17463_s22 + $0x17b0] sm:$0xff]  ;;  %v1027_v18 = vld [vmem:[%s17463_s22 + $0x1758] sm:$0xff] }
 0x21c   : > { %12350 = vmatprep.subr.bf16.mxu0 %v15424_v20  ;;  %12555 = vmatprep.subr.bf16.mxu1 %v15426_v21  ;;  %v1039_v20 = vld [vmem:[%s17463_s22 + $0x17b8] sm:$0xff]  ;;  %v15567_v21 = vcombine.low %v1002_v30, %v1014_v7  ;;  %v15592_v23 = vcombine.high %v1026_v16, %v1038_v17 }
 0x21d   : > { %v15594_v25 = vcombine.high %v1027_v18, %v1039_v20  ;;  %v15593_v32 = vcombine.low %v1027_v18, %v1039_v20  ;;  %v1194_v20 = vld [vmem:[%s17463_s22 + $0x1c90] sm:$0xff] }
 0x21f   : > { %12351 = vmatpush1.bf16.msra.mxu0 %v15423_v27  ;;  %12556 = vmatpush1.bf16.msra.mxu1 %v15425_v28  ;;  %v1062_v27 = vld [vmem:[%s17463_s22 + $0x1870] sm:$0xff]  ;;  %v1051_v28 = vld [vmem:[%s17463_s22 + $0x1818] sm:$0xff] }
 0x220   : > { %12352 = vmatprep.subr.bf16.mxu0 %v15448_v60  ;;  %12557 = vmatprep.subr.bf16.mxu1 %v15450_v31  ;;  %v1063_v60 = vld [vmem:[%s17463_s22 + $0x1878] sm:$0xff]  ;;  %v15591_v31 = vcombine.low %v1026_v16, %v1038_v17  ;;  %v15616_v0 = vcombine.high %v1050_v26, %v1062_v27 }
 0x221   : > { %v15618_v34 = vcombine.high %v1051_v28, %v1063_v60  ;;  %v15617_v41 = vcombine.low %v1051_v28, %v1063_v60  ;;  %v1218_v60 = vld [vmem:[%s17463_s22 + $0x1d50] sm:$0xff] }
 0x223   : > { %12353 = vmatpush1.bf16.msra.mxu0 %v15447_v36  ;;  %12558 = vmatpush1.bf16.msra.mxu1 %v15449_v37  ;;  %v1086_v36 = vld [vmem:[%s17463_s22 + $0x1930] sm:$0xff]  ;;  %v1075_v37 = vld [vmem:[%s17463_s22 + $0x18d8] sm:$0xff] }
 0x224   : > { %12354 = vmatprep.subr.bf16.mxu0 %v15472_v38  ;;  %12559 = vmatprep.subr.bf16.mxu1 %v15474_v40  ;;  %v1087_v38 = vld [vmem:[%s17463_s22 + $0x1938] sm:$0xff]  ;;  %v15615_v40 = vcombine.low %v1050_v26, %v1062_v27  ;;  %v15640_v42 = vcombine.high %v1074_v35, %v1086_v36 }
 0x225   : > { %v15642_v43 = vcombine.high %v1075_v37, %v1087_v38  ;;  %v15641_v52 = vcombine.low %v1075_v37, %v1087_v38  ;;  %v1242_v38 = vld [vmem:[%s17463_s22 + $0x1e10] sm:$0xff] }
 0x227   : > { %12355 = vmatpush1.bf16.msra.mxu0 %v15471_v46  ;;  %12560 = vmatpush1.bf16.msra.mxu1 %v15473_v47  ;;  %v1110_v46 = vld [vmem:[%s17463_s22 + $0x19f0] sm:$0xff]  ;;  %v1099_v47 = vld [vmem:[%s17463_s22 + $0x1998] sm:$0xff] }
 0x228   : > { %12356 = vmatprep.subr.bf16.mxu0 %v15496_v50  ;;  %12561 = vmatprep.subr.bf16.mxu1 %v15498_v51  ;;  %v1111_v50 = vld [vmem:[%s17463_s22 + $0x19f8] sm:$0xff]  ;;  %v15639_v51 = vcombine.low %v1074_v35, %v1086_v36  ;;  %v15664_v53 = vcombine.high %v1098_v44, %v1110_v46 }
 0x229   : > { %v15666_v55 = vcombine.high %v1099_v47, %v1111_v50  ;;  %v15665_v61 = vcombine.low %v1099_v47, %v1111_v50  ;;  %v1266_v50 = vld [vmem:[%s17463_s22 + $0x1ed0] sm:$0xff] }
 0x22b   : > { %12357 = vmatpush1.bf16.msra.mxu0 %v15495_v57  ;;  %12562 = vmatpush1.bf16.msra.mxu1 %v15497_v58  ;;  %v1134_v57 = vld [vmem:[%s17463_s22 + $0x1ab0] sm:$0xff]  ;;  %v1123_v58 = vld [vmem:[%s17463_s22 + $0x1a58] sm:$0xff] }
 0x22c   : > { %12358 = vmatprep.subr.bf16.mxu0 %v15520_v54  ;;  %12563 = vmatprep.subr.bf16.mxu1 %v15522_v11  ;;  %v1135_v54 = vld [vmem:[%s17463_s22 + $0x1ab8] sm:$0xff]  ;;  %v15663_v11 = vcombine.low %v1098_v44, %v1110_v46  ;;  %v15688_v62 = vcombine.high %v1122_v56, %v1134_v57 }
 0x22d   : > { %v15690_v63 = vcombine.high %v1123_v58, %v1135_v54  ;;  %v15689_v30 = vcombine.low %v1123_v58, %v1135_v54  ;;  %v1290_v54 = vld [vmem:[%s17463_s22 + $0x1f90] sm:$0xff] }
 0x22f   : > { %12359 = vmatpush1.bf16.msra.mxu0 %v15519_v2  ;;  %12564 = vmatpush1.bf16.msra.mxu1 %v15521_v3  ;;  %v1158_v2 = vld [vmem:[%s17463_s22 + $0x1b70] sm:$0xff]  ;;  %v1147_v3 = vld [vmem:[%s17463_s22 + $0x1b18] sm:$0xff] }
 0x230   : > { %12360 = vmatprep.subr.bf16.mxu0 %v15544_v4  ;;  %12565 = vmatprep.subr.bf16.mxu1 %v15546_v5  ;;  %v1159_v4 = vld [vmem:[%s17463_s22 + $0x1b78] sm:$0xff]  ;;  %v15687_v5 = vcombine.low %v1122_v56, %v1134_v57  ;;  %v15712_v7 = vcombine.high %v1146_v1, %v1158_v2 }
 0x231   : > { %v15714_v8 = vcombine.high %v1147_v3, %v1159_v4  ;;  %v15713_v16 = vcombine.low %v1147_v3, %v1159_v4  ;;  %v1314_v4 = vld [vmem:[%s17463_s22 + $0x2050] sm:$0xff] }
 0x233   : > { %12361 = vmatpush1.bf16.msra.mxu0 %v15543_v12  ;;  %12566 = vmatpush1.bf16.msra.mxu1 %v15545_v13  ;;  %v1182_v12 = vld [vmem:[%s17463_s22 + $0x1c30] sm:$0xff]  ;;  %v1171_v13 = vld [vmem:[%s17463_s22 + $0x1bd8] sm:$0xff] }
 0x234   : > { %12362 = vmatprep.subr.bf16.mxu0 %v15568_v14  ;;  %12567 = vmatprep.subr.bf16.mxu1 %v15570_v15  ;;  %v1183_v14 = vld [vmem:[%s17463_s22 + $0x1c38] sm:$0xff]  ;;  %v15711_v15 = vcombine.low %v1146_v1, %v1158_v2  ;;  %v15736_v17 = vcombine.high %v1170_v9, %v1182_v12 }
 0x235   : > { %v15738_v18 = vcombine.high %v1171_v13, %v1183_v14  ;;  %v15737_v26 = vcombine.low %v1171_v13, %v1183_v14  ;;  %v1338_v14 = vld [vmem:[%s17463_s22 + $0x2110] sm:$0xff] }
 0x237   : > { %12363 = vmatpush1.bf16.msra.mxu0 %v15567_v21  ;;  %12568 = vmatpush1.bf16.msra.mxu1 %v15569_v22  ;;  %v1206_v21 = vld [vmem:[%s17463_s22 + $0x1cf0] sm:$0xff]  ;;  %v1195_v22 = vld [vmem:[%s17463_s22 + $0x1c98] sm:$0xff] }
 0x238   : > { %12364 = vmatprep.subr.bf16.mxu0 %v15592_v23  ;;  %12569 = vmatprep.subr.bf16.mxu1 %v15594_v25  ;;  %v1207_v23 = vld [vmem:[%s17463_s22 + $0x1cf8] sm:$0xff]  ;;  %v15735_v25 = vcombine.low %v1170_v9, %v1182_v12  ;;  %v15760_v27 = vcombine.high %v1194_v20, %v1206_v21 }
 0x239   : > { %v15762_v28 = vcombine.high %v1195_v22, %v1207_v23  ;;  %v15761_v35 = vcombine.low %v1195_v22, %v1207_v23  ;;  %v1362_v23 = vld [vmem:[%s17463_s22 + $0x21d0] sm:$0xff] }
 0x23b   : > { %12365 = vmatpush1.bf16.msra.mxu0 %v15591_v31  ;;  %12570 = vmatpush1.bf16.msra.mxu1 %v15593_v32  ;;  %v1230_v31 = vld [vmem:[%s17463_s22 + $0x1db0] sm:$0xff]  ;;  %v1219_v32 = vld [vmem:[%s17463_s22 + $0x1d58] sm:$0xff] }
 0x23c   : > { %12375 = vmatprep.subr.bf16.mxu0 %v15616_v0  ;;  %12580 = vmatprep.subr.bf16.mxu1 %v15618_v34  ;;  %v1231_v0 = vld [vmem:[%s17463_s22 + $0x1db8] sm:$0xff]  ;;  %v15759_v34 = vcombine.low %v1194_v20, %v1206_v21  ;;  %v15784_v36 = vcombine.high %v1218_v60, %v1230_v31 }
 0x23d   : > { %v15786_v37 = vcombine.high %v1219_v32, %v1231_v0  ;;  %v15785_v44 = vcombine.low %v1219_v32, %v1231_v0  ;;  %v1386_v0 = vld [vmem:[%s17463_s22 + $0x2290] sm:$0xff] }
 0x23e   : > { %12367 = vmatmul.mubr.bf16.vlgmr.msra.gmra.mrb[4].mxu0 %v17648_v39  ;;  %12572 = vmatmul.mubr.bf16.vlgmr.msra.gmra.mrb[4].mxu1 %v17648_v39 }
 0x23f   : > { %12376 = vmatpush1.bf16.msra.mxu0 %v15615_v40  ;;  %12581 = vmatpush1.bf16.msra.mxu1 %v15617_v41  ;;  %v1254_v40 = vld [vmem:[%s17463_s22 + $0x1e70] sm:$0xff]  ;;  %v1243_v41 = vld [vmem:[%s17463_s22 + $0x1e18] sm:$0xff] }
 0x240   : > { %12377 = vmatprep.subr.bf16.mxu0 %v15640_v42  ;;  %12582 = vmatprep.subr.bf16.mxu1 %v15642_v43  ;;  %v1255_v42 = vld [vmem:[%s17463_s22 + $0x1e78] sm:$0xff]  ;;  %v15783_v43 = vcombine.low %v1218_v60, %v1230_v31  ;;  %v15808_v46 = vcombine.high %v1242_v38, %v1254_v40 }
 0x241   : > { %12407 = vmatprep.mubr.bf16.mxu0 %v17655_v49  ;;  %12612 = vmatprep.mubr.bf16.mxu1 %v17655_v49  ;;  %v15810_v47 = vcombine.high %v1243_v41, %v1255_v42  ;;  %v15809_v56 = vcombine.low %v1243_v41, %v1255_v42  ;;  %v1410_v42 = vld [vmem:[%s17463_s22 + $0x2350] sm:$0xff] }
 0x243   : > { %12378 = vmatpush1.bf16.msra.mxu0 %v15639_v51  ;;  %12583 = vmatpush1.bf16.msra.mxu1 %v15641_v52  ;;  %v1278_v51 = vld [vmem:[%s17463_s22 + $0x1f30] sm:$0xff]  ;;  %v1267_v52 = vld [vmem:[%s17463_s22 + $0x1ed8] sm:$0xff] }
 0x244   : > { %12379 = vmatprep.subr.bf16.mxu0 %v15664_v53  ;;  %12584 = vmatprep.subr.bf16.mxu1 %v15666_v55  ;;  %v1279_v53 = vld [vmem:[%s17463_s22 + $0x1f38] sm:$0xff]  ;;  %v15807_v55 = vcombine.low %v1242_v38, %v1254_v40  ;;  %v15832_v57 = vcombine.high %v1266_v50, %v1278_v51 }
 0x245   : > { %v15834_v58 = vcombine.high %v1267_v52, %v1279_v53  ;;  %v15833_v1 = vcombine.low %v1267_v52, %v1279_v53  ;;  %v1434_v53 = vld [vmem:[%s17463_s22 + $0x2410] sm:$0xff] }
 0x247   : > { %12380 = vmatpush1.bf16.msra.mxu0 %v15663_v11  ;;  %12585 = vmatpush1.bf16.msra.mxu1 %v15665_v61  ;;  %v1302_v11 = vld [vmem:[%s17463_s22 + $0x1ff0] sm:$0xff]  ;;  %v1291_v61 = vld [vmem:[%s17463_s22 + $0x1f98] sm:$0xff] }
 0x248   : > { %12381 = vmatprep.subr.bf16.mxu0 %v15688_v62  ;;  %12586 = vmatprep.subr.bf16.mxu1 %v15690_v63  ;;  %v1303_v62 = vld [vmem:[%s17463_s22 + $0x1ff8] sm:$0xff]  ;;  %v15831_v63 = vcombine.low %v1266_v50, %v1278_v51  ;;  %v15856_v2 = vcombine.high %v1290_v54, %v1302_v11 }
 0x249   : > { %v15858_v3 = vcombine.high %v1291_v61, %v1303_v62  ;;  %v15857_v9 = vcombine.low %v1291_v61, %v1303_v62  ;;  %v1458_v62 = vld [vmem:[%s17463_s22 + $0x24d0] sm:$0xff] }
 0x24b   : > { %12382 = vmatpush1.bf16.msra.mxu0 %v15687_v5  ;;  %12587 = vmatpush1.bf16.msra.mxu1 %v15689_v30  ;;  %v1326_v5 = vld [vmem:[%s17463_s22 + $0x20b0] sm:$0xff]  ;;  %v1315_v30 = vld [vmem:[%s17463_s22 + $0x2058] sm:$0xff] }
 0x24c   : > { %12383 = vmatprep.subr.bf16.mxu0 %v15712_v7  ;;  %12588 = vmatprep.subr.bf16.mxu1 %v15714_v8  ;;  %v1327_v7 = vld [vmem:[%s17463_s22 + $0x20b8] sm:$0xff]  ;;  %v15855_v8 = vcombine.low %v1290_v54, %v1302_v11  ;;  %v15880_v12 = vcombine.high %v1314_v4, %v1326_v5 }
 0x24d   : > { %v15882_v13 = vcombine.high %v1315_v30, %v1327_v7  ;;  %v15881_v20 = vcombine.low %v1315_v30, %v1327_v7  ;;  %v1482_v7 = vld [vmem:[%s17463_s22 + $0x2590] sm:$0xff] }
 0x24f   : > { %12384 = vmatpush1.bf16.msra.mxu0 %v15711_v15  ;;  %12589 = vmatpush1.bf16.msra.mxu1 %v15713_v16  ;;  %v1350_v15 = vld [vmem:[%s17463_s22 + $0x2170] sm:$0xff]  ;;  %v1339_v16 = vld [vmem:[%s17463_s22 + $0x2118] sm:$0xff] }
 0x250   : > { %12385 = vmatprep.subr.bf16.mxu0 %v15736_v17  ;;  %12590 = vmatprep.subr.bf16.mxu1 %v15738_v18  ;;  %v1351_v17 = vld [vmem:[%s17463_s22 + $0x2178] sm:$0xff]  ;;  %v15879_v18 = vcombine.low %v1314_v4, %v1326_v5  ;;  %v15904_v21 = vcombine.high %v1338_v14, %v1350_v15 }
 0x251   : > { %v15906_v22 = vcombine.high %v1339_v16, %v1351_v17  ;;  %v15905_v60 = vcombine.low %v1339_v16, %v1351_v17  ;;  %v1506_v17 = vld [vmem:[%s17463_s22 + $0x2650] sm:$0xff] }
 0x253   : > { %12386 = vmatpush1.bf16.msra.mxu0 %v15735_v25  ;;  %12591 = vmatpush1.bf16.msra.mxu1 %v15737_v26  ;;  %v1374_v25 = vld [vmem:[%s17463_s22 + $0x2230] sm:$0xff]  ;;  %v1363_v26 = vld [vmem:[%s17463_s22 + $0x21d8] sm:$0xff] }
 0x254   : > { %12387 = vmatprep.subr.bf16.mxu0 %v15760_v27  ;;  %12592 = vmatprep.subr.bf16.mxu1 %v15762_v28  ;;  %v1375_v27 = vld [vmem:[%s17463_s22 + $0x2238] sm:$0xff]  ;;  %v15903_v28 = vcombine.low %v1338_v14, %v1350_v15  ;;  %v15928_v31 = vcombine.high %v1362_v23, %v1374_v25 }
 0x255   : > { %v15930_v32 = vcombine.high %v1363_v26, %v1375_v27  ;;  %v15929_v38 = vcombine.low %v1363_v26, %v1375_v27  ;;  %v1530_v27 = vld [vmem:[%s17463_s22 + $0x2710] sm:$0xff] }
 0x257   : > { %12388 = vmatpush1.bf16.msra.mxu0 %v15759_v34  ;;  %12593 = vmatpush1.bf16.msra.mxu1 %v15761_v35  ;;  %v1398_v34 = vld [vmem:[%s17463_s22 + $0x22f0] sm:$0xff]  ;;  %v1387_v35 = vld [vmem:[%s17463_s22 + $0x2298] sm:$0xff] }
 0x258   : > { %12389 = vmatprep.subr.bf16.mxu0 %v15784_v36  ;;  %12594 = vmatprep.subr.bf16.mxu1 %v15786_v37  ;;  %v1399_v36 = vld [vmem:[%s17463_s22 + $0x22f8] sm:$0xff]  ;;  %v15927_v37 = vcombine.low %v1362_v23, %v1374_v25  ;;  %v15952_v40 = vcombine.high %v1386_v0, %v1398_v34 }
 0x259   : > { %v15954_v41 = vcombine.high %v1387_v35, %v1399_v36  ;;  %v15953_v50 = vcombine.low %v1387_v35, %v1399_v36  ;;  %v17248_v36 = vmov 1983009808  }
 0x25b   : > { %12390 = vmatpush1.bf16.msra.mxu0 %v15783_v43  ;;  %12595 = vmatpush1.bf16.msra.mxu1 %v15785_v44  ;;  %v1422_v43 = vld [vmem:[%s17463_s22 + $0x23b0] sm:$0xff]  ;;  %v1411_v44 = vld [vmem:[%s17463_s22 + $0x2358] sm:$0xff] }
 0x25c   : > { %12391 = vmatprep.subr.bf16.mxu0 %v15808_v46  ;;  %12596 = vmatprep.subr.bf16.mxu1 %v15810_v47  ;;  %v1423_v46 = vld [vmem:[%s17463_s22 + $0x23b8] sm:$0xff]  ;;  %v15951_v47 = vcombine.low %v1386_v0, %v1398_v34  ;;  %v15976_v51 = vcombine.high %v1410_v42, %v1422_v43 }
 0x25d   : > { %v15978_v52 = vcombine.high %v1411_v44, %v1423_v46  ;;  %v15977_v54 = vcombine.low %v1411_v44, %v1423_v46 }
 0x25f   : > { %12392 = vmatpush1.bf16.msra.mxu0 %v15807_v55  ;;  %12597 = vmatpush1.bf16.msra.mxu1 %v15809_v56  ;;  %v1446_v55 = vld [vmem:[%s17463_s22 + $0x2470] sm:$0xff]  ;;  %v1435_v56 = vld [vmem:[%s17463_s22 + $0x2418] sm:$0xff] }
 0x260   : > { %12393 = vmatprep.subr.bf16.mxu0 %v15832_v57  ;;  %12598 = vmatprep.subr.bf16.mxu1 %v15834_v58  ;;  %v1447_v57 = vld [vmem:[%s17463_s22 + $0x2478] sm:$0xff]  ;;  %v15975_v58 = vcombine.low %v1410_v42, %v1422_v43  ;;  %v16000_v11 = vcombine.high %v1434_v53, %v1446_v55 }
 0x261   : > { %v16002_v61 = vcombine.high %v1435_v56, %v1447_v57  ;;  %v16001_v4 = vcombine.low %v1435_v56, %v1447_v57  ;;  %v1567_v42 = vld [vmem:[%s17463_s22 + $0x2838] sm:$0xff] }
 0x263   : > { %12394 = vmatpush1.bf16.msra.mxu0 %v15831_v63  ;;  %12599 = vmatpush1.bf16.msra.mxu1 %v15833_v1  ;;  %v1470_v63 = vld [vmem:[%s17463_s22 + $0x2530] sm:$0xff]  ;;  %v1459_v1 = vld [vmem:[%s17463_s22 + $0x24d8] sm:$0xff] }
 0x264   : > { %12395 = vmatprep.subr.bf16.mxu0 %v15856_v2  ;;  %12600 = vmatprep.subr.bf16.mxu1 %v15858_v3  ;;  %v1471_v2 = vld [vmem:[%s17463_s22 + $0x2538] sm:$0xff]  ;;  %v15999_v3 = vcombine.low %v1434_v53, %v1446_v55  ;;  %v16024_v5 = vcombine.high %v1458_v62, %v1470_v63 }
 0x265   : > { %v16026_v30 = vcombine.high %v1459_v1, %v1471_v2  ;;  %v16025_v14 = vcombine.low %v1459_v1, %v1471_v2  ;;  %v1579_v53 = vld [vmem:[%s17463_s22 + $0x2898] sm:$0xff] }
 0x266   : > { %v1591_v55 = vld [vmem:[%s17463_s22 + $0x28f8] sm:$0xff] }
 0x267   : > { %12396 = vmatpush1.bf16.msra.mxu0 %v15855_v8  ;;  %12601 = vmatpush1.bf16.msra.mxu1 %v15857_v9  ;;  %v1494_v8 = vld [vmem:[%s17463_s22 + $0x25f0] sm:$0xff]  ;;  %v1483_v9 = vld [vmem:[%s17463_s22 + $0x2598] sm:$0xff] }
 0x268   : > { %12397 = vmatprep.subr.bf16.mxu0 %v15880_v12  ;;  %12602 = vmatprep.subr.bf16.mxu1 %v15882_v13  ;;  %v1495_v12 = vld [vmem:[%s17463_s22 + $0x25f8] sm:$0xff]  ;;  %v16023_v13 = vcombine.low %v1458_v62, %v1470_v63  ;;  %v16048_v15 = vcombine.high %v1482_v7, %v1494_v8  ;;  %v1602_v62 = vld [vmem:[%s17463_s22 + $0x2950] sm:$0xff] }
 0x269   : > { %v16050_v16 = vcombine.high %v1483_v9, %v1495_v12  ;;  %v16049_v23 = vcombine.low %v1483_v9, %v1495_v12  ;;  %v1614_v63 = vld [vmem:[%s17463_s22 + $0x29b0] sm:$0xff] }
 0x26b   : > { %12398 = vmatpush1.bf16.msra.mxu0 %v15879_v18  ;;  %12603 = vmatpush1.bf16.msra.mxu1 %v15881_v20  ;;  %v1518_v18 = vld [vmem:[%s17463_s22 + $0x26b0] sm:$0xff]  ;;  %v1507_v20 = vld [vmem:[%s17463_s22 + $0x2658] sm:$0xff] }
 0x26c   : > { %12399 = vmatprep.subr.bf16.mxu0 %v15904_v21  ;;  %12604 = vmatprep.subr.bf16.mxu1 %v15906_v22  ;;  %v1519_v21 = vld [vmem:[%s17463_s22 + $0x26b8] sm:$0xff]  ;;  %v16047_v22 = vcombine.low %v1482_v7, %v1494_v8  ;;  %v16072_v25 = vcombine.high %v1506_v17, %v1518_v18 }
 0x26d   : > { %v16074_v26 = vcombine.high %v1507_v20, %v1519_v21  ;;  %v16073_v0 = vcombine.low %v1507_v20, %v1519_v21  ;;  %v1626_v20 = vld [vmem:[%s17463_s22 + $0x2a10] sm:$0xff] }
 0x26e   : > { %v1638_v21 = vld [vmem:[%s17463_s22 + $0x2a70] sm:$0xff] }
 0x26f   : > { %12400 = vmatpush1.bf16.msra.mxu0 %v15903_v28  ;;  %12605 = vmatpush1.bf16.msra.mxu1 %v15905_v60  ;;  %v1542_v28 = vld [vmem:[%s17463_s22 + $0x2770] sm:$0xff]  ;;  %v1531_v60 = vld [vmem:[%s17463_s22 + $0x2718] sm:$0xff] }
 0x270   : > { %12401 = vmatprep.subr.bf16.mxu0 %v15928_v31  ;;  %12606 = vmatprep.subr.bf16.mxu1 %v15930_v32  ;;  %v1543_v31 = vld [vmem:[%s17463_s22 + $0x2778] sm:$0xff]  ;;  %v16071_v32 = vcombine.low %v1506_v17, %v1518_v18  ;;  %v16096_v34 = vcombine.high %v1530_v27, %v1542_v28  ;;  %v16095_v43 = vcombine.low %v1530_v27, %v1542_v28 }
 0x271   : > { %v16098_v35 = vcombine.high %v1531_v60, %v1543_v31  ;;  %v16097_v44 = vcombine.low %v1531_v60, %v1543_v31  ;;  %v16167_v27 = vcombine.low %v1602_v62, %v1614_v63  ;;  %v16192_v31 = vcombine.high %v1626_v20, %v1638_v21 }
 0x273   : > { %12402 = vmatpush1.bf16.msra.mxu0 %v15927_v37  ;;  %12607 = vmatpush1.bf16.msra.mxu1 %v15929_v38  ;;  %v14370_v37 = vunpack.c.l.s4 %v17248_v36  ;;  %v1554_v38 = vld [vmem:[%s17463_s22 + $0x27d0] sm:$0xff]  ;;  %v1651_v36 = vld [vmem:[%s17463_s22 + $0x2ad8] sm:$0xff] }
 0x274   : > { %12403 = vmatprep.subr.bf16.mxu0 %v15952_v40  ;;  %12608 = vmatprep.subr.bf16.mxu1 %v15954_v41  ;;  %v1566_v40 = vld [vmem:[%s17463_s22 + $0x2830] sm:$0xff]  ;;  %v1555_v41 = vld [vmem:[%s17463_s22 + $0x27d8] sm:$0xff] }
 0x275   : > { %v16120_v46 = vcombine.high %v1554_v38, %v1566_v40  ;;  %v16119_v56 = vcombine.low %v1554_v38, %v1566_v40  ;;  %v16121_v57 = vcombine.low %v1555_v41, %v1567_v42  ;;  %v16191_v38 = vcombine.low %v1626_v20, %v1638_v21  ;;  %v1770_v20 = vld [vmem:[%s17463_s22 + $0x2e90] sm:$0xff] }
 0x276   : > { %v1782_v21 = vld [vmem:[%s17463_s22 + $0x2ef0] sm:$0xff] }
 0x277   : > { %12404 = vmatpush1.bf16.msra.mxu0 %v15951_v47  ;;  %12609 = vmatpush1.bf16.msra.mxu1 %v15953_v50  ;;  %v14371_v47 = vunpack.c.0.s8 %v14370_v37  ;;  %v16122_v50 = vcombine.high %v1555_v41, %v1567_v42  ;;  %v1663_v37 = vld [vmem:[%s17463_s22 + $0x2b38] sm:$0xff] }
 0x278   : > { %12405 = vmatprep.subr.bf16.mxu0 %v15976_v51  ;;  %12610 = vmatprep.subr.bf16.mxu1 %v15978_v52  ;;  %v1578_v51 = vld [vmem:[%s17463_s22 + $0x2890] sm:$0xff]  ;;  %v16218_v42 = vcombine.high %v1651_v36, %v1663_v37 }
 0x279   : > { %v1590_v52 = vld [vmem:[%s17463_s22 + $0x28f0] sm:$0xff] }
 0x27a   : > { %v16143_v8 = vcombine.low %v1578_v51, %v1590_v52 }
 0x27b   : > { %12406 = vmatpush1.bf16.msra.mxu0 %v15975_v58  ;;  %12611 = vmatpush1.bf16.msra.mxu1 %v15977_v54  ;;  %v16144_v58 = vcombine.high %v1578_v51, %v1590_v52  ;;  %v16217_v51 = vcombine.low %v1651_v36, %v1663_v37 }
 0x27c   : > { %12416 = vmatprep.subr.bf16.mxu0 %v16000_v11  ;;  %12621 = vmatprep.subr.bf16.mxu1 %v16002_v61  ;;  %v18112_v11 = vsub.s32 %v14371_v47, %v17496_v45  ;;  %v16146_v61 = vcombine.high %v1579_v53, %v1591_v55  ;;  %v1687_v47 = vld [vmem:[%s17463_s22 + $0x2bf8] sm:$0xff] }
 0x27e   : > { %12408 = vmatmul.mubr.bf16.vlgmr.msra.gmra.mrb[4].mxu0 %v17723_v59  ;;  %12613 = vmatmul.mubr.bf16.vlgmr.msra.gmra.mrb[4].mxu1 %v17723_v59 }
 0x27f   : > { %12417 = vmatpush1.bf16.msra.mxu0 %v15999_v3  ;;  %12622 = vmatpush1.bf16.msra.mxu1 %v16001_v4  ;;  %v1603_v3 = vld [vmem:[%s17463_s22 + $0x2958] sm:$0xff] }
 0x280   : > { %12418 = vmatprep.subr.bf16.mxu0 %v16024_v5  ;;  %12623 = vmatprep.subr.bf16.mxu1 %v16026_v30  ;;  %v1615_v4 = vld [vmem:[%s17463_s22 + $0x29b8] sm:$0xff] }
 0x281   : > { %12448 = vmatprep.mubr.bf16.mxu0 %v17731_v6  ;;  %12653 = vmatprep.mubr.bf16.mxu1 %v17731_v6  ;;  %v16170_v18 = vcombine.high %v1603_v3, %v1615_v4  ;;  %v16169_v60 = vcombine.low %v1603_v3, %v1615_v4  ;;  %v1723_v3 = vld [vmem:[%s17463_s22 + $0x2d18] sm:$0xff] }
 0x282   : > { %v1735_v4 = vld [vmem:[%s17463_s22 + $0x2d78] sm:$0xff] }
 0x283   : > { %12419 = vmatpush1.bf16.msra.mxu0 %v16023_v13  ;;  %12624 = vmatpush1.bf16.msra.mxu1 %v16025_v14  ;;  %v16145_v14 = vcombine.low %v1579_v53, %v1591_v55  ;;  %v1698_v55 = vld [vmem:[%s17463_s22 + $0x2c50] sm:$0xff] }
 0x284   : > { %12420 = vmatprep.subr.bf16.mxu0 %v16048_v15  ;;  %12625 = vmatprep.subr.bf16.mxu1 %v16050_v16  ;;  %v16168_v15 = vcombine.high %v1602_v62, %v1614_v63 }
 0x287   : > { %12421 = vmatpush1.bf16.msra.mxu0 %v16047_v22  ;;  %12626 = vmatpush1.bf16.msra.mxu1 %v16049_v23  ;;  %v1627_v23 = vld [vmem:[%s17463_s22 + $0x2a18] sm:$0xff] }
 0x288   : > { %12422 = vmatprep.subr.bf16.mxu0 %v16072_v25  ;;  %12627 = vmatprep.subr.bf16.mxu1 %v16074_v26  ;;  %v1639_v25 = vld [vmem:[%s17463_s22 + $0x2a78] sm:$0xff] }
 0x289   : > { %v272_v26 = vld [vmem:[#allocation2] sm:$0xff]  ;;  %v16193_v40 = vcombine.low %v1627_v23, %v1639_v25 }
 0x28b   : > { %12423 = vmatpush1.bf16.msra.mxu0 %v16071_v32  ;;  %12628 = vmatpush1.bf16.msra.mxu1 %v16073_v0  ;;  %v16194_v32 = vcombine.high %v1627_v23, %v1639_v25  ;;  %v1650_v0 = vld [vmem:[%s17463_s22 + $0x2ad0] sm:$0xff]  ;;  %v1783_v23 = vld [vmem:[%s17463_s22 + $0x2ef8] sm:$0xff] }
 0x28c   : > { %12424 = vmatprep.subr.bf16.mxu0 %v16096_v34  ;;  %12629 = vmatprep.subr.bf16.mxu1 %v16098_v35  ;;  %v1662_v34 = vld [vmem:[%s17463_s22 + $0x2b30] sm:$0xff] }
 0x28d   : > { %v16216_v41 = vcombine.high %v1650_v0, %v1662_v34 }
 0x28f   : > { %12425 = vmatpush1.bf16.msra.mxu0 %v16095_v43  ;;  %12630 = vmatpush1.bf16.msra.mxu1 %v16097_v44  ;;  %v1674_v43 = vld [vmem:[%s17463_s22 + $0x2b90] sm:$0xff] }
 0x290   : > { %12426 = vmatprep.subr.bf16.mxu0 %v16120_v46  ;;  %12631 = vmatprep.subr.bf16.mxu1 %v16122_v50  ;;  %v1686_v44 = vld [vmem:[%s17463_s22 + $0x2bf0] sm:$0xff]  ;;  %v1675_v46 = vld [vmem:[%s17463_s22 + $0x2b98] sm:$0xff]  ;;  %v16215_v50 = vcombine.low %v1650_v0, %v1662_v34  ;;  %v16335_v34 = vcombine.low %v1770_v20, %v1782_v21 }
 0x291   : > { %v12081_v54 = vpop.f32.mrb[0].mxu0  ;;  %v12286_v1 = vpop.f32.mrb[0].mxu1  ;;  %v16240_v52 = vcombine.high %v1674_v43, %v1686_v44  ;;  %v16242_v53 = vcombine.high %v1675_v46, %v1687_v47  ;;  %v1807_v0 = vld [vmem:[%s17463_s22 + $0x2fb8] sm:$0xff] }
 0x292   : > { %v12083_v2 = vpop.f32.mrb[1].mxu0  ;;  %v12288_v30 = vpop.f32.mrb[1].mxu1 }
 0x293   : > { %v14367_v5 = vcombine.low %v12081_v54, %v12083_v2  ;;  %v12085_v7 = vpop.f32.mrb[2].mxu0  ;;  %12427 = vmatpush1.bf16.msra.mxu0 %v16119_v56  ;;  %v14368_v9 = vcombine.low %v12286_v1, %v12288_v30  ;;  %v12290_v12 = vpop.f32.mrb[2].mxu1  ;;  %12632 = vmatpush1.bf16.msra.mxu1 %v16121_v57  ;;  %v1710_v56 = vld [vmem:[%s17463_s22 + $0x2cb0] sm:$0xff]  ;;  %v1699_v57 = vld [vmem:[%s17463_s22 + $0x2c58] sm:$0xff]  ;;  %v16239_v54 = vcombine.low %v1674_v43, %v1686_v44 }
 0x294   : > { %v12086_v13 = vpop.f32.mrb[3].mxu0  ;;  %12428 = vmatprep.subr.bf16.mxu0 %v16144_v58  ;;  %v12291_v17 = vpop.f32.mrb[3].mxu1  ;;  %12633 = vmatprep.subr.bf16.mxu1 %v16146_v61  ;;  %v1711_v58 = vld [vmem:[%s17463_s22 + $0x2cb8] sm:$0xff]  ;;  %v16241_v61 = vcombine.low %v1675_v46, %v1687_v47  ;;  %v16264_v62 = vcombine.high %v1698_v55, %v1710_v56  ;;  %v1722_v1 = vld [vmem:[%s17463_s22 + $0x2d10] sm:$0xff] }
 0x295   : > { %v14375_v16 = vrot.slane %v14367_v5, %v18112_v11  ;;  %v14382_v22 = vrot.slane %v14368_v9, %v18112_v11  ;;  %v16266_v63 = vcombine.high %v1699_v57, %v1711_v58  ;;  %v1734_v2 = vld [vmem:[%s17463_s22 + $0x2d70] sm:$0xff]  ;;  %v16263_v5 = vcombine.low %v1698_v55, %v1710_v56  ;;  %v1747_v13 = vld [vmem:[%s17463_s22 + $0x2dd8] sm:$0xff] }
 0x296   : > { %v16265_v30 = vcombine.low %v1699_v57, %v1711_v58  ;;  %v16288_v7 = vcombine.high %v1722_v1, %v1734_v2  ;;  %v1746_v9 = vld [vmem:[%s17463_s22 + $0x2dd0] sm:$0xff] }
 0x297   : > { %12429 = vmatpush1.bf16.msra.mxu0 %v16143_v8  ;;  %v14383_v28 = vcombine.low %v14375_v16, %v14382_v22  ;;  %12634 = vmatpush1.bf16.msra.mxu1 %v16145_v14  ;;  %v16290_v8 = vcombine.high %v1723_v3, %v1735_v4  ;;  %v1758_v12 = vld [vmem:[%s17463_s22 + $0x2e30] sm:$0xff]  ;;  %v1759_v14 = vld [vmem:[%s17463_s22 + $0x2e38] sm:$0xff]  ;;  %v16289_v16 = vcombine.low %v1723_v3, %v1735_v4 }
 0x298   : > { %12430 = vmatprep.subr.bf16.mxu0 %v16168_v15  ;;  %12635 = vmatprep.subr.bf16.mxu1 %v16170_v18  ;;  %v16287_v15 = vcombine.low %v1722_v1, %v1734_v2  ;;  %v16312_v17 = vcombine.high %v1746_v9, %v1758_v12  ;;  %v16314_v18 = vcombine.high %v1747_v13, %v1759_v14  ;;  %v1771_v22 = vld [vmem:[%s17463_s22 + $0x2e98] sm:$0xff] }
 0x299   : > { %v14475_v35 = vadd.f32 %v14383_v28, %v272_v26  ;;  %v16311_v25 = vcombine.low %v1746_v9, %v1758_v12  ;;  %v16313_v26 = vcombine.low %v1747_v13, %v1759_v14  ;;  %v16338_v28 = vcombine.high %v1771_v22, %v1783_v23 }
 0x29b   : > { %12431 = vmatpush1.bf16.msra.mxu0 %v16167_v27  ;;  %14481 = vst [vmem:[#allocation2] sm:$0xff] %v14475_v35  ;;  %12636 = vmatpush1.bf16.msra.mxu1 %v16169_v60  ;;  %v16336_v27 = vcombine.high %v1770_v20, %v1782_v21  ;;  %v1794_v60 = vld [vmem:[%s17463_s22 + $0x2f50] sm:$0xff]  ;;  %v16337_v35 = vcombine.low %v1771_v22, %v1783_v23 }
 0x29c   : > { %12432 = vmatprep.subr.bf16.mxu0 %v16192_v31  ;;  %12637 = vmatprep.subr.bf16.mxu1 %v16194_v32  ;;  %v1806_v31 = vld [vmem:[%s17463_s22 + $0x2fb0] sm:$0xff]  ;;  %v1795_v32 = vld [vmem:[%s17463_s22 + $0x2f58] sm:$0xff] }
 0x29d   : > { %v16360_v36 = vcombine.high %v1794_v60, %v1806_v31  ;;  %v16362_v37 = vcombine.high %v1795_v32, %v1807_v0  ;;  %v16359_v43 = vcombine.low %v1794_v60, %v1806_v31  ;;  %v16361_v44 = vcombine.low %v1795_v32, %v1807_v0 }
 0x29f   : > { %12433 = vmatpush1.bf16.msra.mxu0 %v16191_v38  ;;  %12638 = vmatpush1.bf16.msra.mxu1 %v16193_v40  ;;  %v1818_v38 = vld [vmem:[%s17463_s22 + $0x3010] sm:$0xff] }
 0x2a0   : > { %12434 = vmatprep.subr.bf16.mxu0 %v16216_v41  ;;  %12639 = vmatprep.subr.bf16.mxu1 %v16218_v42  ;;  %v1830_v40 = vld [vmem:[%s17463_s22 + $0x3070] sm:$0xff]  ;;  %v1819_v41 = vld [vmem:[%s17463_s22 + $0x3018] sm:$0xff] }
 0x2a1   : > { %v1831_v42 = vld [vmem:[%s17463_s22 + $0x3078] sm:$0xff]  ;;  %v16384_v46 = vcombine.high %v1818_v38, %v1830_v40  ;;  %v16383_v55 = vcombine.low %v1818_v38, %v1830_v40 }
 0x2a2   : > { %v16386_v47 = vcombine.high %v1819_v41, %v1831_v42  ;;  %v16385_v56 = vcombine.low %v1819_v41, %v1831_v42 }
 0x2a3   : > { %12435 = vmatpush1.bf16.msra.mxu0 %v16215_v50  ;;  %12640 = vmatpush1.bf16.msra.mxu1 %v16217_v51  ;;  %v1842_v50 = vld [vmem:[%s17463_s22 + $0x30d0] sm:$0xff] }
 0x2a4   : > { %12436 = vmatprep.subr.bf16.mxu0 %v16240_v52  ;;  %12641 = vmatprep.subr.bf16.mxu1 %v16242_v53  ;;  %v1854_v51 = vld [vmem:[%s17463_s22 + $0x3130] sm:$0xff]  ;;  %v1843_v52 = vld [vmem:[%s17463_s22 + $0x30d8] sm:$0xff] }
 0x2a5   : > { %v1855_v53 = vld [vmem:[%s17463_s22 + $0x3138] sm:$0xff]  ;;  %v16408_v57 = vcombine.high %v1842_v50, %v1854_v51  ;;  %v16407_v1 = vcombine.low %v1842_v50, %v1854_v51 }
 0x2a6   : > { %v16410_v58 = vcombine.high %v1843_v52, %v1855_v53  ;;  %v16409_v2 = vcombine.low %v1843_v52, %v1855_v53 }
 0x2a7   : > { %12437 = vmatpush1.bf16.msra.mxu0 %v16239_v54  ;;  %12642 = vmatpush1.bf16.msra.mxu1 %v16241_v61  ;;  %v1866_v54 = vld [vmem:[%s17463_s22 + $0x3190] sm:$0xff] }
 0x2a8   : > { %12438 = vmatprep.subr.bf16.mxu0 %v16264_v62  ;;  %12643 = vmatprep.subr.bf16.mxu1 %v16266_v63  ;;  %v1878_v61 = vld [vmem:[%s17463_s22 + $0x31f0] sm:$0xff]  ;;  %v1867_v62 = vld [vmem:[%s17463_s22 + $0x3198] sm:$0xff] }
 0x2a9   : > { %v1879_v63 = vld [vmem:[%s17463_s22 + $0x31f8] sm:$0xff]  ;;  %v16432_v3 = vcombine.high %v1866_v54, %v1878_v61  ;;  %v16431_v9 = vcombine.low %v1866_v54, %v1878_v61 }
 0x2aa   : > { %v16434_v4 = vcombine.high %v1867_v62, %v1879_v63  ;;  %v16433_v12 = vcombine.low %v1867_v62, %v1879_v63 }
 0x2ab   : > { %12439 = vmatpush1.bf16.msra.mxu0 %v16263_v5  ;;  %12644 = vmatpush1.bf16.msra.mxu1 %v16265_v30  ;;  %v1890_v5 = vld [vmem:[%s17463_s22 + $0x3250] sm:$0xff] }
 0x2ac   : > { %12440 = vmatprep.subr.bf16.mxu0 %v16288_v7  ;;  %12645 = vmatprep.subr.bf16.mxu1 %v16290_v8  ;;  %v1902_v30 = vld [vmem:[%s17463_s22 + $0x32b0] sm:$0xff]  ;;  %v1891_v7 = vld [vmem:[%s17463_s22 + $0x3258] sm:$0xff] }
 0x2ad   : > { %v1903_v8 = vld [vmem:[%s17463_s22 + $0x32b8] sm:$0xff]  ;;  %v16456_v13 = vcombine.high %v1890_v5, %v1902_v30  ;;  %v16455_v20 = vcombine.low %v1890_v5, %v1902_v30 }
 0x2ae   : > { %v16458_v14 = vcombine.high %v1891_v7, %v1903_v8  ;;  %v16457_v21 = vcombine.low %v1891_v7, %v1903_v8 }
 0x2af   : > { %12441 = vmatpush1.bf16.msra.mxu0 %v16287_v15  ;;  %12646 = vmatpush1.bf16.msra.mxu1 %v16289_v16  ;;  %v1914_v15 = vld [vmem:[%s17463_s22 + $0x3310] sm:$0xff] }
 0x2b0   : > { %12442 = vmatprep.subr.bf16.mxu0 %v16312_v17  ;;  %12647 = vmatprep.subr.bf16.mxu1 %v16314_v18  ;;  %v1926_v16 = vld [vmem:[%s17463_s22 + $0x3370] sm:$0xff]  ;;  %v1915_v17 = vld [vmem:[%s17463_s22 + $0x3318] sm:$0xff] }
 0x2b1   : > { %v1927_v18 = vld [vmem:[%s17463_s22 + $0x3378] sm:$0xff]  ;;  %v16480_v22 = vcombine.high %v1914_v15, %v1926_v16  ;;  %v16479_v60 = vcombine.low %v1914_v15, %v1926_v16 }
 0x2b2   : > { %v16482_v23 = vcombine.high %v1915_v17, %v1927_v18  ;;  %v16481_v31 = vcombine.low %v1915_v17, %v1927_v18 }
 0x2b3   : > { %12443 = vmatpush1.bf16.msra.mxu0 %v16311_v25  ;;  %12648 = vmatpush1.bf16.msra.mxu1 %v16313_v26  ;;  %v1938_v25 = vld [vmem:[%s17463_s22 + $0x33d0] sm:$0xff] }
 0x2b4   : > { %12444 = vmatprep.subr.bf16.mxu0 %v16336_v27  ;;  %12649 = vmatprep.subr.bf16.mxu1 %v16338_v28  ;;  %v1950_v26 = vld [vmem:[%s17463_s22 + $0x3430] sm:$0xff]  ;;  %v1939_v27 = vld [vmem:[%s17463_s22 + $0x33d8] sm:$0xff] }
 0x2b5   : > { %v1951_v28 = vld [vmem:[%s17463_s22 + $0x3438] sm:$0xff]  ;;  %v16504_v32 = vcombine.high %v1938_v25, %v1950_v26  ;;  %v16503_v38 = vcombine.low %v1938_v25, %v1950_v26 }
 0x2b6   : > { %v16506_v0 = vcombine.high %v1939_v27, %v1951_v28  ;;  %v16505_v40 = vcombine.low %v1939_v27, %v1951_v28 }
 0x2b7   : > { %12445 = vmatpush1.bf16.msra.mxu0 %v16335_v34  ;;  %12650 = vmatpush1.bf16.msra.mxu1 %v16337_v35  ;;  %v1962_v34 = vld [vmem:[%s17463_s22 + $0x3490] sm:$0xff] }
 0x2b8   : > { %12446 = vmatprep.subr.bf16.mxu0 %v16360_v36  ;;  %12651 = vmatprep.subr.bf16.mxu1 %v16362_v37  ;;  %v1974_v35 = vld [vmem:[%s17463_s22 + $0x34f0] sm:$0xff]  ;;  %v1963_v36 = vld [vmem:[%s17463_s22 + $0x3498] sm:$0xff] }
 0x2b9   : > { %v1975_v37 = vld [vmem:[%s17463_s22 + $0x34f8] sm:$0xff]  ;;  %v16528_v41 = vcombine.high %v1962_v34, %v1974_v35  ;;  %v16527_v50 = vcombine.low %v1962_v34, %v1974_v35 }
 0x2ba   : > { %v16530_v42 = vcombine.high %v1963_v36, %v1975_v37  ;;  %v16529_v51 = vcombine.low %v1963_v36, %v1975_v37 }
 0x2bb   : > { %12447 = vmatpush1.bf16.msra.mxu0 %v16359_v43  ;;  %12652 = vmatpush1.bf16.msra.mxu1 %v16361_v44  ;;  %v1986_v43 = vld [vmem:[%s17463_s22 + $0x3550] sm:$0xff] }
 0x2bc   : > { %12457 = vmatprep.subr.bf16.mxu0 %v16384_v46  ;;  %12662 = vmatprep.subr.bf16.mxu1 %v16386_v47  ;;  %v1998_v44 = vld [vmem:[%s17463_s22 + $0x35b0] sm:$0xff]  ;;  %v1987_v46 = vld [vmem:[%s17463_s22 + $0x3558] sm:$0xff] }
 0x2bd   : > { %v1999_v47 = vld [vmem:[%s17463_s22 + $0x35b8] sm:$0xff]  ;;  %v16552_v52 = vcombine.high %v1986_v43, %v1998_v44  ;;  %v16551_v54 = vcombine.low %v1986_v43, %v1998_v44 }
 0x2be   : > { %12449 = vmatmul.mubr.bf16.vlgmr.msra.gmra.mrb[4].mxu0 %v17804_v19  ;;  %12654 = vmatmul.mubr.bf16.vlgmr.msra.gmra.mrb[4].mxu1 %v17804_v19  ;;  %v16554_v53 = vcombine.high %v1987_v46, %v1999_v47  ;;  %v16553_v61 = vcombine.low %v1987_v46, %v1999_v47 }
 0x2bf   : > { %12458 = vmatpush1.bf16.msra.mxu0 %v16383_v55  ;;  %12663 = vmatpush1.bf16.msra.mxu1 %v16385_v56  ;;  %v2010_v55 = vld [vmem:[%s17463_s22 + $0x3610] sm:$0xff] }
 0x2c0   : > { %12459 = vmatprep.subr.bf16.mxu0 %v16408_v57  ;;  %12664 = vmatprep.subr.bf16.mxu1 %v16410_v58  ;;  %v2022_v56 = vld [vmem:[%s17463_s22 + $0x3670] sm:$0xff]  ;;  %v2011_v57 = vld [vmem:[%s17463_s22 + $0x3618] sm:$0xff] }
 0x2c1   : > { %12489 = vmatprep.mubr.bf16.mxu0 %v17811_v29  ;;  %12694 = vmatprep.mubr.bf16.mxu1 %v17811_v29  ;;  %v2023_v58 = vld [vmem:[%s17463_s22 + $0x3678] sm:$0xff]  ;;  %v16576_v62 = vcombine.high %v2010_v55, %v2022_v56  ;;  %v16575_v5 = vcombine.low %v2010_v55, %v2022_v56 }
 0x2c2   : > { %v16578_v63 = vcombine.high %v2011_v57, %v2023_v58  ;;  %v16577_v30 = vcombine.low %v2011_v57, %v2023_v58 }
 0x2c3   : > { %12460 = vmatpush1.bf16.msra.mxu0 %v16407_v1  ;;  %12665 = vmatpush1.bf16.msra.mxu1 %v16409_v2  ;;  %v2034_v1 = vld [vmem:[%s17463_s22 + $0x36d0] sm:$0xff] }
 0x2c4   : > { %12461 = vmatprep.subr.bf16.mxu0 %v16432_v3  ;;  %12666 = vmatprep.subr.bf16.mxu1 %v16434_v4  ;;  %v2046_v2 = vld [vmem:[%s17463_s22 + $0x3730] sm:$0xff]  ;;  %v2035_v3 = vld [vmem:[%s17463_s22 + $0x36d8] sm:$0xff] }
 0x2c5   : > { %v2047_v4 = vld [vmem:[%s17463_s22 + $0x3738] sm:$0xff]  ;;  %v16600_v7 = vcombine.high %v2034_v1, %v2046_v2  ;;  %v16599_v15 = vcombine.low %v2034_v1, %v2046_v2 }
 0x2c6   : > { %v16602_v8 = vcombine.high %v2035_v3, %v2047_v4  ;;  %v16601_v16 = vcombine.low %v2035_v3, %v2047_v4 }
 0x2c7   : > { %12462 = vmatpush1.bf16.msra.mxu0 %v16431_v9  ;;  %12667 = vmatpush1.bf16.msra.mxu1 %v16433_v12  ;;  %v2058_v9 = vld [vmem:[%s17463_s22 + $0x3790] sm:$0xff] }
 0x2c8   : > { %12463 = vmatprep.subr.bf16.mxu0 %v16456_v13  ;;  %12668 = vmatprep.subr.bf16.mxu1 %v16458_v14  ;;  %v2070_v12 = vld [vmem:[%s17463_s22 + $0x37f0] sm:$0xff]  ;;  %v2059_v13 = vld [vmem:[%s17463_s22 + $0x3798] sm:$0xff] }
 0x2c9   : > { %v2071_v14 = vld [vmem:[%s17463_s22 + $0x37f8] sm:$0xff]  ;;  %v16624_v17 = vcombine.high %v2058_v9, %v2070_v12  ;;  %v16623_v25 = vcombine.low %v2058_v9, %v2070_v12 }
 0x2ca   : > { %v16626_v18 = vcombine.high %v2059_v13, %v2071_v14  ;;  %v16625_v26 = vcombine.low %v2059_v13, %v2071_v14 }
 0x2cb   : > { %12464 = vmatpush1.bf16.msra.mxu0 %v16455_v20  ;;  %12669 = vmatpush1.bf16.msra.mxu1 %v16457_v21  ;;  %v2082_v20 = vld [vmem:[%s17463_s22 + $0x3850] sm:$0xff] }
 0x2cc   : > { %12465 = vmatprep.subr.bf16.mxu0 %v16480_v22  ;;  %12670 = vmatprep.subr.bf16.mxu1 %v16482_v23  ;;  %v2094_v21 = vld [vmem:[%s17463_s22 + $0x38b0] sm:$0xff]  ;;  %v2083_v22 = vld [vmem:[%s17463_s22 + $0x3858] sm:$0xff] }
 0x2cd   : > { %v2095_v23 = vld [vmem:[%s17463_s22 + $0x38b8] sm:$0xff]  ;;  %v16648_v27 = vcombine.high %v2082_v20, %v2094_v21  ;;  %v16647_v34 = vcombine.low %v2082_v20, %v2094_v21 }
 0x2ce   : > { %v16650_v28 = vcombine.high %v2083_v22, %v2095_v23  ;;  %v16649_v35 = vcombine.low %v2083_v22, %v2095_v23 }
 0x2cf   : > { %12466 = vmatpush1.bf16.msra.mxu0 %v16479_v60  ;;  %12671 = vmatpush1.bf16.msra.mxu1 %v16481_v31  ;;  %v2106_v60 = vld [vmem:[%s17463_s22 + $0x3910] sm:$0xff] }
 0x2d0   : > { %12467 = vmatprep.subr.bf16.mxu0 %v16504_v32  ;;  %12672 = vmatprep.subr.bf16.mxu1 %v16506_v0  ;;  %v2118_v31 = vld [vmem:[%s17463_s22 + $0x3970] sm:$0xff]  ;;  %v2107_v32 = vld [vmem:[%s17463_s22 + $0x3918] sm:$0xff] }
 0x2d1   : > { %v2119_v0 = vld [vmem:[%s17463_s22 + $0x3978] sm:$0xff]  ;;  %v16672_v36 = vcombine.high %v2106_v60, %v2118_v31  ;;  %v16671_v43 = vcombine.low %v2106_v60, %v2118_v31 }
 0x2d2   : > { %v16674_v37 = vcombine.high %v2107_v32, %v2119_v0  ;;  %v16673_v44 = vcombine.low %v2107_v32, %v2119_v0 }
 0x2d3   : > { %12468 = vmatpush1.bf16.msra.mxu0 %v16503_v38  ;;  %12673 = vmatpush1.bf16.msra.mxu1 %v16505_v40  ;;  %v2130_v38 = vld [vmem:[%s17463_s22 + $0x39d0] sm:$0xff] }
 0x2d4   : > { %12469 = vmatprep.subr.bf16.mxu0 %v16528_v41  ;;  %12674 = vmatprep.subr.bf16.mxu1 %v16530_v42  ;;  %v2142_v40 = vld [vmem:[%s17463_s22 + $0x3a30] sm:$0xff]  ;;  %v2131_v41 = vld [vmem:[%s17463_s22 + $0x39d8] sm:$0xff] }
 0x2d5   : > { %v2143_v42 = vld [vmem:[%s17463_s22 + $0x3a38] sm:$0xff]  ;;  %v16696_v46 = vcombine.high %v2130_v38, %v2142_v40  ;;  %v16695_v55 = vcombine.low %v2130_v38, %v2142_v40 }
 0x2d6   : > { %v16698_v47 = vcombine.high %v2131_v41, %v2143_v42  ;;  %v16697_v56 = vcombine.low %v2131_v41, %v2143_v42 }
 0x2d7   : > { %12470 = vmatpush1.bf16.msra.mxu0 %v16527_v50  ;;  %12675 = vmatpush1.bf16.msra.mxu1 %v16529_v51  ;;  %v2154_v50 = vld [vmem:[%s17463_s22 + $0x3a90] sm:$0xff] }
 0x2d8   : > { %12471 = vmatprep.subr.bf16.mxu0 %v16552_v52  ;;  %12676 = vmatprep.subr.bf16.mxu1 %v16554_v53  ;;  %v2166_v51 = vld [vmem:[%s17463_s22 + $0x3af0] sm:$0xff]  ;;  %v2155_v52 = vld [vmem:[%s17463_s22 + $0x3a98] sm:$0xff] }
 0x2d9   : > { %v2167_v53 = vld [vmem:[%s17463_s22 + $0x3af8] sm:$0xff]  ;;  %v16720_v57 = vcombine.high %v2154_v50, %v2166_v51  ;;  %v16719_v1 = vcombine.low %v2154_v50, %v2166_v51 }
 0x2da   : > { %v16722_v58 = vcombine.high %v2155_v52, %v2167_v53  ;;  %v16721_v2 = vcombine.low %v2155_v52, %v2167_v53 }
 0x2db   : > { %12472 = vmatpush1.bf16.msra.mxu0 %v16551_v54  ;;  %12677 = vmatpush1.bf16.msra.mxu1 %v16553_v61  ;;  %v2178_v54 = vld [vmem:[%s17463_s22 + $0x3b50] sm:$0xff] }
 0x2dc   : > { %12473 = vmatprep.subr.bf16.mxu0 %v16576_v62  ;;  %12678 = vmatprep.subr.bf16.mxu1 %v16578_v63  ;;  %v2190_v61 = vld [vmem:[%s17463_s22 + $0x3bb0] sm:$0xff]  ;;  %v2179_v62 = vld [vmem:[%s17463_s22 + $0x3b58] sm:$0xff] }
 0x2dd   : > { %v2191_v63 = vld [vmem:[%s17463_s22 + $0x3bb8] sm:$0xff]  ;;  %v16744_v3 = vcombine.high %v2178_v54, %v2190_v61  ;;  %v16743_v9 = vcombine.low %v2178_v54, %v2190_v61 }
 0x2de   : > { %v16746_v4 = vcombine.high %v2179_v62, %v2191_v63  ;;  %v16745_v12 = vcombine.low %v2179_v62, %v2191_v63 }
 0x2df   : > { %12474 = vmatpush1.bf16.msra.mxu0 %v16575_v5  ;;  %12679 = vmatpush1.bf16.msra.mxu1 %v16577_v30  ;;  %v284_v5 = vld [vmem:[%s17463_s22 + $0x20] sm:$0xff] }
 0x2e0   : > { %12475 = vmatprep.subr.bf16.mxu0 %v16600_v7  ;;  %12680 = vmatprep.subr.bf16.mxu1 %v16602_v8  ;;  %v296_v30 = vld [vmem:[%s17463_s22 + $0x80] sm:$0xff]  ;;  %v285_v7 = vld [vmem:[%s17463_s22 + $0x28] sm:$0xff] }
 0x2e1   : > { %v297_v8 = vld [vmem:[%s17463_s22 + $0x88] sm:$0xff]  ;;  %v14852_v13 = vcombine.high %v284_v5, %v296_v30  ;;  %v14851_v20 = vcombine.low %v284_v5, %v296_v30 }
 0x2e2   : > { %v14854_v14 = vcombine.high %v285_v7, %v297_v8  ;;  %v14853_v21 = vcombine.low %v285_v7, %v297_v8 }
 0x2e3   : > { %12476 = vmatpush1.bf16.msra.mxu0 %v16599_v15  ;;  %12681 = vmatpush1.bf16.msra.mxu1 %v16601_v16  ;;  %v308_v15 = vld [vmem:[%s17463_s22 + $0xe0] sm:$0xff] }
 0x2e4   : > { %12477 = vmatprep.subr.bf16.mxu0 %v16624_v17  ;;  %12682 = vmatprep.subr.bf16.mxu1 %v16626_v18  ;;  %v320_v16 = vld [vmem:[%s17463_s22 + $0x140] sm:$0xff]  ;;  %v309_v17 = vld [vmem:[%s17463_s22 + $0xe8] sm:$0xff] }
 0x2e5   : > { %v321_v18 = vld [vmem:[%s17463_s22 + $0x148] sm:$0xff]  ;;  %v14876_v22 = vcombine.high %v308_v15, %v320_v16  ;;  %v14875_v60 = vcombine.low %v308_v15, %v320_v16 }
 0x2e6   : > { %v14878_v23 = vcombine.high %v309_v17, %v321_v18  ;;  %v14877_v31 = vcombine.low %v309_v17, %v321_v18 }
 0x2e7   : > { %12478 = vmatpush1.bf16.msra.mxu0 %v16623_v25  ;;  %12683 = vmatpush1.bf16.msra.mxu1 %v16625_v26  ;;  %v332_v25 = vld [vmem:[%s17463_s22 + $0x1a0] sm:$0xff] }
 0x2e8   : > { %12479 = vmatprep.subr.bf16.mxu0 %v16648_v27  ;;  %12684 = vmatprep.subr.bf16.mxu1 %v16650_v28  ;;  %v344_v26 = vld [vmem:[%s17463_s22 + $0x200] sm:$0xff]  ;;  %v333_v27 = vld [vmem:[%s17463_s22 + $0x1a8] sm:$0xff] }
 0x2e9   : > { %v345_v28 = vld [vmem:[%s17463_s22 + $0x208] sm:$0xff]  ;;  %v14900_v32 = vcombine.high %v332_v25, %v344_v26  ;;  %v14899_v38 = vcombine.low %v332_v25, %v344_v26 }
 0x2ea   : > { %v14902_v0 = vcombine.high %v333_v27, %v345_v28  ;;  %v14901_v40 = vcombine.low %v333_v27, %v345_v28 }
 0x2eb   : > { %12480 = vmatpush1.bf16.msra.mxu0 %v16647_v34  ;;  %12685 = vmatpush1.bf16.msra.mxu1 %v16649_v35  ;;  %v356_v34 = vld [vmem:[%s17463_s22 + $0x260] sm:$0xff] }
 0x2ec   : > { %12481 = vmatprep.subr.bf16.mxu0 %v16672_v36  ;;  %12686 = vmatprep.subr.bf16.mxu1 %v16674_v37  ;;  %v368_v35 = vld [vmem:[%s17463_s22 + $0x2c0] sm:$0xff]  ;;  %v357_v36 = vld [vmem:[%s17463_s22 + $0x268] sm:$0xff] }
 0x2ed   : > { %v369_v37 = vld [vmem:[%s17463_s22 + $0x2c8] sm:$0xff]  ;;  %v14924_v41 = vcombine.high %v356_v34, %v368_v35  ;;  %v14923_v50 = vcombine.low %v356_v34, %v368_v35 }
 0x2ee   : > { %v14926_v42 = vcombine.high %v357_v36, %v369_v37  ;;  %v14925_v51 = vcombine.low %v357_v36, %v369_v37 }
 0x2ef   : > { %12482 = vmatpush1.bf16.msra.mxu0 %v16671_v43  ;;  %12687 = vmatpush1.bf16.msra.mxu1 %v16673_v44  ;;  %v380_v43 = vld [vmem:[%s17463_s22 + $0x320] sm:$0xff] }
 0x2f0   : > { %12483 = vmatprep.subr.bf16.mxu0 %v16696_v46  ;;  %12688 = vmatprep.subr.bf16.mxu1 %v16698_v47  ;;  %v392_v44 = vld [vmem:[%s17463_s22 + $0x380] sm:$0xff]  ;;  %v381_v46 = vld [vmem:[%s17463_s22 + $0x328] sm:$0xff] }
 0x2f1   : > { %v393_v47 = vld [vmem:[%s17463_s22 + $0x388] sm:$0xff]  ;;  %v14948_v52 = vcombine.high %v380_v43, %v392_v44  ;;  %v14947_v54 = vcombine.low %v380_v43, %v392_v44 }
 0x2f2   : > { %v14950_v53 = vcombine.high %v381_v46, %v393_v47  ;;  %v14949_v61 = vcombine.low %v381_v46, %v393_v47 }
 0x2f3   : > { %12484 = vmatpush1.bf16.msra.mxu0 %v16695_v55  ;;  %12689 = vmatpush1.bf16.msra.mxu1 %v16697_v56  ;;  %v404_v55 = vld [vmem:[%s17463_s22 + $0x3e0] sm:$0xff] }
 0x2f4   : > { %12485 = vmatprep.subr.bf16.mxu0 %v16720_v57  ;;  %12690 = vmatprep.subr.bf16.mxu1 %v16722_v58  ;;  %v416_v56 = vld [vmem:[%s17463_s22 + $0x440] sm:$0xff]  ;;  %v405_v57 = vld [vmem:[%s17463_s22 + $0x3e8] sm:$0xff] }
 0x2f5   : > { %v417_v58 = vld [vmem:[%s17463_s22 + $0x448] sm:$0xff]  ;;  %v14972_v62 = vcombine.high %v404_v55, %v416_v56  ;;  %v14971_v5 = vcombine.low %v404_v55, %v416_v56 }
 0x2f6   : > { %v14974_v63 = vcombine.high %v405_v57, %v417_v58  ;;  %v14973_v30 = vcombine.low %v405_v57, %v417_v58 }
 0x2f7   : > { %12486 = vmatpush1.bf16.msra.mxu0 %v16719_v1  ;;  %12691 = vmatpush1.bf16.msra.mxu1 %v16721_v2  ;;  %v428_v1 = vld [vmem:[%s17463_s22 + $0x4a0] sm:$0xff] }
 0x2f8   : > { %12487 = vmatprep.subr.bf16.mxu0 %v16744_v3  ;;  %12692 = vmatprep.subr.bf16.mxu1 %v16746_v4  ;;  %v440_v2 = vld [vmem:[%s17463_s22 + $0x500] sm:$0xff]  ;;  %v429_v3 = vld [vmem:[%s17463_s22 + $0x4a8] sm:$0xff] }
 0x2f9   : > { %v441_v4 = vld [vmem:[%s17463_s22 + $0x508] sm:$0xff]  ;;  %v14996_v7 = vcombine.high %v428_v1, %v440_v2  ;;  %v14995_v15 = vcombine.low %v428_v1, %v440_v2 }
 0x2fa   : > { %v14998_v8 = vcombine.high %v429_v3, %v441_v4  ;;  %v14997_v16 = vcombine.low %v429_v3, %v441_v4 }
 0x2fb   : > { %12488 = vmatpush1.bf16.msra.mxu0 %v16743_v9  ;;  %12693 = vmatpush1.bf16.msra.mxu1 %v16745_v12  ;;  %v452_v9 = vld [vmem:[%s17463_s22 + $0x560] sm:$0xff] }
 0x2fc   : > { %12703 = vmatprep.subr.bf16.mxu0 %v14852_v13  ;;  %12908 = vmatprep.subr.bf16.mxu1 %v14854_v14  ;;  %v464_v12 = vld [vmem:[%s17463_s22 + $0x5c0] sm:$0xff]  ;;  %v453_v13 = vld [vmem:[%s17463_s22 + $0x568] sm:$0xff] }
 0x2fd   : > { %v465_v14 = vld [vmem:[%s17463_s22 + $0x5c8] sm:$0xff]  ;;  %v15020_v17 = vcombine.high %v452_v9, %v464_v12  ;;  %v15019_v25 = vcombine.low %v452_v9, %v464_v12 }
 0x2fe   : > { %12490 = vmatmul.mubr.bf16.vlgmr.msra.gmra.mrb[4].mxu0 %v17879_v48  ;;  %12695 = vmatmul.mubr.bf16.vlgmr.msra.gmra.mrb[4].mxu1 %v17879_v48  ;;  %v15022_v18 = vcombine.high %v453_v13, %v465_v14  ;;  %v15021_v26 = vcombine.low %v453_v13, %v465_v14 }
 0x2ff   : > { %12704 = vmatpush1.bf16.msra.mxu0 %v14851_v20  ;;  %12909 = vmatpush1.bf16.msra.mxu1 %v14853_v21  ;;  %v476_v20 = vld [vmem:[%s17463_s22 + $0x620] sm:$0xff] }
 0x300   : > { %12705 = vmatprep.subr.bf16.mxu0 %v14876_v22  ;;  %12910 = vmatprep.subr.bf16.mxu1 %v14878_v23  ;;  %v488_v21 = vld [vmem:[%s17463_s22 + $0x680] sm:$0xff]  ;;  %v477_v22 = vld [vmem:[%s17463_s22 + $0x628] sm:$0xff] }
 0x301   : > { %12735 = vmatprep.mubr.bf16.mxu0 %v17523_v10  ;;  %12940 = vmatprep.mubr.bf16.mxu1 %v17523_v10  ;;  %v489_v23 = vld [vmem:[%s17463_s22 + $0x688] sm:$0xff]  ;;  %v15044_v27 = vcombine.high %v476_v20, %v488_v21  ;;  %v15043_v34 = vcombine.low %v476_v20, %v488_v21 }
 0x302   : > { %v15046_v28 = vcombine.high %v477_v22, %v489_v23  ;;  %v15045_v35 = vcombine.low %v477_v22, %v489_v23 }
 0x303   : > { %12706 = vmatpush1.bf16.msra.mxu0 %v14875_v60  ;;  %12911 = vmatpush1.bf16.msra.mxu1 %v14877_v31  ;;  %v500_v60 = vld [vmem:[%s17463_s22 + $0x6e0] sm:$0xff] }
 0x304   : > { %12707 = vmatprep.subr.bf16.mxu0 %v14900_v32  ;;  %12912 = vmatprep.subr.bf16.mxu1 %v14902_v0  ;;  %v512_v31 = vld [vmem:[%s17463_s22 + $0x740] sm:$0xff]  ;;  %v501_v32 = vld [vmem:[%s17463_s22 + $0x6e8] sm:$0xff] }
 0x305   : > { %v513_v0 = vld [vmem:[%s17463_s22 + $0x748] sm:$0xff]  ;;  %v15068_v36 = vcombine.high %v500_v60, %v512_v31  ;;  %v15067_v43 = vcombine.low %v500_v60, %v512_v31 }
 0x306   : > { %v15070_v37 = vcombine.high %v501_v32, %v513_v0  ;;  %v15069_v44 = vcombine.low %v501_v32, %v513_v0 }
 0x307   : > { %12708 = vmatpush1.bf16.msra.mxu0 %v14899_v38  ;;  %12913 = vmatpush1.bf16.msra.mxu1 %v14901_v40  ;;  %v524_v38 = vld [vmem:[%s17463_s22 + $0x7a0] sm:$0xff] }
 0x308   : > { %12709 = vmatprep.subr.bf16.mxu0 %v14924_v41  ;;  %12914 = vmatprep.subr.bf16.mxu1 %v14926_v42  ;;  %v536_v40 = vld [vmem:[%s17463_s22 + $0x800] sm:$0xff]  ;;  %v525_v41 = vld [vmem:[%s17463_s22 + $0x7a8] sm:$0xff] }
 0x309   : > { %v537_v42 = vld [vmem:[%s17463_s22 + $0x808] sm:$0xff]  ;;  %v15092_v46 = vcombine.high %v524_v38, %v536_v40  ;;  %v15091_v55 = vcombine.low %v524_v38, %v536_v40 }
 0x30a   : > { %v15094_v47 = vcombine.high %v525_v41, %v537_v42  ;;  %v15093_v56 = vcombine.low %v525_v41, %v537_v42 }
 0x30b   : > { %12710 = vmatpush1.bf16.msra.mxu0 %v14923_v50  ;;  %12915 = vmatpush1.bf16.msra.mxu1 %v14925_v51  ;;  %v548_v50 = vld [vmem:[%s17463_s22 + $0x860] sm:$0xff] }
 0x30c   : > { %12711 = vmatprep.subr.bf16.mxu0 %v14948_v52  ;;  %12916 = vmatprep.subr.bf16.mxu1 %v14950_v53  ;;  %v560_v51 = vld [vmem:[%s17463_s22 + $0x8c0] sm:$0xff]  ;;  %v549_v52 = vld [vmem:[%s17463_s22 + $0x868] sm:$0xff] }
 0x30d   : > { %v561_v53 = vld [vmem:[%s17463_s22 + $0x8c8] sm:$0xff]  ;;  %v15116_v57 = vcombine.high %v548_v50, %v560_v51  ;;  %v15115_v1 = vcombine.low %v548_v50, %v560_v51 }
 0x30e   : > { %v15118_v58 = vcombine.high %v549_v52, %v561_v53  ;;  %v15117_v2 = vcombine.low %v549_v52, %v561_v53 }
 0x30f   : > { %12712 = vmatpush1.bf16.msra.mxu0 %v14947_v54  ;;  %12917 = vmatpush1.bf16.msra.mxu1 %v14949_v61  ;;  %v572_v54 = vld [vmem:[%s17463_s22 + $0x920] sm:$0xff] }
 0x310   : > { %12713 = vmatprep.subr.bf16.mxu0 %v14972_v62  ;;  %12918 = vmatprep.subr.bf16.mxu1 %v14974_v63  ;;  %v584_v61 = vld [vmem:[%s17463_s22 + $0x980] sm:$0xff]  ;;  %v573_v62 = vld [vmem:[%s17463_s22 + $0x928] sm:$0xff] }
 0x311   : > { %v585_v63 = vld [vmem:[%s17463_s22 + $0x988] sm:$0xff]  ;;  %v15140_v3 = vcombine.high %v572_v54, %v584_v61  ;;  %v15139_v9 = vcombine.low %v572_v54, %v584_v61 }
 0x312   : > { %v15142_v4 = vcombine.high %v573_v62, %v585_v63  ;;  %v15141_v12 = vcombine.low %v573_v62, %v585_v63 }
 0x313   : > { %12714 = vmatpush1.bf16.msra.mxu0 %v14971_v5  ;;  %12919 = vmatpush1.bf16.msra.mxu1 %v14973_v30  ;;  %v596_v5 = vld [vmem:[%s17463_s22 + $0x9e0] sm:$0xff] }
 0x314   : > { %12715 = vmatprep.subr.bf16.mxu0 %v14996_v7  ;;  %12920 = vmatprep.subr.bf16.mxu1 %v14998_v8  ;;  %v608_v30 = vld [vmem:[%s17463_s22 + $0xa40] sm:$0xff]  ;;  %v597_v7 = vld [vmem:[%s17463_s22 + $0x9e8] sm:$0xff] }
 0x315   : > { %v609_v8 = vld [vmem:[%s17463_s22 + $0xa48] sm:$0xff]  ;;  %v15164_v13 = vcombine.high %v596_v5, %v608_v30  ;;  %v15163_v20 = vcombine.low %v596_v5, %v608_v30 }
 0x316   : > { %v15166_v14 = vcombine.high %v597_v7, %v609_v8  ;;  %v15165_v21 = vcombine.low %v597_v7, %v609_v8 }
 0x317   : > { %12716 = vmatpush1.bf16.msra.mxu0 %v14995_v15  ;;  %12921 = vmatpush1.bf16.msra.mxu1 %v14997_v16  ;;  %v620_v15 = vld [vmem:[%s17463_s22 + $0xaa0] sm:$0xff] }
 0x318   : > { %12717 = vmatprep.subr.bf16.mxu0 %v15020_v17  ;;  %12922 = vmatprep.subr.bf16.mxu1 %v15022_v18  ;;  %v632_v16 = vld [vmem:[%s17463_s22 + $0xb00] sm:$0xff]  ;;  %v621_v17 = vld [vmem:[%s17463_s22 + $0xaa8] sm:$0xff] }
 0x319   : > { %v633_v18 = vld [vmem:[%s17463_s22 + $0xb08] sm:$0xff]  ;;  %v15188_v22 = vcombine.high %v620_v15, %v632_v16  ;;  %v15187_v60 = vcombine.low %v620_v15, %v632_v16 }
 0x31a   : > { %v15190_v23 = vcombine.high %v621_v17, %v633_v18  ;;  %v15189_v31 = vcombine.low %v621_v17, %v633_v18 }
 0x31b   : > { %12718 = vmatpush1.bf16.msra.mxu0 %v15019_v25  ;;  %12923 = vmatpush1.bf16.msra.mxu1 %v15021_v26  ;;  %v644_v25 = vld [vmem:[%s17463_s22 + $0xb60] sm:$0xff] }
 0x31c   : > { %12719 = vmatprep.subr.bf16.mxu0 %v15044_v27  ;;  %12924 = vmatprep.subr.bf16.mxu1 %v15046_v28  ;;  %v656_v26 = vld [vmem:[%s17463_s22 + $0xbc0] sm:$0xff]  ;;  %v645_v27 = vld [vmem:[%s17463_s22 + $0xb68] sm:$0xff] }
 0x31d   : > { %v657_v28 = vld [vmem:[%s17463_s22 + $0xbc8] sm:$0xff]  ;;  %v15212_v32 = vcombine.high %v644_v25, %v656_v26  ;;  %v15211_v38 = vcombine.low %v644_v25, %v656_v26 }
 0x31e   : > { %v15214_v0 = vcombine.high %v645_v27, %v657_v28  ;;  %v15213_v40 = vcombine.low %v645_v27, %v657_v28 }
 0x31f   : > { %12720 = vmatpush1.bf16.msra.mxu0 %v15043_v34  ;;  %12925 = vmatpush1.bf16.msra.mxu1 %v15045_v35  ;;  %v668_v34 = vld [vmem:[%s17463_s22 + $0xc20] sm:$0xff] }
 0x320   : > { %12721 = vmatprep.subr.bf16.mxu0 %v15068_v36  ;;  %12926 = vmatprep.subr.bf16.mxu1 %v15070_v37  ;;  %v680_v35 = vld [vmem:[%s17463_s22 + $0xc80] sm:$0xff]  ;;  %v669_v36 = vld [vmem:[%s17463_s22 + $0xc28] sm:$0xff] }
 0x321   : > { %v681_v37 = vld [vmem:[%s17463_s22 + $0xc88] sm:$0xff]  ;;  %v15236_v41 = vcombine.high %v668_v34, %v680_v35  ;;  %v15235_v50 = vcombine.low %v668_v34, %v680_v35 }
 0x322   : > { %v15238_v42 = vcombine.high %v669_v36, %v681_v37  ;;  %v15237_v51 = vcombine.low %v669_v36, %v681_v37 }
 0x323   : > { %12722 = vmatpush1.bf16.msra.mxu0 %v15067_v43  ;;  %12927 = vmatpush1.bf16.msra.mxu1 %v15069_v44  ;;  %v692_v43 = vld [vmem:[%s17463_s22 + $0xce0] sm:$0xff] }
 0x324   : > { %12723 = vmatprep.subr.bf16.mxu0 %v15092_v46  ;;  %12928 = vmatprep.subr.bf16.mxu1 %v15094_v47  ;;  %v704_v44 = vld [vmem:[%s17463_s22 + $0xd40] sm:$0xff]  ;;  %v693_v46 = vld [vmem:[%s17463_s22 + $0xce8] sm:$0xff] }
 0x325   : > { %v705_v47 = vld [vmem:[%s17463_s22 + $0xd48] sm:$0xff]  ;;  %v15260_v52 = vcombine.high %v692_v43, %v704_v44  ;;  %v15259_v54 = vcombine.low %v692_v43, %v704_v44 }
 0x326   : > { %v15262_v53 = vcombine.high %v693_v46, %v705_v47  ;;  %v15261_v61 = vcombine.low %v693_v46, %v705_v47 }
 0x327   : > { %12724 = vmatpush1.bf16.msra.mxu0 %v15091_v55  ;;  %12929 = vmatpush1.bf16.msra.mxu1 %v15093_v56  ;;  %v716_v55 = vld [vmem:[%s17463_s22 + $0xda0] sm:$0xff] }
 0x328   : > { %12725 = vmatprep.subr.bf16.mxu0 %v15116_v57  ;;  %12930 = vmatprep.subr.bf16.mxu1 %v15118_v58  ;;  %v728_v56 = vld [vmem:[%s17463_s22 + $0xe00] sm:$0xff]  ;;  %v717_v57 = vld [vmem:[%s17463_s22 + $0xda8] sm:$0xff] }
 0x329   : > { %v729_v58 = vld [vmem:[%s17463_s22 + $0xe08] sm:$0xff]  ;;  %v15284_v62 = vcombine.high %v716_v55, %v728_v56  ;;  %v15283_v5 = vcombine.low %v716_v55, %v728_v56 }
 0x32a   : > { %v15286_v63 = vcombine.high %v717_v57, %v729_v58  ;;  %v15285_v30 = vcombine.low %v717_v57, %v729_v58 }
 0x32b   : > { %12726 = vmatpush1.bf16.msra.mxu0 %v15115_v1  ;;  %12931 = vmatpush1.bf16.msra.mxu1 %v15117_v2  ;;  %v740_v1 = vld [vmem:[%s17463_s22 + $0xe60] sm:$0xff] }
 0x32c   : > { %12727 = vmatprep.subr.bf16.mxu0 %v15140_v3  ;;  %12932 = vmatprep.subr.bf16.mxu1 %v15142_v4  ;;  %v752_v2 = vld [vmem:[%s17463_s22 + $0xec0] sm:$0xff]  ;;  %v741_v3 = vld [vmem:[%s17463_s22 + $0xe68] sm:$0xff] }
 0x32d   : > { %v753_v4 = vld [vmem:[%s17463_s22 + $0xec8] sm:$0xff]  ;;  %v15308_v7 = vcombine.high %v740_v1, %v752_v2  ;;  %v15307_v15 = vcombine.low %v740_v1, %v752_v2 }
 0x32e   : > { %v15310_v8 = vcombine.high %v741_v3, %v753_v4  ;;  %v15309_v16 = vcombine.low %v741_v3, %v753_v4 }
 0x32f   : > { %12728 = vmatpush1.bf16.msra.mxu0 %v15139_v9  ;;  %12933 = vmatpush1.bf16.msra.mxu1 %v15141_v12  ;;  %v764_v9 = vld [vmem:[%s17463_s22 + $0xf20] sm:$0xff] }
 0x330   : > { %12729 = vmatprep.subr.bf16.mxu0 %v15164_v13  ;;  %12934 = vmatprep.subr.bf16.mxu1 %v15166_v14  ;;  %v776_v12 = vld [vmem:[%s17463_s22 + $0xf80] sm:$0xff]  ;;  %v765_v13 = vld [vmem:[%s17463_s22 + $0xf28] sm:$0xff] }
 0x331   : > { %v777_v14 = vld [vmem:[%s17463_s22 + $0xf88] sm:$0xff]  ;;  %v15332_v17 = vcombine.high %v764_v9, %v776_v12  ;;  %v15331_v25 = vcombine.low %v764_v9, %v776_v12 }
 0x332   : > { %v15334_v18 = vcombine.high %v765_v13, %v777_v14  ;;  %v15333_v26 = vcombine.low %v765_v13, %v777_v14 }
 0x333   : > { %12730 = vmatpush1.bf16.msra.mxu0 %v15163_v20  ;;  %12935 = vmatpush1.bf16.msra.mxu1 %v15165_v21  ;;  %v788_v20 = vld [vmem:[%s17463_s22 + $0xfe0] sm:$0xff] }
 0x334   : > { %12731 = vmatprep.subr.bf16.mxu0 %v15188_v22  ;;  %12936 = vmatprep.subr.bf16.mxu1 %v15190_v23  ;;  %v800_v21 = vld [vmem:[%s17463_s22 + $0x1040] sm:$0xff]  ;;  %v789_v22 = vld [vmem:[%s17463_s22 + $0xfe8] sm:$0xff] }
 0x335   : > { %v801_v23 = vld [vmem:[%s17463_s22 + $0x1048] sm:$0xff]  ;;  %v15356_v27 = vcombine.high %v788_v20, %v800_v21  ;;  %v15355_v34 = vcombine.low %v788_v20, %v800_v21 }
 0x336   : > { %v15358_v28 = vcombine.high %v789_v22, %v801_v23  ;;  %v15357_v35 = vcombine.low %v789_v22, %v801_v23 }
 0x337   : > { %12732 = vmatpush1.bf16.msra.mxu0 %v15187_v60  ;;  %12937 = vmatpush1.bf16.msra.mxu1 %v15189_v31  ;;  %v812_v60 = vld [vmem:[%s17463_s22 + $0x10a0] sm:$0xff] }
 0x338   : > { %12733 = vmatprep.subr.bf16.mxu0 %v15212_v32  ;;  %12938 = vmatprep.subr.bf16.mxu1 %v15214_v0  ;;  %v824_v31 = vld [vmem:[%s17463_s22 + $0x1100] sm:$0xff]  ;;  %v813_v32 = vld [vmem:[%s17463_s22 + $0x10a8] sm:$0xff] }
 0x339   : > { %v825_v0 = vld [vmem:[%s17463_s22 + $0x1108] sm:$0xff]  ;;  %v15380_v36 = vcombine.high %v812_v60, %v824_v31  ;;  %v15379_v43 = vcombine.low %v812_v60, %v824_v31 }
 0x33a   : > { %v15382_v37 = vcombine.high %v813_v32, %v825_v0  ;;  %v15381_v44 = vcombine.low %v813_v32, %v825_v0 }
 0x33b   : > { %12734 = vmatpush1.bf16.msra.mxu0 %v15211_v38  ;;  %12939 = vmatpush1.bf16.msra.mxu1 %v15213_v40  ;;  %v836_v38 = vld [vmem:[%s17463_s22 + $0x1160] sm:$0xff] }
 0x33c   : > { %12744 = vmatprep.subr.bf16.mxu0 %v15236_v41  ;;  %12949 = vmatprep.subr.bf16.mxu1 %v15238_v42  ;;  %v848_v40 = vld [vmem:[%s17463_s22 + $0x11c0] sm:$0xff]  ;;  %v837_v41 = vld [vmem:[%s17463_s22 + $0x1168] sm:$0xff] }
 0x33d   : > { %v849_v42 = vld [vmem:[%s17463_s22 + $0x11c8] sm:$0xff]  ;;  %v15404_v46 = vcombine.high %v836_v38, %v848_v40  ;;  %v15403_v55 = vcombine.low %v836_v38, %v848_v40 }
 0x33e   : > { %12736 = vmatmul.mubr.bf16.vlgmr.msra.gmra.mrb[8].mxu0 %v17565_v24  ;;  %12941 = vmatmul.mubr.bf16.vlgmr.msra.gmra.mrb[8].mxu1 %v17565_v24  ;;  %v15406_v47 = vcombine.high %v837_v41, %v849_v42  ;;  %v15405_v56 = vcombine.low %v837_v41, %v849_v42 }
 0x33f   : > { %12745 = vmatpush1.bf16.msra.mxu0 %v15235_v50  ;;  %12950 = vmatpush1.bf16.msra.mxu1 %v15237_v51  ;;  %v860_v50 = vld [vmem:[%s17463_s22 + $0x1220] sm:$0xff] }
 0x340   : > { %12746 = vmatprep.subr.bf16.mxu0 %v15260_v52  ;;  %12951 = vmatprep.subr.bf16.mxu1 %v15262_v53  ;;  %v872_v51 = vld [vmem:[%s17463_s22 + $0x1280] sm:$0xff]  ;;  %v861_v52 = vld [vmem:[%s17463_s22 + $0x1228] sm:$0xff] }
 0x341   : > { %12776 = vmatprep.mubr.bf16.mxu0 %v17573_v33  ;;  %12981 = vmatprep.mubr.bf16.mxu1 %v17573_v33  ;;  %v873_v53 = vld [vmem:[%s17463_s22 + $0x1288] sm:$0xff]  ;;  %v15428_v57 = vcombine.high %v860_v50, %v872_v51  ;;  %v15427_v1 = vcombine.low %v860_v50, %v872_v51 }
 0x342   : > { %v15430_v58 = vcombine.high %v861_v52, %v873_v53  ;;  %v15429_v2 = vcombine.low %v861_v52, %v873_v53 }
 0x343   : > { %12747 = vmatpush1.bf16.msra.mxu0 %v15259_v54  ;;  %12952 = vmatpush1.bf16.msra.mxu1 %v15261_v61  ;;  %v884_v54 = vld [vmem:[%s17463_s22 + $0x12e0] sm:$0xff] }
 0x344   : > { %12748 = vmatprep.subr.bf16.mxu0 %v15284_v62  ;;  %12953 = vmatprep.subr.bf16.mxu1 %v15286_v63  ;;  %v896_v61 = vld [vmem:[%s17463_s22 + $0x1340] sm:$0xff]  ;;  %v885_v62 = vld [vmem:[%s17463_s22 + $0x12e8] sm:$0xff] }
 0x345   : > { %v897_v63 = vld [vmem:[%s17463_s22 + $0x1348] sm:$0xff]  ;;  %v15452_v3 = vcombine.high %v884_v54, %v896_v61  ;;  %v15451_v9 = vcombine.low %v884_v54, %v896_v61 }
 0x346   : > { %v15454_v4 = vcombine.high %v885_v62, %v897_v63  ;;  %v15453_v12 = vcombine.low %v885_v62, %v897_v63 }
 0x347   : > { %12749 = vmatpush1.bf16.msra.mxu0 %v15283_v5  ;;  %12954 = vmatpush1.bf16.msra.mxu1 %v15285_v30  ;;  %v908_v5 = vld [vmem:[%s17463_s22 + $0x13a0] sm:$0xff] }
 0x348   : > { %12750 = vmatprep.subr.bf16.mxu0 %v15308_v7  ;;  %12955 = vmatprep.subr.bf16.mxu1 %v15310_v8  ;;  %v920_v30 = vld [vmem:[%s17463_s22 + $0x1400] sm:$0xff]  ;;  %v909_v7 = vld [vmem:[%s17463_s22 + $0x13a8] sm:$0xff] }
 0x349   : > { %v921_v8 = vld [vmem:[%s17463_s22 + $0x1408] sm:$0xff]  ;;  %v15476_v13 = vcombine.high %v908_v5, %v920_v30  ;;  %v15475_v20 = vcombine.low %v908_v5, %v920_v30 }
 0x34a   : > { %v15478_v14 = vcombine.high %v909_v7, %v921_v8  ;;  %v15477_v21 = vcombine.low %v909_v7, %v921_v8 }
 0x34b   : > { %12751 = vmatpush1.bf16.msra.mxu0 %v15307_v15  ;;  %12956 = vmatpush1.bf16.msra.mxu1 %v15309_v16  ;;  %v932_v15 = vld [vmem:[%s17463_s22 + $0x1460] sm:$0xff] }
 0x34c   : > { %12752 = vmatprep.subr.bf16.mxu0 %v15332_v17  ;;  %12957 = vmatprep.subr.bf16.mxu1 %v15334_v18  ;;  %v944_v16 = vld [vmem:[%s17463_s22 + $0x14c0] sm:$0xff]  ;;  %v933_v17 = vld [vmem:[%s17463_s22 + $0x1468] sm:$0xff] }
 0x34d   : > { %v945_v18 = vld [vmem:[%s17463_s22 + $0x14c8] sm:$0xff]  ;;  %v15500_v22 = vcombine.high %v932_v15, %v944_v16  ;;  %v15499_v60 = vcombine.low %v932_v15, %v944_v16 }
 0x34e   : > { %v15502_v23 = vcombine.high %v933_v17, %v945_v18  ;;  %v15501_v31 = vcombine.low %v933_v17, %v945_v18 }
 0x34f   : > { %12753 = vmatpush1.bf16.msra.mxu0 %v15331_v25  ;;  %12958 = vmatpush1.bf16.msra.mxu1 %v15333_v26  ;;  %v956_v25 = vld [vmem:[%s17463_s22 + $0x1520] sm:$0xff] }
 0x350   : > { %12754 = vmatprep.subr.bf16.mxu0 %v15356_v27  ;;  %12959 = vmatprep.subr.bf16.mxu1 %v15358_v28  ;;  %v968_v26 = vld [vmem:[%s17463_s22 + $0x1580] sm:$0xff]  ;;  %v957_v27 = vld [vmem:[%s17463_s22 + $0x1528] sm:$0xff] }
 0x351   : > { %v969_v28 = vld [vmem:[%s17463_s22 + $0x1588] sm:$0xff]  ;;  %v15524_v32 = vcombine.high %v956_v25, %v968_v26  ;;  %v15523_v38 = vcombine.low %v956_v25, %v968_v26 }
 0x352   : > { %v15526_v0 = vcombine.high %v957_v27, %v969_v28  ;;  %v15525_v40 = vcombine.low %v957_v27, %v969_v28 }
 0x353   : > { %12755 = vmatpush1.bf16.msra.mxu0 %v15355_v34  ;;  %12960 = vmatpush1.bf16.msra.mxu1 %v15357_v35  ;;  %v980_v34 = vld [vmem:[%s17463_s22 + $0x15e0] sm:$0xff] }
 0x354   : > { %12756 = vmatprep.subr.bf16.mxu0 %v15380_v36  ;;  %12961 = vmatprep.subr.bf16.mxu1 %v15382_v37  ;;  %v992_v35 = vld [vmem:[%s17463_s22 + $0x1640] sm:$0xff]  ;;  %v981_v36 = vld [vmem:[%s17463_s22 + $0x15e8] sm:$0xff] }
 0x355   : > { %v993_v37 = vld [vmem:[%s17463_s22 + $0x1648] sm:$0xff]  ;;  %v15548_v41 = vcombine.high %v980_v34, %v992_v35  ;;  %v15547_v50 = vcombine.low %v980_v34, %v992_v35 }
 0x356   : > { %v15550_v42 = vcombine.high %v981_v36, %v993_v37  ;;  %v15549_v51 = vcombine.low %v981_v36, %v993_v37 }
 0x357   : > { %12757 = vmatpush1.bf16.msra.mxu0 %v15379_v43  ;;  %12962 = vmatpush1.bf16.msra.mxu1 %v15381_v44  ;;  %v1004_v43 = vld [vmem:[%s17463_s22 + $0x16a0] sm:$0xff] }
 0x358   : > { %12758 = vmatprep.subr.bf16.mxu0 %v15404_v46  ;;  %12963 = vmatprep.subr.bf16.mxu1 %v15406_v47  ;;  %v1016_v44 = vld [vmem:[%s17463_s22 + $0x1700] sm:$0xff]  ;;  %v1005_v46 = vld [vmem:[%s17463_s22 + $0x16a8] sm:$0xff] }
 0x359   : > { %v1017_v47 = vld [vmem:[%s17463_s22 + $0x1708] sm:$0xff]  ;;  %v15572_v52 = vcombine.high %v1004_v43, %v1016_v44  ;;  %v15571_v54 = vcombine.low %v1004_v43, %v1016_v44 }
 0x35a   : > { %v15574_v53 = vcombine.high %v1005_v46, %v1017_v47  ;;  %v15573_v61 = vcombine.low %v1005_v46, %v1017_v47 }
 0x35b   : > { %12759 = vmatpush1.bf16.msra.mxu0 %v15403_v55  ;;  %12964 = vmatpush1.bf16.msra.mxu1 %v15405_v56  ;;  %v1028_v55 = vld [vmem:[%s17463_s22 + $0x1760] sm:$0xff] }
 0x35c   : > { %12760 = vmatprep.subr.bf16.mxu0 %v15428_v57  ;;  %12965 = vmatprep.subr.bf16.mxu1 %v15430_v58  ;;  %v1040_v56 = vld [vmem:[%s17463_s22 + $0x17c0] sm:$0xff]  ;;  %v1029_v57 = vld [vmem:[%s17463_s22 + $0x1768] sm:$0xff] }
 0x35d   : > { %v1041_v58 = vld [vmem:[%s17463_s22 + $0x17c8] sm:$0xff]  ;;  %v15596_v62 = vcombine.high %v1028_v55, %v1040_v56  ;;  %v15595_v5 = vcombine.low %v1028_v55, %v1040_v56 }
 0x35e   : > { %v15598_v63 = vcombine.high %v1029_v57, %v1041_v58  ;;  %v15597_v30 = vcombine.low %v1029_v57, %v1041_v58 }
 0x35f   : > { %12761 = vmatpush1.bf16.msra.mxu0 %v15427_v1  ;;  %12966 = vmatpush1.bf16.msra.mxu1 %v15429_v2  ;;  %v1052_v1 = vld [vmem:[%s17463_s22 + $0x1820] sm:$0xff] }
 0x360   : > { %12762 = vmatprep.subr.bf16.mxu0 %v15452_v3  ;;  %12967 = vmatprep.subr.bf16.mxu1 %v15454_v4  ;;  %v1064_v2 = vld [vmem:[%s17463_s22 + $0x1880] sm:$0xff]  ;;  %v1053_v3 = vld [vmem:[%s17463_s22 + $0x1828] sm:$0xff] }
 0x361   : > { %v1065_v4 = vld [vmem:[%s17463_s22 + $0x1888] sm:$0xff]  ;;  %v15620_v7 = vcombine.high %v1052_v1, %v1064_v2  ;;  %v15619_v15 = vcombine.low %v1052_v1, %v1064_v2 }
 0x362   : > { %v15622_v8 = vcombine.high %v1053_v3, %v1065_v4  ;;  %v15621_v16 = vcombine.low %v1053_v3, %v1065_v4 }
 0x363   : > { %12763 = vmatpush1.bf16.msra.mxu0 %v15451_v9  ;;  %12968 = vmatpush1.bf16.msra.mxu1 %v15453_v12  ;;  %v1076_v9 = vld [vmem:[%s17463_s22 + $0x18e0] sm:$0xff] }
 0x364   : > { %12764 = vmatprep.subr.bf16.mxu0 %v15476_v13  ;;  %12969 = vmatprep.subr.bf16.mxu1 %v15478_v14  ;;  %v1088_v12 = vld [vmem:[%s17463_s22 + $0x1940] sm:$0xff]  ;;  %v1077_v13 = vld [vmem:[%s17463_s22 + $0x18e8] sm:$0xff] }
 0x365   : > { %v1089_v14 = vld [vmem:[%s17463_s22 + $0x1948] sm:$0xff]  ;;  %v15644_v17 = vcombine.high %v1076_v9, %v1088_v12  ;;  %v15643_v25 = vcombine.low %v1076_v9, %v1088_v12 }
 0x366   : > { %v15646_v18 = vcombine.high %v1077_v13, %v1089_v14  ;;  %v15645_v26 = vcombine.low %v1077_v13, %v1089_v14 }
 0x367   : > { %12765 = vmatpush1.bf16.msra.mxu0 %v15475_v20  ;;  %12970 = vmatpush1.bf16.msra.mxu1 %v15477_v21  ;;  %v1100_v20 = vld [vmem:[%s17463_s22 + $0x19a0] sm:$0xff] }
 0x368   : > { %12766 = vmatprep.subr.bf16.mxu0 %v15500_v22  ;;  %12971 = vmatprep.subr.bf16.mxu1 %v15502_v23  ;;  %v1112_v21 = vld [vmem:[%s17463_s22 + $0x1a00] sm:$0xff]  ;;  %v1101_v22 = vld [vmem:[%s17463_s22 + $0x19a8] sm:$0xff] }
 0x369   : > { %v1113_v23 = vld [vmem:[%s17463_s22 + $0x1a08] sm:$0xff]  ;;  %v15668_v27 = vcombine.high %v1100_v20, %v1112_v21  ;;  %v15667_v34 = vcombine.low %v1100_v20, %v1112_v21 }
 0x36a   : > { %v15670_v28 = vcombine.high %v1101_v22, %v1113_v23  ;;  %v15669_v35 = vcombine.low %v1101_v22, %v1113_v23 }
 0x36b   : > { %12767 = vmatpush1.bf16.msra.mxu0 %v15499_v60  ;;  %12972 = vmatpush1.bf16.msra.mxu1 %v15501_v31  ;;  %v1124_v60 = vld [vmem:[%s17463_s22 + $0x1a60] sm:$0xff] }
 0x36c   : > { %12768 = vmatprep.subr.bf16.mxu0 %v15524_v32  ;;  %12973 = vmatprep.subr.bf16.mxu1 %v15526_v0  ;;  %v1136_v31 = vld [vmem:[%s17463_s22 + $0x1ac0] sm:$0xff]  ;;  %v1125_v32 = vld [vmem:[%s17463_s22 + $0x1a68] sm:$0xff] }
 0x36d   : > { %v1137_v0 = vld [vmem:[%s17463_s22 + $0x1ac8] sm:$0xff]  ;;  %v15692_v36 = vcombine.high %v1124_v60, %v1136_v31  ;;  %v15691_v43 = vcombine.low %v1124_v60, %v1136_v31 }
 0x36e   : > { %v15694_v37 = vcombine.high %v1125_v32, %v1137_v0  ;;  %v15693_v44 = vcombine.low %v1125_v32, %v1137_v0 }
 0x36f   : > { %12769 = vmatpush1.bf16.msra.mxu0 %v15523_v38  ;;  %12974 = vmatpush1.bf16.msra.mxu1 %v15525_v40  ;;  %v1148_v38 = vld [vmem:[%s17463_s22 + $0x1b20] sm:$0xff] }
 0x370   : > { %12770 = vmatprep.subr.bf16.mxu0 %v15548_v41  ;;  %12975 = vmatprep.subr.bf16.mxu1 %v15550_v42  ;;  %v1160_v40 = vld [vmem:[%s17463_s22 + $0x1b80] sm:$0xff]  ;;  %v1149_v41 = vld [vmem:[%s17463_s22 + $0x1b28] sm:$0xff] }
 0x371   : > { %v1161_v42 = vld [vmem:[%s17463_s22 + $0x1b88] sm:$0xff]  ;;  %v15716_v46 = vcombine.high %v1148_v38, %v1160_v40  ;;  %v15715_v55 = vcombine.low %v1148_v38, %v1160_v40 }
 0x372   : > { %v15718_v47 = vcombine.high %v1149_v41, %v1161_v42  ;;  %v15717_v56 = vcombine.low %v1149_v41, %v1161_v42 }
 0x373   : > { %12771 = vmatpush1.bf16.msra.mxu0 %v15547_v50  ;;  %12976 = vmatpush1.bf16.msra.mxu1 %v15549_v51  ;;  %v1172_v50 = vld [vmem:[%s17463_s22 + $0x1be0] sm:$0xff] }
 0x374   : > { %12772 = vmatprep.subr.bf16.mxu0 %v15572_v52  ;;  %12977 = vmatprep.subr.bf16.mxu1 %v15574_v53  ;;  %v1184_v51 = vld [vmem:[%s17463_s22 + $0x1c40] sm:$0xff]  ;;  %v1173_v52 = vld [vmem:[%s17463_s22 + $0x1be8] sm:$0xff] }
 0x375   : > { %v1185_v53 = vld [vmem:[%s17463_s22 + $0x1c48] sm:$0xff]  ;;  %v15740_v57 = vcombine.high %v1172_v50, %v1184_v51  ;;  %v15739_v1 = vcombine.low %v1172_v50, %v1184_v51 }
 0x376   : > { %v15742_v58 = vcombine.high %v1173_v52, %v1185_v53  ;;  %v15741_v2 = vcombine.low %v1173_v52, %v1185_v53 }
 0x377   : > { %12773 = vmatpush1.bf16.msra.mxu0 %v15571_v54  ;;  %12978 = vmatpush1.bf16.msra.mxu1 %v15573_v61  ;;  %v1196_v54 = vld [vmem:[%s17463_s22 + $0x1ca0] sm:$0xff] }
 0x378   : > { %12774 = vmatprep.subr.bf16.mxu0 %v15596_v62  ;;  %12979 = vmatprep.subr.bf16.mxu1 %v15598_v63  ;;  %v1208_v61 = vld [vmem:[%s17463_s22 + $0x1d00] sm:$0xff]  ;;  %v1197_v62 = vld [vmem:[%s17463_s22 + $0x1ca8] sm:$0xff] }
 0x379   : > { %v1209_v63 = vld [vmem:[%s17463_s22 + $0x1d08] sm:$0xff]  ;;  %v15764_v3 = vcombine.high %v1196_v54, %v1208_v61  ;;  %v15763_v9 = vcombine.low %v1196_v54, %v1208_v61 }
 0x37a   : > { %v15766_v4 = vcombine.high %v1197_v62, %v1209_v63  ;;  %v15765_v12 = vcombine.low %v1197_v62, %v1209_v63 }
 0x37b   : > { %12775 = vmatpush1.bf16.msra.mxu0 %v15595_v5  ;;  %12980 = vmatpush1.bf16.msra.mxu1 %v15597_v30  ;;  %v1220_v5 = vld [vmem:[%s17463_s22 + $0x1d60] sm:$0xff] }
 0x37c   : > { %12785 = vmatprep.subr.bf16.mxu0 %v15620_v7  ;;  %12990 = vmatprep.subr.bf16.mxu1 %v15622_v8  ;;  %v1232_v30 = vld [vmem:[%s17463_s22 + $0x1dc0] sm:$0xff]  ;;  %v1221_v7 = vld [vmem:[%s17463_s22 + $0x1d68] sm:$0xff] }
 0x37d   : > { %v1233_v8 = vld [vmem:[%s17463_s22 + $0x1dc8] sm:$0xff]  ;;  %v15788_v13 = vcombine.high %v1220_v5, %v1232_v30  ;;  %v15787_v20 = vcombine.low %v1220_v5, %v1232_v30 }
 0x37e   : > { %12777 = vmatmul.mubr.bf16.vlgmr.msra.gmra.mrb[8].mxu0 %v17648_v39  ;;  %12982 = vmatmul.mubr.bf16.vlgmr.msra.gmra.mrb[8].mxu1 %v17648_v39  ;;  %v15790_v14 = vcombine.high %v1221_v7, %v1233_v8  ;;  %v15789_v21 = vcombine.low %v1221_v7, %v1233_v8 }
 0x37f   : > { %12786 = vmatpush1.bf16.msra.mxu0 %v15619_v15  ;;  %12991 = vmatpush1.bf16.msra.mxu1 %v15621_v16  ;;  %v1244_v15 = vld [vmem:[%s17463_s22 + $0x1e20] sm:$0xff] }
 0x380   : > { %12787 = vmatprep.subr.bf16.mxu0 %v15644_v17  ;;  %12992 = vmatprep.subr.bf16.mxu1 %v15646_v18  ;;  %v1256_v16 = vld [vmem:[%s17463_s22 + $0x1e80] sm:$0xff]  ;;  %v1245_v17 = vld [vmem:[%s17463_s22 + $0x1e28] sm:$0xff] }
 0x381   : > { %12817 = vmatprep.mubr.bf16.mxu0 %v17655_v49  ;;  %13022 = vmatprep.mubr.bf16.mxu1 %v17655_v49  ;;  %v1257_v18 = vld [vmem:[%s17463_s22 + $0x1e88] sm:$0xff]  ;;  %v15812_v22 = vcombine.high %v1244_v15, %v1256_v16  ;;  %v15811_v60 = vcombine.low %v1244_v15, %v1256_v16 }
 0x382   : > { %v15814_v23 = vcombine.high %v1245_v17, %v1257_v18  ;;  %v15813_v31 = vcombine.low %v1245_v17, %v1257_v18 }
 0x383   : > { %12788 = vmatpush1.bf16.msra.mxu0 %v15643_v25  ;;  %12993 = vmatpush1.bf16.msra.mxu1 %v15645_v26  ;;  %v1268_v25 = vld [vmem:[%s17463_s22 + $0x1ee0] sm:$0xff] }
 0x384   : > { %12789 = vmatprep.subr.bf16.mxu0 %v15668_v27  ;;  %12994 = vmatprep.subr.bf16.mxu1 %v15670_v28  ;;  %v1280_v26 = vld [vmem:[%s17463_s22 + $0x1f40] sm:$0xff]  ;;  %v1269_v27 = vld [vmem:[%s17463_s22 + $0x1ee8] sm:$0xff] }
 0x385   : > { %v1281_v28 = vld [vmem:[%s17463_s22 + $0x1f48] sm:$0xff]  ;;  %v15836_v32 = vcombine.high %v1268_v25, %v1280_v26  ;;  %v15835_v38 = vcombine.low %v1268_v25, %v1280_v26 }
 0x386   : > { %v15838_v0 = vcombine.high %v1269_v27, %v1281_v28  ;;  %v15837_v40 = vcombine.low %v1269_v27, %v1281_v28 }
 0x387   : > { %12790 = vmatpush1.bf16.msra.mxu0 %v15667_v34  ;;  %12995 = vmatpush1.bf16.msra.mxu1 %v15669_v35  ;;  %v1292_v34 = vld [vmem:[%s17463_s22 + $0x1fa0] sm:$0xff] }
 0x388   : > { %12791 = vmatprep.subr.bf16.mxu0 %v15692_v36  ;;  %12996 = vmatprep.subr.bf16.mxu1 %v15694_v37  ;;  %v1304_v35 = vld [vmem:[%s17463_s22 + $0x2000] sm:$0xff]  ;;  %v1293_v36 = vld [vmem:[%s17463_s22 + $0x1fa8] sm:$0xff] }
 0x389   : > { %v1305_v37 = vld [vmem:[%s17463_s22 + $0x2008] sm:$0xff]  ;;  %v15860_v41 = vcombine.high %v1292_v34, %v1304_v35  ;;  %v15859_v50 = vcombine.low %v1292_v34, %v1304_v35 }
 0x38a   : > { %v15862_v42 = vcombine.high %v1293_v36, %v1305_v37  ;;  %v15861_v51 = vcombine.low %v1293_v36, %v1305_v37 }
 0x38b   : > { %12792 = vmatpush1.bf16.msra.mxu0 %v15691_v43  ;;  %12997 = vmatpush1.bf16.msra.mxu1 %v15693_v44  ;;  %v1316_v43 = vld [vmem:[%s17463_s22 + $0x2060] sm:$0xff] }
 0x38c   : > { %12793 = vmatprep.subr.bf16.mxu0 %v15716_v46  ;;  %12998 = vmatprep.subr.bf16.mxu1 %v15718_v47  ;;  %v1328_v44 = vld [vmem:[%s17463_s22 + $0x20c0] sm:$0xff]  ;;  %v1317_v46 = vld [vmem:[%s17463_s22 + $0x2068] sm:$0xff] }
 0x38d   : > { %v1329_v47 = vld [vmem:[%s17463_s22 + $0x20c8] sm:$0xff]  ;;  %v15884_v52 = vcombine.high %v1316_v43, %v1328_v44  ;;  %v15883_v54 = vcombine.low %v1316_v43, %v1328_v44 }
 0x38e   : > { %v15886_v53 = vcombine.high %v1317_v46, %v1329_v47  ;;  %v15885_v61 = vcombine.low %v1317_v46, %v1329_v47 }
 0x38f   : > { %12794 = vmatpush1.bf16.msra.mxu0 %v15715_v55  ;;  %12999 = vmatpush1.bf16.msra.mxu1 %v15717_v56  ;;  %v1340_v55 = vld [vmem:[%s17463_s22 + $0x2120] sm:$0xff] }
 0x390   : > { %12795 = vmatprep.subr.bf16.mxu0 %v15740_v57  ;;  %13000 = vmatprep.subr.bf16.mxu1 %v15742_v58  ;;  %v1352_v56 = vld [vmem:[%s17463_s22 + $0x2180] sm:$0xff]  ;;  %v1341_v57 = vld [vmem:[%s17463_s22 + $0x2128] sm:$0xff] }
 0x391   : > { %v1353_v58 = vld [vmem:[%s17463_s22 + $0x2188] sm:$0xff]  ;;  %v15908_v62 = vcombine.high %v1340_v55, %v1352_v56  ;;  %v15907_v5 = vcombine.low %v1340_v55, %v1352_v56 }
 0x392   : > { %v15910_v63 = vcombine.high %v1341_v57, %v1353_v58  ;;  %v15909_v30 = vcombine.low %v1341_v57, %v1353_v58 }
 0x393   : > { %12796 = vmatpush1.bf16.msra.mxu0 %v15739_v1  ;;  %13001 = vmatpush1.bf16.msra.mxu1 %v15741_v2  ;;  %v1364_v1 = vld [vmem:[%s17463_s22 + $0x21e0] sm:$0xff] }
 0x394   : > { %12797 = vmatprep.subr.bf16.mxu0 %v15764_v3  ;;  %13002 = vmatprep.subr.bf16.mxu1 %v15766_v4  ;;  %v1376_v2 = vld [vmem:[%s17463_s22 + $0x2240] sm:$0xff]  ;;  %v1365_v3 = vld [vmem:[%s17463_s22 + $0x21e8] sm:$0xff] }
 0x395   : > { %v1377_v4 = vld [vmem:[%s17463_s22 + $0x2248] sm:$0xff]  ;;  %v15932_v7 = vcombine.high %v1364_v1, %v1376_v2  ;;  %v15931_v15 = vcombine.low %v1364_v1, %v1376_v2 }
 0x396   : > { %v15934_v8 = vcombine.high %v1365_v3, %v1377_v4  ;;  %v15933_v16 = vcombine.low %v1365_v3, %v1377_v4 }
 0x397   : > { %12798 = vmatpush1.bf16.msra.mxu0 %v15763_v9  ;;  %13003 = vmatpush1.bf16.msra.mxu1 %v15765_v12  ;;  %v1388_v9 = vld [vmem:[%s17463_s22 + $0x22a0] sm:$0xff] }
 0x398   : > { %12799 = vmatprep.subr.bf16.mxu0 %v15788_v13  ;;  %13004 = vmatprep.subr.bf16.mxu1 %v15790_v14  ;;  %v1400_v12 = vld [vmem:[%s17463_s22 + $0x2300] sm:$0xff]  ;;  %v1389_v13 = vld [vmem:[%s17463_s22 + $0x22a8] sm:$0xff] }
 0x399   : > { %v1401_v14 = vld [vmem:[%s17463_s22 + $0x2308] sm:$0xff]  ;;  %v15956_v17 = vcombine.high %v1388_v9, %v1400_v12  ;;  %v15955_v25 = vcombine.low %v1388_v9, %v1400_v12 }
 0x39a   : > { %v15958_v18 = vcombine.high %v1389_v13, %v1401_v14  ;;  %v15957_v26 = vcombine.low %v1389_v13, %v1401_v14 }
 0x39b   : > { %12800 = vmatpush1.bf16.msra.mxu0 %v15787_v20  ;;  %13005 = vmatpush1.bf16.msra.mxu1 %v15789_v21  ;;  %v1412_v20 = vld [vmem:[%s17463_s22 + $0x2360] sm:$0xff] }
 0x39c   : > { %12801 = vmatprep.subr.bf16.mxu0 %v15812_v22  ;;  %13006 = vmatprep.subr.bf16.mxu1 %v15814_v23  ;;  %v1424_v21 = vld [vmem:[%s17463_s22 + $0x23c0] sm:$0xff]  ;;  %v1413_v22 = vld [vmem:[%s17463_s22 + $0x2368] sm:$0xff] }
 0x39d   : > { %v1425_v23 = vld [vmem:[%s17463_s22 + $0x23c8] sm:$0xff]  ;;  %v15980_v27 = vcombine.high %v1412_v20, %v1424_v21  ;;  %v15979_v34 = vcombine.low %v1412_v20, %v1424_v21 }
 0x39e   : > { %v15982_v28 = vcombine.high %v1413_v22, %v1425_v23  ;;  %v15981_v35 = vcombine.low %v1413_v22, %v1425_v23 }
 0x39f   : > { %12802 = vmatpush1.bf16.msra.mxu0 %v15811_v60  ;;  %13007 = vmatpush1.bf16.msra.mxu1 %v15813_v31  ;;  %v1436_v60 = vld [vmem:[%s17463_s22 + $0x2420] sm:$0xff] }
 0x3a0   : > { %12803 = vmatprep.subr.bf16.mxu0 %v15836_v32  ;;  %13008 = vmatprep.subr.bf16.mxu1 %v15838_v0  ;;  %v1448_v31 = vld [vmem:[%s17463_s22 + $0x2480] sm:$0xff]  ;;  %v1437_v32 = vld [vmem:[%s17463_s22 + $0x2428] sm:$0xff] }
 0x3a1   : > { %v1449_v0 = vld [vmem:[%s17463_s22 + $0x2488] sm:$0xff]  ;;  %v16004_v36 = vcombine.high %v1436_v60, %v1448_v31  ;;  %v16003_v43 = vcombine.low %v1436_v60, %v1448_v31 }
 0x3a2   : > { %v16006_v37 = vcombine.high %v1437_v32, %v1449_v0  ;;  %v16005_v44 = vcombine.low %v1437_v32, %v1449_v0 }
 0x3a3   : > { %12804 = vmatpush1.bf16.msra.mxu0 %v15835_v38  ;;  %13009 = vmatpush1.bf16.msra.mxu1 %v15837_v40  ;;  %v1460_v38 = vld [vmem:[%s17463_s22 + $0x24e0] sm:$0xff] }
 0x3a4   : > { %12805 = vmatprep.subr.bf16.mxu0 %v15860_v41  ;;  %13010 = vmatprep.subr.bf16.mxu1 %v15862_v42  ;;  %v1472_v40 = vld [vmem:[%s17463_s22 + $0x2540] sm:$0xff]  ;;  %v1461_v41 = vld [vmem:[%s17463_s22 + $0x24e8] sm:$0xff] }
 0x3a5   : > { %v1473_v42 = vld [vmem:[%s17463_s22 + $0x2548] sm:$0xff]  ;;  %v16028_v46 = vcombine.high %v1460_v38, %v1472_v40  ;;  %v16027_v55 = vcombine.low %v1460_v38, %v1472_v40 }
 0x3a6   : > { %v16030_v47 = vcombine.high %v1461_v41, %v1473_v42  ;;  %v16029_v56 = vcombine.low %v1461_v41, %v1473_v42  ;;  %v1605_v40 = vld [vmem:[%s17463_s22 + $0x2968] sm:$0xff] }
 0x3a7   : > { %12806 = vmatpush1.bf16.msra.mxu0 %v15859_v50  ;;  %13011 = vmatpush1.bf16.msra.mxu1 %v15861_v51  ;;  %v1484_v50 = vld [vmem:[%s17463_s22 + $0x25a0] sm:$0xff]  ;;  %v1617_v41 = vld [vmem:[%s17463_s22 + $0x29c8] sm:$0xff] }
 0x3a8   : > { %12807 = vmatprep.subr.bf16.mxu0 %v15884_v52  ;;  %13012 = vmatprep.subr.bf16.mxu1 %v15886_v53  ;;  %v1496_v51 = vld [vmem:[%s17463_s22 + $0x2600] sm:$0xff]  ;;  %v1485_v52 = vld [vmem:[%s17463_s22 + $0x25a8] sm:$0xff] }
 0x3a9   : > { %v1497_v53 = vld [vmem:[%s17463_s22 + $0x2608] sm:$0xff]  ;;  %v16052_v57 = vcombine.high %v1484_v50, %v1496_v51  ;;  %v16051_v1 = vcombine.low %v1484_v50, %v1496_v51 }
 0x3aa   : > { %v16054_v58 = vcombine.high %v1485_v52, %v1497_v53  ;;  %v16053_v2 = vcombine.low %v1485_v52, %v1497_v53 }
 0x3ab   : > { %12808 = vmatpush1.bf16.msra.mxu0 %v15883_v54  ;;  %13013 = vmatpush1.bf16.msra.mxu1 %v15885_v61  ;;  %v1508_v54 = vld [vmem:[%s17463_s22 + $0x2660] sm:$0xff] }
 0x3ac   : > { %12809 = vmatprep.subr.bf16.mxu0 %v15908_v62  ;;  %13014 = vmatprep.subr.bf16.mxu1 %v15910_v63  ;;  %v1520_v61 = vld [vmem:[%s17463_s22 + $0x26c0] sm:$0xff]  ;;  %v1509_v62 = vld [vmem:[%s17463_s22 + $0x2668] sm:$0xff] }
 0x3ad   : > { %v1521_v63 = vld [vmem:[%s17463_s22 + $0x26c8] sm:$0xff]  ;;  %v16076_v3 = vcombine.high %v1508_v54, %v1520_v61  ;;  %v16075_v9 = vcombine.low %v1508_v54, %v1520_v61  ;;  %v1640_v54 = vld [vmem:[%s17463_s22 + $0x2a80] sm:$0xff] }
 0x3ae   : > { %v16078_v4 = vcombine.high %v1509_v62, %v1521_v63  ;;  %v16077_v12 = vcombine.low %v1509_v62, %v1521_v63  ;;  %v1629_v62 = vld [vmem:[%s17463_s22 + $0x2a28] sm:$0xff] }
 0x3af   : > { %12810 = vmatpush1.bf16.msra.mxu0 %v15907_v5  ;;  %13015 = vmatpush1.bf16.msra.mxu1 %v15909_v30  ;;  %v1532_v5 = vld [vmem:[%s17463_s22 + $0x2720] sm:$0xff]  ;;  %v1641_v63 = vld [vmem:[%s17463_s22 + $0x2a88] sm:$0xff] }
 0x3b0   : > { %12811 = vmatprep.subr.bf16.mxu0 %v15932_v7  ;;  %13016 = vmatprep.subr.bf16.mxu1 %v15934_v8  ;;  %v1544_v30 = vld [vmem:[%s17463_s22 + $0x2780] sm:$0xff]  ;;  %v1533_v7 = vld [vmem:[%s17463_s22 + $0x2728] sm:$0xff] }
 0x3b1   : > { %v1545_v8 = vld [vmem:[%s17463_s22 + $0x2788] sm:$0xff]  ;;  %v16100_v13 = vcombine.high %v1532_v5, %v1544_v30  ;;  %v16099_v20 = vcombine.low %v1532_v5, %v1544_v30  ;;  %v16198_v30 = vcombine.high %v1629_v62, %v1641_v63 }
 0x3b2   : > { %v16102_v14 = vcombine.high %v1533_v7, %v1545_v8  ;;  %v16101_v21 = vcombine.low %v1533_v7, %v1545_v8  ;;  %v1652_v7 = vld [vmem:[%s17463_s22 + $0x2ae0] sm:$0xff] }
 0x3b3   : > { %12812 = vmatpush1.bf16.msra.mxu0 %v15931_v15  ;;  %13017 = vmatpush1.bf16.msra.mxu1 %v15933_v16  ;;  %v1556_v15 = vld [vmem:[%s17463_s22 + $0x27e0] sm:$0xff] }
 0x3b4   : > { %12813 = vmatprep.subr.bf16.mxu0 %v15956_v17  ;;  %13018 = vmatprep.subr.bf16.mxu1 %v15958_v18  ;;  %v1568_v16 = vld [vmem:[%s17463_s22 + $0x2840] sm:$0xff]  ;;  %v1557_v17 = vld [vmem:[%s17463_s22 + $0x27e8] sm:$0xff] }
 0x3b5   : > { %v1569_v18 = vld [vmem:[%s17463_s22 + $0x2848] sm:$0xff]  ;;  %v16124_v22 = vcombine.high %v1556_v15, %v1568_v16  ;;  %v16123_v60 = vcombine.low %v1556_v15, %v1568_v16  ;;  %v1664_v8 = vld [vmem:[%s17463_s22 + $0x2b40] sm:$0xff]  ;;  %v16197_v15 = vcombine.low %v1629_v62, %v1641_v63 }
 0x3b6   : > { %v16126_v23 = vcombine.high %v1557_v17, %v1569_v18  ;;  %v16125_v31 = vcombine.low %v1557_v17, %v1569_v18  ;;  %v16220_v16 = vcombine.high %v1652_v7, %v1664_v8  ;;  %v1676_v18 = vld [vmem:[%s17463_s22 + $0x2ba0] sm:$0xff]  ;;  %v1785_v62 = vld [vmem:[%s17463_s22 + $0x2f08] sm:$0xff] }
 0x3b7   : > { %12814 = vmatpush1.bf16.msra.mxu0 %v15955_v25  ;;  %13019 = vmatpush1.bf16.msra.mxu1 %v15957_v26  ;;  %v1580_v25 = vld [vmem:[%s17463_s22 + $0x28a0] sm:$0xff] }
 0x3b8   : > { %12815 = vmatprep.subr.bf16.mxu0 %v15980_v27  ;;  %13020 = vmatprep.subr.bf16.mxu1 %v15982_v28  ;;  %v1592_v26 = vld [vmem:[%s17463_s22 + $0x2900] sm:$0xff]  ;;  %v1581_v27 = vld [vmem:[%s17463_s22 + $0x28a8] sm:$0xff] }
 0x3b9   : > { %v1593_v28 = vld [vmem:[%s17463_s22 + $0x2908] sm:$0xff]  ;;  %v16148_v32 = vcombine.high %v1580_v25, %v1592_v26 }
 0x3ba   : > { %v16149_v52 = vcombine.low %v1581_v27, %v1593_v28 }
 0x3bb   : > { %12816 = vmatpush1.bf16.msra.mxu0 %v15979_v34  ;;  %13021 = vmatpush1.bf16.msra.mxu1 %v15981_v35  ;;  %v16150_v34 = vcombine.high %v1581_v27, %v1593_v28  ;;  %v1604_v35 = vld [vmem:[%s17463_s22 + $0x2960] sm:$0xff] }
 0x3bc   : > { %12826 = vmatprep.subr.bf16.mxu0 %v16004_v36  ;;  %13031 = vmatprep.subr.bf16.mxu1 %v16006_v37  ;;  %v1616_v36 = vld [vmem:[%s17463_s22 + $0x29c0] sm:$0xff] }
 0x3bd   : > { %v16172_v53 = vcombine.high %v1604_v35, %v1616_v36  ;;  %v1700_v28 = vld [vmem:[%s17463_s22 + $0x2c60] sm:$0xff] }
 0x3be   : > { %12818 = vmatmul.mubr.bf16.vlgmr.msra.gmra.mrb[8].mxu0 %v17723_v59  ;;  %13023 = vmatmul.mubr.bf16.vlgmr.msra.gmra.mrb[8].mxu1 %v17723_v59 }
 0x3bf   : > { %12827 = vmatpush1.bf16.msra.mxu0 %v16003_v43  ;;  %13032 = vmatpush1.bf16.msra.mxu1 %v16005_v44 }
 0x3c0   : > { %12828 = vmatprep.subr.bf16.mxu0 %v16028_v46  ;;  %13033 = vmatprep.subr.bf16.mxu1 %v16030_v47  ;;  %v16147_v46 = vcombine.low %v1580_v25, %v1592_v26 }
 0x3c1   : > { %12858 = vmatprep.mubr.bf16.mxu0 %v17731_v6  ;;  %13063 = vmatprep.mubr.bf16.mxu1 %v17731_v6 }
 0x3c3   : > { %12829 = vmatpush1.bf16.msra.mxu0 %v16027_v55  ;;  %13034 = vmatpush1.bf16.msra.mxu1 %v16029_v56 }
 0x3c4   : > { %12830 = vmatprep.subr.bf16.mxu0 %v16052_v57  ;;  %13035 = vmatprep.subr.bf16.mxu1 %v16054_v58  ;;  %v16174_v57 = vcombine.high %v1605_v40, %v1617_v41  ;;  %v1628_v58 = vld [vmem:[%s17463_s22 + $0x2a20] sm:$0xff] }
 0x3c5   : > { %v16196_v5 = vcombine.high %v1628_v58, %v1640_v54 }
 0x3c7   : > { %12831 = vmatpush1.bf16.msra.mxu0 %v16051_v1  ;;  %13036 = vmatpush1.bf16.msra.mxu1 %v16053_v2  ;;  %v273_v1 = vld [vmem:[#allocation2 + $0x8] sm:$0xff]  ;;  %v16171_v2 = vcombine.low %v1604_v35, %v1616_v36 }
 0x3c8   : > { %12832 = vmatprep.subr.bf16.mxu0 %v16076_v3  ;;  %13037 = vmatprep.subr.bf16.mxu1 %v16078_v4  ;;  %v16173_v4 = vcombine.low %v1605_v40, %v1617_v41  ;;  %v1725_v40 = vld [vmem:[%s17463_s22 + $0x2d28] sm:$0xff] }
 0x3c9   : > { %v1737_v41 = vld [vmem:[%s17463_s22 + $0x2d88] sm:$0xff] }
 0x3cb   : > { %12833 = vmatpush1.bf16.msra.mxu0 %v16075_v9  ;;  %13038 = vmatpush1.bf16.msra.mxu1 %v16077_v12  ;;  %v1653_v12 = vld [vmem:[%s17463_s22 + $0x2ae8] sm:$0xff] }
 0x3cc   : > { %12834 = vmatprep.subr.bf16.mxu0 %v16100_v13  ;;  %13039 = vmatprep.subr.bf16.mxu1 %v16102_v14  ;;  %v1665_v13 = vld [vmem:[%s17463_s22 + $0x2b48] sm:$0xff]  ;;  %v16195_v14 = vcombine.low %v1628_v58, %v1640_v54  ;;  %v1772_v58 = vld [vmem:[%s17463_s22 + $0x2ea0] sm:$0xff] }
 0x3cd   : > { %v16222_v17 = vcombine.high %v1653_v12, %v1665_v13  ;;  %v16221_v25 = vcombine.low %v1653_v12, %v1665_v13  ;;  %v1784_v54 = vld [vmem:[%s17463_s22 + $0x2f00] sm:$0xff] }
 0x3cf   : > { %12835 = vmatpush1.bf16.msra.mxu0 %v16099_v20  ;;  %13040 = vmatpush1.bf16.msra.mxu1 %v16101_v21  ;;  %v1688_v20 = vld [vmem:[%s17463_s22 + $0x2c00] sm:$0xff]  ;;  %v1677_v21 = vld [vmem:[%s17463_s22 + $0x2ba8] sm:$0xff] }
 0x3d0   : > { %12836 = vmatprep.subr.bf16.mxu0 %v16124_v22  ;;  %13041 = vmatprep.subr.bf16.mxu1 %v16126_v23  ;;  %v1689_v22 = vld [vmem:[%s17463_s22 + $0x2c08] sm:$0xff]  ;;  %v16219_v23 = vcombine.low %v1652_v7, %v1664_v8  ;;  %v16244_v26 = vcombine.high %v1676_v18, %v1688_v20  ;;  %v16339_v8 = vcombine.low %v1772_v58, %v1784_v54 }
 0x3d1   : > { %v12491_v0 = vpop.f32.mrb[4].mxu0  ;;  %v12696_v37 = vpop.f32.mrb[4].mxu1  ;;  %v16246_v27 = vcombine.high %v1677_v21, %v1689_v22  ;;  %v1809_v7 = vld [vmem:[%s17463_s22 + $0x2fc8] sm:$0xff] }
 0x3d2   : > { %v12493_v38 = vpop.f32.mrb[5].mxu0  ;;  %v12698_v43 = vpop.f32.mrb[5].mxu1 }
 0x3d3   : > { %v14384_v42 = vcombine.low %v12491_v0, %v12493_v38  ;;  %v12495_v44 = vpop.f32.mrb[6].mxu0  ;;  %12837 = vmatpush1.bf16.msra.mxu0 %v16123_v60  ;;  %v14385_v47 = vcombine.low %v12696_v37, %v12698_v43  ;;  %v12700_v50 = vpop.f32.mrb[6].mxu1  ;;  %13042 = vmatpush1.bf16.msra.mxu1 %v16125_v31  ;;  %v1712_v60 = vld [vmem:[%s17463_s22 + $0x2cc0] sm:$0xff]  ;;  %v1701_v31 = vld [vmem:[%s17463_s22 + $0x2c68] sm:$0xff]  ;;  %v16243_v0 = vcombine.low %v1676_v18, %v1688_v20 }
 0x3d4   : > { %v12496_v51 = vpop.f32.mrb[7].mxu0  ;;  %12838 = vmatprep.subr.bf16.mxu0 %v16148_v32  ;;  %v12701_v56 = vpop.f32.mrb[7].mxu1  ;;  %13043 = vmatprep.subr.bf16.mxu1 %v16150_v34  ;;  %v1713_v32 = vld [vmem:[%s17463_s22 + $0x2cc8] sm:$0xff]  ;;  %v16245_v34 = vcombine.low %v1677_v21, %v1689_v22  ;;  %v16268_v35 = vcombine.high %v1700_v28, %v1712_v60  ;;  %v1724_v37 = vld [vmem:[%s17463_s22 + $0x2d20] sm:$0xff] }
 0x3d5   : > { %v14392_v55 = vrot.slane %v14384_v42, %v18112_v11  ;;  %v14399_v61 = vrot.slane %v14385_v47, %v18112_v11  ;;  %v16270_v36 = vcombine.high %v1701_v31, %v1713_v32  ;;  %v1736_v38 = vld [vmem:[%s17463_s22 + $0x2d80] sm:$0xff]  ;;  %v16267_v42 = vcombine.low %v1700_v28, %v1712_v60  ;;  %v1749_v51 = vld [vmem:[%s17463_s22 + $0x2de8] sm:$0xff] }
 0x3d6   : > { %v16269_v43 = vcombine.low %v1701_v31, %v1713_v32  ;;  %v16292_v44 = vcombine.high %v1724_v37, %v1736_v38  ;;  %v1748_v47 = vld [vmem:[%s17463_s22 + $0x2de0] sm:$0xff] }
 0x3d7   : > { %12839 = vmatpush1.bf16.msra.mxu0 %v16147_v46  ;;  %v14400_v3 = vcombine.low %v14392_v55, %v14399_v61  ;;  %13044 = vmatpush1.bf16.msra.mxu1 %v16149_v52  ;;  %v16294_v46 = vcombine.high %v1725_v40, %v1737_v41  ;;  %v1760_v50 = vld [vmem:[%s17463_s22 + $0x2e40] sm:$0xff]  ;;  %v1761_v52 = vld [vmem:[%s17463_s22 + $0x2e48] sm:$0xff]  ;;  %v16293_v55 = vcombine.low %v1725_v40, %v1737_v41 }
 0x3d8   : > { %12840 = vmatprep.subr.bf16.mxu0 %v16172_v53  ;;  %13045 = vmatprep.subr.bf16.mxu1 %v16174_v57  ;;  %v16291_v53 = vcombine.low %v1724_v37, %v1736_v38  ;;  %v16316_v56 = vcombine.high %v1748_v47, %v1760_v50  ;;  %v16318_v57 = vcombine.high %v1749_v51, %v1761_v52  ;;  %v1773_v61 = vld [vmem:[%s17463_s22 + $0x2ea8] sm:$0xff] }
 0x3d9   : > { %v14476_v9 = vadd.f32 %v14400_v3, %v273_v1  ;;  %v16315_v63 = vcombine.low %v1748_v47, %v1760_v50  ;;  %v16317_v1 = vcombine.low %v1749_v51, %v1761_v52  ;;  %v16342_v3 = vcombine.high %v1773_v61, %v1785_v62 }
 0x3db   : > { %12841 = vmatpush1.bf16.msra.mxu0 %v16171_v2  ;;  %14482 = vst [vmem:[#allocation2 + $0x8] sm:$0xff] %v14476_v9  ;;  %13046 = vmatpush1.bf16.msra.mxu1 %v16173_v4  ;;  %v16340_v2 = vcombine.high %v1772_v58, %v1784_v54  ;;  %v1796_v4 = vld [vmem:[%s17463_s22 + $0x2f60] sm:$0xff]  ;;  %v16341_v9 = vcombine.low %v1773_v61, %v1785_v62 }
 0x3dc   : > { %12842 = vmatprep.subr.bf16.mxu0 %v16196_v5  ;;  %13047 = vmatprep.subr.bf16.mxu1 %v16198_v30  ;;  %v1808_v5 = vld [vmem:[%s17463_s22 + $0x2fc0] sm:$0xff]  ;;  %v1797_v30 = vld [vmem:[%s17463_s22 + $0x2f68] sm:$0xff] }
 0x3dd   : > { %v16364_v12 = vcombine.high %v1796_v4, %v1808_v5  ;;  %v16366_v13 = vcombine.high %v1797_v30, %v1809_v7  ;;  %v16363_v18 = vcombine.low %v1796_v4, %v1808_v5  ;;  %v16365_v20 = vcombine.low %v1797_v30, %v1809_v7 }
 0x3df   : > { %12843 = vmatpush1.bf16.msra.mxu0 %v16195_v14  ;;  %13048 = vmatpush1.bf16.msra.mxu1 %v16197_v15  ;;  %v1820_v14 = vld [vmem:[%s17463_s22 + $0x3020] sm:$0xff] }
 0x3e0   : > { %12844 = vmatprep.subr.bf16.mxu0 %v16220_v16  ;;  %13049 = vmatprep.subr.bf16.mxu1 %v16222_v17  ;;  %v1832_v15 = vld [vmem:[%s17463_s22 + $0x3080] sm:$0xff]  ;;  %v1821_v16 = vld [vmem:[%s17463_s22 + $0x3028] sm:$0xff] }
 0x3e1   : > { %v1833_v17 = vld [vmem:[%s17463_s22 + $0x3088] sm:$0xff]  ;;  %v16388_v21 = vcombine.high %v1820_v14, %v1832_v15  ;;  %v16387_v28 = vcombine.low %v1820_v14, %v1832_v15 }
 0x3e2   : > { %v16390_v22 = vcombine.high %v1821_v16, %v1833_v17  ;;  %v16389_v60 = vcombine.low %v1821_v16, %v1833_v17 }
 0x3e3   : > { %12845 = vmatpush1.bf16.msra.mxu0 %v16219_v23  ;;  %13050 = vmatpush1.bf16.msra.mxu1 %v16221_v25  ;;  %v1844_v23 = vld [vmem:[%s17463_s22 + $0x30e0] sm:$0xff] }
 0x3e4   : > { %12846 = vmatprep.subr.bf16.mxu0 %v16244_v26  ;;  %13051 = vmatprep.subr.bf16.mxu1 %v16246_v27  ;;  %v1856_v25 = vld [vmem:[%s17463_s22 + $0x3140] sm:$0xff]  ;;  %v1845_v26 = vld [vmem:[%s17463_s22 + $0x30e8] sm:$0xff] }
 0x3e5   : > { %v1857_v27 = vld [vmem:[%s17463_s22 + $0x3148] sm:$0xff]  ;;  %v16412_v31 = vcombine.high %v1844_v23, %v1856_v25  ;;  %v16411_v37 = vcombine.low %v1844_v23, %v1856_v25 }
 0x3e6   : > { %v16414_v32 = vcombine.high %v1845_v26, %v1857_v27  ;;  %v16413_v38 = vcombine.low %v1845_v26, %v1857_v27 }
 0x3e7   : > { %12847 = vmatpush1.bf16.msra.mxu0 %v16243_v0  ;;  %13052 = vmatpush1.bf16.msra.mxu1 %v16245_v34  ;;  %v1868_v0 = vld [vmem:[%s17463_s22 + $0x31a0] sm:$0xff] }
 0x3e8   : > { %12848 = vmatprep.subr.bf16.mxu0 %v16268_v35  ;;  %13053 = vmatprep.subr.bf16.mxu1 %v16270_v36  ;;  %v1880_v34 = vld [vmem:[%s17463_s22 + $0x3200] sm:$0xff]  ;;  %v1869_v35 = vld [vmem:[%s17463_s22 + $0x31a8] sm:$0xff] }
 0x3e9   : > { %v1881_v36 = vld [vmem:[%s17463_s22 + $0x3208] sm:$0xff]  ;;  %v16436_v40 = vcombine.high %v1868_v0, %v1880_v34  ;;  %v16435_v47 = vcombine.low %v1868_v0, %v1880_v34 }
 0x3ea   : > { %v16438_v41 = vcombine.high %v1869_v35, %v1881_v36  ;;  %v16437_v50 = vcombine.low %v1869_v35, %v1881_v36 }
 0x3eb   : > { %12849 = vmatpush1.bf16.msra.mxu0 %v16267_v42  ;;  %13054 = vmatpush1.bf16.msra.mxu1 %v16269_v43  ;;  %v1892_v42 = vld [vmem:[%s17463_s22 + $0x3260] sm:$0xff] }
 0x3ec   : > { %12850 = vmatprep.subr.bf16.mxu0 %v16292_v44  ;;  %13055 = vmatprep.subr.bf16.mxu1 %v16294_v46  ;;  %v1904_v43 = vld [vmem:[%s17463_s22 + $0x32c0] sm:$0xff]  ;;  %v1893_v44 = vld [vmem:[%s17463_s22 + $0x3268] sm:$0xff] }
 0x3ed   : > { %v1905_v46 = vld [vmem:[%s17463_s22 + $0x32c8] sm:$0xff]  ;;  %v16460_v51 = vcombine.high %v1892_v42, %v1904_v43  ;;  %v16459_v58 = vcombine.low %v1892_v42, %v1904_v43 }
 0x3ee   : > { %v16462_v52 = vcombine.high %v1893_v44, %v1905_v46  ;;  %v16461_v54 = vcombine.low %v1893_v44, %v1905_v46 }
 0x3ef   : > { %12851 = vmatpush1.bf16.msra.mxu0 %v16291_v53  ;;  %13056 = vmatpush1.bf16.msra.mxu1 %v16293_v55  ;;  %v1916_v53 = vld [vmem:[%s17463_s22 + $0x3320] sm:$0xff] }
 0x3f0   : > { %12852 = vmatprep.subr.bf16.mxu0 %v16316_v56  ;;  %13057 = vmatprep.subr.bf16.mxu1 %v16318_v57  ;;  %v1928_v55 = vld [vmem:[%s17463_s22 + $0x3380] sm:$0xff]  ;;  %v1917_v56 = vld [vmem:[%s17463_s22 + $0x3328] sm:$0xff] }
 0x3f1   : > { %v1929_v57 = vld [vmem:[%s17463_s22 + $0x3388] sm:$0xff]  ;;  %v16484_v61 = vcombine.high %v1916_v53, %v1928_v55  ;;  %v16483_v4 = vcombine.low %v1916_v53, %v1928_v55 }
 0x3f2   : > { %v16486_v62 = vcombine.high %v1917_v56, %v1929_v57  ;;  %v16485_v5 = vcombine.low %v1917_v56, %v1929_v57 }
 0x3f3   : > { %12853 = vmatpush1.bf16.msra.mxu0 %v16315_v63  ;;  %13058 = vmatpush1.bf16.msra.mxu1 %v16317_v1  ;;  %v1940_v63 = vld [vmem:[%s17463_s22 + $0x33e0] sm:$0xff] }
 0x3f4   : > { %12854 = vmatprep.subr.bf16.mxu0 %v16340_v2  ;;  %13059 = vmatprep.subr.bf16.mxu1 %v16342_v3  ;;  %v1952_v1 = vld [vmem:[%s17463_s22 + $0x3440] sm:$0xff]  ;;  %v1941_v2 = vld [vmem:[%s17463_s22 + $0x33e8] sm:$0xff] }
 0x3f5   : > { %v1953_v3 = vld [vmem:[%s17463_s22 + $0x3448] sm:$0xff]  ;;  %v16508_v30 = vcombine.high %v1940_v63, %v1952_v1  ;;  %v16507_v14 = vcombine.low %v1940_v63, %v1952_v1 }
 0x3f6   : > { %v16510_v7 = vcombine.high %v1941_v2, %v1953_v3  ;;  %v16509_v15 = vcombine.low %v1941_v2, %v1953_v3 }
 0x3f7   : > { %12855 = vmatpush1.bf16.msra.mxu0 %v16339_v8  ;;  %13060 = vmatpush1.bf16.msra.mxu1 %v16341_v9  ;;  %v1964_v8 = vld [vmem:[%s17463_s22 + $0x34a0] sm:$0xff] }
 0x3f8   : > { %12856 = vmatprep.subr.bf16.mxu0 %v16364_v12  ;;  %13061 = vmatprep.subr.bf16.mxu1 %v16366_v13  ;;  %v1976_v9 = vld [vmem:[%s17463_s22 + $0x3500] sm:$0xff]  ;;  %v1965_v12 = vld [vmem:[%s17463_s22 + $0x34a8] sm:$0xff] }
 0x3f9   : > { %v1977_v13 = vld [vmem:[%s17463_s22 + $0x3508] sm:$0xff]  ;;  %v16532_v16 = vcombine.high %v1964_v8, %v1976_v9  ;;  %v16531_v23 = vcombine.low %v1964_v8, %v1976_v9 }
 0x3fa   : > { %v16534_v17 = vcombine.high %v1965_v12, %v1977_v13  ;;  %v16533_v25 = vcombine.low %v1965_v12, %v1977_v13 }
 0x3fb   : > { %12857 = vmatpush1.bf16.msra.mxu0 %v16363_v18  ;;  %13062 = vmatpush1.bf16.msra.mxu1 %v16365_v20  ;;  %v1988_v18 = vld [vmem:[%s17463_s22 + $0x3560] sm:$0xff] }
 0x3fc   : > { %12867 = vmatprep.subr.bf16.mxu0 %v16388_v21  ;;  %13072 = vmatprep.subr.bf16.mxu1 %v16390_v22  ;;  %v2000_v20 = vld [vmem:[%s17463_s22 + $0x35c0] sm:$0xff]  ;;  %v1989_v21 = vld [vmem:[%s17463_s22 + $0x3568] sm:$0xff] }
 0x3fd   : > { %v2001_v22 = vld [vmem:[%s17463_s22 + $0x35c8] sm:$0xff]  ;;  %v16556_v26 = vcombine.high %v1988_v18, %v2000_v20  ;;  %v16555_v0 = vcombine.low %v1988_v18, %v2000_v20 }
 0x3fe   : > { %12859 = vmatmul.mubr.bf16.vlgmr.msra.gmra.mrb[8].mxu0 %v17804_v19  ;;  %13064 = vmatmul.mubr.bf16.vlgmr.msra.gmra.mrb[8].mxu1 %v17804_v19  ;;  %v16558_v27 = vcombine.high %v1989_v21, %v2001_v22  ;;  %v16557_v34 = vcombine.low %v1989_v21, %v2001_v22 }
 0x3ff   : > { %12868 = vmatpush1.bf16.msra.mxu0 %v16387_v28  ;;  %13073 = vmatpush1.bf16.msra.mxu1 %v16389_v60  ;;  %v2012_v28 = vld [vmem:[%s17463_s22 + $0x3620] sm:$0xff] }
 0x400   : > { %12869 = vmatprep.subr.bf16.mxu0 %v16412_v31  ;;  %13074 = vmatprep.subr.bf16.mxu1 %v16414_v32  ;;  %v2024_v60 = vld [vmem:[%s17463_s22 + $0x3680] sm:$0xff]  ;;  %v2013_v31 = vld [vmem:[%s17463_s22 + $0x3628] sm:$0xff] }
 0x401   : > { %12899 = vmatprep.mubr.bf16.mxu0 %v17811_v29  ;;  %13104 = vmatprep.mubr.bf16.mxu1 %v17811_v29  ;;  %v2025_v32 = vld [vmem:[%s17463_s22 + $0x3688] sm:$0xff]  ;;  %v16580_v35 = vcombine.high %v2012_v28, %v2024_v60  ;;  %v16579_v42 = vcombine.low %v2012_v28, %v2024_v60 }
 0x402   : > { %v16582_v36 = vcombine.high %v2013_v31, %v2025_v32  ;;  %v16581_v43 = vcombine.low %v2013_v31, %v2025_v32 }
 0x403   : > { %12870 = vmatpush1.bf16.msra.mxu0 %v16411_v37  ;;  %13075 = vmatpush1.bf16.msra.mxu1 %v16413_v38  ;;  %v2036_v37 = vld [vmem:[%s17463_s22 + $0x36e0] sm:$0xff] }
 0x404   : > { %12871 = vmatprep.subr.bf16.mxu0 %v16436_v40  ;;  %13076 = vmatprep.subr.bf16.mxu1 %v16438_v41  ;;  %v2048_v38 = vld [vmem:[%s17463_s22 + $0x3740] sm:$0xff]  ;;  %v2037_v40 = vld [vmem:[%s17463_s22 + $0x36e8] sm:$0xff] }
 0x405   : > { %v2049_v41 = vld [vmem:[%s17463_s22 + $0x3748] sm:$0xff]  ;;  %v16604_v44 = vcombine.high %v2036_v37, %v2048_v38  ;;  %v16603_v53 = vcombine.low %v2036_v37, %v2048_v38 }
 0x406   : > { %v16606_v46 = vcombine.high %v2037_v40, %v2049_v41  ;;  %v16605_v55 = vcombine.low %v2037_v40, %v2049_v41 }
 0x407   : > { %12872 = vmatpush1.bf16.msra.mxu0 %v16435_v47  ;;  %13077 = vmatpush1.bf16.msra.mxu1 %v16437_v50  ;;  %v2060_v47 = vld [vmem:[%s17463_s22 + $0x37a0] sm:$0xff] }
 0x408   : > { %12873 = vmatprep.subr.bf16.mxu0 %v16460_v51  ;;  %13078 = vmatprep.subr.bf16.mxu1 %v16462_v52  ;;  %v2072_v50 = vld [vmem:[%s17463_s22 + $0x3800] sm:$0xff]  ;;  %v2061_v51 = vld [vmem:[%s17463_s22 + $0x37a8] sm:$0xff] }
 0x409   : > { %v2073_v52 = vld [vmem:[%s17463_s22 + $0x3808] sm:$0xff]  ;;  %v16628_v56 = vcombine.high %v2060_v47, %v2072_v50  ;;  %v16627_v63 = vcombine.low %v2060_v47, %v2072_v50 }
 0x40a   : > { %v16630_v57 = vcombine.high %v2061_v51, %v2073_v52  ;;  %v16629_v1 = vcombine.low %v2061_v51, %v2073_v52 }
 0x40b   : > { %12874 = vmatpush1.bf16.msra.mxu0 %v16459_v58  ;;  %13079 = vmatpush1.bf16.msra.mxu1 %v16461_v54  ;;  %v2084_v58 = vld [vmem:[%s17463_s22 + $0x3860] sm:$0xff] }
 0x40c   : > { %12875 = vmatprep.subr.bf16.mxu0 %v16484_v61  ;;  %13080 = vmatprep.subr.bf16.mxu1 %v16486_v62  ;;  %v2096_v54 = vld [vmem:[%s17463_s22 + $0x38c0] sm:$0xff]  ;;  %v2085_v61 = vld [vmem:[%s17463_s22 + $0x3868] sm:$0xff] }
 0x40d   : > { %v2097_v62 = vld [vmem:[%s17463_s22 + $0x38c8] sm:$0xff]  ;;  %v16652_v2 = vcombine.high %v2084_v58, %v2096_v54  ;;  %v16651_v8 = vcombine.low %v2084_v58, %v2096_v54 }
 0x40e   : > { %v16654_v3 = vcombine.high %v2085_v61, %v2097_v62  ;;  %v16653_v9 = vcombine.low %v2085_v61, %v2097_v62 }
 0x40f   : > { %12876 = vmatpush1.bf16.msra.mxu0 %v16483_v4  ;;  %13081 = vmatpush1.bf16.msra.mxu1 %v16485_v5  ;;  %v2108_v4 = vld [vmem:[%s17463_s22 + $0x3920] sm:$0xff] }
 0x410   : > { %12877 = vmatprep.subr.bf16.mxu0 %v16508_v30  ;;  %13082 = vmatprep.subr.bf16.mxu1 %v16510_v7  ;;  %v2120_v5 = vld [vmem:[%s17463_s22 + $0x3980] sm:$0xff]  ;;  %v2109_v30 = vld [vmem:[%s17463_s22 + $0x3928] sm:$0xff] }
 0x411   : > { %v2121_v7 = vld [vmem:[%s17463_s22 + $0x3988] sm:$0xff]  ;;  %v16676_v12 = vcombine.high %v2108_v4, %v2120_v5  ;;  %v16675_v18 = vcombine.low %v2108_v4, %v2120_v5 }
 0x412   : > { %v16678_v13 = vcombine.high %v2109_v30, %v2121_v7  ;;  %v16677_v20 = vcombine.low %v2109_v30, %v2121_v7 }
 0x413   : > { %12878 = vmatpush1.bf16.msra.mxu0 %v16507_v14  ;;  %13083 = vmatpush1.bf16.msra.mxu1 %v16509_v15  ;;  %v2132_v14 = vld [vmem:[%s17463_s22 + $0x39e0] sm:$0xff] }
 0x414   : > { %12879 = vmatprep.subr.bf16.mxu0 %v16532_v16  ;;  %13084 = vmatprep.subr.bf16.mxu1 %v16534_v17  ;;  %v2144_v15 = vld [vmem:[%s17463_s22 + $0x3a40] sm:$0xff]  ;;  %v2133_v16 = vld [vmem:[%s17463_s22 + $0x39e8] sm:$0xff] }
 0x415   : > { %v2145_v17 = vld [vmem:[%s17463_s22 + $0x3a48] sm:$0xff]  ;;  %v16700_v21 = vcombine.high %v2132_v14, %v2144_v15  ;;  %v16699_v28 = vcombine.low %v2132_v14, %v2144_v15 }
 0x416   : > { %v16702_v22 = vcombine.high %v2133_v16, %v2145_v17  ;;  %v16701_v60 = vcombine.low %v2133_v16, %v2145_v17 }
 0x417   : > { %12880 = vmatpush1.bf16.msra.mxu0 %v16531_v23  ;;  %13085 = vmatpush1.bf16.msra.mxu1 %v16533_v25  ;;  %v2156_v23 = vld [vmem:[%s17463_s22 + $0x3aa0] sm:$0xff] }
 0x418   : > { %12881 = vmatprep.subr.bf16.mxu0 %v16556_v26  ;;  %13086 = vmatprep.subr.bf16.mxu1 %v16558_v27  ;;  %v2168_v25 = vld [vmem:[%s17463_s22 + $0x3b00] sm:$0xff]  ;;  %v2157_v26 = vld [vmem:[%s17463_s22 + $0x3aa8] sm:$0xff] }
 0x419   : > { %v2169_v27 = vld [vmem:[%s17463_s22 + $0x3b08] sm:$0xff]  ;;  %v16724_v31 = vcombine.high %v2156_v23, %v2168_v25  ;;  %v16723_v37 = vcombine.low %v2156_v23, %v2168_v25 }
 0x41a   : > { %v16726_v32 = vcombine.high %v2157_v26, %v2169_v27  ;;  %v16725_v38 = vcombine.low %v2157_v26, %v2169_v27 }
 0x41b   : > { %12882 = vmatpush1.bf16.msra.mxu0 %v16555_v0  ;;  %13087 = vmatpush1.bf16.msra.mxu1 %v16557_v34  ;;  %v2180_v0 = vld [vmem:[%s17463_s22 + $0x3b60] sm:$0xff] }
 0x41c   : > { %12883 = vmatprep.subr.bf16.mxu0 %v16580_v35  ;;  %13088 = vmatprep.subr.bf16.mxu1 %v16582_v36  ;;  %v2192_v34 = vld [vmem:[%s17463_s22 + $0x3bc0] sm:$0xff]  ;;  %v2181_v35 = vld [vmem:[%s17463_s22 + $0x3b68] sm:$0xff] }
 0x41d   : > { %v2193_v36 = vld [vmem:[%s17463_s22 + $0x3bc8] sm:$0xff]  ;;  %v16748_v40 = vcombine.high %v2180_v0, %v2192_v34  ;;  %v16747_v47 = vcombine.low %v2180_v0, %v2192_v34 }
 0x41e   : > { %v16750_v41 = vcombine.high %v2181_v35, %v2193_v36  ;;  %v16749_v50 = vcombine.low %v2181_v35, %v2193_v36 }
 0x41f   : > { %12884 = vmatpush1.bf16.msra.mxu0 %v16579_v42  ;;  %13089 = vmatpush1.bf16.msra.mxu1 %v16581_v43  ;;  %v286_v42 = vld [vmem:[%s17463_s22 + $0x30] sm:$0xff] }
 0x420   : > { %12885 = vmatprep.subr.bf16.mxu0 %v16604_v44  ;;  %13090 = vmatprep.subr.bf16.mxu1 %v16606_v46  ;;  %v298_v43 = vld [vmem:[%s17463_s22 + $0x90] sm:$0xff]  ;;  %v287_v44 = vld [vmem:[%s17463_s22 + $0x38] sm:$0xff] }
 0x421   : > { %v299_v46 = vld [vmem:[%s17463_s22 + $0x98] sm:$0xff]  ;;  %v14856_v51 = vcombine.high %v286_v42, %v298_v43  ;;  %v14855_v58 = vcombine.low %v286_v42, %v298_v43 }
 0x422   : > { %v14858_v52 = vcombine.high %v287_v44, %v299_v46  ;;  %v14857_v54 = vcombine.low %v287_v44, %v299_v46 }
 0x423   : > { %12886 = vmatpush1.bf16.msra.mxu0 %v16603_v53  ;;  %13091 = vmatpush1.bf16.msra.mxu1 %v16605_v55  ;;  %v310_v53 = vld [vmem:[%s17463_s22 + $0xf0] sm:$0xff] }
 0x424   : > { %12887 = vmatprep.subr.bf16.mxu0 %v16628_v56  ;;  %13092 = vmatprep.subr.bf16.mxu1 %v16630_v57  ;;  %v322_v55 = vld [vmem:[%s17463_s22 + $0x150] sm:$0xff]  ;;  %v311_v56 = vld [vmem:[%s17463_s22 + $0xf8] sm:$0xff] }
 0x425   : > { %v323_v57 = vld [vmem:[%s17463_s22 + $0x158] sm:$0xff]  ;;  %v14880_v61 = vcombine.high %v310_v53, %v322_v55  ;;  %v14879_v4 = vcombine.low %v310_v53, %v322_v55 }
 0x426   : > { %v14882_v62 = vcombine.high %v311_v56, %v323_v57  ;;  %v14881_v5 = vcombine.low %v311_v56, %v323_v57 }
 0x427   : > { %12888 = vmatpush1.bf16.msra.mxu0 %v16627_v63  ;;  %13093 = vmatpush1.bf16.msra.mxu1 %v16629_v1  ;;  %v334_v63 = vld [vmem:[%s17463_s22 + $0x1b0] sm:$0xff] }
 0x428   : > { %12889 = vmatprep.subr.bf16.mxu0 %v16652_v2  ;;  %13094 = vmatprep.subr.bf16.mxu1 %v16654_v3  ;;  %v346_v1 = vld [vmem:[%s17463_s22 + $0x210] sm:$0xff]  ;;  %v335_v2 = vld [vmem:[%s17463_s22 + $0x1b8] sm:$0xff] }
 0x429   : > { %v347_v3 = vld [vmem:[%s17463_s22 + $0x218] sm:$0xff]  ;;  %v14904_v30 = vcombine.high %v334_v63, %v346_v1  ;;  %v14903_v14 = vcombine.low %v334_v63, %v346_v1 }
 0x42a   : > { %v14906_v7 = vcombine.high %v335_v2, %v347_v3  ;;  %v14905_v15 = vcombine.low %v335_v2, %v347_v3 }
 0x42b   : > { %12890 = vmatpush1.bf16.msra.mxu0 %v16651_v8  ;;  %13095 = vmatpush1.bf16.msra.mxu1 %v16653_v9  ;;  %v358_v8 = vld [vmem:[%s17463_s22 + $0x270] sm:$0xff] }
 0x42c   : > { %12891 = vmatprep.subr.bf16.mxu0 %v16676_v12  ;;  %13096 = vmatprep.subr.bf16.mxu1 %v16678_v13  ;;  %v370_v9 = vld [vmem:[%s17463_s22 + $0x2d0] sm:$0xff]  ;;  %v359_v12 = vld [vmem:[%s17463_s22 + $0x278] sm:$0xff] }
 0x42d   : > { %v371_v13 = vld [vmem:[%s17463_s22 + $0x2d8] sm:$0xff]  ;;  %v14928_v16 = vcombine.high %v358_v8, %v370_v9  ;;  %v14927_v23 = vcombine.low %v358_v8, %v370_v9 }
 0x42e   : > { %v14930_v17 = vcombine.high %v359_v12, %v371_v13  ;;  %v14929_v25 = vcombine.low %v359_v12, %v371_v13 }
 0x42f   : > { %12892 = vmatpush1.bf16.msra.mxu0 %v16675_v18  ;;  %13097 = vmatpush1.bf16.msra.mxu1 %v16677_v20  ;;  %v382_v18 = vld [vmem:[%s17463_s22 + $0x330] sm:$0xff] }
 0x430   : > { %12893 = vmatprep.subr.bf16.mxu0 %v16700_v21  ;;  %13098 = vmatprep.subr.bf16.mxu1 %v16702_v22  ;;  %v394_v20 = vld [vmem:[%s17463_s22 + $0x390] sm:$0xff]  ;;  %v383_v21 = vld [vmem:[%s17463_s22 + $0x338] sm:$0xff] }
 0x431   : > { %v395_v22 = vld [vmem:[%s17463_s22 + $0x398] sm:$0xff]  ;;  %v14952_v26 = vcombine.high %v382_v18, %v394_v20  ;;  %v14951_v0 = vcombine.low %v382_v18, %v394_v20 }
 0x432   : > { %v14954_v27 = vcombine.high %v383_v21, %v395_v22  ;;  %v14953_v34 = vcombine.low %v383_v21, %v395_v22 }
 0x433   : > { %12894 = vmatpush1.bf16.msra.mxu0 %v16699_v28  ;;  %13099 = vmatpush1.bf16.msra.mxu1 %v16701_v60  ;;  %v406_v28 = vld [vmem:[%s17463_s22 + $0x3f0] sm:$0xff] }
 0x434   : > { %12895 = vmatprep.subr.bf16.mxu0 %v16724_v31  ;;  %13100 = vmatprep.subr.bf16.mxu1 %v16726_v32  ;;  %v418_v60 = vld [vmem:[%s17463_s22 + $0x450] sm:$0xff]  ;;  %v407_v31 = vld [vmem:[%s17463_s22 + $0x3f8] sm:$0xff] }
 0x435   : > { %v419_v32 = vld [vmem:[%s17463_s22 + $0x458] sm:$0xff]  ;;  %v14976_v35 = vcombine.high %v406_v28, %v418_v60  ;;  %v14975_v42 = vcombine.low %v406_v28, %v418_v60 }
 0x436   : > { %v14978_v36 = vcombine.high %v407_v31, %v419_v32  ;;  %v14977_v43 = vcombine.low %v407_v31, %v419_v32 }
 0x437   : > { %12896 = vmatpush1.bf16.msra.mxu0 %v16723_v37  ;;  %13101 = vmatpush1.bf16.msra.mxu1 %v16725_v38  ;;  %v430_v37 = vld [vmem:[%s17463_s22 + $0x4b0] sm:$0xff] }
 0x438   : > { %12897 = vmatprep.subr.bf16.mxu0 %v16748_v40  ;;  %13102 = vmatprep.subr.bf16.mxu1 %v16750_v41  ;;  %v442_v38 = vld [vmem:[%s17463_s22 + $0x510] sm:$0xff]  ;;  %v431_v40 = vld [vmem:[%s17463_s22 + $0x4b8] sm:$0xff] }
 0x439   : > { %v443_v41 = vld [vmem:[%s17463_s22 + $0x518] sm:$0xff]  ;;  %v15000_v44 = vcombine.high %v430_v37, %v442_v38  ;;  %v14999_v53 = vcombine.low %v430_v37, %v442_v38 }
 0x43a   : > { %v15002_v46 = vcombine.high %v431_v40, %v443_v41  ;;  %v15001_v55 = vcombine.low %v431_v40, %v443_v41 }
 0x43b   : > { %12898 = vmatpush1.bf16.msra.mxu0 %v16747_v47  ;;  %13103 = vmatpush1.bf16.msra.mxu1 %v16749_v50  ;;  %v454_v47 = vld [vmem:[%s17463_s22 + $0x570] sm:$0xff] }
 0x43c   : > { %13113 = vmatprep.subr.bf16.mxu0 %v14856_v51  ;;  %13318 = vmatprep.subr.bf16.mxu1 %v14858_v52  ;;  %v466_v50 = vld [vmem:[%s17463_s22 + $0x5d0] sm:$0xff]  ;;  %v455_v51 = vld [vmem:[%s17463_s22 + $0x578] sm:$0xff] }
 0x43d   : > { %v467_v52 = vld [vmem:[%s17463_s22 + $0x5d8] sm:$0xff]  ;;  %v15024_v56 = vcombine.high %v454_v47, %v466_v50  ;;  %v15023_v63 = vcombine.low %v454_v47, %v466_v50 }
 0x43e   : > { %12900 = vmatmul.mubr.bf16.vlgmr.msra.gmra.mrb[8].mxu0 %v17879_v48  ;;  %13105 = vmatmul.mubr.bf16.vlgmr.msra.gmra.mrb[8].mxu1 %v17879_v48  ;;  %v15026_v57 = vcombine.high %v455_v51, %v467_v52  ;;  %v15025_v1 = vcombine.low %v455_v51, %v467_v52 }
 0x43f   : > { %13114 = vmatpush1.bf16.msra.mxu0 %v14855_v58  ;;  %13319 = vmatpush1.bf16.msra.mxu1 %v14857_v54  ;;  %v478_v58 = vld [vmem:[%s17463_s22 + $0x630] sm:$0xff] }
 0x440   : > { %13115 = vmatprep.subr.bf16.mxu0 %v14880_v61  ;;  %13320 = vmatprep.subr.bf16.mxu1 %v14882_v62  ;;  %v490_v54 = vld [vmem:[%s17463_s22 + $0x690] sm:$0xff]  ;;  %v479_v61 = vld [vmem:[%s17463_s22 + $0x638] sm:$0xff] }
 0x441   : > { %13145 = vmatprep.mubr.bf16.mxu0 %v17523_v10  ;;  %13350 = vmatprep.mubr.bf16.mxu1 %v17523_v10  ;;  %v491_v62 = vld [vmem:[%s17463_s22 + $0x698] sm:$0xff]  ;;  %v15048_v2 = vcombine.high %v478_v58, %v490_v54  ;;  %v15047_v8 = vcombine.low %v478_v58, %v490_v54 }
 0x442   : > { %v15050_v3 = vcombine.high %v479_v61, %v491_v62  ;;  %v15049_v9 = vcombine.low %v479_v61, %v491_v62 }
 0x443   : > { %13116 = vmatpush1.bf16.msra.mxu0 %v14879_v4  ;;  %13321 = vmatpush1.bf16.msra.mxu1 %v14881_v5  ;;  %v502_v4 = vld [vmem:[%s17463_s22 + $0x6f0] sm:$0xff] }
 0x444   : > { %13117 = vmatprep.subr.bf16.mxu0 %v14904_v30  ;;  %13322 = vmatprep.subr.bf16.mxu1 %v14906_v7  ;;  %v514_v5 = vld [vmem:[%s17463_s22 + $0x750] sm:$0xff]  ;;  %v503_v30 = vld [vmem:[%s17463_s22 + $0x6f8] sm:$0xff] }
 0x445   : > { %v515_v7 = vld [vmem:[%s17463_s22 + $0x758] sm:$0xff]  ;;  %v15072_v12 = vcombine.high %v502_v4, %v514_v5  ;;  %v15071_v18 = vcombine.low %v502_v4, %v514_v5 }
 0x446   : > { %v15074_v13 = vcombine.high %v503_v30, %v515_v7  ;;  %v15073_v20 = vcombine.low %v503_v30, %v515_v7 }
 0x447   : > { %13118 = vmatpush1.bf16.msra.mxu0 %v14903_v14  ;;  %13323 = vmatpush1.bf16.msra.mxu1 %v14905_v15  ;;  %v526_v14 = vld [vmem:[%s17463_s22 + $0x7b0] sm:$0xff] }
 0x448   : > { %13119 = vmatprep.subr.bf16.mxu0 %v14928_v16  ;;  %13324 = vmatprep.subr.bf16.mxu1 %v14930_v17  ;;  %v538_v15 = vld [vmem:[%s17463_s22 + $0x810] sm:$0xff]  ;;  %v527_v16 = vld [vmem:[%s17463_s22 + $0x7b8] sm:$0xff] }
 0x449   : > { %v539_v17 = vld [vmem:[%s17463_s22 + $0x818] sm:$0xff]  ;;  %v15096_v21 = vcombine.high %v526_v14, %v538_v15  ;;  %v15095_v28 = vcombine.low %v526_v14, %v538_v15 }
 0x44a   : > { %v15098_v22 = vcombine.high %v527_v16, %v539_v17  ;;  %v15097_v60 = vcombine.low %v527_v16, %v539_v17 }
 0x44b   : > { %13120 = vmatpush1.bf16.msra.mxu0 %v14927_v23  ;;  %13325 = vmatpush1.bf16.msra.mxu1 %v14929_v25  ;;  %v550_v23 = vld [vmem:[%s17463_s22 + $0x870] sm:$0xff] }
 0x44c   : > { %13121 = vmatprep.subr.bf16.mxu0 %v14952_v26  ;;  %13326 = vmatprep.subr.bf16.mxu1 %v14954_v27  ;;  %v562_v25 = vld [vmem:[%s17463_s22 + $0x8d0] sm:$0xff]  ;;  %v551_v26 = vld [vmem:[%s17463_s22 + $0x878] sm:$0xff] }
 0x44d   : > { %v563_v27 = vld [vmem:[%s17463_s22 + $0x8d8] sm:$0xff]  ;;  %v15120_v31 = vcombine.high %v550_v23, %v562_v25  ;;  %v15119_v37 = vcombine.low %v550_v23, %v562_v25 }
 0x44e   : > { %v15122_v32 = vcombine.high %v551_v26, %v563_v27  ;;  %v15121_v38 = vcombine.low %v551_v26, %v563_v27 }
 0x44f   : > { %13122 = vmatpush1.bf16.msra.mxu0 %v14951_v0  ;;  %13327 = vmatpush1.bf16.msra.mxu1 %v14953_v34  ;;  %v574_v0 = vld [vmem:[%s17463_s22 + $0x930] sm:$0xff] }
 0x450   : > { %13123 = vmatprep.subr.bf16.mxu0 %v14976_v35  ;;  %13328 = vmatprep.subr.bf16.mxu1 %v14978_v36  ;;  %v586_v34 = vld [vmem:[%s17463_s22 + $0x990] sm:$0xff]  ;;  %v575_v35 = vld [vmem:[%s17463_s22 + $0x938] sm:$0xff] }
 0x451   : > { %v587_v36 = vld [vmem:[%s17463_s22 + $0x998] sm:$0xff]  ;;  %v15144_v40 = vcombine.high %v574_v0, %v586_v34  ;;  %v15143_v47 = vcombine.low %v574_v0, %v586_v34 }
 0x452   : > { %v15146_v41 = vcombine.high %v575_v35, %v587_v36  ;;  %v15145_v50 = vcombine.low %v575_v35, %v587_v36 }
 0x453   : > { %13124 = vmatpush1.bf16.msra.mxu0 %v14975_v42  ;;  %13329 = vmatpush1.bf16.msra.mxu1 %v14977_v43  ;;  %v598_v42 = vld [vmem:[%s17463_s22 + $0x9f0] sm:$0xff] }
 0x454   : > { %13125 = vmatprep.subr.bf16.mxu0 %v15000_v44  ;;  %13330 = vmatprep.subr.bf16.mxu1 %v15002_v46  ;;  %v610_v43 = vld [vmem:[%s17463_s22 + $0xa50] sm:$0xff]  ;;  %v599_v44 = vld [vmem:[%s17463_s22 + $0x9f8] sm:$0xff] }
 0x455   : > { %v611_v46 = vld [vmem:[%s17463_s22 + $0xa58] sm:$0xff]  ;;  %v15168_v51 = vcombine.high %v598_v42, %v610_v43  ;;  %v15167_v58 = vcombine.low %v598_v42, %v610_v43 }
 0x456   : > { %v15170_v52 = vcombine.high %v599_v44, %v611_v46  ;;  %v15169_v54 = vcombine.low %v599_v44, %v611_v46 }
 0x457   : > { %13126 = vmatpush1.bf16.msra.mxu0 %v14999_v53  ;;  %13331 = vmatpush1.bf16.msra.mxu1 %v15001_v55  ;;  %v622_v53 = vld [vmem:[%s17463_s22 + $0xab0] sm:$0xff] }
 0x458   : > { %13127 = vmatprep.subr.bf16.mxu0 %v15024_v56  ;;  %13332 = vmatprep.subr.bf16.mxu1 %v15026_v57  ;;  %v634_v55 = vld [vmem:[%s17463_s22 + $0xb10] sm:$0xff]  ;;  %v623_v56 = vld [vmem:[%s17463_s22 + $0xab8] sm:$0xff] }
 0x459   : > { %v635_v57 = vld [vmem:[%s17463_s22 + $0xb18] sm:$0xff]  ;;  %v15192_v61 = vcombine.high %v622_v53, %v634_v55  ;;  %v15191_v4 = vcombine.low %v622_v53, %v634_v55 }
 0x45a   : > { %v15194_v62 = vcombine.high %v623_v56, %v635_v57  ;;  %v15193_v5 = vcombine.low %v623_v56, %v635_v57 }
 0x45b   : > { %13128 = vmatpush1.bf16.msra.mxu0 %v15023_v63  ;;  %13333 = vmatpush1.bf16.msra.mxu1 %v15025_v1  ;;  %v646_v63 = vld [vmem:[%s17463_s22 + $0xb70] sm:$0xff] }
 0x45c   : > { %13129 = vmatprep.subr.bf16.mxu0 %v15048_v2  ;;  %13334 = vmatprep.subr.bf16.mxu1 %v15050_v3  ;;  %v658_v1 = vld [vmem:[%s17463_s22 + $0xbd0] sm:$0xff]  ;;  %v647_v2 = vld [vmem:[%s17463_s22 + $0xb78] sm:$0xff] }
 0x45d   : > { %v659_v3 = vld [vmem:[%s17463_s22 + $0xbd8] sm:$0xff]  ;;  %v15216_v30 = vcombine.high %v646_v63, %v658_v1  ;;  %v15215_v14 = vcombine.low %v646_v63, %v658_v1 }
 0x45e   : > { %v15218_v7 = vcombine.high %v647_v2, %v659_v3  ;;  %v15217_v15 = vcombine.low %v647_v2, %v659_v3 }
 0x45f   : > { %13130 = vmatpush1.bf16.msra.mxu0 %v15047_v8  ;;  %13335 = vmatpush1.bf16.msra.mxu1 %v15049_v9  ;;  %v670_v8 = vld [vmem:[%s17463_s22 + $0xc30] sm:$0xff] }
 0x460   : > { %13131 = vmatprep.subr.bf16.mxu0 %v15072_v12  ;;  %13336 = vmatprep.subr.bf16.mxu1 %v15074_v13  ;;  %v682_v9 = vld [vmem:[%s17463_s22 + $0xc90] sm:$0xff]  ;;  %v671_v12 = vld [vmem:[%s17463_s22 + $0xc38] sm:$0xff] }
 0x461   : > { %v683_v13 = vld [vmem:[%s17463_s22 + $0xc98] sm:$0xff]  ;;  %v15240_v16 = vcombine.high %v670_v8, %v682_v9  ;;  %v15239_v23 = vcombine.low %v670_v8, %v682_v9 }
 0x462   : > { %v15242_v17 = vcombine.high %v671_v12, %v683_v13  ;;  %v15241_v25 = vcombine.low %v671_v12, %v683_v13 }
 0x463   : > { %13132 = vmatpush1.bf16.msra.mxu0 %v15071_v18  ;;  %13337 = vmatpush1.bf16.msra.mxu1 %v15073_v20  ;;  %v694_v18 = vld [vmem:[%s17463_s22 + $0xcf0] sm:$0xff] }
 0x464   : > { %13133 = vmatprep.subr.bf16.mxu0 %v15096_v21  ;;  %13338 = vmatprep.subr.bf16.mxu1 %v15098_v22  ;;  %v706_v20 = vld [vmem:[%s17463_s22 + $0xd50] sm:$0xff]  ;;  %v695_v21 = vld [vmem:[%s17463_s22 + $0xcf8] sm:$0xff] }
 0x465   : > { %v707_v22 = vld [vmem:[%s17463_s22 + $0xd58] sm:$0xff]  ;;  %v15264_v26 = vcombine.high %v694_v18, %v706_v20  ;;  %v15263_v0 = vcombine.low %v694_v18, %v706_v20 }
 0x466   : > { %v15266_v27 = vcombine.high %v695_v21, %v707_v22  ;;  %v15265_v34 = vcombine.low %v695_v21, %v707_v22 }
 0x467   : > { %13134 = vmatpush1.bf16.msra.mxu0 %v15095_v28  ;;  %13339 = vmatpush1.bf16.msra.mxu1 %v15097_v60  ;;  %v718_v28 = vld [vmem:[%s17463_s22 + $0xdb0] sm:$0xff] }
 0x468   : > { %13135 = vmatprep.subr.bf16.mxu0 %v15120_v31  ;;  %13340 = vmatprep.subr.bf16.mxu1 %v15122_v32  ;;  %v730_v60 = vld [vmem:[%s17463_s22 + $0xe10] sm:$0xff]  ;;  %v719_v31 = vld [vmem:[%s17463_s22 + $0xdb8] sm:$0xff] }
 0x469   : > { %v731_v32 = vld [vmem:[%s17463_s22 + $0xe18] sm:$0xff]  ;;  %v15288_v35 = vcombine.high %v718_v28, %v730_v60  ;;  %v15287_v42 = vcombine.low %v718_v28, %v730_v60 }
 0x46a   : > { %v15290_v36 = vcombine.high %v719_v31, %v731_v32  ;;  %v15289_v43 = vcombine.low %v719_v31, %v731_v32 }
 0x46b   : > { %13136 = vmatpush1.bf16.msra.mxu0 %v15119_v37  ;;  %13341 = vmatpush1.bf16.msra.mxu1 %v15121_v38  ;;  %v742_v37 = vld [vmem:[%s17463_s22 + $0xe70] sm:$0xff] }
 0x46c   : > { %13137 = vmatprep.subr.bf16.mxu0 %v15144_v40  ;;  %13342 = vmatprep.subr.bf16.mxu1 %v15146_v41  ;;  %v754_v38 = vld [vmem:[%s17463_s22 + $0xed0] sm:$0xff]  ;;  %v743_v40 = vld [vmem:[%s17463_s22 + $0xe78] sm:$0xff] }
 0x46d   : > { %v755_v41 = vld [vmem:[%s17463_s22 + $0xed8] sm:$0xff]  ;;  %v15312_v44 = vcombine.high %v742_v37, %v754_v38  ;;  %v15311_v53 = vcombine.low %v742_v37, %v754_v38 }
 0x46e   : > { %v15314_v46 = vcombine.high %v743_v40, %v755_v41  ;;  %v15313_v55 = vcombine.low %v743_v40, %v755_v41 }
 0x46f   : > { %13138 = vmatpush1.bf16.msra.mxu0 %v15143_v47  ;;  %13343 = vmatpush1.bf16.msra.mxu1 %v15145_v50  ;;  %v766_v47 = vld [vmem:[%s17463_s22 + $0xf30] sm:$0xff] }
 0x470   : > { %13139 = vmatprep.subr.bf16.mxu0 %v15168_v51  ;;  %13344 = vmatprep.subr.bf16.mxu1 %v15170_v52  ;;  %v778_v50 = vld [vmem:[%s17463_s22 + $0xf90] sm:$0xff]  ;;  %v767_v51 = vld [vmem:[%s17463_s22 + $0xf38] sm:$0xff] }
 0x471   : > { %v779_v52 = vld [vmem:[%s17463_s22 + $0xf98] sm:$0xff]  ;;  %v15336_v56 = vcombine.high %v766_v47, %v778_v50  ;;  %v15335_v63 = vcombine.low %v766_v47, %v778_v50 }
 0x472   : > { %v15338_v57 = vcombine.high %v767_v51, %v779_v52  ;;  %v15337_v1 = vcombine.low %v767_v51, %v779_v52 }
 0x473   : > { %13140 = vmatpush1.bf16.msra.mxu0 %v15167_v58  ;;  %13345 = vmatpush1.bf16.msra.mxu1 %v15169_v54  ;;  %v790_v58 = vld [vmem:[%s17463_s22 + $0xff0] sm:$0xff] }
 0x474   : > { %13141 = vmatprep.subr.bf16.mxu0 %v15192_v61  ;;  %13346 = vmatprep.subr.bf16.mxu1 %v15194_v62  ;;  %v802_v54 = vld [vmem:[%s17463_s22 + $0x1050] sm:$0xff]  ;;  %v791_v61 = vld [vmem:[%s17463_s22 + $0xff8] sm:$0xff] }
 0x475   : > { %v803_v62 = vld [vmem:[%s17463_s22 + $0x1058] sm:$0xff]  ;;  %v15360_v2 = vcombine.high %v790_v58, %v802_v54  ;;  %v15359_v8 = vcombine.low %v790_v58, %v802_v54 }
 0x476   : > { %v15362_v3 = vcombine.high %v791_v61, %v803_v62  ;;  %v15361_v9 = vcombine.low %v791_v61, %v803_v62 }
 0x477   : > { %13142 = vmatpush1.bf16.msra.mxu0 %v15191_v4  ;;  %13347 = vmatpush1.bf16.msra.mxu1 %v15193_v5  ;;  %v814_v4 = vld [vmem:[%s17463_s22 + $0x10b0] sm:$0xff] }
 0x478   : > { %13143 = vmatprep.subr.bf16.mxu0 %v15216_v30  ;;  %13348 = vmatprep.subr.bf16.mxu1 %v15218_v7  ;;  %v826_v5 = vld [vmem:[%s17463_s22 + $0x1110] sm:$0xff]  ;;  %v815_v30 = vld [vmem:[%s17463_s22 + $0x10b8] sm:$0xff] }
 0x479   : > { %v827_v7 = vld [vmem:[%s17463_s22 + $0x1118] sm:$0xff]  ;;  %v15384_v12 = vcombine.high %v814_v4, %v826_v5  ;;  %v15383_v18 = vcombine.low %v814_v4, %v826_v5 }
 0x47a   : > { %v15386_v13 = vcombine.high %v815_v30, %v827_v7  ;;  %v15385_v20 = vcombine.low %v815_v30, %v827_v7 }
 0x47b   : > { %13144 = vmatpush1.bf16.msra.mxu0 %v15215_v14  ;;  %13349 = vmatpush1.bf16.msra.mxu1 %v15217_v15  ;;  %v838_v14 = vld [vmem:[%s17463_s22 + $0x1170] sm:$0xff] }
 0x47c   : > { %13154 = vmatprep.subr.bf16.mxu0 %v15240_v16  ;;  %13359 = vmatprep.subr.bf16.mxu1 %v15242_v17  ;;  %v850_v15 = vld [vmem:[%s17463_s22 + $0x11d0] sm:$0xff]  ;;  %v839_v16 = vld [vmem:[%s17463_s22 + $0x1178] sm:$0xff] }
 0x47d   : > { %v851_v17 = vld [vmem:[%s17463_s22 + $0x11d8] sm:$0xff]  ;;  %v15408_v21 = vcombine.high %v838_v14, %v850_v15  ;;  %v15407_v28 = vcombine.low %v838_v14, %v850_v15 }
 0x47e   : > { %13146 = vmatmul.mubr.bf16.vlgmr.msra.gmra.mrb[12].mxu0 %v17565_v24  ;;  %13351 = vmatmul.mubr.bf16.vlgmr.msra.gmra.mrb[12].mxu1 %v17565_v24  ;;  %v15410_v22 = vcombine.high %v839_v16, %v851_v17  ;;  %v15409_v60 = vcombine.low %v839_v16, %v851_v17 }
 0x47f   : > { %13155 = vmatpush1.bf16.msra.mxu0 %v15239_v23  ;;  %13360 = vmatpush1.bf16.msra.mxu1 %v15241_v25  ;;  %v862_v23 = vld [vmem:[%s17463_s22 + $0x1230] sm:$0xff] }
 0x480   : > { %13156 = vmatprep.subr.bf16.mxu0 %v15264_v26  ;;  %13361 = vmatprep.subr.bf16.mxu1 %v15266_v27  ;;  %v874_v25 = vld [vmem:[%s17463_s22 + $0x1290] sm:$0xff]  ;;  %v863_v26 = vld [vmem:[%s17463_s22 + $0x1238] sm:$0xff] }
 0x481   : > { %13186 = vmatprep.mubr.bf16.mxu0 %v17573_v33  ;;  %13391 = vmatprep.mubr.bf16.mxu1 %v17573_v33  ;;  %v875_v27 = vld [vmem:[%s17463_s22 + $0x1298] sm:$0xff]  ;;  %v15432_v31 = vcombine.high %v862_v23, %v874_v25  ;;  %v15431_v37 = vcombine.low %v862_v23, %v874_v25 }
 0x482   : > { %v15434_v32 = vcombine.high %v863_v26, %v875_v27  ;;  %v15433_v38 = vcombine.low %v863_v26, %v875_v27 }
 0x483   : > { %13157 = vmatpush1.bf16.msra.mxu0 %v15263_v0  ;;  %13362 = vmatpush1.bf16.msra.mxu1 %v15265_v34  ;;  %v886_v0 = vld [vmem:[%s17463_s22 + $0x12f0] sm:$0xff] }
 0x484   : > { %13158 = vmatprep.subr.bf16.mxu0 %v15288_v35  ;;  %13363 = vmatprep.subr.bf16.mxu1 %v15290_v36  ;;  %v898_v34 = vld [vmem:[%s17463_s22 + $0x1350] sm:$0xff]  ;;  %v887_v35 = vld [vmem:[%s17463_s22 + $0x12f8] sm:$0xff] }
 0x485   : > { %v899_v36 = vld [vmem:[%s17463_s22 + $0x1358] sm:$0xff]  ;;  %v15456_v40 = vcombine.high %v886_v0, %v898_v34  ;;  %v15455_v47 = vcombine.low %v886_v0, %v898_v34 }
 0x486   : > { %v15458_v41 = vcombine.high %v887_v35, %v899_v36  ;;  %v15457_v50 = vcombine.low %v887_v35, %v899_v36 }
 0x487   : > { %13159 = vmatpush1.bf16.msra.mxu0 %v15287_v42  ;;  %13364 = vmatpush1.bf16.msra.mxu1 %v15289_v43  ;;  %v910_v42 = vld [vmem:[%s17463_s22 + $0x13b0] sm:$0xff] }
 0x488   : > { %13160 = vmatprep.subr.bf16.mxu0 %v15312_v44  ;;  %13365 = vmatprep.subr.bf16.mxu1 %v15314_v46  ;;  %v922_v43 = vld [vmem:[%s17463_s22 + $0x1410] sm:$0xff]  ;;  %v911_v44 = vld [vmem:[%s17463_s22 + $0x13b8] sm:$0xff] }
 0x489   : > { %v923_v46 = vld [vmem:[%s17463_s22 + $0x1418] sm:$0xff]  ;;  %v15480_v51 = vcombine.high %v910_v42, %v922_v43  ;;  %v15479_v58 = vcombine.low %v910_v42, %v922_v43 }
 0x48a   : > { %v15482_v52 = vcombine.high %v911_v44, %v923_v46  ;;  %v15481_v54 = vcombine.low %v911_v44, %v923_v46 }
 0x48b   : > { %13161 = vmatpush1.bf16.msra.mxu0 %v15311_v53  ;;  %13366 = vmatpush1.bf16.msra.mxu1 %v15313_v55  ;;  %v934_v53 = vld [vmem:[%s17463_s22 + $0x1470] sm:$0xff] }
 0x48c   : > { %13162 = vmatprep.subr.bf16.mxu0 %v15336_v56  ;;  %13367 = vmatprep.subr.bf16.mxu1 %v15338_v57  ;;  %v946_v55 = vld [vmem:[%s17463_s22 + $0x14d0] sm:$0xff]  ;;  %v935_v56 = vld [vmem:[%s17463_s22 + $0x1478] sm:$0xff] }
 0x48d   : > { %v947_v57 = vld [vmem:[%s17463_s22 + $0x14d8] sm:$0xff]  ;;  %v15504_v61 = vcombine.high %v934_v53, %v946_v55  ;;  %v15503_v4 = vcombine.low %v934_v53, %v946_v55 }
 0x48e   : > { %v15506_v62 = vcombine.high %v935_v56, %v947_v57  ;;  %v15505_v5 = vcombine.low %v935_v56, %v947_v57 }
 0x48f   : > { %13163 = vmatpush1.bf16.msra.mxu0 %v15335_v63  ;;  %13368 = vmatpush1.bf16.msra.mxu1 %v15337_v1  ;;  %v958_v63 = vld [vmem:[%s17463_s22 + $0x1530] sm:$0xff] }
 0x490   : > { %13164 = vmatprep.subr.bf16.mxu0 %v15360_v2  ;;  %13369 = vmatprep.subr.bf16.mxu1 %v15362_v3  ;;  %v970_v1 = vld [vmem:[%s17463_s22 + $0x1590] sm:$0xff]  ;;  %v959_v2 = vld [vmem:[%s17463_s22 + $0x1538] sm:$0xff] }
 0x491   : > { %v971_v3 = vld [vmem:[%s17463_s22 + $0x1598] sm:$0xff]  ;;  %v15528_v30 = vcombine.high %v958_v63, %v970_v1  ;;  %v15527_v14 = vcombine.low %v958_v63, %v970_v1 }
 0x492   : > { %v15530_v7 = vcombine.high %v959_v2, %v971_v3  ;;  %v15529_v15 = vcombine.low %v959_v2, %v971_v3 }
 0x493   : > { %13165 = vmatpush1.bf16.msra.mxu0 %v15359_v8  ;;  %13370 = vmatpush1.bf16.msra.mxu1 %v15361_v9  ;;  %v982_v8 = vld [vmem:[%s17463_s22 + $0x15f0] sm:$0xff] }
 0x494   : > { %13166 = vmatprep.subr.bf16.mxu0 %v15384_v12  ;;  %13371 = vmatprep.subr.bf16.mxu1 %v15386_v13  ;;  %v994_v9 = vld [vmem:[%s17463_s22 + $0x1650] sm:$0xff]  ;;  %v983_v12 = vld [vmem:[%s17463_s22 + $0x15f8] sm:$0xff] }
 0x495   : > { %v995_v13 = vld [vmem:[%s17463_s22 + $0x1658] sm:$0xff]  ;;  %v15552_v16 = vcombine.high %v982_v8, %v994_v9  ;;  %v15551_v23 = vcombine.low %v982_v8, %v994_v9 }
 0x496   : > { %v15554_v17 = vcombine.high %v983_v12, %v995_v13  ;;  %v15553_v25 = vcombine.low %v983_v12, %v995_v13 }
 0x497   : > { %13167 = vmatpush1.bf16.msra.mxu0 %v15383_v18  ;;  %13372 = vmatpush1.bf16.msra.mxu1 %v15385_v20  ;;  %v1006_v18 = vld [vmem:[%s17463_s22 + $0x16b0] sm:$0xff] }
 0x498   : > { %13168 = vmatprep.subr.bf16.mxu0 %v15408_v21  ;;  %13373 = vmatprep.subr.bf16.mxu1 %v15410_v22  ;;  %v1018_v20 = vld [vmem:[%s17463_s22 + $0x1710] sm:$0xff]  ;;  %v1007_v21 = vld [vmem:[%s17463_s22 + $0x16b8] sm:$0xff] }
 0x499   : > { %v1019_v22 = vld [vmem:[%s17463_s22 + $0x1718] sm:$0xff]  ;;  %v15576_v26 = vcombine.high %v1006_v18, %v1018_v20  ;;  %v15575_v0 = vcombine.low %v1006_v18, %v1018_v20 }
 0x49a   : > { %v15578_v27 = vcombine.high %v1007_v21, %v1019_v22  ;;  %v15577_v34 = vcombine.low %v1007_v21, %v1019_v22 }
 0x49b   : > { %13169 = vmatpush1.bf16.msra.mxu0 %v15407_v28  ;;  %13374 = vmatpush1.bf16.msra.mxu1 %v15409_v60  ;;  %v1030_v28 = vld [vmem:[%s17463_s22 + $0x1770] sm:$0xff] }
 0x49c   : > { %13170 = vmatprep.subr.bf16.mxu0 %v15432_v31  ;;  %13375 = vmatprep.subr.bf16.mxu1 %v15434_v32  ;;  %v1042_v60 = vld [vmem:[%s17463_s22 + $0x17d0] sm:$0xff]  ;;  %v1031_v31 = vld [vmem:[%s17463_s22 + $0x1778] sm:$0xff] }
 0x49d   : > { %v1043_v32 = vld [vmem:[%s17463_s22 + $0x17d8] sm:$0xff]  ;;  %v15600_v35 = vcombine.high %v1030_v28, %v1042_v60  ;;  %v15599_v42 = vcombine.low %v1030_v28, %v1042_v60 }
 0x49e   : > { %v15602_v36 = vcombine.high %v1031_v31, %v1043_v32  ;;  %v15601_v43 = vcombine.low %v1031_v31, %v1043_v32 }
 0x49f   : > { %13171 = vmatpush1.bf16.msra.mxu0 %v15431_v37  ;;  %13376 = vmatpush1.bf16.msra.mxu1 %v15433_v38  ;;  %v1054_v37 = vld [vmem:[%s17463_s22 + $0x1830] sm:$0xff] }
 0x4a0   : > { %13172 = vmatprep.subr.bf16.mxu0 %v15456_v40  ;;  %13377 = vmatprep.subr.bf16.mxu1 %v15458_v41  ;;  %v1066_v38 = vld [vmem:[%s17463_s22 + $0x1890] sm:$0xff]  ;;  %v1055_v40 = vld [vmem:[%s17463_s22 + $0x1838] sm:$0xff] }
 0x4a1   : > { %v1067_v41 = vld [vmem:[%s17463_s22 + $0x1898] sm:$0xff]  ;;  %v15624_v44 = vcombine.high %v1054_v37, %v1066_v38  ;;  %v15623_v53 = vcombine.low %v1054_v37, %v1066_v38 }
 0x4a2   : > { %v15626_v46 = vcombine.high %v1055_v40, %v1067_v41  ;;  %v15625_v55 = vcombine.low %v1055_v40, %v1067_v41 }
 0x4a3   : > { %13173 = vmatpush1.bf16.msra.mxu0 %v15455_v47  ;;  %13378 = vmatpush1.bf16.msra.mxu1 %v15457_v50  ;;  %v1078_v47 = vld [vmem:[%s17463_s22 + $0x18f0] sm:$0xff] }
 0x4a4   : > { %13174 = vmatprep.subr.bf16.mxu0 %v15480_v51  ;;  %13379 = vmatprep.subr.bf16.mxu1 %v15482_v52  ;;  %v1090_v50 = vld [vmem:[%s17463_s22 + $0x1950] sm:$0xff]  ;;  %v1079_v51 = vld [vmem:[%s17463_s22 + $0x18f8] sm:$0xff] }
 0x4a5   : > { %v1091_v52 = vld [vmem:[%s17463_s22 + $0x1958] sm:$0xff]  ;;  %v15648_v56 = vcombine.high %v1078_v47, %v1090_v50  ;;  %v15647_v63 = vcombine.low %v1078_v47, %v1090_v50 }
 0x4a6   : > { %v15650_v57 = vcombine.high %v1079_v51, %v1091_v52  ;;  %v15649_v1 = vcombine.low %v1079_v51, %v1091_v52 }
 0x4a7   : > { %13175 = vmatpush1.bf16.msra.mxu0 %v15479_v58  ;;  %13380 = vmatpush1.bf16.msra.mxu1 %v15481_v54  ;;  %v1102_v58 = vld [vmem:[%s17463_s22 + $0x19b0] sm:$0xff] }
 0x4a8   : > { %13176 = vmatprep.subr.bf16.mxu0 %v15504_v61  ;;  %13381 = vmatprep.subr.bf16.mxu1 %v15506_v62  ;;  %v1114_v54 = vld [vmem:[%s17463_s22 + $0x1a10] sm:$0xff]  ;;  %v1103_v61 = vld [vmem:[%s17463_s22 + $0x19b8] sm:$0xff] }
 0x4a9   : > { %v1115_v62 = vld [vmem:[%s17463_s22 + $0x1a18] sm:$0xff]  ;;  %v15672_v2 = vcombine.high %v1102_v58, %v1114_v54  ;;  %v15671_v8 = vcombine.low %v1102_v58, %v1114_v54 }
 0x4aa   : > { %v15674_v3 = vcombine.high %v1103_v61, %v1115_v62  ;;  %v15673_v9 = vcombine.low %v1103_v61, %v1115_v62 }
 0x4ab   : > { %13177 = vmatpush1.bf16.msra.mxu0 %v15503_v4  ;;  %13382 = vmatpush1.bf16.msra.mxu1 %v15505_v5  ;;  %v1126_v4 = vld [vmem:[%s17463_s22 + $0x1a70] sm:$0xff] }
 0x4ac   : > { %13178 = vmatprep.subr.bf16.mxu0 %v15528_v30  ;;  %13383 = vmatprep.subr.bf16.mxu1 %v15530_v7  ;;  %v1138_v5 = vld [vmem:[%s17463_s22 + $0x1ad0] sm:$0xff]  ;;  %v1127_v30 = vld [vmem:[%s17463_s22 + $0x1a78] sm:$0xff] }
 0x4ad   : > { %v1139_v7 = vld [vmem:[%s17463_s22 + $0x1ad8] sm:$0xff]  ;;  %v15696_v12 = vcombine.high %v1126_v4, %v1138_v5  ;;  %v15695_v18 = vcombine.low %v1126_v4, %v1138_v5 }
 0x4ae   : > { %v15698_v13 = vcombine.high %v1127_v30, %v1139_v7  ;;  %v15697_v20 = vcombine.low %v1127_v30, %v1139_v7 }
 0x4af   : > { %13179 = vmatpush1.bf16.msra.mxu0 %v15527_v14  ;;  %13384 = vmatpush1.bf16.msra.mxu1 %v15529_v15  ;;  %v1150_v14 = vld [vmem:[%s17463_s22 + $0x1b30] sm:$0xff] }
 0x4b0   : > { %13180 = vmatprep.subr.bf16.mxu0 %v15552_v16  ;;  %13385 = vmatprep.subr.bf16.mxu1 %v15554_v17  ;;  %v1162_v15 = vld [vmem:[%s17463_s22 + $0x1b90] sm:$0xff]  ;;  %v1151_v16 = vld [vmem:[%s17463_s22 + $0x1b38] sm:$0xff] }
 0x4b1   : > { %v1163_v17 = vld [vmem:[%s17463_s22 + $0x1b98] sm:$0xff]  ;;  %v15720_v21 = vcombine.high %v1150_v14, %v1162_v15  ;;  %v15719_v28 = vcombine.low %v1150_v14, %v1162_v15 }
 0x4b2   : > { %v15722_v22 = vcombine.high %v1151_v16, %v1163_v17  ;;  %v15721_v60 = vcombine.low %v1151_v16, %v1163_v17 }
 0x4b3   : > { %13181 = vmatpush1.bf16.msra.mxu0 %v15551_v23  ;;  %13386 = vmatpush1.bf16.msra.mxu1 %v15553_v25  ;;  %v1174_v23 = vld [vmem:[%s17463_s22 + $0x1bf0] sm:$0xff] }
 0x4b4   : > { %13182 = vmatprep.subr.bf16.mxu0 %v15576_v26  ;;  %13387 = vmatprep.subr.bf16.mxu1 %v15578_v27  ;;  %v1186_v25 = vld [vmem:[%s17463_s22 + $0x1c50] sm:$0xff]  ;;  %v1175_v26 = vld [vmem:[%s17463_s22 + $0x1bf8] sm:$0xff] }
 0x4b5   : > { %v1187_v27 = vld [vmem:[%s17463_s22 + $0x1c58] sm:$0xff]  ;;  %v15744_v31 = vcombine.high %v1174_v23, %v1186_v25  ;;  %v15743_v37 = vcombine.low %v1174_v23, %v1186_v25 }
 0x4b6   : > { %v15746_v32 = vcombine.high %v1175_v26, %v1187_v27  ;;  %v15745_v38 = vcombine.low %v1175_v26, %v1187_v27 }
 0x4b7   : > { %13183 = vmatpush1.bf16.msra.mxu0 %v15575_v0  ;;  %13388 = vmatpush1.bf16.msra.mxu1 %v15577_v34  ;;  %v1198_v0 = vld [vmem:[%s17463_s22 + $0x1cb0] sm:$0xff] }
 0x4b8   : > { %13184 = vmatprep.subr.bf16.mxu0 %v15600_v35  ;;  %13389 = vmatprep.subr.bf16.mxu1 %v15602_v36  ;;  %v1210_v34 = vld [vmem:[%s17463_s22 + $0x1d10] sm:$0xff]  ;;  %v1199_v35 = vld [vmem:[%s17463_s22 + $0x1cb8] sm:$0xff] }
 0x4b9   : > { %v1211_v36 = vld [vmem:[%s17463_s22 + $0x1d18] sm:$0xff]  ;;  %v15768_v40 = vcombine.high %v1198_v0, %v1210_v34  ;;  %v15767_v47 = vcombine.low %v1198_v0, %v1210_v34 }
 0x4ba   : > { %v15770_v41 = vcombine.high %v1199_v35, %v1211_v36  ;;  %v15769_v50 = vcombine.low %v1199_v35, %v1211_v36 }
 0x4bb   : > { %13185 = vmatpush1.bf16.msra.mxu0 %v15599_v42  ;;  %13390 = vmatpush1.bf16.msra.mxu1 %v15601_v43  ;;  %v1222_v42 = vld [vmem:[%s17463_s22 + $0x1d70] sm:$0xff] }
 0x4bc   : > { %13195 = vmatprep.subr.bf16.mxu0 %v15624_v44  ;;  %13400 = vmatprep.subr.bf16.mxu1 %v15626_v46  ;;  %v1234_v43 = vld [vmem:[%s17463_s22 + $0x1dd0] sm:$0xff]  ;;  %v1223_v44 = vld [vmem:[%s17463_s22 + $0x1d78] sm:$0xff] }
 0x4bd   : > { %v1235_v46 = vld [vmem:[%s17463_s22 + $0x1dd8] sm:$0xff]  ;;  %v15792_v51 = vcombine.high %v1222_v42, %v1234_v43  ;;  %v15791_v58 = vcombine.low %v1222_v42, %v1234_v43 }
 0x4be   : > { %13187 = vmatmul.mubr.bf16.vlgmr.msra.gmra.mrb[12].mxu0 %v17648_v39  ;;  %13392 = vmatmul.mubr.bf16.vlgmr.msra.gmra.mrb[12].mxu1 %v17648_v39  ;;  %v15794_v52 = vcombine.high %v1223_v44, %v1235_v46  ;;  %v15793_v54 = vcombine.low %v1223_v44, %v1235_v46 }
 0x4bf   : > { %13196 = vmatpush1.bf16.msra.mxu0 %v15623_v53  ;;  %13401 = vmatpush1.bf16.msra.mxu1 %v15625_v55  ;;  %v1246_v53 = vld [vmem:[%s17463_s22 + $0x1e30] sm:$0xff] }
 0x4c0   : > { %13197 = vmatprep.subr.bf16.mxu0 %v15648_v56  ;;  %13402 = vmatprep.subr.bf16.mxu1 %v15650_v57  ;;  %v1258_v55 = vld [vmem:[%s17463_s22 + $0x1e90] sm:$0xff]  ;;  %v1247_v56 = vld [vmem:[%s17463_s22 + $0x1e38] sm:$0xff] }
 0x4c1   : > { %13227 = vmatprep.mubr.bf16.mxu0 %v17655_v49  ;;  %13432 = vmatprep.mubr.bf16.mxu1 %v17655_v49  ;;  %v1259_v57 = vld [vmem:[%s17463_s22 + $0x1e98] sm:$0xff]  ;;  %v15816_v61 = vcombine.high %v1246_v53, %v1258_v55  ;;  %v15815_v4 = vcombine.low %v1246_v53, %v1258_v55 }
 0x4c2   : > { %v15818_v62 = vcombine.high %v1247_v56, %v1259_v57  ;;  %v15817_v5 = vcombine.low %v1247_v56, %v1259_v57 }
 0x4c3   : > { %13198 = vmatpush1.bf16.msra.mxu0 %v15647_v63  ;;  %13403 = vmatpush1.bf16.msra.mxu1 %v15649_v1  ;;  %v1270_v63 = vld [vmem:[%s17463_s22 + $0x1ef0] sm:$0xff] }
 0x4c4   : > { %13199 = vmatprep.subr.bf16.mxu0 %v15672_v2  ;;  %13404 = vmatprep.subr.bf16.mxu1 %v15674_v3  ;;  %v1282_v1 = vld [vmem:[%s17463_s22 + $0x1f50] sm:$0xff]  ;;  %v1271_v2 = vld [vmem:[%s17463_s22 + $0x1ef8] sm:$0xff] }
 0x4c5   : > { %v1283_v3 = vld [vmem:[%s17463_s22 + $0x1f58] sm:$0xff]  ;;  %v15840_v30 = vcombine.high %v1270_v63, %v1282_v1  ;;  %v15839_v14 = vcombine.low %v1270_v63, %v1282_v1 }
 0x4c6   : > { %v15842_v7 = vcombine.high %v1271_v2, %v1283_v3  ;;  %v15841_v15 = vcombine.low %v1271_v2, %v1283_v3 }
 0x4c7   : > { %13200 = vmatpush1.bf16.msra.mxu0 %v15671_v8  ;;  %13405 = vmatpush1.bf16.msra.mxu1 %v15673_v9  ;;  %v1294_v8 = vld [vmem:[%s17463_s22 + $0x1fb0] sm:$0xff] }
 0x4c8   : > { %13201 = vmatprep.subr.bf16.mxu0 %v15696_v12  ;;  %13406 = vmatprep.subr.bf16.mxu1 %v15698_v13  ;;  %v1306_v9 = vld [vmem:[%s17463_s22 + $0x2010] sm:$0xff]  ;;  %v1295_v12 = vld [vmem:[%s17463_s22 + $0x1fb8] sm:$0xff] }
 0x4c9   : > { %v1307_v13 = vld [vmem:[%s17463_s22 + $0x2018] sm:$0xff]  ;;  %v15864_v16 = vcombine.high %v1294_v8, %v1306_v9  ;;  %v15863_v23 = vcombine.low %v1294_v8, %v1306_v9 }
 0x4ca   : > { %v15866_v17 = vcombine.high %v1295_v12, %v1307_v13  ;;  %v15865_v25 = vcombine.low %v1295_v12, %v1307_v13 }
 0x4cb   : > { %13202 = vmatpush1.bf16.msra.mxu0 %v15695_v18  ;;  %13407 = vmatpush1.bf16.msra.mxu1 %v15697_v20  ;;  %v1318_v18 = vld [vmem:[%s17463_s22 + $0x2070] sm:$0xff] }
 0x4cc   : > { %13203 = vmatprep.subr.bf16.mxu0 %v15720_v21  ;;  %13408 = vmatprep.subr.bf16.mxu1 %v15722_v22  ;;  %v1330_v20 = vld [vmem:[%s17463_s22 + $0x20d0] sm:$0xff]  ;;  %v1319_v21 = vld [vmem:[%s17463_s22 + $0x2078] sm:$0xff] }
 0x4cd   : > { %v1331_v22 = vld [vmem:[%s17463_s22 + $0x20d8] sm:$0xff]  ;;  %v15888_v26 = vcombine.high %v1318_v18, %v1330_v20  ;;  %v15887_v0 = vcombine.low %v1318_v18, %v1330_v20 }
 0x4ce   : > { %v15890_v27 = vcombine.high %v1319_v21, %v1331_v22  ;;  %v15889_v34 = vcombine.low %v1319_v21, %v1331_v22 }
 0x4cf   : > { %13204 = vmatpush1.bf16.msra.mxu0 %v15719_v28  ;;  %13409 = vmatpush1.bf16.msra.mxu1 %v15721_v60  ;;  %v1342_v28 = vld [vmem:[%s17463_s22 + $0x2130] sm:$0xff] }
 0x4d0   : > { %13205 = vmatprep.subr.bf16.mxu0 %v15744_v31  ;;  %13410 = vmatprep.subr.bf16.mxu1 %v15746_v32  ;;  %v1354_v60 = vld [vmem:[%s17463_s22 + $0x2190] sm:$0xff]  ;;  %v1343_v31 = vld [vmem:[%s17463_s22 + $0x2138] sm:$0xff] }
 0x4d1   : > { %v1355_v32 = vld [vmem:[%s17463_s22 + $0x2198] sm:$0xff]  ;;  %v15912_v35 = vcombine.high %v1342_v28, %v1354_v60  ;;  %v15911_v42 = vcombine.low %v1342_v28, %v1354_v60 }
 0x4d2   : > { %v15914_v36 = vcombine.high %v1343_v31, %v1355_v32  ;;  %v15913_v43 = vcombine.low %v1343_v31, %v1355_v32 }
 0x4d3   : > { %13206 = vmatpush1.bf16.msra.mxu0 %v15743_v37  ;;  %13411 = vmatpush1.bf16.msra.mxu1 %v15745_v38  ;;  %v1366_v37 = vld [vmem:[%s17463_s22 + $0x21f0] sm:$0xff] }
 0x4d4   : > { %13207 = vmatprep.subr.bf16.mxu0 %v15768_v40  ;;  %13412 = vmatprep.subr.bf16.mxu1 %v15770_v41  ;;  %v1378_v38 = vld [vmem:[%s17463_s22 + $0x2250] sm:$0xff]  ;;  %v1367_v40 = vld [vmem:[%s17463_s22 + $0x21f8] sm:$0xff] }
 0x4d5   : > { %v1379_v41 = vld [vmem:[%s17463_s22 + $0x2258] sm:$0xff]  ;;  %v15936_v44 = vcombine.high %v1366_v37, %v1378_v38  ;;  %v15935_v53 = vcombine.low %v1366_v37, %v1378_v38 }
 0x4d6   : > { %v15938_v46 = vcombine.high %v1367_v40, %v1379_v41  ;;  %v15937_v55 = vcombine.low %v1367_v40, %v1379_v41 }
 0x4d7   : > { %13208 = vmatpush1.bf16.msra.mxu0 %v15767_v47  ;;  %13413 = vmatpush1.bf16.msra.mxu1 %v15769_v50  ;;  %v1390_v47 = vld [vmem:[%s17463_s22 + $0x22b0] sm:$0xff] }
 0x4d8   : > { %13209 = vmatprep.subr.bf16.mxu0 %v15792_v51  ;;  %13414 = vmatprep.subr.bf16.mxu1 %v15794_v52  ;;  %v1402_v50 = vld [vmem:[%s17463_s22 + $0x2310] sm:$0xff]  ;;  %v1391_v51 = vld [vmem:[%s17463_s22 + $0x22b8] sm:$0xff] }
 0x4d9   : > { %v1403_v52 = vld [vmem:[%s17463_s22 + $0x2318] sm:$0xff]  ;;  %v15960_v56 = vcombine.high %v1390_v47, %v1402_v50  ;;  %v15959_v63 = vcombine.low %v1390_v47, %v1402_v50 }
 0x4da   : > { %v15962_v57 = vcombine.high %v1391_v51, %v1403_v52  ;;  %v15961_v1 = vcombine.low %v1391_v51, %v1403_v52 }
 0x4db   : > { %13210 = vmatpush1.bf16.msra.mxu0 %v15791_v58  ;;  %13415 = vmatpush1.bf16.msra.mxu1 %v15793_v54  ;;  %v1414_v58 = vld [vmem:[%s17463_s22 + $0x2370] sm:$0xff] }
 0x4dc   : > { %13211 = vmatprep.subr.bf16.mxu0 %v15816_v61  ;;  %13416 = vmatprep.subr.bf16.mxu1 %v15818_v62  ;;  %v1426_v54 = vld [vmem:[%s17463_s22 + $0x23d0] sm:$0xff]  ;;  %v1415_v61 = vld [vmem:[%s17463_s22 + $0x2378] sm:$0xff] }
 0x4dd   : > { %v1427_v62 = vld [vmem:[%s17463_s22 + $0x23d8] sm:$0xff]  ;;  %v15984_v2 = vcombine.high %v1414_v58, %v1426_v54  ;;  %v15983_v8 = vcombine.low %v1414_v58, %v1426_v54 }
 0x4de   : > { %v15986_v3 = vcombine.high %v1415_v61, %v1427_v62  ;;  %v15985_v9 = vcombine.low %v1415_v61, %v1427_v62 }
 0x4df   : > { %13212 = vmatpush1.bf16.msra.mxu0 %v15815_v4  ;;  %13417 = vmatpush1.bf16.msra.mxu1 %v15817_v5  ;;  %v1438_v4 = vld [vmem:[%s17463_s22 + $0x2430] sm:$0xff] }
 0x4e0   : > { %13213 = vmatprep.subr.bf16.mxu0 %v15840_v30  ;;  %13418 = vmatprep.subr.bf16.mxu1 %v15842_v7  ;;  %v1450_v5 = vld [vmem:[%s17463_s22 + $0x2490] sm:$0xff]  ;;  %v1439_v30 = vld [vmem:[%s17463_s22 + $0x2438] sm:$0xff] }
 0x4e1   : > { %v1451_v7 = vld [vmem:[%s17463_s22 + $0x2498] sm:$0xff]  ;;  %v16008_v12 = vcombine.high %v1438_v4, %v1450_v5  ;;  %v16007_v18 = vcombine.low %v1438_v4, %v1450_v5 }
 0x4e2   : > { %v16010_v13 = vcombine.high %v1439_v30, %v1451_v7  ;;  %v16009_v20 = vcombine.low %v1439_v30, %v1451_v7 }
 0x4e3   : > { %13214 = vmatpush1.bf16.msra.mxu0 %v15839_v14  ;;  %13419 = vmatpush1.bf16.msra.mxu1 %v15841_v15  ;;  %v1462_v14 = vld [vmem:[%s17463_s22 + $0x24f0] sm:$0xff] }
 0x4e4   : > { %13215 = vmatprep.subr.bf16.mxu0 %v15864_v16  ;;  %13420 = vmatprep.subr.bf16.mxu1 %v15866_v17  ;;  %v1474_v15 = vld [vmem:[%s17463_s22 + $0x2550] sm:$0xff]  ;;  %v1463_v16 = vld [vmem:[%s17463_s22 + $0x24f8] sm:$0xff] }
 0x4e5   : > { %v1475_v17 = vld [vmem:[%s17463_s22 + $0x2558] sm:$0xff]  ;;  %v16032_v21 = vcombine.high %v1462_v14, %v1474_v15  ;;  %v16031_v28 = vcombine.low %v1462_v14, %v1474_v15 }
 0x4e6   : > { %v16034_v22 = vcombine.high %v1463_v16, %v1475_v17  ;;  %v16033_v60 = vcombine.low %v1463_v16, %v1475_v17  ;;  %v1607_v15 = vld [vmem:[%s17463_s22 + $0x2978] sm:$0xff] }
 0x4e7   : > { %13216 = vmatpush1.bf16.msra.mxu0 %v15863_v23  ;;  %13421 = vmatpush1.bf16.msra.mxu1 %v15865_v25  ;;  %v1486_v23 = vld [vmem:[%s17463_s22 + $0x25b0] sm:$0xff]  ;;  %v1619_v16 = vld [vmem:[%s17463_s22 + $0x29d8] sm:$0xff] }
 0x4e8   : > { %13217 = vmatprep.subr.bf16.mxu0 %v15888_v26  ;;  %13422 = vmatprep.subr.bf16.mxu1 %v15890_v27  ;;  %v1498_v25 = vld [vmem:[%s17463_s22 + $0x2610] sm:$0xff]  ;;  %v1487_v26 = vld [vmem:[%s17463_s22 + $0x25b8] sm:$0xff] }
 0x4e9   : > { %v1499_v27 = vld [vmem:[%s17463_s22 + $0x2618] sm:$0xff]  ;;  %v16056_v31 = vcombine.high %v1486_v23, %v1498_v25  ;;  %v16055_v37 = vcombine.low %v1486_v23, %v1498_v25 }
 0x4ea   : > { %v16058_v32 = vcombine.high %v1487_v26, %v1499_v27  ;;  %v16057_v38 = vcombine.low %v1487_v26, %v1499_v27 }
 0x4eb   : > { %13218 = vmatpush1.bf16.msra.mxu0 %v15887_v0  ;;  %13423 = vmatpush1.bf16.msra.mxu1 %v15889_v34  ;;  %v1510_v0 = vld [vmem:[%s17463_s22 + $0x2670] sm:$0xff] }
 0x4ec   : > { %13219 = vmatprep.subr.bf16.mxu0 %v15912_v35  ;;  %13424 = vmatprep.subr.bf16.mxu1 %v15914_v36  ;;  %v1522_v34 = vld [vmem:[%s17463_s22 + $0x26d0] sm:$0xff]  ;;  %v1511_v35 = vld [vmem:[%s17463_s22 + $0x2678] sm:$0xff] }
 0x4ed   : > { %v1523_v36 = vld [vmem:[%s17463_s22 + $0x26d8] sm:$0xff]  ;;  %v16080_v40 = vcombine.high %v1510_v0, %v1522_v34  ;;  %v16079_v47 = vcombine.low %v1510_v0, %v1522_v34  ;;  %v1642_v0 = vld [vmem:[%s17463_s22 + $0x2a90] sm:$0xff] }
 0x4ee   : > { %v16082_v41 = vcombine.high %v1511_v35, %v1523_v36  ;;  %v16081_v50 = vcombine.low %v1511_v35, %v1523_v36  ;;  %v1631_v35 = vld [vmem:[%s17463_s22 + $0x2a38] sm:$0xff] }
 0x4ef   : > { %13220 = vmatpush1.bf16.msra.mxu0 %v15911_v42  ;;  %13425 = vmatpush1.bf16.msra.mxu1 %v15913_v43  ;;  %v1534_v42 = vld [vmem:[%s17463_s22 + $0x2730] sm:$0xff]  ;;  %v1643_v36 = vld [vmem:[%s17463_s22 + $0x2a98] sm:$0xff] }
 0x4f0   : > { %13221 = vmatprep.subr.bf16.mxu0 %v15936_v44  ;;  %13426 = vmatprep.subr.bf16.mxu1 %v15938_v46  ;;  %v1546_v43 = vld [vmem:[%s17463_s22 + $0x2790] sm:$0xff]  ;;  %v1535_v44 = vld [vmem:[%s17463_s22 + $0x2738] sm:$0xff] }
 0x4f1   : > { %v1547_v46 = vld [vmem:[%s17463_s22 + $0x2798] sm:$0xff]  ;;  %v16104_v51 = vcombine.high %v1534_v42, %v1546_v43  ;;  %v16103_v58 = vcombine.low %v1534_v42, %v1546_v43  ;;  %v16202_v43 = vcombine.high %v1631_v35, %v1643_v36 }
 0x4f2   : > { %v16106_v52 = vcombine.high %v1535_v44, %v1547_v46  ;;  %v16105_v54 = vcombine.low %v1535_v44, %v1547_v46  ;;  %v1654_v44 = vld [vmem:[%s17463_s22 + $0x2af0] sm:$0xff] }
 0x4f3   : > { %13222 = vmatpush1.bf16.msra.mxu0 %v15935_v53  ;;  %13427 = vmatpush1.bf16.msra.mxu1 %v15937_v55  ;;  %v1558_v53 = vld [vmem:[%s17463_s22 + $0x27f0] sm:$0xff] }
 0x4f4   : > { %13223 = vmatprep.subr.bf16.mxu0 %v15960_v56  ;;  %13428 = vmatprep.subr.bf16.mxu1 %v15962_v57  ;;  %v1570_v55 = vld [vmem:[%s17463_s22 + $0x2850] sm:$0xff]  ;;  %v1559_v56 = vld [vmem:[%s17463_s22 + $0x27f8] sm:$0xff] }
 0x4f5   : > { %v1571_v57 = vld [vmem:[%s17463_s22 + $0x2858] sm:$0xff]  ;;  %v16128_v61 = vcombine.high %v1558_v53, %v1570_v55  ;;  %v16127_v4 = vcombine.low %v1558_v53, %v1570_v55  ;;  %v1666_v46 = vld [vmem:[%s17463_s22 + $0x2b50] sm:$0xff]  ;;  %v16201_v53 = vcombine.low %v1631_v35, %v1643_v36 }
 0x4f6   : > { %v16130_v62 = vcombine.high %v1559_v56, %v1571_v57  ;;  %v16129_v5 = vcombine.low %v1559_v56, %v1571_v57  ;;  %v16224_v55 = vcombine.high %v1654_v44, %v1666_v46  ;;  %v1678_v57 = vld [vmem:[%s17463_s22 + $0x2bb0] sm:$0xff]  ;;  %v1787_v35 = vld [vmem:[%s17463_s22 + $0x2f18] sm:$0xff] }
 0x4f7   : > { %13224 = vmatpush1.bf16.msra.mxu0 %v15959_v63  ;;  %13429 = vmatpush1.bf16.msra.mxu1 %v15961_v1  ;;  %v1582_v63 = vld [vmem:[%s17463_s22 + $0x28b0] sm:$0xff] }
 0x4f8   : > { %13225 = vmatprep.subr.bf16.mxu0 %v15984_v2  ;;  %13430 = vmatprep.subr.bf16.mxu1 %v15986_v3  ;;  %v1594_v1 = vld [vmem:[%s17463_s22 + $0x2910] sm:$0xff]  ;;  %v1583_v2 = vld [vmem:[%s17463_s22 + $0x28b8] sm:$0xff] }
 0x4f9   : > { %v1595_v3 = vld [vmem:[%s17463_s22 + $0x2918] sm:$0xff]  ;;  %v16152_v30 = vcombine.high %v1582_v63, %v1594_v1 }
 0x4fa   : > { %v16153_v26 = vcombine.low %v1583_v2, %v1595_v3 }
 0x4fb   : > { %13226 = vmatpush1.bf16.msra.mxu0 %v15983_v8  ;;  %13431 = vmatpush1.bf16.msra.mxu1 %v15985_v9  ;;  %v16154_v8 = vcombine.high %v1583_v2, %v1595_v3  ;;  %v1606_v9 = vld [vmem:[%s17463_s22 + $0x2970] sm:$0xff] }
 0x4fc   : > { %13236 = vmatprep.subr.bf16.mxu0 %v16008_v12  ;;  %13441 = vmatprep.subr.bf16.mxu1 %v16010_v13  ;;  %v1618_v12 = vld [vmem:[%s17463_s22 + $0x29d0] sm:$0xff] }
 0x4fd   : > { %v16176_v27 = vcombine.high %v1606_v9, %v1618_v12  ;;  %v1702_v3 = vld [vmem:[%s17463_s22 + $0x2c70] sm:$0xff] }
 0x4fe   : > { %13228 = vmatmul.mubr.bf16.vlgmr.msra.gmra.mrb[12].mxu0 %v17723_v59  ;;  %13433 = vmatmul.mubr.bf16.vlgmr.msra.gmra.mrb[12].mxu1 %v17723_v59 }
 0x4ff   : > { %13237 = vmatpush1.bf16.msra.mxu0 %v16007_v18  ;;  %13442 = vmatpush1.bf16.msra.mxu1 %v16009_v20 }
 0x500   : > { %13238 = vmatprep.subr.bf16.mxu0 %v16032_v21  ;;  %13443 = vmatprep.subr.bf16.mxu1 %v16034_v22  ;;  %v16151_v21 = vcombine.low %v1582_v63, %v1594_v1 }
 0x501   : > { %13268 = vmatprep.mubr.bf16.mxu0 %v17731_v6  ;;  %13473 = vmatprep.mubr.bf16.mxu1 %v17731_v6 }
 0x503   : > { %13239 = vmatpush1.bf16.msra.mxu0 %v16031_v28  ;;  %13444 = vmatpush1.bf16.msra.mxu1 %v16033_v60 }
 0x504   : > { %13240 = vmatprep.subr.bf16.mxu0 %v16056_v31  ;;  %13445 = vmatprep.subr.bf16.mxu1 %v16058_v32  ;;  %v16178_v31 = vcombine.high %v1607_v15, %v1619_v16  ;;  %v1630_v32 = vld [vmem:[%s17463_s22 + $0x2a30] sm:$0xff] }
 0x505   : > { %v16200_v42 = vcombine.high %v1630_v32, %v1642_v0 }
 0x507   : > { %13241 = vmatpush1.bf16.msra.mxu0 %v16055_v37  ;;  %13446 = vmatpush1.bf16.msra.mxu1 %v16057_v38  ;;  %v274_v37 = vld [vmem:[#allocation2 + $0x10] sm:$0xff]  ;;  %v16175_v38 = vcombine.low %v1606_v9, %v1618_v12 }
 0x508   : > { %13242 = vmatprep.subr.bf16.mxu0 %v16080_v40  ;;  %13447 = vmatprep.subr.bf16.mxu1 %v16082_v41  ;;  %v16177_v41 = vcombine.low %v1607_v15, %v1619_v16  ;;  %v1727_v15 = vld [vmem:[%s17463_s22 + $0x2d38] sm:$0xff] }
 0x509   : > { %v1739_v16 = vld [vmem:[%s17463_s22 + $0x2d98] sm:$0xff] }
 0x50b   : > { %13243 = vmatpush1.bf16.msra.mxu0 %v16079_v47  ;;  %13448 = vmatpush1.bf16.msra.mxu1 %v16081_v50  ;;  %v1655_v50 = vld [vmem:[%s17463_s22 + $0x2af8] sm:$0xff] }
 0x50c   : > { %13244 = vmatprep.subr.bf16.mxu0 %v16104_v51  ;;  %13449 = vmatprep.subr.bf16.mxu1 %v16106_v52  ;;  %v1667_v51 = vld [vmem:[%s17463_s22 + $0x2b58] sm:$0xff]  ;;  %v16199_v52 = vcombine.low %v1630_v32, %v1642_v0  ;;  %v1774_v32 = vld [vmem:[%s17463_s22 + $0x2eb0] sm:$0xff] }
 0x50d   : > { %v16226_v56 = vcombine.high %v1655_v50, %v1667_v51  ;;  %v16225_v63 = vcombine.low %v1655_v50, %v1667_v51  ;;  %v1786_v0 = vld [vmem:[%s17463_s22 + $0x2f10] sm:$0xff] }
 0x50f   : > { %13245 = vmatpush1.bf16.msra.mxu0 %v16103_v58  ;;  %13450 = vmatpush1.bf16.msra.mxu1 %v16105_v54  ;;  %v1690_v58 = vld [vmem:[%s17463_s22 + $0x2c10] sm:$0xff]  ;;  %v1679_v54 = vld [vmem:[%s17463_s22 + $0x2bb8] sm:$0xff] }
 0x510   : > { %13246 = vmatprep.subr.bf16.mxu0 %v16128_v61  ;;  %13451 = vmatprep.subr.bf16.mxu1 %v16130_v62  ;;  %v1691_v61 = vld [vmem:[%s17463_s22 + $0x2c18] sm:$0xff]  ;;  %v16223_v62 = vcombine.low %v1654_v44, %v1666_v46  ;;  %v16248_v1 = vcombine.high %v1678_v57, %v1690_v58  ;;  %v16343_v46 = vcombine.low %v1774_v32, %v1786_v0 }
 0x511   : > { %v12901_v7 = vpop.f32.mrb[8].mxu0  ;;  %v13106_v13 = vpop.f32.mrb[8].mxu1  ;;  %v16250_v2 = vcombine.high %v1679_v54, %v1691_v61  ;;  %v1811_v44 = vld [vmem:[%s17463_s22 + $0x2fd8] sm:$0xff] }
 0x512   : > { %v12903_v14 = vpop.f32.mrb[9].mxu0  ;;  %v13108_v18 = vpop.f32.mrb[9].mxu1 }
 0x513   : > { %v14401_v17 = vcombine.low %v12901_v7, %v12903_v14  ;;  %v12905_v20 = vpop.f32.mrb[10].mxu0  ;;  %13247 = vmatpush1.bf16.msra.mxu0 %v16127_v4  ;;  %v14402_v22 = vcombine.low %v13106_v13, %v13108_v18  ;;  %v13110_v23 = vpop.f32.mrb[10].mxu1  ;;  %13452 = vmatpush1.bf16.msra.mxu1 %v16129_v5  ;;  %v1714_v4 = vld [vmem:[%s17463_s22 + $0x2cd0] sm:$0xff]  ;;  %v1703_v5 = vld [vmem:[%s17463_s22 + $0x2c78] sm:$0xff]  ;;  %v16247_v7 = vcombine.low %v1678_v57, %v1690_v58 }
 0x514   : > { %v12906_v25 = vpop.f32.mrb[11].mxu0  ;;  %13248 = vmatprep.subr.bf16.mxu0 %v16152_v30  ;;  %v13111_v60 = vpop.f32.mrb[11].mxu1  ;;  %13453 = vmatprep.subr.bf16.mxu1 %v16154_v8  ;;  %v1715_v30 = vld [vmem:[%s17463_s22 + $0x2cd8] sm:$0xff]  ;;  %v16249_v8 = vcombine.low %v1679_v54, %v1691_v61  ;;  %v16272_v9 = vcombine.high %v1702_v3, %v1714_v4  ;;  %v1726_v13 = vld [vmem:[%s17463_s22 + $0x2d30] sm:$0xff] }
 0x515   : > { %v14409_v28 = vrot.slane %v14401_v17, %v18112_v11  ;;  %v14416_v34 = vrot.slane %v14402_v22, %v18112_v11  ;;  %v16274_v12 = vcombine.high %v1703_v5, %v1715_v30  ;;  %v1738_v14 = vld [vmem:[%s17463_s22 + $0x2d90] sm:$0xff]  ;;  %v16271_v17 = vcombine.low %v1702_v3, %v1714_v4  ;;  %v1751_v25 = vld [vmem:[%s17463_s22 + $0x2df8] sm:$0xff] }
 0x516   : > { %v16273_v18 = vcombine.low %v1703_v5, %v1715_v30  ;;  %v16296_v20 = vcombine.high %v1726_v13, %v1738_v14  ;;  %v1750_v22 = vld [vmem:[%s17463_s22 + $0x2df0] sm:$0xff] }
 0x517   : > { %13249 = vmatpush1.bf16.msra.mxu0 %v16151_v21  ;;  %v14417_v40 = vcombine.low %v14409_v28, %v14416_v34  ;;  %13454 = vmatpush1.bf16.msra.mxu1 %v16153_v26  ;;  %v16298_v21 = vcombine.high %v1727_v15, %v1739_v16  ;;  %v1762_v23 = vld [vmem:[%s17463_s22 + $0x2e50] sm:$0xff]  ;;  %v1763_v26 = vld [vmem:[%s17463_s22 + $0x2e58] sm:$0xff]  ;;  %v16297_v28 = vcombine.low %v1727_v15, %v1739_v16 }
 0x518   : > { %13250 = vmatprep.subr.bf16.mxu0 %v16176_v27  ;;  %13455 = vmatprep.subr.bf16.mxu1 %v16178_v31  ;;  %v16295_v27 = vcombine.low %v1726_v13, %v1738_v14  ;;  %v16320_v60 = vcombine.high %v1750_v22, %v1762_v23  ;;  %v16322_v31 = vcombine.high %v1751_v25, %v1763_v26  ;;  %v1775_v34 = vld [vmem:[%s17463_s22 + $0x2eb8] sm:$0xff] }
 0x519   : > { %v14477_v47 = vadd.f32 %v14417_v40, %v274_v37  ;;  %v16319_v36 = vcombine.low %v1750_v22, %v1762_v23  ;;  %v16321_v37 = vcombine.low %v1751_v25, %v1763_v26  ;;  %v16346_v40 = vcombine.high %v1775_v34, %v1787_v35 }
 0x51b   : > { %13251 = vmatpush1.bf16.msra.mxu0 %v16175_v38  ;;  %14483 = vst [vmem:[#allocation2 + $0x10] sm:$0xff] %v14477_v47  ;;  %13456 = vmatpush1.bf16.msra.mxu1 %v16177_v41  ;;  %v16344_v38 = vcombine.high %v1774_v32, %v1786_v0  ;;  %v1798_v41 = vld [vmem:[%s17463_s22 + $0x2f70] sm:$0xff]  ;;  %v16345_v47 = vcombine.low %v1775_v34, %v1787_v35 }
 0x51c   : > { %13252 = vmatprep.subr.bf16.mxu0 %v16200_v42  ;;  %13457 = vmatprep.subr.bf16.mxu1 %v16202_v43  ;;  %v1810_v42 = vld [vmem:[%s17463_s22 + $0x2fd0] sm:$0xff]  ;;  %v1799_v43 = vld [vmem:[%s17463_s22 + $0x2f78] sm:$0xff] }
 0x51d   : > { %v16368_v50 = vcombine.high %v1798_v41, %v1810_v42  ;;  %v16370_v51 = vcombine.high %v1799_v43, %v1811_v44  ;;  %v16367_v57 = vcombine.low %v1798_v41, %v1810_v42  ;;  %v16369_v58 = vcombine.low %v1799_v43, %v1811_v44 }
 0x51f   : > { %13253 = vmatpush1.bf16.msra.mxu0 %v16199_v52  ;;  %13458 = vmatpush1.bf16.msra.mxu1 %v16201_v53  ;;  %v1822_v52 = vld [vmem:[%s17463_s22 + $0x3030] sm:$0xff] }
 0x520   : > { %13254 = vmatprep.subr.bf16.mxu0 %v16224_v55  ;;  %13459 = vmatprep.subr.bf16.mxu1 %v16226_v56  ;;  %v1834_v53 = vld [vmem:[%s17463_s22 + $0x3090] sm:$0xff]  ;;  %v1823_v55 = vld [vmem:[%s17463_s22 + $0x3038] sm:$0xff] }
 0x521   : > { %v1835_v56 = vld [vmem:[%s17463_s22 + $0x3098] sm:$0xff]  ;;  %v16392_v54 = vcombine.high %v1822_v52, %v1834_v53  ;;  %v16391_v3 = vcombine.low %v1822_v52, %v1834_v53 }
 0x522   : > { %v16394_v61 = vcombine.high %v1823_v55, %v1835_v56  ;;  %v16393_v4 = vcombine.low %v1823_v55, %v1835_v56 }
 0x523   : > { %13255 = vmatpush1.bf16.msra.mxu0 %v16223_v62  ;;  %13460 = vmatpush1.bf16.msra.mxu1 %v16225_v63  ;;  %v1846_v62 = vld [vmem:[%s17463_s22 + $0x30f0] sm:$0xff] }
 0x524   : > { %13256 = vmatprep.subr.bf16.mxu0 %v16248_v1  ;;  %13461 = vmatprep.subr.bf16.mxu1 %v16250_v2  ;;  %v1858_v63 = vld [vmem:[%s17463_s22 + $0x3150] sm:$0xff]  ;;  %v1847_v1 = vld [vmem:[%s17463_s22 + $0x30f8] sm:$0xff] }
 0x525   : > { %v1859_v2 = vld [vmem:[%s17463_s22 + $0x3158] sm:$0xff]  ;;  %v16416_v5 = vcombine.high %v1846_v62, %v1858_v63  ;;  %v16415_v13 = vcombine.low %v1846_v62, %v1858_v63 }
 0x526   : > { %v16418_v30 = vcombine.high %v1847_v1, %v1859_v2  ;;  %v16417_v14 = vcombine.low %v1847_v1, %v1859_v2 }
 0x527   : > { %13257 = vmatpush1.bf16.msra.mxu0 %v16247_v7  ;;  %13462 = vmatpush1.bf16.msra.mxu1 %v16249_v8  ;;  %v1870_v7 = vld [vmem:[%s17463_s22 + $0x31b0] sm:$0xff] }
 0x528   : > { %13258 = vmatprep.subr.bf16.mxu0 %v16272_v9  ;;  %13463 = vmatprep.subr.bf16.mxu1 %v16274_v12  ;;  %v1882_v8 = vld [vmem:[%s17463_s22 + $0x3210] sm:$0xff]  ;;  %v1871_v9 = vld [vmem:[%s17463_s22 + $0x31b8] sm:$0xff] }
 0x529   : > { %v1883_v12 = vld [vmem:[%s17463_s22 + $0x3218] sm:$0xff]  ;;  %v16440_v15 = vcombine.high %v1870_v7, %v1882_v8  ;;  %v16439_v22 = vcombine.low %v1870_v7, %v1882_v8 }
 0x52a   : > { %v16442_v16 = vcombine.high %v1871_v9, %v1883_v12  ;;  %v16441_v23 = vcombine.low %v1871_v9, %v1883_v12 }
 0x52b   : > { %13259 = vmatpush1.bf16.msra.mxu0 %v16271_v17  ;;  %13464 = vmatpush1.bf16.msra.mxu1 %v16273_v18  ;;  %v1894_v17 = vld [vmem:[%s17463_s22 + $0x3270] sm:$0xff] }
 0x52c   : > { %13260 = vmatprep.subr.bf16.mxu0 %v16296_v20  ;;  %13465 = vmatprep.subr.bf16.mxu1 %v16298_v21  ;;  %v1906_v18 = vld [vmem:[%s17463_s22 + $0x32d0] sm:$0xff]  ;;  %v1895_v20 = vld [vmem:[%s17463_s22 + $0x3278] sm:$0xff] }
 0x52d   : > { %v1907_v21 = vld [vmem:[%s17463_s22 + $0x32d8] sm:$0xff]  ;;  %v16464_v25 = vcombine.high %v1894_v17, %v1906_v18  ;;  %v16463_v32 = vcombine.low %v1894_v17, %v1906_v18 }
 0x52e   : > { %v16466_v26 = vcombine.high %v1895_v20, %v1907_v21  ;;  %v16465_v0 = vcombine.low %v1895_v20, %v1907_v21 }
 0x52f   : > { %13261 = vmatpush1.bf16.msra.mxu0 %v16295_v27  ;;  %13466 = vmatpush1.bf16.msra.mxu1 %v16297_v28  ;;  %v1918_v27 = vld [vmem:[%s17463_s22 + $0x3330] sm:$0xff] }
 0x530   : > { %13262 = vmatprep.subr.bf16.mxu0 %v16320_v60  ;;  %13467 = vmatprep.subr.bf16.mxu1 %v16322_v31  ;;  %v1930_v28 = vld [vmem:[%s17463_s22 + $0x3390] sm:$0xff]  ;;  %v1919_v60 = vld [vmem:[%s17463_s22 + $0x3338] sm:$0xff] }
 0x531   : > { %v1931_v31 = vld [vmem:[%s17463_s22 + $0x3398] sm:$0xff]  ;;  %v16488_v34 = vcombine.high %v1918_v27, %v1930_v28  ;;  %v16487_v41 = vcombine.low %v1918_v27, %v1930_v28 }
 0x532   : > { %v16490_v35 = vcombine.high %v1919_v60, %v1931_v31  ;;  %v16489_v42 = vcombine.low %v1919_v60, %v1931_v31 }
 0x533   : > { %13263 = vmatpush1.bf16.msra.mxu0 %v16319_v36  ;;  %13468 = vmatpush1.bf16.msra.mxu1 %v16321_v37  ;;  %v1942_v36 = vld [vmem:[%s17463_s22 + $0x33f0] sm:$0xff] }
 0x534   : > { %13264 = vmatprep.subr.bf16.mxu0 %v16344_v38  ;;  %13469 = vmatprep.subr.bf16.mxu1 %v16346_v40  ;;  %v1954_v37 = vld [vmem:[%s17463_s22 + $0x3450] sm:$0xff]  ;;  %v1943_v38 = vld [vmem:[%s17463_s22 + $0x33f8] sm:$0xff] }
 0x535   : > { %v1955_v40 = vld [vmem:[%s17463_s22 + $0x3458] sm:$0xff]  ;;  %v16512_v43 = vcombine.high %v1942_v36, %v1954_v37  ;;  %v16511_v52 = vcombine.low %v1942_v36, %v1954_v37 }
 0x536   : > { %v16514_v44 = vcombine.high %v1943_v38, %v1955_v40  ;;  %v16513_v53 = vcombine.low %v1943_v38, %v1955_v40 }
 0x537   : > { %13265 = vmatpush1.bf16.msra.mxu0 %v16343_v46  ;;  %13470 = vmatpush1.bf16.msra.mxu1 %v16345_v47  ;;  %v1966_v46 = vld [vmem:[%s17463_s22 + $0x34b0] sm:$0xff] }
 0x538   : > { %13266 = vmatprep.subr.bf16.mxu0 %v16368_v50  ;;  %13471 = vmatprep.subr.bf16.mxu1 %v16370_v51  ;;  %v1978_v47 = vld [vmem:[%s17463_s22 + $0x3510] sm:$0xff]  ;;  %v1967_v50 = vld [vmem:[%s17463_s22 + $0x34b8] sm:$0xff] }
 0x539   : > { %v1979_v51 = vld [vmem:[%s17463_s22 + $0x3518] sm:$0xff]  ;;  %v16536_v55 = vcombine.high %v1966_v46, %v1978_v47  ;;  %v16535_v62 = vcombine.low %v1966_v46, %v1978_v47 }
 0x53a   : > { %v16538_v56 = vcombine.high %v1967_v50, %v1979_v51  ;;  %v16537_v63 = vcombine.low %v1967_v50, %v1979_v51 }
 0x53b   : > { %13267 = vmatpush1.bf16.msra.mxu0 %v16367_v57  ;;  %13472 = vmatpush1.bf16.msra.mxu1 %v16369_v58  ;;  %v1990_v57 = vld [vmem:[%s17463_s22 + $0x3570] sm:$0xff] }
 0x53c   : > { %13277 = vmatprep.subr.bf16.mxu0 %v16392_v54  ;;  %13482 = vmatprep.subr.bf16.mxu1 %v16394_v61  ;;  %v2002_v58 = vld [vmem:[%s17463_s22 + $0x35d0] sm:$0xff]  ;;  %v1991_v54 = vld [vmem:[%s17463_s22 + $0x3578] sm:$0xff] }
 0x53d   : > { %v2003_v61 = vld [vmem:[%s17463_s22 + $0x35d8] sm:$0xff]  ;;  %v16560_v1 = vcombine.high %v1990_v57, %v2002_v58  ;;  %v16559_v7 = vcombine.low %v1990_v57, %v2002_v58 }
 0x53e   : > { %13269 = vmatmul.mubr.bf16.vlgmr.msra.gmra.mrb[12].mxu0 %v17804_v19  ;;  %13474 = vmatmul.mubr.bf16.vlgmr.msra.gmra.mrb[12].mxu1 %v17804_v19  ;;  %v16562_v2 = vcombine.high %v1991_v54, %v2003_v61  ;;  %v16561_v8 = vcombine.low %v1991_v54, %v2003_v61 }
 0x53f   : > { %13278 = vmatpush1.bf16.msra.mxu0 %v16391_v3  ;;  %13483 = vmatpush1.bf16.msra.mxu1 %v16393_v4  ;;  %v2014_v3 = vld [vmem:[%s17463_s22 + $0x3630] sm:$0xff] }
 0x540   : > { %13279 = vmatprep.subr.bf16.mxu0 %v16416_v5  ;;  %13484 = vmatprep.subr.bf16.mxu1 %v16418_v30  ;;  %v2026_v4 = vld [vmem:[%s17463_s22 + $0x3690] sm:$0xff]  ;;  %v2015_v5 = vld [vmem:[%s17463_s22 + $0x3638] sm:$0xff] }
 0x541   : > { %13309 = vmatprep.mubr.bf16.mxu0 %v17811_v29  ;;  %13514 = vmatprep.mubr.bf16.mxu1 %v17811_v29  ;;  %v2027_v30 = vld [vmem:[%s17463_s22 + $0x3698] sm:$0xff]  ;;  %v16584_v9 = vcombine.high %v2014_v3, %v2026_v4  ;;  %v16583_v17 = vcombine.low %v2014_v3, %v2026_v4 }
 0x542   : > { %v16586_v12 = vcombine.high %v2015_v5, %v2027_v30  ;;  %v16585_v18 = vcombine.low %v2015_v5, %v2027_v30 }
 0x543   : > { %13280 = vmatpush1.bf16.msra.mxu0 %v16415_v13  ;;  %13485 = vmatpush1.bf16.msra.mxu1 %v16417_v14  ;;  %v2038_v13 = vld [vmem:[%s17463_s22 + $0x36f0] sm:$0xff] }
 0x544   : > { %13281 = vmatprep.subr.bf16.mxu0 %v16440_v15  ;;  %13486 = vmatprep.subr.bf16.mxu1 %v16442_v16  ;;  %v2050_v14 = vld [vmem:[%s17463_s22 + $0x3750] sm:$0xff]  ;;  %v2039_v15 = vld [vmem:[%s17463_s22 + $0x36f8] sm:$0xff] }
 0x545   : > { %v2051_v16 = vld [vmem:[%s17463_s22 + $0x3758] sm:$0xff]  ;;  %v16608_v20 = vcombine.high %v2038_v13, %v2050_v14  ;;  %v16607_v27 = vcombine.low %v2038_v13, %v2050_v14 }
 0x546   : > { %v16610_v21 = vcombine.high %v2039_v15, %v2051_v16  ;;  %v16609_v28 = vcombine.low %v2039_v15, %v2051_v16 }
 0x547   : > { %13282 = vmatpush1.bf16.msra.mxu0 %v16439_v22  ;;  %13487 = vmatpush1.bf16.msra.mxu1 %v16441_v23  ;;  %v2062_v22 = vld [vmem:[%s17463_s22 + $0x37b0] sm:$0xff] }
 0x548   : > { %13283 = vmatprep.subr.bf16.mxu0 %v16464_v25  ;;  %13488 = vmatprep.subr.bf16.mxu1 %v16466_v26  ;;  %v2074_v23 = vld [vmem:[%s17463_s22 + $0x3810] sm:$0xff]  ;;  %v2063_v25 = vld [vmem:[%s17463_s22 + $0x37b8] sm:$0xff] }
 0x549   : > { %v2075_v26 = vld [vmem:[%s17463_s22 + $0x3818] sm:$0xff]  ;;  %v16632_v60 = vcombine.high %v2062_v22, %v2074_v23  ;;  %v16631_v36 = vcombine.low %v2062_v22, %v2074_v23 }
 0x54a   : > { %v16634_v31 = vcombine.high %v2063_v25, %v2075_v26  ;;  %v16633_v37 = vcombine.low %v2063_v25, %v2075_v26 }
 0x54b   : > { %13284 = vmatpush1.bf16.msra.mxu0 %v16463_v32  ;;  %13489 = vmatpush1.bf16.msra.mxu1 %v16465_v0  ;;  %v2086_v32 = vld [vmem:[%s17463_s22 + $0x3870] sm:$0xff] }
 0x54c   : > { %13285 = vmatprep.subr.bf16.mxu0 %v16488_v34  ;;  %13490 = vmatprep.subr.bf16.mxu1 %v16490_v35  ;;  %v2098_v0 = vld [vmem:[%s17463_s22 + $0x38d0] sm:$0xff]  ;;  %v2087_v34 = vld [vmem:[%s17463_s22 + $0x3878] sm:$0xff] }
 0x54d   : > { %v2099_v35 = vld [vmem:[%s17463_s22 + $0x38d8] sm:$0xff]  ;;  %v16656_v38 = vcombine.high %v2086_v32, %v2098_v0  ;;  %v16655_v46 = vcombine.low %v2086_v32, %v2098_v0 }
 0x54e   : > { %v16658_v40 = vcombine.high %v2087_v34, %v2099_v35  ;;  %v16657_v47 = vcombine.low %v2087_v34, %v2099_v35 }
 0x54f   : > { %13286 = vmatpush1.bf16.msra.mxu0 %v16487_v41  ;;  %13491 = vmatpush1.bf16.msra.mxu1 %v16489_v42  ;;  %v2110_v41 = vld [vmem:[%s17463_s22 + $0x3930] sm:$0xff] }
 0x550   : > { %13287 = vmatprep.subr.bf16.mxu0 %v16512_v43  ;;  %13492 = vmatprep.subr.bf16.mxu1 %v16514_v44  ;;  %v2122_v42 = vld [vmem:[%s17463_s22 + $0x3990] sm:$0xff]  ;;  %v2111_v43 = vld [vmem:[%s17463_s22 + $0x3938] sm:$0xff] }
 0x551   : > { %v2123_v44 = vld [vmem:[%s17463_s22 + $0x3998] sm:$0xff]  ;;  %v16680_v50 = vcombine.high %v2110_v41, %v2122_v42  ;;  %v16679_v57 = vcombine.low %v2110_v41, %v2122_v42 }
 0x552   : > { %v16682_v51 = vcombine.high %v2111_v43, %v2123_v44  ;;  %v16681_v58 = vcombine.low %v2111_v43, %v2123_v44 }
 0x553   : > { %13288 = vmatpush1.bf16.msra.mxu0 %v16511_v52  ;;  %13493 = vmatpush1.bf16.msra.mxu1 %v16513_v53  ;;  %v2134_v52 = vld [vmem:[%s17463_s22 + $0x39f0] sm:$0xff] }
 0x554   : > { %13289 = vmatprep.subr.bf16.mxu0 %v16536_v55  ;;  %13494 = vmatprep.subr.bf16.mxu1 %v16538_v56  ;;  %v2146_v53 = vld [vmem:[%s17463_s22 + $0x3a50] sm:$0xff]  ;;  %v2135_v55 = vld [vmem:[%s17463_s22 + $0x39f8] sm:$0xff] }
 0x555   : > { %v2147_v56 = vld [vmem:[%s17463_s22 + $0x3a58] sm:$0xff]  ;;  %v16704_v54 = vcombine.high %v2134_v52, %v2146_v53  ;;  %v16703_v3 = vcombine.low %v2134_v52, %v2146_v53 }
 0x556   : > { %v16706_v61 = vcombine.high %v2135_v55, %v2147_v56  ;;  %v16705_v4 = vcombine.low %v2135_v55, %v2147_v56 }
 0x557   : > { %13290 = vmatpush1.bf16.msra.mxu0 %v16535_v62  ;;  %13495 = vmatpush1.bf16.msra.mxu1 %v16537_v63  ;;  %v2158_v62 = vld [vmem:[%s17463_s22 + $0x3ab0] sm:$0xff] }
 0x558   : > { %13291 = vmatprep.subr.bf16.mxu0 %v16560_v1  ;;  %13496 = vmatprep.subr.bf16.mxu1 %v16562_v2  ;;  %v2170_v63 = vld [vmem:[%s17463_s22 + $0x3b10] sm:$0xff]  ;;  %v2159_v1 = vld [vmem:[%s17463_s22 + $0x3ab8] sm:$0xff] }
 0x559   : > { %v2171_v2 = vld [vmem:[%s17463_s22 + $0x3b18] sm:$0xff]  ;;  %v16728_v5 = vcombine.high %v2158_v62, %v2170_v63  ;;  %v16727_v13 = vcombine.low %v2158_v62, %v2170_v63 }
 0x55a   : > { %v16730_v30 = vcombine.high %v2159_v1, %v2171_v2  ;;  %v16729_v14 = vcombine.low %v2159_v1, %v2171_v2 }
 0x55b   : > { %13292 = vmatpush1.bf16.msra.mxu0 %v16559_v7  ;;  %13497 = vmatpush1.bf16.msra.mxu1 %v16561_v8  ;;  %v2182_v7 = vld [vmem:[%s17463_s22 + $0x3b70] sm:$0xff] }
 0x55c   : > { %13293 = vmatprep.subr.bf16.mxu0 %v16584_v9  ;;  %13498 = vmatprep.subr.bf16.mxu1 %v16586_v12  ;;  %v2194_v8 = vld [vmem:[%s17463_s22 + $0x3bd0] sm:$0xff]  ;;  %v2183_v9 = vld [vmem:[%s17463_s22 + $0x3b78] sm:$0xff] }
 0x55d   : > { %v2195_v12 = vld [vmem:[%s17463_s22 + $0x3bd8] sm:$0xff]  ;;  %v16752_v15 = vcombine.high %v2182_v7, %v2194_v8  ;;  %v16751_v22 = vcombine.low %v2182_v7, %v2194_v8 }
 0x55e   : > { %v16754_v16 = vcombine.high %v2183_v9, %v2195_v12  ;;  %v16753_v23 = vcombine.low %v2183_v9, %v2195_v12 }
 0x55f   : > { %13294 = vmatpush1.bf16.msra.mxu0 %v16583_v17  ;;  %13499 = vmatpush1.bf16.msra.mxu1 %v16585_v18  ;;  %v288_v17 = vld [vmem:[%s17463_s22 + $0x40] sm:$0xff] }
 0x560   : > { %13295 = vmatprep.subr.bf16.mxu0 %v16608_v20  ;;  %13500 = vmatprep.subr.bf16.mxu1 %v16610_v21  ;;  %v300_v18 = vld [vmem:[%s17463_s22 + $0xa0] sm:$0xff]  ;;  %v289_v20 = vld [vmem:[%s17463_s22 + $0x48] sm:$0xff] }
 0x561   : > { %v301_v21 = vld [vmem:[%s17463_s22 + $0xa8] sm:$0xff]  ;;  %v14860_v25 = vcombine.high %v288_v17, %v300_v18  ;;  %v14859_v32 = vcombine.low %v288_v17, %v300_v18 }
 0x562   : > { %v14862_v26 = vcombine.high %v289_v20, %v301_v21  ;;  %v14861_v0 = vcombine.low %v289_v20, %v301_v21 }
 0x563   : > { %13296 = vmatpush1.bf16.msra.mxu0 %v16607_v27  ;;  %13501 = vmatpush1.bf16.msra.mxu1 %v16609_v28  ;;  %v312_v27 = vld [vmem:[%s17463_s22 + $0x100] sm:$0xff] }
 0x564   : > { %13297 = vmatprep.subr.bf16.mxu0 %v16632_v60  ;;  %13502 = vmatprep.subr.bf16.mxu1 %v16634_v31  ;;  %v324_v28 = vld [vmem:[%s17463_s22 + $0x160] sm:$0xff]  ;;  %v313_v60 = vld [vmem:[%s17463_s22 + $0x108] sm:$0xff] }
 0x565   : > { %v325_v31 = vld [vmem:[%s17463_s22 + $0x168] sm:$0xff]  ;;  %v14884_v34 = vcombine.high %v312_v27, %v324_v28  ;;  %v14883_v41 = vcombine.low %v312_v27, %v324_v28 }
 0x566   : > { %v14886_v35 = vcombine.high %v313_v60, %v325_v31  ;;  %v14885_v42 = vcombine.low %v313_v60, %v325_v31 }
 0x567   : > { %13298 = vmatpush1.bf16.msra.mxu0 %v16631_v36  ;;  %13503 = vmatpush1.bf16.msra.mxu1 %v16633_v37  ;;  %v336_v36 = vld [vmem:[%s17463_s22 + $0x1c0] sm:$0xff] }
 0x568   : > { %13299 = vmatprep.subr.bf16.mxu0 %v16656_v38  ;;  %13504 = vmatprep.subr.bf16.mxu1 %v16658_v40  ;;  %v348_v37 = vld [vmem:[%s17463_s22 + $0x220] sm:$0xff]  ;;  %v337_v38 = vld [vmem:[%s17463_s22 + $0x1c8] sm:$0xff] }
 0x569   : > { %v349_v40 = vld [vmem:[%s17463_s22 + $0x228] sm:$0xff]  ;;  %v14908_v43 = vcombine.high %v336_v36, %v348_v37  ;;  %v14907_v52 = vcombine.low %v336_v36, %v348_v37 }
 0x56a   : > { %v14910_v44 = vcombine.high %v337_v38, %v349_v40  ;;  %v14909_v53 = vcombine.low %v337_v38, %v349_v40 }
 0x56b   : > { %13300 = vmatpush1.bf16.msra.mxu0 %v16655_v46  ;;  %13505 = vmatpush1.bf16.msra.mxu1 %v16657_v47  ;;  %v360_v46 = vld [vmem:[%s17463_s22 + $0x280] sm:$0xff] }
 0x56c   : > { %13301 = vmatprep.subr.bf16.mxu0 %v16680_v50  ;;  %13506 = vmatprep.subr.bf16.mxu1 %v16682_v51  ;;  %v372_v47 = vld [vmem:[%s17463_s22 + $0x2e0] sm:$0xff]  ;;  %v361_v50 = vld [vmem:[%s17463_s22 + $0x288] sm:$0xff] }
 0x56d   : > { %v373_v51 = vld [vmem:[%s17463_s22 + $0x2e8] sm:$0xff]  ;;  %v14932_v55 = vcombine.high %v360_v46, %v372_v47  ;;  %v14931_v62 = vcombine.low %v360_v46, %v372_v47 }
 0x56e   : > { %v14934_v56 = vcombine.high %v361_v50, %v373_v51  ;;  %v14933_v63 = vcombine.low %v361_v50, %v373_v51 }
 0x56f   : > { %13302 = vmatpush1.bf16.msra.mxu0 %v16679_v57  ;;  %13507 = vmatpush1.bf16.msra.mxu1 %v16681_v58  ;;  %v384_v57 = vld [vmem:[%s17463_s22 + $0x340] sm:$0xff] }
 0x570   : > { %13303 = vmatprep.subr.bf16.mxu0 %v16704_v54  ;;  %13508 = vmatprep.subr.bf16.mxu1 %v16706_v61  ;;  %v396_v58 = vld [vmem:[%s17463_s22 + $0x3a0] sm:$0xff]  ;;  %v385_v54 = vld [vmem:[%s17463_s22 + $0x348] sm:$0xff] }
 0x571   : > { %v397_v61 = vld [vmem:[%s17463_s22 + $0x3a8] sm:$0xff]  ;;  %v14956_v1 = vcombine.high %v384_v57, %v396_v58  ;;  %v14955_v7 = vcombine.low %v384_v57, %v396_v58 }
 0x572   : > { %v14958_v2 = vcombine.high %v385_v54, %v397_v61  ;;  %v14957_v8 = vcombine.low %v385_v54, %v397_v61 }
 0x573   : > { %13304 = vmatpush1.bf16.msra.mxu0 %v16703_v3  ;;  %13509 = vmatpush1.bf16.msra.mxu1 %v16705_v4  ;;  %v408_v3 = vld [vmem:[%s17463_s22 + $0x400] sm:$0xff] }
 0x574   : > { %13305 = vmatprep.subr.bf16.mxu0 %v16728_v5  ;;  %13510 = vmatprep.subr.bf16.mxu1 %v16730_v30  ;;  %v420_v4 = vld [vmem:[%s17463_s22 + $0x460] sm:$0xff]  ;;  %v409_v5 = vld [vmem:[%s17463_s22 + $0x408] sm:$0xff] }
 0x575   : > { %v421_v30 = vld [vmem:[%s17463_s22 + $0x468] sm:$0xff]  ;;  %v14980_v9 = vcombine.high %v408_v3, %v420_v4  ;;  %v14979_v17 = vcombine.low %v408_v3, %v420_v4 }
 0x576   : > { %v14982_v12 = vcombine.high %v409_v5, %v421_v30  ;;  %v14981_v18 = vcombine.low %v409_v5, %v421_v30 }
 0x577   : > { %13306 = vmatpush1.bf16.msra.mxu0 %v16727_v13  ;;  %13511 = vmatpush1.bf16.msra.mxu1 %v16729_v14  ;;  %v432_v13 = vld [vmem:[%s17463_s22 + $0x4c0] sm:$0xff] }
 0x578   : > { %13307 = vmatprep.subr.bf16.mxu0 %v16752_v15  ;;  %13512 = vmatprep.subr.bf16.mxu1 %v16754_v16  ;;  %v444_v14 = vld [vmem:[%s17463_s22 + $0x520] sm:$0xff]  ;;  %v433_v15 = vld [vmem:[%s17463_s22 + $0x4c8] sm:$0xff] }
 0x579   : > { %v445_v16 = vld [vmem:[%s17463_s22 + $0x528] sm:$0xff]  ;;  %v15004_v20 = vcombine.high %v432_v13, %v444_v14  ;;  %v15003_v27 = vcombine.low %v432_v13, %v444_v14 }
 0x57a   : > { %v15006_v21 = vcombine.high %v433_v15, %v445_v16  ;;  %v15005_v28 = vcombine.low %v433_v15, %v445_v16 }
 0x57b   : > { %13308 = vmatpush1.bf16.msra.mxu0 %v16751_v22  ;;  %13513 = vmatpush1.bf16.msra.mxu1 %v16753_v23  ;;  %v456_v22 = vld [vmem:[%s17463_s22 + $0x580] sm:$0xff] }
 0x57c   : > { %13523 = vmatprep.subr.bf16.mxu0 %v14860_v25  ;;  %13728 = vmatprep.subr.bf16.mxu1 %v14862_v26  ;;  %v468_v23 = vld [vmem:[%s17463_s22 + $0x5e0] sm:$0xff]  ;;  %v457_v25 = vld [vmem:[%s17463_s22 + $0x588] sm:$0xff] }
 0x57d   : > { %v469_v26 = vld [vmem:[%s17463_s22 + $0x5e8] sm:$0xff]  ;;  %v15028_v60 = vcombine.high %v456_v22, %v468_v23  ;;  %v15027_v36 = vcombine.low %v456_v22, %v468_v23 }
 0x57e   : > { %13310 = vmatmul.mubr.bf16.vlgmr.msra.gmra.mrb[12].mxu0 %v17879_v48  ;;  %13515 = vmatmul.mubr.bf16.vlgmr.msra.gmra.mrb[12].mxu1 %v17879_v48  ;;  %v15030_v31 = vcombine.high %v457_v25, %v469_v26  ;;  %v15029_v37 = vcombine.low %v457_v25, %v469_v26 }
 0x57f   : > { %13524 = vmatpush1.bf16.msra.mxu0 %v14859_v32  ;;  %13729 = vmatpush1.bf16.msra.mxu1 %v14861_v0  ;;  %v480_v32 = vld [vmem:[%s17463_s22 + $0x640] sm:$0xff] }
 0x580   : > { %13525 = vmatprep.subr.bf16.mxu0 %v14884_v34  ;;  %13730 = vmatprep.subr.bf16.mxu1 %v14886_v35  ;;  %v492_v0 = vld [vmem:[%s17463_s22 + $0x6a0] sm:$0xff]  ;;  %v481_v34 = vld [vmem:[%s17463_s22 + $0x648] sm:$0xff] }
 0x581   : > { %13555 = vmatprep.mubr.bf16.mxu0 %v17523_v10  ;;  %13760 = vmatprep.mubr.bf16.mxu1 %v17523_v10  ;;  %v493_v35 = vld [vmem:[%s17463_s22 + $0x6a8] sm:$0xff]  ;;  %v15052_v38 = vcombine.high %v480_v32, %v492_v0  ;;  %v15051_v46 = vcombine.low %v480_v32, %v492_v0 }
 0x582   : > { %v15054_v40 = vcombine.high %v481_v34, %v493_v35  ;;  %v15053_v47 = vcombine.low %v481_v34, %v493_v35 }
 0x583   : > { %13526 = vmatpush1.bf16.msra.mxu0 %v14883_v41  ;;  %13731 = vmatpush1.bf16.msra.mxu1 %v14885_v42  ;;  %v504_v41 = vld [vmem:[%s17463_s22 + $0x700] sm:$0xff] }
 0x584   : > { %13527 = vmatprep.subr.bf16.mxu0 %v14908_v43  ;;  %13732 = vmatprep.subr.bf16.mxu1 %v14910_v44  ;;  %v516_v42 = vld [vmem:[%s17463_s22 + $0x760] sm:$0xff]  ;;  %v505_v43 = vld [vmem:[%s17463_s22 + $0x708] sm:$0xff] }
 0x585   : > { %v517_v44 = vld [vmem:[%s17463_s22 + $0x768] sm:$0xff]  ;;  %v15076_v50 = vcombine.high %v504_v41, %v516_v42  ;;  %v15075_v57 = vcombine.low %v504_v41, %v516_v42 }
 0x586   : > { %v15078_v51 = vcombine.high %v505_v43, %v517_v44  ;;  %v15077_v58 = vcombine.low %v505_v43, %v517_v44 }
 0x587   : > { %13528 = vmatpush1.bf16.msra.mxu0 %v14907_v52  ;;  %13733 = vmatpush1.bf16.msra.mxu1 %v14909_v53  ;;  %v528_v52 = vld [vmem:[%s17463_s22 + $0x7c0] sm:$0xff] }
 0x588   : > { %13529 = vmatprep.subr.bf16.mxu0 %v14932_v55  ;;  %13734 = vmatprep.subr.bf16.mxu1 %v14934_v56  ;;  %v540_v53 = vld [vmem:[%s17463_s22 + $0x820] sm:$0xff]  ;;  %v529_v55 = vld [vmem:[%s17463_s22 + $0x7c8] sm:$0xff] }
 0x589   : > { %v541_v56 = vld [vmem:[%s17463_s22 + $0x828] sm:$0xff]  ;;  %v15100_v54 = vcombine.high %v528_v52, %v540_v53  ;;  %v15099_v3 = vcombine.low %v528_v52, %v540_v53 }
 0x58a   : > { %v15102_v61 = vcombine.high %v529_v55, %v541_v56  ;;  %v15101_v4 = vcombine.low %v529_v55, %v541_v56 }
 0x58b   : > { %13530 = vmatpush1.bf16.msra.mxu0 %v14931_v62  ;;  %13735 = vmatpush1.bf16.msra.mxu1 %v14933_v63  ;;  %v552_v62 = vld [vmem:[%s17463_s22 + $0x880] sm:$0xff] }
 0x58c   : > { %13531 = vmatprep.subr.bf16.mxu0 %v14956_v1  ;;  %13736 = vmatprep.subr.bf16.mxu1 %v14958_v2  ;;  %v564_v63 = vld [vmem:[%s17463_s22 + $0x8e0] sm:$0xff]  ;;  %v553_v1 = vld [vmem:[%s17463_s22 + $0x888] sm:$0xff] }
 0x58d   : > { %v565_v2 = vld [vmem:[%s17463_s22 + $0x8e8] sm:$0xff]  ;;  %v15124_v5 = vcombine.high %v552_v62, %v564_v63  ;;  %v15123_v13 = vcombine.low %v552_v62, %v564_v63 }
 0x58e   : > { %v15126_v30 = vcombine.high %v553_v1, %v565_v2  ;;  %v15125_v14 = vcombine.low %v553_v1, %v565_v2 }
 0x58f   : > { %13532 = vmatpush1.bf16.msra.mxu0 %v14955_v7  ;;  %13737 = vmatpush1.bf16.msra.mxu1 %v14957_v8  ;;  %v576_v7 = vld [vmem:[%s17463_s22 + $0x940] sm:$0xff] }
 0x590   : > { %13533 = vmatprep.subr.bf16.mxu0 %v14980_v9  ;;  %13738 = vmatprep.subr.bf16.mxu1 %v14982_v12  ;;  %v588_v8 = vld [vmem:[%s17463_s22 + $0x9a0] sm:$0xff]  ;;  %v577_v9 = vld [vmem:[%s17463_s22 + $0x948] sm:$0xff] }
 0x591   : > { %v589_v12 = vld [vmem:[%s17463_s22 + $0x9a8] sm:$0xff]  ;;  %v15148_v15 = vcombine.high %v576_v7, %v588_v8  ;;  %v15147_v22 = vcombine.low %v576_v7, %v588_v8 }
 0x592   : > { %v15150_v16 = vcombine.high %v577_v9, %v589_v12  ;;  %v15149_v23 = vcombine.low %v577_v9, %v589_v12 }
 0x593   : > { %13534 = vmatpush1.bf16.msra.mxu0 %v14979_v17  ;;  %13739 = vmatpush1.bf16.msra.mxu1 %v14981_v18  ;;  %v600_v17 = vld [vmem:[%s17463_s22 + $0xa00] sm:$0xff] }
 0x594   : > { %13535 = vmatprep.subr.bf16.mxu0 %v15004_v20  ;;  %13740 = vmatprep.subr.bf16.mxu1 %v15006_v21  ;;  %v612_v18 = vld [vmem:[%s17463_s22 + $0xa60] sm:$0xff]  ;;  %v601_v20 = vld [vmem:[%s17463_s22 + $0xa08] sm:$0xff] }
 0x595   : > { %v613_v21 = vld [vmem:[%s17463_s22 + $0xa68] sm:$0xff]  ;;  %v15172_v25 = vcombine.high %v600_v17, %v612_v18  ;;  %v15171_v32 = vcombine.low %v600_v17, %v612_v18 }
 0x596   : > { %v15174_v26 = vcombine.high %v601_v20, %v613_v21  ;;  %v15173_v0 = vcombine.low %v601_v20, %v613_v21 }
 0x597   : > { %13536 = vmatpush1.bf16.msra.mxu0 %v15003_v27  ;;  %13741 = vmatpush1.bf16.msra.mxu1 %v15005_v28  ;;  %v624_v27 = vld [vmem:[%s17463_s22 + $0xac0] sm:$0xff] }
 0x598   : > { %13537 = vmatprep.subr.bf16.mxu0 %v15028_v60  ;;  %13742 = vmatprep.subr.bf16.mxu1 %v15030_v31  ;;  %v636_v28 = vld [vmem:[%s17463_s22 + $0xb20] sm:$0xff]  ;;  %v625_v60 = vld [vmem:[%s17463_s22 + $0xac8] sm:$0xff] }
 0x599   : > { %v637_v31 = vld [vmem:[%s17463_s22 + $0xb28] sm:$0xff]  ;;  %v15196_v34 = vcombine.high %v624_v27, %v636_v28  ;;  %v15195_v41 = vcombine.low %v624_v27, %v636_v28 }
 0x59a   : > { %v15198_v35 = vcombine.high %v625_v60, %v637_v31  ;;  %v15197_v42 = vcombine.low %v625_v60, %v637_v31 }
 0x59b   : > { %13538 = vmatpush1.bf16.msra.mxu0 %v15027_v36  ;;  %13743 = vmatpush1.bf16.msra.mxu1 %v15029_v37  ;;  %v648_v36 = vld [vmem:[%s17463_s22 + $0xb80] sm:$0xff] }
 0x59c   : > { %13539 = vmatprep.subr.bf16.mxu0 %v15052_v38  ;;  %13744 = vmatprep.subr.bf16.mxu1 %v15054_v40  ;;  %v660_v37 = vld [vmem:[%s17463_s22 + $0xbe0] sm:$0xff]  ;;  %v649_v38 = vld [vmem:[%s17463_s22 + $0xb88] sm:$0xff] }
 0x59d   : > { %v661_v40 = vld [vmem:[%s17463_s22 + $0xbe8] sm:$0xff]  ;;  %v15220_v43 = vcombine.high %v648_v36, %v660_v37  ;;  %v15219_v52 = vcombine.low %v648_v36, %v660_v37 }
 0x59e   : > { %v15222_v44 = vcombine.high %v649_v38, %v661_v40  ;;  %v15221_v53 = vcombine.low %v649_v38, %v661_v40 }
 0x59f   : > { %13540 = vmatpush1.bf16.msra.mxu0 %v15051_v46  ;;  %13745 = vmatpush1.bf16.msra.mxu1 %v15053_v47  ;;  %v672_v46 = vld [vmem:[%s17463_s22 + $0xc40] sm:$0xff] }
 0x5a0   : > { %13541 = vmatprep.subr.bf16.mxu0 %v15076_v50  ;;  %13746 = vmatprep.subr.bf16.mxu1 %v15078_v51  ;;  %v684_v47 = vld [vmem:[%s17463_s22 + $0xca0] sm:$0xff]  ;;  %v673_v50 = vld [vmem:[%s17463_s22 + $0xc48] sm:$0xff] }
 0x5a1   : > { %v685_v51 = vld [vmem:[%s17463_s22 + $0xca8] sm:$0xff]  ;;  %v15244_v55 = vcombine.high %v672_v46, %v684_v47  ;;  %v15243_v62 = vcombine.low %v672_v46, %v684_v47 }
 0x5a2   : > { %v15246_v56 = vcombine.high %v673_v50, %v685_v51  ;;  %v15245_v63 = vcombine.low %v673_v50, %v685_v51 }
 0x5a3   : > { %13542 = vmatpush1.bf16.msra.mxu0 %v15075_v57  ;;  %13747 = vmatpush1.bf16.msra.mxu1 %v15077_v58  ;;  %v696_v57 = vld [vmem:[%s17463_s22 + $0xd00] sm:$0xff] }
 0x5a4   : > { %13543 = vmatprep.subr.bf16.mxu0 %v15100_v54  ;;  %13748 = vmatprep.subr.bf16.mxu1 %v15102_v61  ;;  %v708_v58 = vld [vmem:[%s17463_s22 + $0xd60] sm:$0xff]  ;;  %v697_v54 = vld [vmem:[%s17463_s22 + $0xd08] sm:$0xff] }
 0x5a5   : > { %v709_v61 = vld [vmem:[%s17463_s22 + $0xd68] sm:$0xff]  ;;  %v15268_v1 = vcombine.high %v696_v57, %v708_v58  ;;  %v15267_v7 = vcombine.low %v696_v57, %v708_v58 }
 0x5a6   : > { %v15270_v2 = vcombine.high %v697_v54, %v709_v61  ;;  %v15269_v8 = vcombine.low %v697_v54, %v709_v61 }
 0x5a7   : > { %13544 = vmatpush1.bf16.msra.mxu0 %v15099_v3  ;;  %13749 = vmatpush1.bf16.msra.mxu1 %v15101_v4  ;;  %v720_v3 = vld [vmem:[%s17463_s22 + $0xdc0] sm:$0xff] }
 0x5a8   : > { %13545 = vmatprep.subr.bf16.mxu0 %v15124_v5  ;;  %13750 = vmatprep.subr.bf16.mxu1 %v15126_v30  ;;  %v732_v4 = vld [vmem:[%s17463_s22 + $0xe20] sm:$0xff]  ;;  %v721_v5 = vld [vmem:[%s17463_s22 + $0xdc8] sm:$0xff] }
 0x5a9   : > { %v733_v30 = vld [vmem:[%s17463_s22 + $0xe28] sm:$0xff]  ;;  %v15292_v9 = vcombine.high %v720_v3, %v732_v4  ;;  %v15291_v17 = vcombine.low %v720_v3, %v732_v4 }
 0x5aa   : > { %v15294_v12 = vcombine.high %v721_v5, %v733_v30  ;;  %v15293_v18 = vcombine.low %v721_v5, %v733_v30 }
 0x5ab   : > { %13546 = vmatpush1.bf16.msra.mxu0 %v15123_v13  ;;  %13751 = vmatpush1.bf16.msra.mxu1 %v15125_v14  ;;  %v744_v13 = vld [vmem:[%s17463_s22 + $0xe80] sm:$0xff] }
 0x5ac   : > { %13547 = vmatprep.subr.bf16.mxu0 %v15148_v15  ;;  %13752 = vmatprep.subr.bf16.mxu1 %v15150_v16  ;;  %v756_v14 = vld [vmem:[%s17463_s22 + $0xee0] sm:$0xff]  ;;  %v745_v15 = vld [vmem:[%s17463_s22 + $0xe88] sm:$0xff] }
 0x5ad   : > { %v757_v16 = vld [vmem:[%s17463_s22 + $0xee8] sm:$0xff]  ;;  %v15316_v20 = vcombine.high %v744_v13, %v756_v14  ;;  %v15315_v27 = vcombine.low %v744_v13, %v756_v14 }
 0x5ae   : > { %v15318_v21 = vcombine.high %v745_v15, %v757_v16  ;;  %v15317_v28 = vcombine.low %v745_v15, %v757_v16 }
 0x5af   : > { %13548 = vmatpush1.bf16.msra.mxu0 %v15147_v22  ;;  %13753 = vmatpush1.bf16.msra.mxu1 %v15149_v23  ;;  %v768_v22 = vld [vmem:[%s17463_s22 + $0xf40] sm:$0xff] }
 0x5b0   : > { %13549 = vmatprep.subr.bf16.mxu0 %v15172_v25  ;;  %13754 = vmatprep.subr.bf16.mxu1 %v15174_v26  ;;  %v780_v23 = vld [vmem:[%s17463_s22 + $0xfa0] sm:$0xff]  ;;  %v769_v25 = vld [vmem:[%s17463_s22 + $0xf48] sm:$0xff] }
 0x5b1   : > { %v781_v26 = vld [vmem:[%s17463_s22 + $0xfa8] sm:$0xff]  ;;  %v15340_v60 = vcombine.high %v768_v22, %v780_v23  ;;  %v15339_v36 = vcombine.low %v768_v22, %v780_v23 }
 0x5b2   : > { %v15342_v31 = vcombine.high %v769_v25, %v781_v26  ;;  %v15341_v37 = vcombine.low %v769_v25, %v781_v26 }
 0x5b3   : > { %13550 = vmatpush1.bf16.msra.mxu0 %v15171_v32  ;;  %13755 = vmatpush1.bf16.msra.mxu1 %v15173_v0  ;;  %v792_v32 = vld [vmem:[%s17463_s22 + $0x1000] sm:$0xff] }
 0x5b4   : > { %13551 = vmatprep.subr.bf16.mxu0 %v15196_v34  ;;  %13756 = vmatprep.subr.bf16.mxu1 %v15198_v35  ;;  %v804_v0 = vld [vmem:[%s17463_s22 + $0x1060] sm:$0xff]  ;;  %v793_v34 = vld [vmem:[%s17463_s22 + $0x1008] sm:$0xff] }
 0x5b5   : > { %v805_v35 = vld [vmem:[%s17463_s22 + $0x1068] sm:$0xff]  ;;  %v15364_v38 = vcombine.high %v792_v32, %v804_v0  ;;  %v15363_v46 = vcombine.low %v792_v32, %v804_v0 }
 0x5b6   : > { %v15366_v40 = vcombine.high %v793_v34, %v805_v35  ;;  %v15365_v47 = vcombine.low %v793_v34, %v805_v35 }
 0x5b7   : > { %13552 = vmatpush1.bf16.msra.mxu0 %v15195_v41  ;;  %13757 = vmatpush1.bf16.msra.mxu1 %v15197_v42  ;;  %v816_v41 = vld [vmem:[%s17463_s22 + $0x10c0] sm:$0xff] }
 0x5b8   : > { %13553 = vmatprep.subr.bf16.mxu0 %v15220_v43  ;;  %13758 = vmatprep.subr.bf16.mxu1 %v15222_v44  ;;  %v828_v42 = vld [vmem:[%s17463_s22 + $0x1120] sm:$0xff]  ;;  %v817_v43 = vld [vmem:[%s17463_s22 + $0x10c8] sm:$0xff] }
 0x5b9   : > { %v829_v44 = vld [vmem:[%s17463_s22 + $0x1128] sm:$0xff]  ;;  %v15388_v50 = vcombine.high %v816_v41, %v828_v42  ;;  %v15387_v57 = vcombine.low %v816_v41, %v828_v42 }
 0x5ba   : > { %v15390_v51 = vcombine.high %v817_v43, %v829_v44  ;;  %v15389_v58 = vcombine.low %v817_v43, %v829_v44 }
 0x5bb   : > { %13554 = vmatpush1.bf16.msra.mxu0 %v15219_v52  ;;  %13759 = vmatpush1.bf16.msra.mxu1 %v15221_v53  ;;  %v840_v52 = vld [vmem:[%s17463_s22 + $0x1180] sm:$0xff] }
 0x5bc   : > { %13564 = vmatprep.subr.bf16.mxu0 %v15244_v55  ;;  %13769 = vmatprep.subr.bf16.mxu1 %v15246_v56  ;;  %v852_v53 = vld [vmem:[%s17463_s22 + $0x11e0] sm:$0xff]  ;;  %v841_v55 = vld [vmem:[%s17463_s22 + $0x1188] sm:$0xff] }
 0x5bd   : > { %v853_v56 = vld [vmem:[%s17463_s22 + $0x11e8] sm:$0xff]  ;;  %v15412_v54 = vcombine.high %v840_v52, %v852_v53  ;;  %v15411_v3 = vcombine.low %v840_v52, %v852_v53 }
 0x5be   : > { %13556 = vmatmul.mubr.bf16.vlgmr.msra.gmra.mrb[16].mxu0 %v17565_v24  ;;  %13761 = vmatmul.mubr.bf16.vlgmr.msra.gmra.mrb[16].mxu1 %v17565_v24  ;;  %v15414_v61 = vcombine.high %v841_v55, %v853_v56  ;;  %v15413_v4 = vcombine.low %v841_v55, %v853_v56 }
 0x5bf   : > { %13565 = vmatpush1.bf16.msra.mxu0 %v15243_v62  ;;  %13770 = vmatpush1.bf16.msra.mxu1 %v15245_v63  ;;  %v864_v62 = vld [vmem:[%s17463_s22 + $0x1240] sm:$0xff] }
 0x5c0   : > { %13566 = vmatprep.subr.bf16.mxu0 %v15268_v1  ;;  %13771 = vmatprep.subr.bf16.mxu1 %v15270_v2  ;;  %v876_v63 = vld [vmem:[%s17463_s22 + $0x12a0] sm:$0xff]  ;;  %v865_v1 = vld [vmem:[%s17463_s22 + $0x1248] sm:$0xff] }
 0x5c1   : > { %13596 = vmatprep.mubr.bf16.mxu0 %v17573_v33  ;;  %13801 = vmatprep.mubr.bf16.mxu1 %v17573_v33  ;;  %v877_v2 = vld [vmem:[%s17463_s22 + $0x12a8] sm:$0xff]  ;;  %v15436_v5 = vcombine.high %v864_v62, %v876_v63  ;;  %v15435_v13 = vcombine.low %v864_v62, %v876_v63 }
 0x5c2   : > { %v15438_v30 = vcombine.high %v865_v1, %v877_v2  ;;  %v15437_v14 = vcombine.low %v865_v1, %v877_v2 }
 0x5c3   : > { %13567 = vmatpush1.bf16.msra.mxu0 %v15267_v7  ;;  %13772 = vmatpush1.bf16.msra.mxu1 %v15269_v8  ;;  %v888_v7 = vld [vmem:[%s17463_s22 + $0x1300] sm:$0xff] }
 0x5c4   : > { %13568 = vmatprep.subr.bf16.mxu0 %v15292_v9  ;;  %13773 = vmatprep.subr.bf16.mxu1 %v15294_v12  ;;  %v900_v8 = vld [vmem:[%s17463_s22 + $0x1360] sm:$0xff]  ;;  %v889_v9 = vld [vmem:[%s17463_s22 + $0x1308] sm:$0xff] }
 0x5c5   : > { %v901_v12 = vld [vmem:[%s17463_s22 + $0x1368] sm:$0xff]  ;;  %v15460_v15 = vcombine.high %v888_v7, %v900_v8  ;;  %v15459_v22 = vcombine.low %v888_v7, %v900_v8 }
 0x5c6   : > { %v15462_v16 = vcombine.high %v889_v9, %v901_v12  ;;  %v15461_v23 = vcombine.low %v889_v9, %v901_v12 }
 0x5c7   : > { %13569 = vmatpush1.bf16.msra.mxu0 %v15291_v17  ;;  %13774 = vmatpush1.bf16.msra.mxu1 %v15293_v18  ;;  %v912_v17 = vld [vmem:[%s17463_s22 + $0x13c0] sm:$0xff] }
 0x5c8   : > { %13570 = vmatprep.subr.bf16.mxu0 %v15316_v20  ;;  %13775 = vmatprep.subr.bf16.mxu1 %v15318_v21  ;;  %v924_v18 = vld [vmem:[%s17463_s22 + $0x1420] sm:$0xff]  ;;  %v913_v20 = vld [vmem:[%s17463_s22 + $0x13c8] sm:$0xff] }
 0x5c9   : > { %v925_v21 = vld [vmem:[%s17463_s22 + $0x1428] sm:$0xff]  ;;  %v15484_v25 = vcombine.high %v912_v17, %v924_v18  ;;  %v15483_v32 = vcombine.low %v912_v17, %v924_v18 }
 0x5ca   : > { %v15486_v26 = vcombine.high %v913_v20, %v925_v21  ;;  %v15485_v0 = vcombine.low %v913_v20, %v925_v21 }
 0x5cb   : > { %13571 = vmatpush1.bf16.msra.mxu0 %v15315_v27  ;;  %13776 = vmatpush1.bf16.msra.mxu1 %v15317_v28  ;;  %v936_v27 = vld [vmem:[%s17463_s22 + $0x1480] sm:$0xff] }
 0x5cc   : > { %13572 = vmatprep.subr.bf16.mxu0 %v15340_v60  ;;  %13777 = vmatprep.subr.bf16.mxu1 %v15342_v31  ;;  %v948_v28 = vld [vmem:[%s17463_s22 + $0x14e0] sm:$0xff]  ;;  %v937_v60 = vld [vmem:[%s17463_s22 + $0x1488] sm:$0xff] }
 0x5cd   : > { %v949_v31 = vld [vmem:[%s17463_s22 + $0x14e8] sm:$0xff]  ;;  %v15508_v34 = vcombine.high %v936_v27, %v948_v28  ;;  %v15507_v41 = vcombine.low %v936_v27, %v948_v28 }
 0x5ce   : > { %v15510_v35 = vcombine.high %v937_v60, %v949_v31  ;;  %v15509_v42 = vcombine.low %v937_v60, %v949_v31 }
 0x5cf   : > { %13573 = vmatpush1.bf16.msra.mxu0 %v15339_v36  ;;  %13778 = vmatpush1.bf16.msra.mxu1 %v15341_v37  ;;  %v960_v36 = vld [vmem:[%s17463_s22 + $0x1540] sm:$0xff] }
 0x5d0   : > { %13574 = vmatprep.subr.bf16.mxu0 %v15364_v38  ;;  %13779 = vmatprep.subr.bf16.mxu1 %v15366_v40  ;;  %v972_v37 = vld [vmem:[%s17463_s22 + $0x15a0] sm:$0xff]  ;;  %v961_v38 = vld [vmem:[%s17463_s22 + $0x1548] sm:$0xff] }
 0x5d1   : > { %v973_v40 = vld [vmem:[%s17463_s22 + $0x15a8] sm:$0xff]  ;;  %v15532_v43 = vcombine.high %v960_v36, %v972_v37  ;;  %v15531_v52 = vcombine.low %v960_v36, %v972_v37 }
 0x5d2   : > { %v15534_v44 = vcombine.high %v961_v38, %v973_v40  ;;  %v15533_v53 = vcombine.low %v961_v38, %v973_v40 }
 0x5d3   : > { %13575 = vmatpush1.bf16.msra.mxu0 %v15363_v46  ;;  %13780 = vmatpush1.bf16.msra.mxu1 %v15365_v47  ;;  %v984_v46 = vld [vmem:[%s17463_s22 + $0x1600] sm:$0xff] }
 0x5d4   : > { %13576 = vmatprep.subr.bf16.mxu0 %v15388_v50  ;;  %13781 = vmatprep.subr.bf16.mxu1 %v15390_v51  ;;  %v996_v47 = vld [vmem:[%s17463_s22 + $0x1660] sm:$0xff]  ;;  %v985_v50 = vld [vmem:[%s17463_s22 + $0x1608] sm:$0xff] }
 0x5d5   : > { %v997_v51 = vld [vmem:[%s17463_s22 + $0x1668] sm:$0xff]  ;;  %v15556_v55 = vcombine.high %v984_v46, %v996_v47  ;;  %v15555_v62 = vcombine.low %v984_v46, %v996_v47 }
 0x5d6   : > { %v15558_v56 = vcombine.high %v985_v50, %v997_v51  ;;  %v15557_v63 = vcombine.low %v985_v50, %v997_v51 }
 0x5d7   : > { %13577 = vmatpush1.bf16.msra.mxu0 %v15387_v57  ;;  %13782 = vmatpush1.bf16.msra.mxu1 %v15389_v58  ;;  %v1008_v57 = vld [vmem:[%s17463_s22 + $0x16c0] sm:$0xff] }
 0x5d8   : > { %13578 = vmatprep.subr.bf16.mxu0 %v15412_v54  ;;  %13783 = vmatprep.subr.bf16.mxu1 %v15414_v61  ;;  %v1020_v58 = vld [vmem:[%s17463_s22 + $0x1720] sm:$0xff]  ;;  %v1009_v54 = vld [vmem:[%s17463_s22 + $0x16c8] sm:$0xff] }
 0x5d9   : > { %v1021_v61 = vld [vmem:[%s17463_s22 + $0x1728] sm:$0xff]  ;;  %v15580_v1 = vcombine.high %v1008_v57, %v1020_v58  ;;  %v15579_v7 = vcombine.low %v1008_v57, %v1020_v58 }
 0x5da   : > { %v15582_v2 = vcombine.high %v1009_v54, %v1021_v61  ;;  %v15581_v8 = vcombine.low %v1009_v54, %v1021_v61 }
 0x5db   : > { %13579 = vmatpush1.bf16.msra.mxu0 %v15411_v3  ;;  %13784 = vmatpush1.bf16.msra.mxu1 %v15413_v4  ;;  %v1032_v3 = vld [vmem:[%s17463_s22 + $0x1780] sm:$0xff] }
 0x5dc   : > { %13580 = vmatprep.subr.bf16.mxu0 %v15436_v5  ;;  %13785 = vmatprep.subr.bf16.mxu1 %v15438_v30  ;;  %v1044_v4 = vld [vmem:[%s17463_s22 + $0x17e0] sm:$0xff]  ;;  %v1033_v5 = vld [vmem:[%s17463_s22 + $0x1788] sm:$0xff] }
 0x5dd   : > { %v1045_v30 = vld [vmem:[%s17463_s22 + $0x17e8] sm:$0xff]  ;;  %v15604_v9 = vcombine.high %v1032_v3, %v1044_v4  ;;  %v15603_v17 = vcombine.low %v1032_v3, %v1044_v4 }
 0x5de   : > { %v15606_v12 = vcombine.high %v1033_v5, %v1045_v30  ;;  %v15605_v18 = vcombine.low %v1033_v5, %v1045_v30 }
 0x5df   : > { %13581 = vmatpush1.bf16.msra.mxu0 %v15435_v13  ;;  %13786 = vmatpush1.bf16.msra.mxu1 %v15437_v14  ;;  %v1056_v13 = vld [vmem:[%s17463_s22 + $0x1840] sm:$0xff] }
 0x5e0   : > { %13582 = vmatprep.subr.bf16.mxu0 %v15460_v15  ;;  %13787 = vmatprep.subr.bf16.mxu1 %v15462_v16  ;;  %v1068_v14 = vld [vmem:[%s17463_s22 + $0x18a0] sm:$0xff]  ;;  %v1057_v15 = vld [vmem:[%s17463_s22 + $0x1848] sm:$0xff] }
 0x5e1   : > { %v1069_v16 = vld [vmem:[%s17463_s22 + $0x18a8] sm:$0xff]  ;;  %v15628_v20 = vcombine.high %v1056_v13, %v1068_v14  ;;  %v15627_v27 = vcombine.low %v1056_v13, %v1068_v14 }
 0x5e2   : > { %v15630_v21 = vcombine.high %v1057_v15, %v1069_v16  ;;  %v15629_v28 = vcombine.low %v1057_v15, %v1069_v16 }
 0x5e3   : > { %13583 = vmatpush1.bf16.msra.mxu0 %v15459_v22  ;;  %13788 = vmatpush1.bf16.msra.mxu1 %v15461_v23  ;;  %v1080_v22 = vld [vmem:[%s17463_s22 + $0x1900] sm:$0xff] }
 0x5e4   : > { %13584 = vmatprep.subr.bf16.mxu0 %v15484_v25  ;;  %13789 = vmatprep.subr.bf16.mxu1 %v15486_v26  ;;  %v1092_v23 = vld [vmem:[%s17463_s22 + $0x1960] sm:$0xff]  ;;  %v1081_v25 = vld [vmem:[%s17463_s22 + $0x1908] sm:$0xff] }
 0x5e5   : > { %v1093_v26 = vld [vmem:[%s17463_s22 + $0x1968] sm:$0xff]  ;;  %v15652_v60 = vcombine.high %v1080_v22, %v1092_v23  ;;  %v15651_v36 = vcombine.low %v1080_v22, %v1092_v23 }
 0x5e6   : > { %v15654_v31 = vcombine.high %v1081_v25, %v1093_v26  ;;  %v15653_v37 = vcombine.low %v1081_v25, %v1093_v26 }
 0x5e7   : > { %13585 = vmatpush1.bf16.msra.mxu0 %v15483_v32  ;;  %13790 = vmatpush1.bf16.msra.mxu1 %v15485_v0  ;;  %v1104_v32 = vld [vmem:[%s17463_s22 + $0x19c0] sm:$0xff] }
 0x5e8   : > { %13586 = vmatprep.subr.bf16.mxu0 %v15508_v34  ;;  %13791 = vmatprep.subr.bf16.mxu1 %v15510_v35  ;;  %v1116_v0 = vld [vmem:[%s17463_s22 + $0x1a20] sm:$0xff]  ;;  %v1105_v34 = vld [vmem:[%s17463_s22 + $0x19c8] sm:$0xff] }
 0x5e9   : > { %v1117_v35 = vld [vmem:[%s17463_s22 + $0x1a28] sm:$0xff]  ;;  %v15676_v38 = vcombine.high %v1104_v32, %v1116_v0  ;;  %v15675_v46 = vcombine.low %v1104_v32, %v1116_v0 }
 0x5ea   : > { %v15678_v40 = vcombine.high %v1105_v34, %v1117_v35  ;;  %v15677_v47 = vcombine.low %v1105_v34, %v1117_v35 }
 0x5eb   : > { %13587 = vmatpush1.bf16.msra.mxu0 %v15507_v41  ;;  %13792 = vmatpush1.bf16.msra.mxu1 %v15509_v42  ;;  %v1128_v41 = vld [vmem:[%s17463_s22 + $0x1a80] sm:$0xff] }
 0x5ec   : > { %13588 = vmatprep.subr.bf16.mxu0 %v15532_v43  ;;  %13793 = vmatprep.subr.bf16.mxu1 %v15534_v44  ;;  %v1140_v42 = vld [vmem:[%s17463_s22 + $0x1ae0] sm:$0xff]  ;;  %v1129_v43 = vld [vmem:[%s17463_s22 + $0x1a88] sm:$0xff] }
 0x5ed   : > { %v1141_v44 = vld [vmem:[%s17463_s22 + $0x1ae8] sm:$0xff]  ;;  %v15700_v50 = vcombine.high %v1128_v41, %v1140_v42  ;;  %v15699_v57 = vcombine.low %v1128_v41, %v1140_v42 }
 0x5ee   : > { %v15702_v51 = vcombine.high %v1129_v43, %v1141_v44  ;;  %v15701_v58 = vcombine.low %v1129_v43, %v1141_v44 }
 0x5ef   : > { %13589 = vmatpush1.bf16.msra.mxu0 %v15531_v52  ;;  %13794 = vmatpush1.bf16.msra.mxu1 %v15533_v53  ;;  %v1152_v52 = vld [vmem:[%s17463_s22 + $0x1b40] sm:$0xff] }
 0x5f0   : > { %13590 = vmatprep.subr.bf16.mxu0 %v15556_v55  ;;  %13795 = vmatprep.subr.bf16.mxu1 %v15558_v56  ;;  %v1164_v53 = vld [vmem:[%s17463_s22 + $0x1ba0] sm:$0xff]  ;;  %v1153_v55 = vld [vmem:[%s17463_s22 + $0x1b48] sm:$0xff] }
 0x5f1   : > { %v1165_v56 = vld [vmem:[%s17463_s22 + $0x1ba8] sm:$0xff]  ;;  %v15724_v54 = vcombine.high %v1152_v52, %v1164_v53  ;;  %v15723_v3 = vcombine.low %v1152_v52, %v1164_v53 }
 0x5f2   : > { %v15726_v61 = vcombine.high %v1153_v55, %v1165_v56  ;;  %v15725_v4 = vcombine.low %v1153_v55, %v1165_v56 }
 0x5f3   : > { %13591 = vmatpush1.bf16.msra.mxu0 %v15555_v62  ;;  %13796 = vmatpush1.bf16.msra.mxu1 %v15557_v63  ;;  %v1176_v62 = vld [vmem:[%s17463_s22 + $0x1c00] sm:$0xff] }
 0x5f4   : > { %13592 = vmatprep.subr.bf16.mxu0 %v15580_v1  ;;  %13797 = vmatprep.subr.bf16.mxu1 %v15582_v2  ;;  %v1188_v63 = vld [vmem:[%s17463_s22 + $0x1c60] sm:$0xff]  ;;  %v1177_v1 = vld [vmem:[%s17463_s22 + $0x1c08] sm:$0xff] }
 0x5f5   : > { %v1189_v2 = vld [vmem:[%s17463_s22 + $0x1c68] sm:$0xff]  ;;  %v15748_v5 = vcombine.high %v1176_v62, %v1188_v63  ;;  %v15747_v13 = vcombine.low %v1176_v62, %v1188_v63 }
 0x5f6   : > { %v15750_v30 = vcombine.high %v1177_v1, %v1189_v2  ;;  %v15749_v14 = vcombine.low %v1177_v1, %v1189_v2 }
 0x5f7   : > { %13593 = vmatpush1.bf16.msra.mxu0 %v15579_v7  ;;  %13798 = vmatpush1.bf16.msra.mxu1 %v15581_v8  ;;  %v1200_v7 = vld [vmem:[%s17463_s22 + $0x1cc0] sm:$0xff] }
 0x5f8   : > { %13594 = vmatprep.subr.bf16.mxu0 %v15604_v9  ;;  %13799 = vmatprep.subr.bf16.mxu1 %v15606_v12  ;;  %v1212_v8 = vld [vmem:[%s17463_s22 + $0x1d20] sm:$0xff]  ;;  %v1201_v9 = vld [vmem:[%s17463_s22 + $0x1cc8] sm:$0xff] }
 0x5f9   : > { %v1213_v12 = vld [vmem:[%s17463_s22 + $0x1d28] sm:$0xff]  ;;  %v15772_v15 = vcombine.high %v1200_v7, %v1212_v8  ;;  %v15771_v22 = vcombine.low %v1200_v7, %v1212_v8 }
 0x5fa   : > { %v15774_v16 = vcombine.high %v1201_v9, %v1213_v12  ;;  %v15773_v23 = vcombine.low %v1201_v9, %v1213_v12 }
 0x5fb   : > { %13595 = vmatpush1.bf16.msra.mxu0 %v15603_v17  ;;  %13800 = vmatpush1.bf16.msra.mxu1 %v15605_v18  ;;  %v1224_v17 = vld [vmem:[%s17463_s22 + $0x1d80] sm:$0xff] }
 0x5fc   : > { %13605 = vmatprep.subr.bf16.mxu0 %v15628_v20  ;;  %13810 = vmatprep.subr.bf16.mxu1 %v15630_v21  ;;  %v1236_v18 = vld [vmem:[%s17463_s22 + $0x1de0] sm:$0xff]  ;;  %v1225_v20 = vld [vmem:[%s17463_s22 + $0x1d88] sm:$0xff] }
 0x5fd   : > { %v1237_v21 = vld [vmem:[%s17463_s22 + $0x1de8] sm:$0xff]  ;;  %v15796_v25 = vcombine.high %v1224_v17, %v1236_v18  ;;  %v15795_v32 = vcombine.low %v1224_v17, %v1236_v18 }
 0x5fe   : > { %13597 = vmatmul.mubr.bf16.vlgmr.msra.gmra.mrb[16].mxu0 %v17648_v39  ;;  %13802 = vmatmul.mubr.bf16.vlgmr.msra.gmra.mrb[16].mxu1 %v17648_v39  ;;  %v15798_v26 = vcombine.high %v1225_v20, %v1237_v21  ;;  %v15797_v0 = vcombine.low %v1225_v20, %v1237_v21 }
 0x5ff   : > { %13606 = vmatpush1.bf16.msra.mxu0 %v15627_v27  ;;  %13811 = vmatpush1.bf16.msra.mxu1 %v15629_v28  ;;  %v1248_v27 = vld [vmem:[%s17463_s22 + $0x1e40] sm:$0xff] }
 0x600   : > { %13607 = vmatprep.subr.bf16.mxu0 %v15652_v60  ;;  %13812 = vmatprep.subr.bf16.mxu1 %v15654_v31  ;;  %v1260_v28 = vld [vmem:[%s17463_s22 + $0x1ea0] sm:$0xff]  ;;  %v1249_v60 = vld [vmem:[%s17463_s22 + $0x1e48] sm:$0xff] }
 0x601   : > { %13637 = vmatprep.mubr.bf16.mxu0 %v17655_v49  ;;  %13842 = vmatprep.mubr.bf16.mxu1 %v17655_v49  ;;  %v1261_v31 = vld [vmem:[%s17463_s22 + $0x1ea8] sm:$0xff]  ;;  %v15820_v34 = vcombine.high %v1248_v27, %v1260_v28  ;;  %v15819_v41 = vcombine.low %v1248_v27, %v1260_v28 }
 0x602   : > { %v15822_v35 = vcombine.high %v1249_v60, %v1261_v31  ;;  %v15821_v42 = vcombine.low %v1249_v60, %v1261_v31 }
 0x603   : > { %13608 = vmatpush1.bf16.msra.mxu0 %v15651_v36  ;;  %13813 = vmatpush1.bf16.msra.mxu1 %v15653_v37  ;;  %v1272_v36 = vld [vmem:[%s17463_s22 + $0x1f00] sm:$0xff] }
 0x604   : > { %13609 = vmatprep.subr.bf16.mxu0 %v15676_v38  ;;  %13814 = vmatprep.subr.bf16.mxu1 %v15678_v40  ;;  %v1284_v37 = vld [vmem:[%s17463_s22 + $0x1f60] sm:$0xff]  ;;  %v1273_v38 = vld [vmem:[%s17463_s22 + $0x1f08] sm:$0xff] }
 0x605   : > { %v1285_v40 = vld [vmem:[%s17463_s22 + $0x1f68] sm:$0xff]  ;;  %v15844_v43 = vcombine.high %v1272_v36, %v1284_v37  ;;  %v15843_v52 = vcombine.low %v1272_v36, %v1284_v37 }
 0x606   : > { %v15846_v44 = vcombine.high %v1273_v38, %v1285_v40  ;;  %v15845_v53 = vcombine.low %v1273_v38, %v1285_v40 }
 0x607   : > { %13610 = vmatpush1.bf16.msra.mxu0 %v15675_v46  ;;  %13815 = vmatpush1.bf16.msra.mxu1 %v15677_v47  ;;  %v1296_v46 = vld [vmem:[%s17463_s22 + $0x1fc0] sm:$0xff] }
 0x608   : > { %13611 = vmatprep.subr.bf16.mxu0 %v15700_v50  ;;  %13816 = vmatprep.subr.bf16.mxu1 %v15702_v51  ;;  %v1308_v47 = vld [vmem:[%s17463_s22 + $0x2020] sm:$0xff]  ;;  %v1297_v50 = vld [vmem:[%s17463_s22 + $0x1fc8] sm:$0xff] }
 0x609   : > { %v1309_v51 = vld [vmem:[%s17463_s22 + $0x2028] sm:$0xff]  ;;  %v15868_v55 = vcombine.high %v1296_v46, %v1308_v47  ;;  %v15867_v62 = vcombine.low %v1296_v46, %v1308_v47 }
 0x60a   : > { %v15870_v56 = vcombine.high %v1297_v50, %v1309_v51  ;;  %v15869_v63 = vcombine.low %v1297_v50, %v1309_v51 }
 0x60b   : > { %13612 = vmatpush1.bf16.msra.mxu0 %v15699_v57  ;;  %13817 = vmatpush1.bf16.msra.mxu1 %v15701_v58  ;;  %v1320_v57 = vld [vmem:[%s17463_s22 + $0x2080] sm:$0xff] }
 0x60c   : > { %13613 = vmatprep.subr.bf16.mxu0 %v15724_v54  ;;  %13818 = vmatprep.subr.bf16.mxu1 %v15726_v61  ;;  %v1332_v58 = vld [vmem:[%s17463_s22 + $0x20e0] sm:$0xff]  ;;  %v1321_v54 = vld [vmem:[%s17463_s22 + $0x2088] sm:$0xff] }
 0x60d   : > { %v1333_v61 = vld [vmem:[%s17463_s22 + $0x20e8] sm:$0xff]  ;;  %v15892_v1 = vcombine.high %v1320_v57, %v1332_v58  ;;  %v15891_v7 = vcombine.low %v1320_v57, %v1332_v58 }
 0x60e   : > { %v15894_v2 = vcombine.high %v1321_v54, %v1333_v61  ;;  %v15893_v8 = vcombine.low %v1321_v54, %v1333_v61 }
 0x60f   : > { %13614 = vmatpush1.bf16.msra.mxu0 %v15723_v3  ;;  %13819 = vmatpush1.bf16.msra.mxu1 %v15725_v4  ;;  %v1344_v3 = vld [vmem:[%s17463_s22 + $0x2140] sm:$0xff] }
 0x610   : > { %13615 = vmatprep.subr.bf16.mxu0 %v15748_v5  ;;  %13820 = vmatprep.subr.bf16.mxu1 %v15750_v30  ;;  %v1356_v4 = vld [vmem:[%s17463_s22 + $0x21a0] sm:$0xff]  ;;  %v1345_v5 = vld [vmem:[%s17463_s22 + $0x2148] sm:$0xff] }
 0x611   : > { %v1357_v30 = vld [vmem:[%s17463_s22 + $0x21a8] sm:$0xff]  ;;  %v15916_v9 = vcombine.high %v1344_v3, %v1356_v4  ;;  %v15915_v17 = vcombine.low %v1344_v3, %v1356_v4 }
 0x612   : > { %v15918_v12 = vcombine.high %v1345_v5, %v1357_v30  ;;  %v15917_v18 = vcombine.low %v1345_v5, %v1357_v30 }
 0x613   : > { %13616 = vmatpush1.bf16.msra.mxu0 %v15747_v13  ;;  %13821 = vmatpush1.bf16.msra.mxu1 %v15749_v14  ;;  %v1368_v13 = vld [vmem:[%s17463_s22 + $0x2200] sm:$0xff] }
 0x614   : > { %13617 = vmatprep.subr.bf16.mxu0 %v15772_v15  ;;  %13822 = vmatprep.subr.bf16.mxu1 %v15774_v16  ;;  %v1380_v14 = vld [vmem:[%s17463_s22 + $0x2260] sm:$0xff]  ;;  %v1369_v15 = vld [vmem:[%s17463_s22 + $0x2208] sm:$0xff] }
 0x615   : > { %v1381_v16 = vld [vmem:[%s17463_s22 + $0x2268] sm:$0xff]  ;;  %v15940_v20 = vcombine.high %v1368_v13, %v1380_v14  ;;  %v15939_v27 = vcombine.low %v1368_v13, %v1380_v14 }
 0x616   : > { %v15942_v21 = vcombine.high %v1369_v15, %v1381_v16  ;;  %v15941_v28 = vcombine.low %v1369_v15, %v1381_v16 }
 0x617   : > { %13618 = vmatpush1.bf16.msra.mxu0 %v15771_v22  ;;  %13823 = vmatpush1.bf16.msra.mxu1 %v15773_v23  ;;  %v1392_v22 = vld [vmem:[%s17463_s22 + $0x22c0] sm:$0xff] }
 0x618   : > { %13619 = vmatprep.subr.bf16.mxu0 %v15796_v25  ;;  %13824 = vmatprep.subr.bf16.mxu1 %v15798_v26  ;;  %v1404_v23 = vld [vmem:[%s17463_s22 + $0x2320] sm:$0xff]  ;;  %v1393_v25 = vld [vmem:[%s17463_s22 + $0x22c8] sm:$0xff] }
 0x619   : > { %v1405_v26 = vld [vmem:[%s17463_s22 + $0x2328] sm:$0xff]  ;;  %v15964_v60 = vcombine.high %v1392_v22, %v1404_v23  ;;  %v15963_v36 = vcombine.low %v1392_v22, %v1404_v23 }
 0x61a   : > { %v15966_v31 = vcombine.high %v1393_v25, %v1405_v26  ;;  %v15965_v37 = vcombine.low %v1393_v25, %v1405_v26 }
 0x61b   : > { %13620 = vmatpush1.bf16.msra.mxu0 %v15795_v32  ;;  %13825 = vmatpush1.bf16.msra.mxu1 %v15797_v0  ;;  %v1416_v32 = vld [vmem:[%s17463_s22 + $0x2380] sm:$0xff] }
 0x61c   : > { %13621 = vmatprep.subr.bf16.mxu0 %v15820_v34  ;;  %13826 = vmatprep.subr.bf16.mxu1 %v15822_v35  ;;  %v1428_v0 = vld [vmem:[%s17463_s22 + $0x23e0] sm:$0xff]  ;;  %v1417_v34 = vld [vmem:[%s17463_s22 + $0x2388] sm:$0xff] }
 0x61d   : > { %v1429_v35 = vld [vmem:[%s17463_s22 + $0x23e8] sm:$0xff]  ;;  %v15988_v38 = vcombine.high %v1416_v32, %v1428_v0  ;;  %v15987_v46 = vcombine.low %v1416_v32, %v1428_v0 }
 0x61e   : > { %v15990_v40 = vcombine.high %v1417_v34, %v1429_v35  ;;  %v15989_v47 = vcombine.low %v1417_v34, %v1429_v35 }
 0x61f   : > { %13622 = vmatpush1.bf16.msra.mxu0 %v15819_v41  ;;  %13827 = vmatpush1.bf16.msra.mxu1 %v15821_v42  ;;  %v1440_v41 = vld [vmem:[%s17463_s22 + $0x2440] sm:$0xff] }
 0x620   : > { %13623 = vmatprep.subr.bf16.mxu0 %v15844_v43  ;;  %13828 = vmatprep.subr.bf16.mxu1 %v15846_v44  ;;  %v1452_v42 = vld [vmem:[%s17463_s22 + $0x24a0] sm:$0xff]  ;;  %v1441_v43 = vld [vmem:[%s17463_s22 + $0x2448] sm:$0xff] }
 0x621   : > { %v1453_v44 = vld [vmem:[%s17463_s22 + $0x24a8] sm:$0xff]  ;;  %v16012_v50 = vcombine.high %v1440_v41, %v1452_v42  ;;  %v16011_v57 = vcombine.low %v1440_v41, %v1452_v42 }
 0x622   : > { %v16014_v51 = vcombine.high %v1441_v43, %v1453_v44  ;;  %v16013_v58 = vcombine.low %v1441_v43, %v1453_v44 }
 0x623   : > { %13624 = vmatpush1.bf16.msra.mxu0 %v15843_v52  ;;  %13829 = vmatpush1.bf16.msra.mxu1 %v15845_v53  ;;  %v1464_v52 = vld [vmem:[%s17463_s22 + $0x2500] sm:$0xff] }
 0x624   : > { %13625 = vmatprep.subr.bf16.mxu0 %v15868_v55  ;;  %13830 = vmatprep.subr.bf16.mxu1 %v15870_v56  ;;  %v1476_v53 = vld [vmem:[%s17463_s22 + $0x2560] sm:$0xff]  ;;  %v1465_v55 = vld [vmem:[%s17463_s22 + $0x2508] sm:$0xff] }
 0x625   : > { %v1477_v56 = vld [vmem:[%s17463_s22 + $0x2568] sm:$0xff]  ;;  %v16036_v54 = vcombine.high %v1464_v52, %v1476_v53  ;;  %v16035_v3 = vcombine.low %v1464_v52, %v1476_v53 }
 0x626   : > { %v16038_v61 = vcombine.high %v1465_v55, %v1477_v56  ;;  %v16037_v4 = vcombine.low %v1465_v55, %v1477_v56  ;;  %v1609_v53 = vld [vmem:[%s17463_s22 + $0x2988] sm:$0xff] }
 0x627   : > { %13626 = vmatpush1.bf16.msra.mxu0 %v15867_v62  ;;  %13831 = vmatpush1.bf16.msra.mxu1 %v15869_v63  ;;  %v1488_v62 = vld [vmem:[%s17463_s22 + $0x25c0] sm:$0xff]  ;;  %v1621_v55 = vld [vmem:[%s17463_s22 + $0x29e8] sm:$0xff] }
 0x628   : > { %13627 = vmatprep.subr.bf16.mxu0 %v15892_v1  ;;  %13832 = vmatprep.subr.bf16.mxu1 %v15894_v2  ;;  %v1500_v63 = vld [vmem:[%s17463_s22 + $0x2620] sm:$0xff]  ;;  %v1489_v1 = vld [vmem:[%s17463_s22 + $0x25c8] sm:$0xff] }
 0x629   : > { %v1501_v2 = vld [vmem:[%s17463_s22 + $0x2628] sm:$0xff]  ;;  %v16060_v5 = vcombine.high %v1488_v62, %v1500_v63  ;;  %v16059_v13 = vcombine.low %v1488_v62, %v1500_v63 }
 0x62a   : > { %v16062_v30 = vcombine.high %v1489_v1, %v1501_v2  ;;  %v16061_v14 = vcombine.low %v1489_v1, %v1501_v2 }
 0x62b   : > { %13628 = vmatpush1.bf16.msra.mxu0 %v15891_v7  ;;  %13833 = vmatpush1.bf16.msra.mxu1 %v15893_v8  ;;  %v1512_v7 = vld [vmem:[%s17463_s22 + $0x2680] sm:$0xff] }
 0x62c   : > { %13629 = vmatprep.subr.bf16.mxu0 %v15916_v9  ;;  %13834 = vmatprep.subr.bf16.mxu1 %v15918_v12  ;;  %v1524_v8 = vld [vmem:[%s17463_s22 + $0x26e0] sm:$0xff]  ;;  %v1513_v9 = vld [vmem:[%s17463_s22 + $0x2688] sm:$0xff] }
 0x62d   : > { %v1525_v12 = vld [vmem:[%s17463_s22 + $0x26e8] sm:$0xff]  ;;  %v16084_v15 = vcombine.high %v1512_v7, %v1524_v8  ;;  %v16083_v22 = vcombine.low %v1512_v7, %v1524_v8  ;;  %v1644_v7 = vld [vmem:[%s17463_s22 + $0x2aa0] sm:$0xff] }
 0x62e   : > { %v16086_v16 = vcombine.high %v1513_v9, %v1525_v12  ;;  %v16085_v23 = vcombine.low %v1513_v9, %v1525_v12  ;;  %v1633_v9 = vld [vmem:[%s17463_s22 + $0x2a48] sm:$0xff] }
 0x62f   : > { %13630 = vmatpush1.bf16.msra.mxu0 %v15915_v17  ;;  %13835 = vmatpush1.bf16.msra.mxu1 %v15917_v18  ;;  %v1536_v17 = vld [vmem:[%s17463_s22 + $0x2740] sm:$0xff]  ;;  %v1645_v12 = vld [vmem:[%s17463_s22 + $0x2aa8] sm:$0xff] }
 0x630   : > { %13631 = vmatprep.subr.bf16.mxu0 %v15940_v20  ;;  %13836 = vmatprep.subr.bf16.mxu1 %v15942_v21  ;;  %v1548_v18 = vld [vmem:[%s17463_s22 + $0x27a0] sm:$0xff]  ;;  %v1537_v20 = vld [vmem:[%s17463_s22 + $0x2748] sm:$0xff] }
 0x631   : > { %v1549_v21 = vld [vmem:[%s17463_s22 + $0x27a8] sm:$0xff]  ;;  %v16108_v25 = vcombine.high %v1536_v17, %v1548_v18  ;;  %v16107_v32 = vcombine.low %v1536_v17, %v1548_v18  ;;  %v16206_v18 = vcombine.high %v1633_v9, %v1645_v12 }
 0x632   : > { %v16110_v26 = vcombine.high %v1537_v20, %v1549_v21  ;;  %v16109_v0 = vcombine.low %v1537_v20, %v1549_v21  ;;  %v1656_v20 = vld [vmem:[%s17463_s22 + $0x2b00] sm:$0xff] }
 0x633   : > { %13632 = vmatpush1.bf16.msra.mxu0 %v15939_v27  ;;  %13837 = vmatpush1.bf16.msra.mxu1 %v15941_v28  ;;  %v1560_v27 = vld [vmem:[%s17463_s22 + $0x2800] sm:$0xff] }
 0x634   : > { %13633 = vmatprep.subr.bf16.mxu0 %v15964_v60  ;;  %13838 = vmatprep.subr.bf16.mxu1 %v15966_v31  ;;  %v1572_v28 = vld [vmem:[%s17463_s22 + $0x2860] sm:$0xff]  ;;  %v1561_v60 = vld [vmem:[%s17463_s22 + $0x2808] sm:$0xff] }
 0x635   : > { %v1573_v31 = vld [vmem:[%s17463_s22 + $0x2868] sm:$0xff]  ;;  %v16132_v34 = vcombine.high %v1560_v27, %v1572_v28  ;;  %v16131_v41 = vcombine.low %v1560_v27, %v1572_v28  ;;  %v1668_v21 = vld [vmem:[%s17463_s22 + $0x2b60] sm:$0xff]  ;;  %v16205_v27 = vcombine.low %v1633_v9, %v1645_v12 }
 0x636   : > { %v16134_v35 = vcombine.high %v1561_v60, %v1573_v31  ;;  %v16133_v42 = vcombine.low %v1561_v60, %v1573_v31  ;;  %v16228_v28 = vcombine.high %v1656_v20, %v1668_v21  ;;  %v1680_v31 = vld [vmem:[%s17463_s22 + $0x2bc0] sm:$0xff]  ;;  %v1789_v9 = vld [vmem:[%s17463_s22 + $0x2f28] sm:$0xff] }
 0x637   : > { %13634 = vmatpush1.bf16.msra.mxu0 %v15963_v36  ;;  %13839 = vmatpush1.bf16.msra.mxu1 %v15965_v37  ;;  %v1584_v36 = vld [vmem:[%s17463_s22 + $0x28c0] sm:$0xff] }
 0x638   : > { %13635 = vmatprep.subr.bf16.mxu0 %v15988_v38  ;;  %13840 = vmatprep.subr.bf16.mxu1 %v15990_v40  ;;  %v1596_v37 = vld [vmem:[%s17463_s22 + $0x2920] sm:$0xff]  ;;  %v1585_v38 = vld [vmem:[%s17463_s22 + $0x28c8] sm:$0xff] }
 0x639   : > { %v1597_v40 = vld [vmem:[%s17463_s22 + $0x2928] sm:$0xff]  ;;  %v16156_v43 = vcombine.high %v1584_v36, %v1596_v37 }
 0x63a   : > { %v16157_v1 = vcombine.low %v1585_v38, %v1597_v40 }
 0x63b   : > { %13636 = vmatpush1.bf16.msra.mxu0 %v15987_v46  ;;  %13841 = vmatpush1.bf16.msra.mxu1 %v15989_v47  ;;  %v16158_v46 = vcombine.high %v1585_v38, %v1597_v40  ;;  %v1608_v47 = vld [vmem:[%s17463_s22 + $0x2980] sm:$0xff] }
 0x63c   : > { %13646 = vmatprep.subr.bf16.mxu0 %v16012_v50  ;;  %13851 = vmatprep.subr.bf16.mxu1 %v16014_v51  ;;  %v1620_v50 = vld [vmem:[%s17463_s22 + $0x29e0] sm:$0xff] }
 0x63d   : > { %v16180_v2 = vcombine.high %v1608_v47, %v1620_v50  ;;  %v1704_v40 = vld [vmem:[%s17463_s22 + $0x2c80] sm:$0xff] }
 0x63e   : > { %13638 = vmatmul.mubr.bf16.vlgmr.msra.gmra.mrb[16].mxu0 %v17723_v59  ;;  %13843 = vmatmul.mubr.bf16.vlgmr.msra.gmra.mrb[16].mxu1 %v17723_v59 }
 0x63f   : > { %13647 = vmatpush1.bf16.msra.mxu0 %v16011_v57  ;;  %13852 = vmatpush1.bf16.msra.mxu1 %v16013_v58 }
 0x640   : > { %13648 = vmatprep.subr.bf16.mxu0 %v16036_v54  ;;  %13853 = vmatprep.subr.bf16.mxu1 %v16038_v61  ;;  %v16155_v54 = vcombine.low %v1584_v36, %v1596_v37 }
 0x641   : > { %13678 = vmatprep.mubr.bf16.mxu0 %v17731_v6  ;;  %13883 = vmatprep.mubr.bf16.mxu1 %v17731_v6 }
 0x643   : > { %13649 = vmatpush1.bf16.msra.mxu0 %v16035_v3  ;;  %13854 = vmatpush1.bf16.msra.mxu1 %v16037_v4 }
 0x644   : > { %13650 = vmatprep.subr.bf16.mxu0 %v16060_v5  ;;  %13855 = vmatprep.subr.bf16.mxu1 %v16062_v30  ;;  %v16182_v5 = vcombine.high %v1609_v53, %v1621_v55  ;;  %v1632_v30 = vld [vmem:[%s17463_s22 + $0x2a40] sm:$0xff] }
 0x645   : > { %v16204_v17 = vcombine.high %v1632_v30, %v1644_v7 }
 0x647   : > { %13651 = vmatpush1.bf16.msra.mxu0 %v16059_v13  ;;  %13856 = vmatpush1.bf16.msra.mxu1 %v16061_v14  ;;  %v275_v13 = vld [vmem:[#allocation2 + $0x18] sm:$0xff]  ;;  %v16179_v14 = vcombine.low %v1608_v47, %v1620_v50 }
 0x648   : > { %13652 = vmatprep.subr.bf16.mxu0 %v16084_v15  ;;  %13857 = vmatprep.subr.bf16.mxu1 %v16086_v16  ;;  %v16181_v16 = vcombine.low %v1609_v53, %v1621_v55  ;;  %v1729_v53 = vld [vmem:[%s17463_s22 + $0x2d48] sm:$0xff] }
 0x649   : > { %v1741_v55 = vld [vmem:[%s17463_s22 + $0x2da8] sm:$0xff] }
 0x64b   : > { %13653 = vmatpush1.bf16.msra.mxu0 %v16083_v22  ;;  %13858 = vmatpush1.bf16.msra.mxu1 %v16085_v23  ;;  %v1657_v23 = vld [vmem:[%s17463_s22 + $0x2b08] sm:$0xff] }
 0x64c   : > { %13654 = vmatprep.subr.bf16.mxu0 %v16108_v25  ;;  %13859 = vmatprep.subr.bf16.mxu1 %v16110_v26  ;;  %v1669_v25 = vld [vmem:[%s17463_s22 + $0x2b68] sm:$0xff]  ;;  %v16203_v26 = vcombine.low %v1632_v30, %v1644_v7  ;;  %v1776_v30 = vld [vmem:[%s17463_s22 + $0x2ec0] sm:$0xff] }
 0x64d   : > { %v16230_v60 = vcombine.high %v1657_v23, %v1669_v25  ;;  %v16229_v36 = vcombine.low %v1657_v23, %v1669_v25  ;;  %v1788_v7 = vld [vmem:[%s17463_s22 + $0x2f20] sm:$0xff] }
 0x64f   : > { %13655 = vmatpush1.bf16.msra.mxu0 %v16107_v32  ;;  %13860 = vmatpush1.bf16.msra.mxu1 %v16109_v0  ;;  %v1692_v32 = vld [vmem:[%s17463_s22 + $0x2c20] sm:$0xff]  ;;  %v1681_v0 = vld [vmem:[%s17463_s22 + $0x2bc8] sm:$0xff] }
 0x650   : > { %13656 = vmatprep.subr.bf16.mxu0 %v16132_v34  ;;  %13861 = vmatprep.subr.bf16.mxu1 %v16134_v35  ;;  %v1693_v34 = vld [vmem:[%s17463_s22 + $0x2c28] sm:$0xff]  ;;  %v16227_v35 = vcombine.low %v1656_v20, %v1668_v21  ;;  %v16252_v37 = vcombine.high %v1680_v31, %v1692_v32  ;;  %v16347_v21 = vcombine.low %v1776_v30, %v1788_v7 }
 0x651   : > { %v13311_v44 = vpop.f32.mrb[12].mxu0  ;;  %v13516_v51 = vpop.f32.mrb[12].mxu1  ;;  %v16254_v38 = vcombine.high %v1681_v0, %v1693_v34  ;;  %v1813_v20 = vld [vmem:[%s17463_s22 + $0x2fe8] sm:$0xff] }
 0x652   : > { %v13313_v52 = vpop.f32.mrb[13].mxu0  ;;  %v13518_v57 = vpop.f32.mrb[13].mxu1 }
 0x653   : > { %v14418_v56 = vcombine.low %v13311_v44, %v13313_v52  ;;  %v13315_v58 = vpop.f32.mrb[14].mxu0  ;;  %13657 = vmatpush1.bf16.msra.mxu0 %v16131_v41  ;;  %v14419_v61 = vcombine.low %v13516_v51, %v13518_v57  ;;  %v13520_v62 = vpop.f32.mrb[14].mxu1  ;;  %13862 = vmatpush1.bf16.msra.mxu1 %v16133_v42  ;;  %v1716_v41 = vld [vmem:[%s17463_s22 + $0x2ce0] sm:$0xff]  ;;  %v1705_v42 = vld [vmem:[%s17463_s22 + $0x2c88] sm:$0xff]  ;;  %v16251_v44 = vcombine.low %v1680_v31, %v1692_v32 }
 0x654   : > { %v13316_v63 = vpop.f32.mrb[15].mxu0  ;;  %13658 = vmatprep.subr.bf16.mxu0 %v16156_v43  ;;  %v13521_v4 = vpop.f32.mrb[15].mxu1  ;;  %13863 = vmatprep.subr.bf16.mxu1 %v16158_v46  ;;  %v1717_v43 = vld [vmem:[%s17463_s22 + $0x2ce8] sm:$0xff]  ;;  %v16253_v46 = vcombine.low %v1681_v0, %v1693_v34  ;;  %v16276_v47 = vcombine.high %v1704_v40, %v1716_v41  ;;  %v1728_v51 = vld [vmem:[%s17463_s22 + $0x2d40] sm:$0xff] }
 0x655   : > { %v14426_v3 = vrot.slane %v14418_v56, %v18112_v11  ;;  %v14433_v8 = vrot.slane %v14419_v61, %v18112_v11  ;;  %v16278_v50 = vcombine.high %v1705_v42, %v1717_v43  ;;  %v1740_v52 = vld [vmem:[%s17463_s22 + $0x2da0] sm:$0xff]  ;;  %v16275_v56 = vcombine.low %v1704_v40, %v1716_v41  ;;  %v1753_v63 = vld [vmem:[%s17463_s22 + $0x2e08] sm:$0xff] }
 0x656   : > { %v16277_v57 = vcombine.low %v1705_v42, %v1717_v43  ;;  %v16300_v58 = vcombine.high %v1728_v51, %v1740_v52  ;;  %v1752_v61 = vld [vmem:[%s17463_s22 + $0x2e00] sm:$0xff] }
 0x657   : > { %13659 = vmatpush1.bf16.msra.mxu0 %v16155_v54  ;;  %v14434_v15 = vcombine.low %v14426_v3, %v14433_v8  ;;  %13864 = vmatpush1.bf16.msra.mxu1 %v16157_v1  ;;  %v16302_v54 = vcombine.high %v1729_v53, %v1741_v55  ;;  %v1764_v62 = vld [vmem:[%s17463_s22 + $0x2e60] sm:$0xff]  ;;  %v1765_v1 = vld [vmem:[%s17463_s22 + $0x2e68] sm:$0xff]  ;;  %v16301_v3 = vcombine.low %v1729_v53, %v1741_v55 }
 0x658   : > { %13660 = vmatprep.subr.bf16.mxu0 %v16180_v2  ;;  %13865 = vmatprep.subr.bf16.mxu1 %v16182_v5  ;;  %v16299_v2 = vcombine.low %v1728_v51, %v1740_v52  ;;  %v16324_v4 = vcombine.high %v1752_v61, %v1764_v62  ;;  %v16326_v5 = vcombine.high %v1753_v63, %v1765_v1  ;;  %v1777_v8 = vld [vmem:[%s17463_s22 + $0x2ec8] sm:$0xff] }
 0x659   : > { %v14478_v22 = vadd.f32 %v14434_v15, %v275_v13  ;;  %v16323_v12 = vcombine.low %v1752_v61, %v1764_v62  ;;  %v16325_v13 = vcombine.low %v1753_v63, %v1765_v1  ;;  %v16350_v15 = vcombine.high %v1777_v8, %v1789_v9 }
 0x65b   : > { %13661 = vmatpush1.bf16.msra.mxu0 %v16179_v14  ;;  %14484 = vst [vmem:[#allocation2 + $0x18] sm:$0xff] %v14478_v22  ;;  %13866 = vmatpush1.bf16.msra.mxu1 %v16181_v16  ;;  %v16348_v14 = vcombine.high %v1776_v30, %v1788_v7  ;;  %v1800_v16 = vld [vmem:[%s17463_s22 + $0x2f80] sm:$0xff]  ;;  %v16349_v22 = vcombine.low %v1777_v8, %v1789_v9 }
 0x65c   : > { %13662 = vmatprep.subr.bf16.mxu0 %v16204_v17  ;;  %13867 = vmatprep.subr.bf16.mxu1 %v16206_v18  ;;  %v1812_v17 = vld [vmem:[%s17463_s22 + $0x2fe0] sm:$0xff]  ;;  %v1801_v18 = vld [vmem:[%s17463_s22 + $0x2f88] sm:$0xff] }
 0x65d   : > { %v16372_v23 = vcombine.high %v1800_v16, %v1812_v17  ;;  %v16374_v25 = vcombine.high %v1801_v18, %v1813_v20  ;;  %v16371_v31 = vcombine.low %v1800_v16, %v1812_v17  ;;  %v16373_v32 = vcombine.low %v1801_v18, %v1813_v20 }
 0x65f   : > { %13663 = vmatpush1.bf16.msra.mxu0 %v16203_v26  ;;  %13868 = vmatpush1.bf16.msra.mxu1 %v16205_v27  ;;  %v1824_v26 = vld [vmem:[%s17463_s22 + $0x3040] sm:$0xff] }
 0x660   : > { %13664 = vmatprep.subr.bf16.mxu0 %v16228_v28  ;;  %13869 = vmatprep.subr.bf16.mxu1 %v16230_v60  ;;  %v1836_v27 = vld [vmem:[%s17463_s22 + $0x30a0] sm:$0xff]  ;;  %v1825_v28 = vld [vmem:[%s17463_s22 + $0x3048] sm:$0xff] }
 0x661   : > { %v1837_v60 = vld [vmem:[%s17463_s22 + $0x30a8] sm:$0xff]  ;;  %v16396_v0 = vcombine.high %v1824_v26, %v1836_v27  ;;  %v16395_v40 = vcombine.low %v1824_v26, %v1836_v27 }
 0x662   : > { %v16398_v34 = vcombine.high %v1825_v28, %v1837_v60  ;;  %v16397_v41 = vcombine.low %v1825_v28, %v1837_v60 }
 0x663   : > { %13665 = vmatpush1.bf16.msra.mxu0 %v16227_v35  ;;  %13870 = vmatpush1.bf16.msra.mxu1 %v16229_v36  ;;  %v1848_v35 = vld [vmem:[%s17463_s22 + $0x3100] sm:$0xff] }
 0x664   : > { %13666 = vmatprep.subr.bf16.mxu0 %v16252_v37  ;;  %13871 = vmatprep.subr.bf16.mxu1 %v16254_v38  ;;  %v1860_v36 = vld [vmem:[%s17463_s22 + $0x3160] sm:$0xff]  ;;  %v1849_v37 = vld [vmem:[%s17463_s22 + $0x3108] sm:$0xff] }
 0x665   : > { %v1861_v38 = vld [vmem:[%s17463_s22 + $0x3168] sm:$0xff]  ;;  %v16420_v42 = vcombine.high %v1848_v35, %v1860_v36  ;;  %v16419_v51 = vcombine.low %v1848_v35, %v1860_v36 }
 0x666   : > { %v16422_v43 = vcombine.high %v1849_v37, %v1861_v38  ;;  %v16421_v52 = vcombine.low %v1849_v37, %v1861_v38 }
 0x667   : > { %13667 = vmatpush1.bf16.msra.mxu0 %v16251_v44  ;;  %13872 = vmatpush1.bf16.msra.mxu1 %v16253_v46  ;;  %v1872_v44 = vld [vmem:[%s17463_s22 + $0x31c0] sm:$0xff] }
 0x668   : > { %13668 = vmatprep.subr.bf16.mxu0 %v16276_v47  ;;  %13873 = vmatprep.subr.bf16.mxu1 %v16278_v50  ;;  %v1884_v46 = vld [vmem:[%s17463_s22 + $0x3220] sm:$0xff]  ;;  %v1873_v47 = vld [vmem:[%s17463_s22 + $0x31c8] sm:$0xff] }
 0x669   : > { %v1885_v50 = vld [vmem:[%s17463_s22 + $0x3228] sm:$0xff]  ;;  %v16444_v53 = vcombine.high %v1872_v44, %v1884_v46  ;;  %v16443_v61 = vcombine.low %v1872_v44, %v1884_v46 }
 0x66a   : > { %v16446_v55 = vcombine.high %v1873_v47, %v1885_v50  ;;  %v16445_v62 = vcombine.low %v1873_v47, %v1885_v50 }
 0x66b   : > { %13669 = vmatpush1.bf16.msra.mxu0 %v16275_v56  ;;  %13874 = vmatpush1.bf16.msra.mxu1 %v16277_v57  ;;  %v1896_v56 = vld [vmem:[%s17463_s22 + $0x3280] sm:$0xff] }
 0x66c   : > { %13670 = vmatprep.subr.bf16.mxu0 %v16300_v58  ;;  %13875 = vmatprep.subr.bf16.mxu1 %v16302_v54  ;;  %v1908_v57 = vld [vmem:[%s17463_s22 + $0x32e0] sm:$0xff]  ;;  %v1897_v58 = vld [vmem:[%s17463_s22 + $0x3288] sm:$0xff] }
 0x66d   : > { %v1909_v54 = vld [vmem:[%s17463_s22 + $0x32e8] sm:$0xff]  ;;  %v16468_v63 = vcombine.high %v1896_v56, %v1908_v57  ;;  %v16467_v30 = vcombine.low %v1896_v56, %v1908_v57 }
 0x66e   : > { %v16470_v1 = vcombine.high %v1897_v58, %v1909_v54  ;;  %v16469_v7 = vcombine.low %v1897_v58, %v1909_v54 }
 0x66f   : > { %13671 = vmatpush1.bf16.msra.mxu0 %v16299_v2  ;;  %13876 = vmatpush1.bf16.msra.mxu1 %v16301_v3  ;;  %v1920_v2 = vld [vmem:[%s17463_s22 + $0x3340] sm:$0xff] }
 0x670   : > { %13672 = vmatprep.subr.bf16.mxu0 %v16324_v4  ;;  %13877 = vmatprep.subr.bf16.mxu1 %v16326_v5  ;;  %v1932_v3 = vld [vmem:[%s17463_s22 + $0x33a0] sm:$0xff]  ;;  %v1921_v4 = vld [vmem:[%s17463_s22 + $0x3348] sm:$0xff] }
 0x671   : > { %v1933_v5 = vld [vmem:[%s17463_s22 + $0x33a8] sm:$0xff]  ;;  %v16492_v8 = vcombine.high %v1920_v2, %v1932_v3  ;;  %v16491_v16 = vcombine.low %v1920_v2, %v1932_v3 }
 0x672   : > { %v16494_v9 = vcombine.high %v1921_v4, %v1933_v5  ;;  %v16493_v17 = vcombine.low %v1921_v4, %v1933_v5 }
 0x673   : > { %13673 = vmatpush1.bf16.msra.mxu0 %v16323_v12  ;;  %13878 = vmatpush1.bf16.msra.mxu1 %v16325_v13  ;;  %v1944_v12 = vld [vmem:[%s17463_s22 + $0x3400] sm:$0xff] }
 0x674   : > { %13674 = vmatprep.subr.bf16.mxu0 %v16348_v14  ;;  %13879 = vmatprep.subr.bf16.mxu1 %v16350_v15  ;;  %v1956_v13 = vld [vmem:[%s17463_s22 + $0x3460] sm:$0xff]  ;;  %v1945_v14 = vld [vmem:[%s17463_s22 + $0x3408] sm:$0xff] }
 0x675   : > { %v1957_v15 = vld [vmem:[%s17463_s22 + $0x3468] sm:$0xff]  ;;  %v16516_v18 = vcombine.high %v1944_v12, %v1956_v13  ;;  %v16515_v26 = vcombine.low %v1944_v12, %v1956_v13 }
 0x676   : > { %v16518_v20 = vcombine.high %v1945_v14, %v1957_v15  ;;  %v16517_v27 = vcombine.low %v1945_v14, %v1957_v15 }
 0x677   : > { %13675 = vmatpush1.bf16.msra.mxu0 %v16347_v21  ;;  %13880 = vmatpush1.bf16.msra.mxu1 %v16349_v22  ;;  %v1968_v21 = vld [vmem:[%s17463_s22 + $0x34c0] sm:$0xff] }
 0x678   : > { %13676 = vmatprep.subr.bf16.mxu0 %v16372_v23  ;;  %13881 = vmatprep.subr.bf16.mxu1 %v16374_v25  ;;  %v1980_v22 = vld [vmem:[%s17463_s22 + $0x3520] sm:$0xff]  ;;  %v1969_v23 = vld [vmem:[%s17463_s22 + $0x34c8] sm:$0xff] }
 0x679   : > { %v1981_v25 = vld [vmem:[%s17463_s22 + $0x3528] sm:$0xff]  ;;  %v16540_v28 = vcombine.high %v1968_v21, %v1980_v22  ;;  %v16539_v35 = vcombine.low %v1968_v21, %v1980_v22 }
 0x67a   : > { %v16542_v60 = vcombine.high %v1969_v23, %v1981_v25  ;;  %v16541_v36 = vcombine.low %v1969_v23, %v1981_v25 }
 0x67b   : > { %13677 = vmatpush1.bf16.msra.mxu0 %v16371_v31  ;;  %13882 = vmatpush1.bf16.msra.mxu1 %v16373_v32  ;;  %v1992_v31 = vld [vmem:[%s17463_s22 + $0x3580] sm:$0xff] }
 0x67c   : > { %13687 = vmatprep.subr.bf16.mxu0 %v16396_v0  ;;  %13892 = vmatprep.subr.bf16.mxu1 %v16398_v34  ;;  %v2004_v32 = vld [vmem:[%s17463_s22 + $0x35e0] sm:$0xff]  ;;  %v1993_v0 = vld [vmem:[%s17463_s22 + $0x3588] sm:$0xff] }
 0x67d   : > { %v2005_v34 = vld [vmem:[%s17463_s22 + $0x35e8] sm:$0xff]  ;;  %v16564_v37 = vcombine.high %v1992_v31, %v2004_v32  ;;  %v16563_v44 = vcombine.low %v1992_v31, %v2004_v32 }
 0x67e   : > { %13679 = vmatmul.mubr.bf16.vlgmr.msra.gmra.mrb[16].mxu0 %v17804_v19  ;;  %13884 = vmatmul.mubr.bf16.vlgmr.msra.gmra.mrb[16].mxu1 %v17804_v19  ;;  %v16566_v38 = vcombine.high %v1993_v0, %v2005_v34  ;;  %v16565_v46 = vcombine.low %v1993_v0, %v2005_v34 }
 0x67f   : > { %13688 = vmatpush1.bf16.msra.mxu0 %v16395_v40  ;;  %13893 = vmatpush1.bf16.msra.mxu1 %v16397_v41  ;;  %v2016_v40 = vld [vmem:[%s17463_s22 + $0x3640] sm:$0xff] }
 0x680   : > { %13689 = vmatprep.subr.bf16.mxu0 %v16420_v42  ;;  %13894 = vmatprep.subr.bf16.mxu1 %v16422_v43  ;;  %v2028_v41 = vld [vmem:[%s17463_s22 + $0x36a0] sm:$0xff]  ;;  %v2017_v42 = vld [vmem:[%s17463_s22 + $0x3648] sm:$0xff] }
 0x681   : > { %13719 = vmatprep.mubr.bf16.mxu0 %v17811_v29  ;;  %13924 = vmatprep.mubr.bf16.mxu1 %v17811_v29  ;;  %v2029_v43 = vld [vmem:[%s17463_s22 + $0x36a8] sm:$0xff]  ;;  %v16588_v47 = vcombine.high %v2016_v40, %v2028_v41  ;;  %v16587_v56 = vcombine.low %v2016_v40, %v2028_v41 }
 0x682   : > { %v16590_v50 = vcombine.high %v2017_v42, %v2029_v43  ;;  %v16589_v57 = vcombine.low %v2017_v42, %v2029_v43 }
 0x683   : > { %13690 = vmatpush1.bf16.msra.mxu0 %v16419_v51  ;;  %13895 = vmatpush1.bf16.msra.mxu1 %v16421_v52  ;;  %v2040_v51 = vld [vmem:[%s17463_s22 + $0x3700] sm:$0xff] }
 0x684   : > { %13691 = vmatprep.subr.bf16.mxu0 %v16444_v53  ;;  %13896 = vmatprep.subr.bf16.mxu1 %v16446_v55  ;;  %v2052_v52 = vld [vmem:[%s17463_s22 + $0x3760] sm:$0xff]  ;;  %v2041_v53 = vld [vmem:[%s17463_s22 + $0x3708] sm:$0xff] }
 0x685   : > { %v2053_v55 = vld [vmem:[%s17463_s22 + $0x3768] sm:$0xff]  ;;  %v16612_v58 = vcombine.high %v2040_v51, %v2052_v52  ;;  %v16611_v2 = vcombine.low %v2040_v51, %v2052_v52 }
 0x686   : > { %v16614_v54 = vcombine.high %v2041_v53, %v2053_v55  ;;  %v16613_v3 = vcombine.low %v2041_v53, %v2053_v55 }
 0x687   : > { %13692 = vmatpush1.bf16.msra.mxu0 %v16443_v61  ;;  %13897 = vmatpush1.bf16.msra.mxu1 %v16445_v62  ;;  %v2064_v61 = vld [vmem:[%s17463_s22 + $0x37c0] sm:$0xff] }
 0x688   : > { %13693 = vmatprep.subr.bf16.mxu0 %v16468_v63  ;;  %13898 = vmatprep.subr.bf16.mxu1 %v16470_v1  ;;  %v2076_v62 = vld [vmem:[%s17463_s22 + $0x3820] sm:$0xff]  ;;  %v2065_v63 = vld [vmem:[%s17463_s22 + $0x37c8] sm:$0xff] }
 0x689   : > { %v2077_v1 = vld [vmem:[%s17463_s22 + $0x3828] sm:$0xff]  ;;  %v16636_v4 = vcombine.high %v2064_v61, %v2076_v62  ;;  %v16635_v12 = vcombine.low %v2064_v61, %v2076_v62 }
 0x68a   : > { %v16638_v5 = vcombine.high %v2065_v63, %v2077_v1  ;;  %v16637_v13 = vcombine.low %v2065_v63, %v2077_v1 }
 0x68b   : > { %13694 = vmatpush1.bf16.msra.mxu0 %v16467_v30  ;;  %13899 = vmatpush1.bf16.msra.mxu1 %v16469_v7  ;;  %v2088_v30 = vld [vmem:[%s17463_s22 + $0x3880] sm:$0xff] }
 0x68c   : > { %13695 = vmatprep.subr.bf16.mxu0 %v16492_v8  ;;  %13900 = vmatprep.subr.bf16.mxu1 %v16494_v9  ;;  %v2100_v7 = vld [vmem:[%s17463_s22 + $0x38e0] sm:$0xff]  ;;  %v2089_v8 = vld [vmem:[%s17463_s22 + $0x3888] sm:$0xff] }
 0x68d   : > { %v2101_v9 = vld [vmem:[%s17463_s22 + $0x38e8] sm:$0xff]  ;;  %v16660_v14 = vcombine.high %v2088_v30, %v2100_v7  ;;  %v16659_v21 = vcombine.low %v2088_v30, %v2100_v7 }
 0x68e   : > { %v16662_v15 = vcombine.high %v2089_v8, %v2101_v9  ;;  %v16661_v22 = vcombine.low %v2089_v8, %v2101_v9 }
 0x68f   : > { %13696 = vmatpush1.bf16.msra.mxu0 %v16491_v16  ;;  %13901 = vmatpush1.bf16.msra.mxu1 %v16493_v17  ;;  %v2112_v16 = vld [vmem:[%s17463_s22 + $0x3940] sm:$0xff] }
 0x690   : > { %13697 = vmatprep.subr.bf16.mxu0 %v16516_v18  ;;  %13902 = vmatprep.subr.bf16.mxu1 %v16518_v20  ;;  %v2124_v17 = vld [vmem:[%s17463_s22 + $0x39a0] sm:$0xff]  ;;  %v2113_v18 = vld [vmem:[%s17463_s22 + $0x3948] sm:$0xff] }
 0x691   : > { %v2125_v20 = vld [vmem:[%s17463_s22 + $0x39a8] sm:$0xff]  ;;  %v16684_v23 = vcombine.high %v2112_v16, %v2124_v17  ;;  %v16683_v31 = vcombine.low %v2112_v16, %v2124_v17 }
 0x692   : > { %v16686_v25 = vcombine.high %v2113_v18, %v2125_v20  ;;  %v16685_v32 = vcombine.low %v2113_v18, %v2125_v20 }
 0x693   : > { %13698 = vmatpush1.bf16.msra.mxu0 %v16515_v26  ;;  %13903 = vmatpush1.bf16.msra.mxu1 %v16517_v27  ;;  %v2136_v26 = vld [vmem:[%s17463_s22 + $0x3a00] sm:$0xff] }
 0x694   : > { %13699 = vmatprep.subr.bf16.mxu0 %v16540_v28  ;;  %13904 = vmatprep.subr.bf16.mxu1 %v16542_v60  ;;  %v2148_v27 = vld [vmem:[%s17463_s22 + $0x3a60] sm:$0xff]  ;;  %v2137_v28 = vld [vmem:[%s17463_s22 + $0x3a08] sm:$0xff] }
 0x695   : > { %v2149_v60 = vld [vmem:[%s17463_s22 + $0x3a68] sm:$0xff]  ;;  %v16708_v0 = vcombine.high %v2136_v26, %v2148_v27  ;;  %v16707_v40 = vcombine.low %v2136_v26, %v2148_v27 }
 0x696   : > { %v16710_v34 = vcombine.high %v2137_v28, %v2149_v60  ;;  %v16709_v41 = vcombine.low %v2137_v28, %v2149_v60 }
 0x697   : > { %13700 = vmatpush1.bf16.msra.mxu0 %v16539_v35  ;;  %13905 = vmatpush1.bf16.msra.mxu1 %v16541_v36  ;;  %v2160_v35 = vld [vmem:[%s17463_s22 + $0x3ac0] sm:$0xff] }
 0x698   : > { %13701 = vmatprep.subr.bf16.mxu0 %v16564_v37  ;;  %13906 = vmatprep.subr.bf16.mxu1 %v16566_v38  ;;  %v2172_v36 = vld [vmem:[%s17463_s22 + $0x3b20] sm:$0xff]  ;;  %v2161_v37 = vld [vmem:[%s17463_s22 + $0x3ac8] sm:$0xff] }
 0x699   : > { %v2173_v38 = vld [vmem:[%s17463_s22 + $0x3b28] sm:$0xff]  ;;  %v16732_v42 = vcombine.high %v2160_v35, %v2172_v36  ;;  %v16731_v51 = vcombine.low %v2160_v35, %v2172_v36 }
 0x69a   : > { %v16734_v43 = vcombine.high %v2161_v37, %v2173_v38  ;;  %v16733_v52 = vcombine.low %v2161_v37, %v2173_v38  ;;  %v410_v38 = vld [vmem:[%s17463_s22 + $0x410] sm:$0xff] }
 0x69b   : > { %13702 = vmatpush1.bf16.msra.mxu0 %v16563_v44  ;;  %13907 = vmatpush1.bf16.msra.mxu1 %v16565_v46  ;;  %v2184_v44 = vld [vmem:[%s17463_s22 + $0x3b80] sm:$0xff] }
 0x69c   : > { %13703 = vmatprep.subr.bf16.mxu0 %v16588_v47  ;;  %13908 = vmatprep.subr.bf16.mxu1 %v16590_v50  ;;  %v2196_v46 = vld [vmem:[%s17463_s22 + $0x3be0] sm:$0xff]  ;;  %v2185_v47 = vld [vmem:[%s17463_s22 + $0x3b88] sm:$0xff] }
 0x69d   : > { %v2197_v50 = vld [vmem:[%s17463_s22 + $0x3be8] sm:$0xff]  ;;  %v16756_v53 = vcombine.high %v2184_v44, %v2196_v46  ;;  %v16755_v61 = vcombine.low %v2184_v44, %v2196_v46 }
 0x69e   : > { %v16758_v55 = vcombine.high %v2185_v47, %v2197_v50  ;;  %v16757_v62 = vcombine.low %v2185_v47, %v2197_v50  ;;  %v434_v50 = vld [vmem:[%s17463_s22 + $0x4d0] sm:$0xff] }
 0x69f   : > { %13704 = vmatpush1.bf16.msra.mxu0 %v16587_v56  ;;  %13909 = vmatpush1.bf16.msra.mxu1 %v16589_v57  ;;  %v290_v56 = vld [vmem:[%s17463_s22 + $0x50] sm:$0xff] }
 0x6a0   : > { %13705 = vmatprep.subr.bf16.mxu0 %v16612_v58  ;;  %13910 = vmatprep.subr.bf16.mxu1 %v16614_v54  ;;  %v302_v57 = vld [vmem:[%s17463_s22 + $0xb0] sm:$0xff]  ;;  %v291_v58 = vld [vmem:[%s17463_s22 + $0x58] sm:$0xff] }
 0x6a1   : > { %v303_v54 = vld [vmem:[%s17463_s22 + $0xb8] sm:$0xff]  ;;  %v14864_v63 = vcombine.high %v290_v56, %v302_v57  ;;  %v14863_v30 = vcombine.low %v290_v56, %v302_v57 }
 0x6a2   : > { %v14866_v1 = vcombine.high %v291_v58, %v303_v54  ;;  %v14865_v7 = vcombine.low %v291_v58, %v303_v54  ;;  %v458_v54 = vld [vmem:[%s17463_s22 + $0x590] sm:$0xff] }
 0x6a3   : > { %13706 = vmatpush1.bf16.msra.mxu0 %v16611_v2  ;;  %13911 = vmatpush1.bf16.msra.mxu1 %v16613_v3  ;;  %v314_v2 = vld [vmem:[%s17463_s22 + $0x110] sm:$0xff] }
 0x6a4   : > { %13707 = vmatprep.subr.bf16.mxu0 %v16636_v4  ;;  %13912 = vmatprep.subr.bf16.mxu1 %v16638_v5  ;;  %v326_v3 = vld [vmem:[%s17463_s22 + $0x170] sm:$0xff]  ;;  %v315_v4 = vld [vmem:[%s17463_s22 + $0x118] sm:$0xff] }
 0x6a5   : > { %v327_v5 = vld [vmem:[%s17463_s22 + $0x178] sm:$0xff]  ;;  %v14888_v8 = vcombine.high %v314_v2, %v326_v3  ;;  %v14887_v16 = vcombine.low %v314_v2, %v326_v3 }
 0x6a6   : > { %v14890_v9 = vcombine.high %v315_v4, %v327_v5  ;;  %v14889_v17 = vcombine.low %v315_v4, %v327_v5  ;;  %v482_v5 = vld [vmem:[%s17463_s22 + $0x650] sm:$0xff] }
 0x6a7   : > { %13708 = vmatpush1.bf16.msra.mxu0 %v16635_v12  ;;  %13913 = vmatpush1.bf16.msra.mxu1 %v16637_v13  ;;  %v338_v12 = vld [vmem:[%s17463_s22 + $0x1d0] sm:$0xff] }
 0x6a8   : > { %13709 = vmatprep.subr.bf16.mxu0 %v16660_v14  ;;  %13914 = vmatprep.subr.bf16.mxu1 %v16662_v15  ;;  %v350_v13 = vld [vmem:[%s17463_s22 + $0x230] sm:$0xff]  ;;  %v339_v14 = vld [vmem:[%s17463_s22 + $0x1d8] sm:$0xff] }
 0x6a9   : > { %v351_v15 = vld [vmem:[%s17463_s22 + $0x238] sm:$0xff]  ;;  %v14912_v18 = vcombine.high %v338_v12, %v350_v13  ;;  %v14911_v26 = vcombine.low %v338_v12, %v350_v13 }
 0x6aa   : > { %v14914_v20 = vcombine.high %v339_v14, %v351_v15  ;;  %v14913_v27 = vcombine.low %v339_v14, %v351_v15  ;;  %v506_v15 = vld [vmem:[%s17463_s22 + $0x710] sm:$0xff] }
 0x6ab   : > { %13710 = vmatpush1.bf16.msra.mxu0 %v16659_v21  ;;  %13915 = vmatpush1.bf16.msra.mxu1 %v16661_v22  ;;  %v362_v21 = vld [vmem:[%s17463_s22 + $0x290] sm:$0xff] }
 0x6ac   : > { %13711 = vmatprep.subr.bf16.mxu0 %v16684_v23  ;;  %13916 = vmatprep.subr.bf16.mxu1 %v16686_v25  ;;  %v374_v22 = vld [vmem:[%s17463_s22 + $0x2f0] sm:$0xff]  ;;  %v363_v23 = vld [vmem:[%s17463_s22 + $0x298] sm:$0xff] }
 0x6ad   : > { %v375_v25 = vld [vmem:[%s17463_s22 + $0x2f8] sm:$0xff]  ;;  %v14936_v28 = vcombine.high %v362_v21, %v374_v22  ;;  %v14935_v35 = vcombine.low %v362_v21, %v374_v22 }
 0x6ae   : > { %v14938_v60 = vcombine.high %v363_v23, %v375_v25 }
 0x6af   : > { %13712 = vmatpush1.bf16.msra.mxu0 %v16683_v31  ;;  %13917 = vmatpush1.bf16.msra.mxu1 %v16685_v32  ;;  %v386_v31 = vld [vmem:[%s17463_s22 + $0x350] sm:$0xff] }
 0x6b0   : > { %13713 = vmatprep.subr.bf16.mxu0 %v16708_v0  ;;  %13918 = vmatprep.subr.bf16.mxu1 %v16710_v34  ;;  %v398_v32 = vld [vmem:[%s17463_s22 + $0x3b0] sm:$0xff]  ;;  %v387_v0 = vld [vmem:[%s17463_s22 + $0x358] sm:$0xff] }
 0x6b1   : > { %v399_v34 = vld [vmem:[%s17463_s22 + $0x3b8] sm:$0xff]  ;;  %v14960_v36 = vcombine.high %v386_v31, %v398_v32 }
 0x6b2   : > { %v14962_v37 = vcombine.high %v387_v0, %v399_v34  ;;  %v14961_v44 = vcombine.low %v387_v0, %v399_v34  ;;  %v554_v34 = vld [vmem:[%s17463_s22 + $0x890] sm:$0xff] }
 0x6b3   : > { %13714 = vmatpush1.bf16.msra.mxu0 %v16707_v40  ;;  %13919 = vmatpush1.bf16.msra.mxu1 %v16709_v41  ;;  %v422_v40 = vld [vmem:[%s17463_s22 + $0x470] sm:$0xff]  ;;  %v411_v41 = vld [vmem:[%s17463_s22 + $0x418] sm:$0xff] }
 0x6b4   : > { %13715 = vmatprep.subr.bf16.mxu0 %v16732_v42  ;;  %13920 = vmatprep.subr.bf16.mxu1 %v16734_v43  ;;  %v423_v42 = vld [vmem:[%s17463_s22 + $0x478] sm:$0xff]  ;;  %v14959_v43 = vcombine.low %v386_v31, %v398_v32  ;;  %v14984_v46 = vcombine.high %v410_v38, %v422_v40 }
 0x6b5   : > { %v14986_v47 = vcombine.high %v411_v41, %v423_v42  ;;  %v14985_v56 = vcombine.low %v411_v41, %v423_v42  ;;  %v578_v42 = vld [vmem:[%s17463_s22 + $0x950] sm:$0xff] }
 0x6b7   : > { %13716 = vmatpush1.bf16.msra.mxu0 %v16731_v51  ;;  %13921 = vmatpush1.bf16.msra.mxu1 %v16733_v52  ;;  %v446_v51 = vld [vmem:[%s17463_s22 + $0x530] sm:$0xff]  ;;  %v435_v52 = vld [vmem:[%s17463_s22 + $0x4d8] sm:$0xff] }
 0x6b8   : > { %13717 = vmatprep.subr.bf16.mxu0 %v16756_v53  ;;  %13922 = vmatprep.subr.bf16.mxu1 %v16758_v55  ;;  %v447_v53 = vld [vmem:[%s17463_s22 + $0x538] sm:$0xff]  ;;  %v14983_v55 = vcombine.low %v410_v38, %v422_v40  ;;  %v15008_v57 = vcombine.high %v434_v50, %v446_v51 }
 0x6b9   : > { %v15010_v58 = vcombine.high %v435_v52, %v447_v53  ;;  %v15009_v2 = vcombine.low %v435_v52, %v447_v53  ;;  %v602_v53 = vld [vmem:[%s17463_s22 + $0xa10] sm:$0xff] }
 0x6bb   : > { %13718 = vmatpush1.bf16.msra.mxu0 %v16755_v61  ;;  %13923 = vmatpush1.bf16.msra.mxu1 %v16757_v62  ;;  %v470_v61 = vld [vmem:[%s17463_s22 + $0x5f0] sm:$0xff]  ;;  %v459_v62 = vld [vmem:[%s17463_s22 + $0x598] sm:$0xff] }
 0x6bc   : > { %13933 = vmatprep.subr.bf16.mxu0 %v14864_v63  ;;  %14138 = vmatprep.subr.bf16.mxu1 %v14866_v1  ;;  %v471_v63 = vld [vmem:[%s17463_s22 + $0x5f8] sm:$0xff]  ;;  %v15007_v1 = vcombine.low %v434_v50, %v446_v51  ;;  %v15032_v3 = vcombine.high %v458_v54, %v470_v61 }
 0x6bd   : > { %v15034_v4 = vcombine.high %v459_v62, %v471_v63  ;;  %v15033_v12 = vcombine.low %v459_v62, %v471_v63  ;;  %v626_v63 = vld [vmem:[%s17463_s22 + $0xad0] sm:$0xff] }
 0x6be   : > { %13720 = vmatmul.mubr.bf16.vlgmr.msra.gmra.mrb[16].mxu0 %v17879_v48  ;;  %13925 = vmatmul.mubr.bf16.vlgmr.msra.gmra.mrb[16].mxu1 %v17879_v48 }
 0x6bf   : > { %13934 = vmatpush1.bf16.msra.mxu0 %v14863_v30  ;;  %14139 = vmatpush1.bf16.msra.mxu1 %v14865_v7  ;;  %v494_v30 = vld [vmem:[%s17463_s22 + $0x6b0] sm:$0xff]  ;;  %v483_v7 = vld [vmem:[%s17463_s22 + $0x658] sm:$0xff] }
 0x6c0   : > { %13935 = vmatprep.subr.bf16.mxu0 %v14888_v8  ;;  %14140 = vmatprep.subr.bf16.mxu1 %v14890_v9  ;;  %v495_v8 = vld [vmem:[%s17463_s22 + $0x6b8] sm:$0xff]  ;;  %v15031_v9 = vcombine.low %v458_v54, %v470_v61  ;;  %v15056_v13 = vcombine.high %v482_v5, %v494_v30 }
 0x6c1   : > { %13965 = vmatprep.mubr.bf16.mxu0 %v17523_v10  ;;  %14170 = vmatprep.mubr.bf16.mxu1 %v17523_v10  ;;  %v14937_v10 = vcombine.low %v363_v23, %v375_v25  ;;  %v15058_v14 = vcombine.high %v483_v7, %v495_v8  ;;  %v15057_v21 = vcombine.low %v483_v7, %v495_v8  ;;  %v530_v25 = vld [vmem:[%s17463_s22 + $0x7d0] sm:$0xff] }
 0x6c2   : > { %v650_v8 = vld [vmem:[%s17463_s22 + $0xb90] sm:$0xff] }
 0x6c3   : > { %13936 = vmatpush1.bf16.msra.mxu0 %v14887_v16  ;;  %14141 = vmatpush1.bf16.msra.mxu1 %v14889_v17  ;;  %v518_v16 = vld [vmem:[%s17463_s22 + $0x770] sm:$0xff]  ;;  %v507_v17 = vld [vmem:[%s17463_s22 + $0x718] sm:$0xff] }
 0x6c4   : > { %13937 = vmatprep.subr.bf16.mxu0 %v14912_v18  ;;  %14142 = vmatprep.subr.bf16.mxu1 %v14914_v20  ;;  %v519_v18 = vld [vmem:[%s17463_s22 + $0x778] sm:$0xff]  ;;  %v15055_v20 = vcombine.low %v482_v5, %v494_v30  ;;  %v15080_v22 = vcombine.high %v506_v15, %v518_v16 }
 0x6c5   : > { %v15082_v23 = vcombine.high %v507_v17, %v519_v18  ;;  %v15081_v31 = vcombine.low %v507_v17, %v519_v18  ;;  %v674_v18 = vld [vmem:[%s17463_s22 + $0xc50] sm:$0xff] }
 0x6c7   : > { %13938 = vmatpush1.bf16.msra.mxu0 %v14911_v26  ;;  %14143 = vmatpush1.bf16.msra.mxu1 %v14913_v27  ;;  %v542_v26 = vld [vmem:[%s17463_s22 + $0x830] sm:$0xff]  ;;  %v531_v27 = vld [vmem:[%s17463_s22 + $0x7d8] sm:$0xff] }
 0x6c8   : > { %13939 = vmatprep.subr.bf16.mxu0 %v14936_v28  ;;  %14144 = vmatprep.subr.bf16.mxu1 %v14938_v60  ;;  %v543_v28 = vld [vmem:[%s17463_s22 + $0x838] sm:$0xff]  ;;  %v15079_v60 = vcombine.low %v506_v15, %v518_v16  ;;  %v15104_v32 = vcombine.high %v530_v25, %v542_v26 }
 0x6c9   : > { %v15106_v0 = vcombine.high %v531_v27, %v543_v28  ;;  %v15105_v38 = vcombine.low %v531_v27, %v543_v28  ;;  %v698_v28 = vld [vmem:[%s17463_s22 + $0xd10] sm:$0xff] }
 0x6cb   : > { %13940 = vmatpush1.bf16.msra.mxu0 %v14935_v35  ;;  %14145 = vmatpush1.bf16.msra.mxu1 %v14937_v10  ;;  %v566_v35 = vld [vmem:[%s17463_s22 + $0x8f0] sm:$0xff]  ;;  %v555_v10 = vld [vmem:[%s17463_s22 + $0x898] sm:$0xff] }
 0x6cc   : > { %13941 = vmatprep.subr.bf16.mxu0 %v14960_v36  ;;  %14146 = vmatprep.subr.bf16.mxu1 %v14962_v37  ;;  %v567_v36 = vld [vmem:[%s17463_s22 + $0x8f8] sm:$0xff]  ;;  %v15103_v37 = vcombine.low %v530_v25, %v542_v26  ;;  %v15128_v40 = vcombine.high %v554_v34, %v566_v35 }
 0x6cd   : > { %v15130_v41 = vcombine.high %v555_v10, %v567_v36  ;;  %v15129_v50 = vcombine.low %v555_v10, %v567_v36  ;;  %v722_v36 = vld [vmem:[%s17463_s22 + $0xdd0] sm:$0xff] }
 0x6cf   : > { %13942 = vmatpush1.bf16.msra.mxu0 %v14959_v43  ;;  %14147 = vmatpush1.bf16.msra.mxu1 %v14961_v44  ;;  %v590_v43 = vld [vmem:[%s17463_s22 + $0x9b0] sm:$0xff]  ;;  %v579_v44 = vld [vmem:[%s17463_s22 + $0x958] sm:$0xff] }
 0x6d0   : > { %13943 = vmatprep.subr.bf16.mxu0 %v14984_v46  ;;  %14148 = vmatprep.subr.bf16.mxu1 %v14986_v47  ;;  %v591_v46 = vld [vmem:[%s17463_s22 + $0x9b8] sm:$0xff]  ;;  %v15127_v47 = vcombine.low %v554_v34, %v566_v35  ;;  %v15152_v51 = vcombine.high %v578_v42, %v590_v43 }
 0x6d1   : > { %v15154_v52 = vcombine.high %v579_v44, %v591_v46  ;;  %v15153_v54 = vcombine.low %v579_v44, %v591_v46  ;;  %v746_v46 = vld [vmem:[%s17463_s22 + $0xe90] sm:$0xff] }
 0x6d3   : > { %13944 = vmatpush1.bf16.msra.mxu0 %v14983_v55  ;;  %14149 = vmatpush1.bf16.msra.mxu1 %v14985_v56  ;;  %v614_v55 = vld [vmem:[%s17463_s22 + $0xa70] sm:$0xff]  ;;  %v603_v56 = vld [vmem:[%s17463_s22 + $0xa18] sm:$0xff] }
 0x6d4   : > { %13945 = vmatprep.subr.bf16.mxu0 %v15008_v57  ;;  %14150 = vmatprep.subr.bf16.mxu1 %v15010_v58  ;;  %v615_v57 = vld [vmem:[%s17463_s22 + $0xa78] sm:$0xff]  ;;  %v15151_v58 = vcombine.low %v578_v42, %v590_v43  ;;  %v15176_v61 = vcombine.high %v602_v53, %v614_v55 }
 0x6d5   : > { %v15178_v62 = vcombine.high %v603_v56, %v615_v57  ;;  %v15177_v5 = vcombine.low %v603_v56, %v615_v57  ;;  %v770_v56 = vld [vmem:[%s17463_s22 + $0xf50] sm:$0xff] }
 0x6d6   : > { %v782_v57 = vld [vmem:[%s17463_s22 + $0xfb0] sm:$0xff] }
 0x6d7   : > { %13946 = vmatpush1.bf16.msra.mxu0 %v15007_v1  ;;  %14151 = vmatpush1.bf16.msra.mxu1 %v15009_v2  ;;  %v638_v1 = vld [vmem:[%s17463_s22 + $0xb30] sm:$0xff]  ;;  %v627_v2 = vld [vmem:[%s17463_s22 + $0xad8] sm:$0xff] }
 0x6d8   : > { %13947 = vmatprep.subr.bf16.mxu0 %v15032_v3  ;;  %14152 = vmatprep.subr.bf16.mxu1 %v15034_v4  ;;  %v639_v3 = vld [vmem:[%s17463_s22 + $0xb38] sm:$0xff]  ;;  %v15175_v4 = vcombine.low %v602_v53, %v614_v55  ;;  %v15200_v30 = vcombine.high %v626_v63, %v638_v1 }
 0x6d9   : > { %v15202_v7 = vcombine.high %v627_v2, %v639_v3  ;;  %v15201_v15 = vcombine.low %v627_v2, %v639_v3  ;;  %v806_v2 = vld [vmem:[%s17463_s22 + $0x1070] sm:$0xff]  ;;  %v795_v3 = vld [vmem:[%s17463_s22 + $0x1018] sm:$0xff] }
 0x6db   : > { %13948 = vmatpush1.bf16.msra.mxu0 %v15031_v9  ;;  %14153 = vmatpush1.bf16.msra.mxu1 %v15033_v12  ;;  %v662_v9 = vld [vmem:[%s17463_s22 + $0xbf0] sm:$0xff]  ;;  %v651_v12 = vld [vmem:[%s17463_s22 + $0xb98] sm:$0xff] }
 0x6dc   : > { %13949 = vmatprep.subr.bf16.mxu0 %v15056_v13  ;;  %14154 = vmatprep.subr.bf16.mxu1 %v15058_v14  ;;  %v663_v13 = vld [vmem:[%s17463_s22 + $0xbf8] sm:$0xff]  ;;  %v15199_v14 = vcombine.low %v626_v63, %v638_v1  ;;  %v15224_v16 = vcombine.high %v650_v8, %v662_v9  ;;  %v794_v1 = vld [vmem:[%s17463_s22 + $0x1010] sm:$0xff] }
 0x6dd   : > { %v15226_v17 = vcombine.high %v651_v12, %v663_v13  ;;  %v15225_v25 = vcombine.low %v651_v12, %v663_v13  ;;  %v830_v12 = vld [vmem:[%s17463_s22 + $0x1130] sm:$0xff]  ;;  %v819_v13 = vld [vmem:[%s17463_s22 + $0x10d8] sm:$0xff] }
 0x6df   : > { %13950 = vmatpush1.bf16.msra.mxu0 %v15055_v20  ;;  %14155 = vmatpush1.bf16.msra.mxu1 %v15057_v21  ;;  %v686_v20 = vld [vmem:[%s17463_s22 + $0xcb0] sm:$0xff]  ;;  %v675_v21 = vld [vmem:[%s17463_s22 + $0xc58] sm:$0xff] }
 0x6e0   : > { %13951 = vmatprep.subr.bf16.mxu0 %v15080_v22  ;;  %14156 = vmatprep.subr.bf16.mxu1 %v15082_v23  ;;  %v687_v22 = vld [vmem:[%s17463_s22 + $0xcb8] sm:$0xff]  ;;  %v15223_v23 = vcombine.low %v650_v8, %v662_v9  ;;  %v15248_v26 = vcombine.high %v674_v18, %v686_v20  ;;  %v818_v9 = vld [vmem:[%s17463_s22 + $0x10d0] sm:$0xff] }
 0x6e1   : > { %v15250_v27 = vcombine.high %v675_v21, %v687_v22  ;;  %v15249_v34 = vcombine.low %v675_v21, %v687_v22  ;;  %v854_v21 = vld [vmem:[%s17463_s22 + $0x11f0] sm:$0xff]  ;;  %v843_v22 = vld [vmem:[%s17463_s22 + $0x1198] sm:$0xff] }
 0x6e3   : > { %13952 = vmatpush1.bf16.msra.mxu0 %v15079_v60  ;;  %14157 = vmatpush1.bf16.msra.mxu1 %v15081_v31  ;;  %v710_v60 = vld [vmem:[%s17463_s22 + $0xd70] sm:$0xff]  ;;  %v699_v31 = vld [vmem:[%s17463_s22 + $0xd18] sm:$0xff] }
 0x6e4   : > { %13953 = vmatprep.subr.bf16.mxu0 %v15104_v32  ;;  %14158 = vmatprep.subr.bf16.mxu1 %v15106_v0  ;;  %v711_v32 = vld [vmem:[%s17463_s22 + $0xd78] sm:$0xff]  ;;  %v15247_v0 = vcombine.low %v674_v18, %v686_v20  ;;  %v15272_v35 = vcombine.high %v698_v28, %v710_v60  ;;  %v842_v20 = vld [vmem:[%s17463_s22 + $0x1190] sm:$0xff] }
 0x6e5   : > { %v15274_v10 = vcombine.high %v699_v31, %v711_v32  ;;  %v15273_v42 = vcombine.low %v699_v31, %v711_v32  ;;  %v878_v31 = vld [vmem:[%s17463_s22 + $0x12b0] sm:$0xff]  ;;  %v867_v32 = vld [vmem:[%s17463_s22 + $0x1258] sm:$0xff] }
 0x6e7   : > { %13954 = vmatpush1.bf16.msra.mxu0 %v15103_v37  ;;  %14159 = vmatpush1.bf16.msra.mxu1 %v15105_v38  ;;  %v734_v37 = vld [vmem:[%s17463_s22 + $0xe30] sm:$0xff]  ;;  %v723_v38 = vld [vmem:[%s17463_s22 + $0xdd8] sm:$0xff] }
 0x6e8   : > { %13955 = vmatprep.subr.bf16.mxu0 %v15128_v40  ;;  %14160 = vmatprep.subr.bf16.mxu1 %v15130_v41  ;;  %v735_v40 = vld [vmem:[%s17463_s22 + $0xe38] sm:$0xff]  ;;  %v15271_v41 = vcombine.low %v698_v28, %v710_v60  ;;  %v15296_v43 = vcombine.high %v722_v36, %v734_v37  ;;  %v866_v60 = vld [vmem:[%s17463_s22 + $0x1250] sm:$0xff] }
 0x6e9   : > { %v15298_v44 = vcombine.high %v723_v38, %v735_v40 }
 0x6eb   : > { %13956 = vmatpush1.bf16.msra.mxu0 %v15127_v47  ;;  %14161 = vmatpush1.bf16.msra.mxu1 %v15129_v50  ;;  %v758_v47 = vld [vmem:[%s17463_s22 + $0xef0] sm:$0xff]  ;;  %v747_v50 = vld [vmem:[%s17463_s22 + $0xe98] sm:$0xff] }
 0x6ec   : > { %13957 = vmatprep.subr.bf16.mxu0 %v15152_v51  ;;  %14162 = vmatprep.subr.bf16.mxu1 %v15154_v52  ;;  %v759_v51 = vld [vmem:[%s17463_s22 + $0xef8] sm:$0xff]  ;;  %v15297_v52 = vcombine.low %v723_v38, %v735_v40  ;;  %v15320_v53 = vcombine.high %v746_v46, %v758_v47  ;;  %v902_v38 = vld [vmem:[%s17463_s22 + $0x1370] sm:$0xff] }
 0x6ed   : > { %v15322_v55 = vcombine.high %v747_v50, %v759_v51  ;;  %v891_v40 = vld [vmem:[%s17463_s22 + $0x1318] sm:$0xff] }
 0x6ef   : > { %13958 = vmatpush1.bf16.msra.mxu0 %v15151_v58  ;;  %14163 = vmatpush1.bf16.msra.mxu1 %v15153_v54  ;;  %v771_v58 = vld [vmem:[%s17463_s22 + $0xf58] sm:$0xff] }
 0x6f0   : > { %13959 = vmatprep.subr.bf16.mxu0 %v15176_v61  ;;  %14164 = vmatprep.subr.bf16.mxu1 %v15178_v62  ;;  %v783_v54 = vld [vmem:[%s17463_s22 + $0xfb8] sm:$0xff]  ;;  %v15319_v61 = vcombine.low %v746_v46, %v758_v47  ;;  %v15344_v62 = vcombine.high %v770_v56, %v782_v57  ;;  %v914_v47 = vld [vmem:[%s17463_s22 + $0x13d0] sm:$0xff] }
 0x6f1   : > { %v15346_v63 = vcombine.high %v771_v58, %v783_v54 }
 0x6f3   : > { %13960 = vmatpush1.bf16.msra.mxu0 %v15175_v4  ;;  %14165 = vmatpush1.bf16.msra.mxu1 %v15177_v5  ;;  %v807_v4 = vld [vmem:[%s17463_s22 + $0x1078] sm:$0xff]  ;;  %v15343_v5 = vcombine.low %v770_v56, %v782_v57  ;;  %v938_v57 = vld [vmem:[%s17463_s22 + $0x1490] sm:$0xff] }
 0x6f4   : > { %13961 = vmatprep.subr.bf16.mxu0 %v15200_v30  ;;  %14166 = vmatprep.subr.bf16.mxu1 %v15202_v7  ;;  %v15345_v30 = vcombine.low %v771_v58, %v783_v54  ;;  %v15368_v7 = vcombine.high %v794_v1, %v806_v2  ;;  %v15370_v8 = vcombine.high %v795_v3, %v807_v4  ;;  %v950_v58 = vld [vmem:[%s17463_s22 + $0x14f0] sm:$0xff]  ;;  %v939_v54 = vld [vmem:[%s17463_s22 + $0x1498] sm:$0xff] }
 0x6f7   : > { %13962 = vmatpush1.bf16.msra.mxu0 %v15199_v14  ;;  %14167 = vmatpush1.bf16.msra.mxu1 %v15201_v15  ;;  %v831_v14 = vld [vmem:[%s17463_s22 + $0x1138] sm:$0xff]  ;;  %v15367_v15 = vcombine.low %v794_v1, %v806_v2  ;;  %v962_v2 = vld [vmem:[%s17463_s22 + $0x1550] sm:$0xff] }
 0x6f8   : > { %13963 = vmatprep.subr.bf16.mxu0 %v15224_v16  ;;  %14168 = vmatprep.subr.bf16.mxu1 %v15226_v17  ;;  %v15369_v16 = vcombine.low %v795_v3, %v807_v4  ;;  %v15392_v17 = vcombine.high %v818_v9, %v830_v12  ;;  %v15394_v18 = vcombine.high %v819_v13, %v831_v14  ;;  %v974_v3 = vld [vmem:[%s17463_s22 + $0x15b0] sm:$0xff]  ;;  %v963_v4 = vld [vmem:[%s17463_s22 + $0x1558] sm:$0xff] }
 0x6fb   : > { %13964 = vmatpush1.bf16.msra.mxu0 %v15223_v23  ;;  %14169 = vmatpush1.bf16.msra.mxu1 %v15225_v25  ;;  %v855_v23 = vld [vmem:[%s17463_s22 + $0x11f8] sm:$0xff]  ;;  %v15391_v25 = vcombine.low %v818_v9, %v830_v12  ;;  %v986_v12 = vld [vmem:[%s17463_s22 + $0x1610] sm:$0xff] }
 0x6fc   : > { %13974 = vmatprep.subr.bf16.mxu0 %v15248_v26  ;;  %14179 = vmatprep.subr.bf16.mxu1 %v15250_v27  ;;  %v15393_v26 = vcombine.low %v819_v13, %v831_v14  ;;  %v15416_v27 = vcombine.high %v842_v20, %v854_v21  ;;  %v15418_v28 = vcombine.high %v843_v22, %v855_v23  ;;  %v998_v13 = vld [vmem:[%s17463_s22 + $0x1670] sm:$0xff]  ;;  %v987_v14 = vld [vmem:[%s17463_s22 + $0x1618] sm:$0xff] }
 0x6fe   : > { %13966 = vmatmul.mubr.bf16.vlgmr.msra.gmra.mrb[20].mxu0 %v17565_v24  ;;  %14171 = vmatmul.mubr.bf16.vlgmr.msra.gmra.mrb[20].mxu1 %v17565_v24  ;;  %v15295_v24 = vcombine.low %v722_v36, %v734_v37  ;;  %v890_v37 = vld [vmem:[%s17463_s22 + $0x1310] sm:$0xff] }
 0x6ff   : > { %13975 = vmatpush1.bf16.msra.mxu0 %v15247_v0  ;;  %14180 = vmatpush1.bf16.msra.mxu1 %v15249_v34  ;;  %v879_v0 = vld [vmem:[%s17463_s22 + $0x12b8] sm:$0xff]  ;;  %v15415_v34 = vcombine.low %v842_v20, %v854_v21  ;;  %v1010_v21 = vld [vmem:[%s17463_s22 + $0x16d0] sm:$0xff] }
 0x700   : > { %13976 = vmatprep.subr.bf16.mxu0 %v15272_v35  ;;  %14181 = vmatprep.subr.bf16.mxu1 %v15274_v10  ;;  %v15417_v35 = vcombine.low %v843_v22, %v855_v23  ;;  %v15440_v10 = vcombine.high %v866_v60, %v878_v31  ;;  %v15442_v36 = vcombine.high %v867_v32, %v879_v0  ;;  %v1022_v22 = vld [vmem:[%s17463_s22 + $0x1730] sm:$0xff]  ;;  %v1011_v23 = vld [vmem:[%s17463_s22 + $0x16d8] sm:$0xff] }
 0x701   : > { %14006 = vmatprep.mubr.bf16.mxu0 %v17573_v33  ;;  %14211 = vmatprep.mubr.bf16.mxu1 %v17573_v33  ;;  %v15321_v33 = vcombine.low %v747_v50, %v759_v51  ;;  %v926_v50 = vld [vmem:[%s17463_s22 + $0x1430] sm:$0xff]  ;;  %v915_v51 = vld [vmem:[%s17463_s22 + $0x13d8] sm:$0xff] }
 0x703   : > { %13977 = vmatpush1.bf16.msra.mxu0 %v15271_v41  ;;  %14182 = vmatpush1.bf16.msra.mxu1 %v15273_v42  ;;  %v903_v41 = vld [vmem:[%s17463_s22 + $0x1378] sm:$0xff]  ;;  %v15439_v42 = vcombine.low %v866_v60, %v878_v31  ;;  %v1034_v31 = vld [vmem:[%s17463_s22 + $0x1790] sm:$0xff] }
 0x704   : > { %13978 = vmatprep.subr.bf16.mxu0 %v15296_v43  ;;  %14183 = vmatprep.subr.bf16.mxu1 %v15298_v44  ;;  %v15441_v43 = vcombine.low %v867_v32, %v879_v0  ;;  %v15464_v44 = vcombine.high %v890_v37, %v902_v38  ;;  %v15466_v46 = vcombine.high %v891_v40, %v903_v41  ;;  %v1046_v32 = vld [vmem:[%s17463_s22 + $0x17f0] sm:$0xff]  ;;  %v1035_v0 = vld [vmem:[%s17463_s22 + $0x1798] sm:$0xff] }
 0x707   : > { %13979 = vmatpush1.bf16.msra.mxu0 %v15295_v24  ;;  %14184 = vmatpush1.bf16.msra.mxu1 %v15297_v52  ;;  %v927_v24 = vld [vmem:[%s17463_s22 + $0x1438] sm:$0xff]  ;;  %v15463_v52 = vcombine.low %v890_v37, %v902_v38  ;;  %v1058_v38 = vld [vmem:[%s17463_s22 + $0x1850] sm:$0xff] }
 0x708   : > { %13980 = vmatprep.subr.bf16.mxu0 %v15320_v53  ;;  %14185 = vmatprep.subr.bf16.mxu1 %v15322_v55  ;;  %v15465_v53 = vcombine.low %v891_v40, %v903_v41  ;;  %v15488_v55 = vcombine.high %v914_v47, %v926_v50  ;;  %v15490_v56 = vcombine.high %v915_v51, %v927_v24  ;;  %v1070_v40 = vld [vmem:[%s17463_s22 + $0x18b0] sm:$0xff]  ;;  %v1059_v41 = vld [vmem:[%s17463_s22 + $0x1858] sm:$0xff] }
 0x70b   : > { %13981 = vmatpush1.bf16.msra.mxu0 %v15319_v61  ;;  %14186 = vmatpush1.bf16.msra.mxu1 %v15321_v33  ;;  %v951_v61 = vld [vmem:[%s17463_s22 + $0x14f8] sm:$0xff]  ;;  %v15487_v33 = vcombine.low %v914_v47, %v926_v50  ;;  %v1082_v50 = vld [vmem:[%s17463_s22 + $0x1910] sm:$0xff] }
 0x70c   : > { %13982 = vmatprep.subr.bf16.mxu0 %v15344_v62  ;;  %14187 = vmatprep.subr.bf16.mxu1 %v15346_v63  ;;  %v15489_v62 = vcombine.low %v915_v51, %v927_v24  ;;  %v15512_v63 = vcombine.high %v938_v57, %v950_v58  ;;  %v15514_v1 = vcombine.high %v939_v54, %v951_v61  ;;  %v1094_v51 = vld [vmem:[%s17463_s22 + $0x1970] sm:$0xff]  ;;  %v1083_v24 = vld [vmem:[%s17463_s22 + $0x1918] sm:$0xff] }
 0x70f   : > { %13983 = vmatpush1.bf16.msra.mxu0 %v15343_v5  ;;  %14188 = vmatpush1.bf16.msra.mxu1 %v15345_v30  ;;  %v975_v5 = vld [vmem:[%s17463_s22 + $0x15b8] sm:$0xff]  ;;  %v15511_v30 = vcombine.low %v938_v57, %v950_v58  ;;  %v1106_v58 = vld [vmem:[%s17463_s22 + $0x19d0] sm:$0xff] }
 0x710   : > { %13984 = vmatprep.subr.bf16.mxu0 %v15368_v7  ;;  %14189 = vmatprep.subr.bf16.mxu1 %v15370_v8  ;;  %v15513_v7 = vcombine.low %v939_v54, %v951_v61  ;;  %v15536_v8 = vcombine.high %v962_v2, %v974_v3  ;;  %v15538_v9 = vcombine.high %v963_v4, %v975_v5  ;;  %v1118_v54 = vld [vmem:[%s17463_s22 + $0x1a30] sm:$0xff]  ;;  %v1107_v61 = vld [vmem:[%s17463_s22 + $0x19d8] sm:$0xff] }
 0x713   : > { %13985 = vmatpush1.bf16.msra.mxu0 %v15367_v15  ;;  %14190 = vmatpush1.bf16.msra.mxu1 %v15369_v16  ;;  %v999_v15 = vld [vmem:[%s17463_s22 + $0x1678] sm:$0xff]  ;;  %v15535_v16 = vcombine.low %v962_v2, %v974_v3  ;;  %v1130_v3 = vld [vmem:[%s17463_s22 + $0x1a90] sm:$0xff] }
 0x714   : > { %13986 = vmatprep.subr.bf16.mxu0 %v15392_v17  ;;  %14191 = vmatprep.subr.bf16.mxu1 %v15394_v18  ;;  %v15537_v17 = vcombine.low %v963_v4, %v975_v5  ;;  %v15560_v18 = vcombine.high %v986_v12, %v998_v13  ;;  %v15562_v20 = vcombine.high %v987_v14, %v999_v15  ;;  %v1142_v4 = vld [vmem:[%s17463_s22 + $0x1af0] sm:$0xff]  ;;  %v1131_v5 = vld [vmem:[%s17463_s22 + $0x1a98] sm:$0xff] }
 0x717   : > { %13987 = vmatpush1.bf16.msra.mxu0 %v15391_v25  ;;  %14192 = vmatpush1.bf16.msra.mxu1 %v15393_v26  ;;  %v1023_v25 = vld [vmem:[%s17463_s22 + $0x1738] sm:$0xff]  ;;  %v15559_v26 = vcombine.low %v986_v12, %v998_v13  ;;  %v1154_v12 = vld [vmem:[%s17463_s22 + $0x1b50] sm:$0xff] }
 0x718   : > { %13988 = vmatprep.subr.bf16.mxu0 %v15416_v27  ;;  %14193 = vmatprep.subr.bf16.mxu1 %v15418_v28  ;;  %v15561_v27 = vcombine.low %v987_v14, %v999_v15  ;;  %v15584_v28 = vcombine.high %v1010_v21, %v1022_v22  ;;  %v15586_v60 = vcombine.high %v1011_v23, %v1023_v25  ;;  %v1166_v13 = vld [vmem:[%s17463_s22 + $0x1bb0] sm:$0xff]  ;;  %v1155_v14 = vld [vmem:[%s17463_s22 + $0x1b58] sm:$0xff] }
 0x719   : > { %v1167_v15 = vld [vmem:[%s17463_s22 + $0x1bb8] sm:$0xff] }
 0x71b   : > { %13989 = vmatpush1.bf16.msra.mxu0 %v15415_v34  ;;  %14194 = vmatpush1.bf16.msra.mxu1 %v15417_v35  ;;  %v1047_v34 = vld [vmem:[%s17463_s22 + $0x17f8] sm:$0xff]  ;;  %v15583_v35 = vcombine.low %v1010_v21, %v1022_v22  ;;  %v1190_v21 = vld [vmem:[%s17463_s22 + $0x1c70] sm:$0xff] }
 0x71c   : > { %13990 = vmatprep.subr.bf16.mxu0 %v15440_v10  ;;  %14195 = vmatprep.subr.bf16.mxu1 %v15442_v36  ;;  %v15585_v10 = vcombine.low %v1011_v23, %v1023_v25  ;;  %v15608_v36 = vcombine.high %v1034_v31, %v1046_v32  ;;  %v15610_v37 = vcombine.high %v1035_v0, %v1047_v34  ;;  %v1179_v22 = vld [vmem:[%s17463_s22 + $0x1c18] sm:$0xff] }
 0x71d   : > { %v1191_v23 = vld [vmem:[%s17463_s22 + $0x1c78] sm:$0xff]  ;;  %v15727_v25 = vcombine.low %v1154_v12, %v1166_v13 }
 0x71f   : > { %13991 = vmatpush1.bf16.msra.mxu0 %v15439_v42  ;;  %14196 = vmatpush1.bf16.msra.mxu1 %v15441_v43  ;;  %v1071_v42 = vld [vmem:[%s17463_s22 + $0x18b8] sm:$0xff]  ;;  %v15607_v43 = vcombine.low %v1034_v31, %v1046_v32  ;;  %v1214_v31 = vld [vmem:[%s17463_s22 + $0x1d30] sm:$0xff] }
 0x720   : > { %13992 = vmatprep.subr.bf16.mxu0 %v15464_v44  ;;  %14197 = vmatprep.subr.bf16.mxu1 %v15466_v46  ;;  %v15609_v44 = vcombine.low %v1035_v0, %v1047_v34  ;;  %v15632_v46 = vcombine.high %v1058_v38, %v1070_v40  ;;  %v15634_v47 = vcombine.high %v1059_v41, %v1071_v42  ;;  %v1203_v32 = vld [vmem:[%s17463_s22 + $0x1cd8] sm:$0xff] }
 0x721   : > { %v1215_v0 = vld [vmem:[%s17463_s22 + $0x1d38] sm:$0xff] }
 0x723   : > { %13993 = vmatpush1.bf16.msra.mxu0 %v15463_v52  ;;  %14198 = vmatpush1.bf16.msra.mxu1 %v15465_v53  ;;  %v1095_v52 = vld [vmem:[%s17463_s22 + $0x1978] sm:$0xff]  ;;  %v15631_v53 = vcombine.low %v1058_v38, %v1070_v40  ;;  %v1238_v38 = vld [vmem:[%s17463_s22 + $0x1df0] sm:$0xff] }
 0x724   : > { %13994 = vmatprep.subr.bf16.mxu0 %v15488_v55  ;;  %14199 = vmatprep.subr.bf16.mxu1 %v15490_v56  ;;  %v15633_v55 = vcombine.low %v1059_v41, %v1071_v42  ;;  %v15656_v56 = vcombine.high %v1082_v50, %v1094_v51  ;;  %v15658_v57 = vcombine.high %v1083_v24, %v1095_v52  ;;  %v1227_v40 = vld [vmem:[%s17463_s22 + $0x1d98] sm:$0xff] }
 0x725   : > { %v1239_v41 = vld [vmem:[%s17463_s22 + $0x1df8] sm:$0xff] }
 0x727   : > { %13995 = vmatpush1.bf16.msra.mxu0 %v15487_v33  ;;  %14200 = vmatpush1.bf16.msra.mxu1 %v15489_v62  ;;  %v1119_v33 = vld [vmem:[%s17463_s22 + $0x1a38] sm:$0xff]  ;;  %v15655_v62 = vcombine.low %v1082_v50, %v1094_v51  ;;  %v1262_v50 = vld [vmem:[%s17463_s22 + $0x1eb0] sm:$0xff] }
 0x728   : > { %13996 = vmatprep.subr.bf16.mxu0 %v15512_v63  ;;  %14201 = vmatprep.subr.bf16.mxu1 %v15514_v1  ;;  %v15657_v63 = vcombine.low %v1083_v24, %v1095_v52  ;;  %v15680_v1 = vcombine.high %v1106_v58, %v1118_v54  ;;  %v15682_v2 = vcombine.high %v1107_v61, %v1119_v33  ;;  %v1251_v51 = vld [vmem:[%s17463_s22 + $0x1e58] sm:$0xff] }
 0x729   : > { %v1263_v24 = vld [vmem:[%s17463_s22 + $0x1eb8] sm:$0xff] }
 0x72b   : > { %13997 = vmatpush1.bf16.msra.mxu0 %v15511_v30  ;;  %14202 = vmatpush1.bf16.msra.mxu1 %v15513_v7  ;;  %v1143_v30 = vld [vmem:[%s17463_s22 + $0x1af8] sm:$0xff]  ;;  %v15681_v7 = vcombine.low %v1107_v61, %v1119_v33 }
 0x72c   : > { %13998 = vmatprep.subr.bf16.mxu0 %v15536_v8  ;;  %14203 = vmatprep.subr.bf16.mxu1 %v15538_v9  ;;  %v15704_v8 = vcombine.high %v1130_v3, %v1142_v4  ;;  %v15706_v9 = vcombine.high %v1131_v5, %v1143_v30  ;;  %v1287_v61 = vld [vmem:[%s17463_s22 + $0x1f78] sm:$0xff] }
 0x72f   : > { %13999 = vmatpush1.bf16.msra.mxu0 %v15535_v16  ;;  %14204 = vmatpush1.bf16.msra.mxu1 %v15537_v17  ;;  %v15703_v16 = vcombine.low %v1130_v3, %v1142_v4  ;;  %v15728_v17 = vcombine.high %v1154_v12, %v1166_v13  ;;  %v1310_v3 = vld [vmem:[%s17463_s22 + $0x2030] sm:$0xff]  ;;  %v1299_v4 = vld [vmem:[%s17463_s22 + $0x1fd8] sm:$0xff] }
 0x730   : > { %14000 = vmatprep.subr.bf16.mxu0 %v15560_v18  ;;  %14205 = vmatprep.subr.bf16.mxu1 %v15562_v20  ;;  %v15730_v18 = vcombine.high %v1155_v14, %v1167_v15  ;;  %v1178_v20 = vld [vmem:[%s17463_s22 + $0x1c10] sm:$0xff]  ;;  %v1323_v13 = vld [vmem:[%s17463_s22 + $0x2098] sm:$0xff] }
 0x731   : > { %v15751_v34 = vcombine.low %v1178_v20, %v1190_v21  ;;  %v1334_v12 = vld [vmem:[%s17463_s22 + $0x20f0] sm:$0xff] }
 0x733   : > { %14001 = vmatpush1.bf16.msra.mxu0 %v15559_v26  ;;  %14206 = vmatpush1.bf16.msra.mxu1 %v15561_v27  ;;  %v15729_v26 = vcombine.low %v1155_v14, %v1167_v15  ;;  %v15752_v27 = vcombine.high %v1178_v20, %v1190_v21  ;;  %v1335_v14 = vld [vmem:[%s17463_s22 + $0x20f8] sm:$0xff]  ;;  %v1358_v20 = vld [vmem:[%s17463_s22 + $0x21b0] sm:$0xff] }
 0x734   : > { %14002 = vmatprep.subr.bf16.mxu0 %v15584_v28  ;;  %14207 = vmatprep.subr.bf16.mxu1 %v15586_v60  ;;  %v15754_v28 = vcombine.high %v1179_v22, %v1191_v23  ;;  %v1202_v60 = vld [vmem:[%s17463_s22 + $0x1cd0] sm:$0xff]  ;;  %v1347_v21 = vld [vmem:[%s17463_s22 + $0x2158] sm:$0xff] }
 0x735   : > { %v15775_v42 = vcombine.low %v1202_v60, %v1214_v31 }
 0x737   : > { %14003 = vmatpush1.bf16.msra.mxu0 %v15583_v35  ;;  %14208 = vmatpush1.bf16.msra.mxu1 %v15585_v10  ;;  %v15753_v35 = vcombine.low %v1179_v22, %v1191_v23  ;;  %v15776_v10 = vcombine.high %v1202_v60, %v1214_v31  ;;  %v1359_v22 = vld [vmem:[%s17463_s22 + $0x21b8] sm:$0xff]  ;;  %v1382_v60 = vld [vmem:[%s17463_s22 + $0x2270] sm:$0xff] }
 0x738   : > { %14004 = vmatprep.subr.bf16.mxu0 %v15608_v36  ;;  %14209 = vmatprep.subr.bf16.mxu1 %v15610_v37  ;;  %v15778_v36 = vcombine.high %v1203_v32, %v1215_v0  ;;  %v1226_v37 = vld [vmem:[%s17463_s22 + $0x1d90] sm:$0xff]  ;;  %v1371_v31 = vld [vmem:[%s17463_s22 + $0x2218] sm:$0xff] }
 0x739   : > { %v15799_v52 = vcombine.low %v1226_v37, %v1238_v38 }
 0x73b   : > { %14005 = vmatpush1.bf16.msra.mxu0 %v15607_v43  ;;  %14210 = vmatpush1.bf16.msra.mxu1 %v15609_v44  ;;  %v15777_v43 = vcombine.low %v1203_v32, %v1215_v0  ;;  %v15800_v44 = vcombine.high %v1226_v37, %v1238_v38  ;;  %v1383_v32 = vld [vmem:[%s17463_s22 + $0x2278] sm:$0xff]  ;;  %v1406_v37 = vld [vmem:[%s17463_s22 + $0x2330] sm:$0xff] }
 0x73c   : > { %14015 = vmatprep.subr.bf16.mxu0 %v15632_v46  ;;  %14220 = vmatprep.subr.bf16.mxu1 %v15634_v47  ;;  %v15802_v46 = vcombine.high %v1227_v40, %v1239_v41  ;;  %v1250_v47 = vld [vmem:[%s17463_s22 + $0x1e50] sm:$0xff]  ;;  %v1395_v38 = vld [vmem:[%s17463_s22 + $0x22d8] sm:$0xff] }
 0x73d   : > { %v15823_v33 = vcombine.low %v1250_v47, %v1262_v50 }
 0x73e   : > { %14007 = vmatmul.mubr.bf16.vlgmr.msra.gmra.mrb[20].mxu0 %v17648_v39  ;;  %14212 = vmatmul.mubr.bf16.vlgmr.msra.gmra.mrb[20].mxu1 %v17648_v39  ;;  %v15679_v39 = vcombine.low %v1106_v58, %v1118_v54  ;;  %v1286_v58 = vld [vmem:[%s17463_s22 + $0x1f70] sm:$0xff]  ;;  %v1275_v54 = vld [vmem:[%s17463_s22 + $0x1f18] sm:$0xff] }
 0x73f   : > { %14016 = vmatpush1.bf16.msra.mxu0 %v15631_v53  ;;  %14221 = vmatpush1.bf16.msra.mxu1 %v15633_v55  ;;  %v15801_v53 = vcombine.low %v1227_v40, %v1239_v41  ;;  %v15824_v55 = vcombine.high %v1250_v47, %v1262_v50  ;;  %v1407_v40 = vld [vmem:[%s17463_s22 + $0x2338] sm:$0xff]  ;;  %v1430_v47 = vld [vmem:[%s17463_s22 + $0x23f0] sm:$0xff] }
 0x740   : > { %14017 = vmatprep.subr.bf16.mxu0 %v15656_v56  ;;  %14222 = vmatprep.subr.bf16.mxu1 %v15658_v57  ;;  %v15826_v56 = vcombine.high %v1251_v51, %v1263_v24  ;;  %v1274_v57 = vld [vmem:[%s17463_s22 + $0x1f10] sm:$0xff]  ;;  %v1419_v50 = vld [vmem:[%s17463_s22 + $0x2398] sm:$0xff] }
 0x741   : > { %14047 = vmatprep.mubr.bf16.mxu0 %v17655_v49  ;;  %14252 = vmatprep.mubr.bf16.mxu1 %v17655_v49  ;;  %v15705_v49 = vcombine.low %v1131_v5, %v1143_v30  ;;  %v1311_v5 = vld [vmem:[%s17463_s22 + $0x2038] sm:$0xff]  ;;  %v15847_v30 = vcombine.low %v1274_v57, %v1286_v58 }
 0x743   : > { %14018 = vmatpush1.bf16.msra.mxu0 %v15655_v62  ;;  %14223 = vmatpush1.bf16.msra.mxu1 %v15657_v63  ;;  %v15825_v62 = vcombine.low %v1251_v51, %v1263_v24  ;;  %v15848_v63 = vcombine.high %v1274_v57, %v1286_v58  ;;  %v1431_v51 = vld [vmem:[%s17463_s22 + $0x23f8] sm:$0xff]  ;;  %v1454_v57 = vld [vmem:[%s17463_s22 + $0x24b0] sm:$0xff] }
 0x744   : > { %14019 = vmatprep.subr.bf16.mxu0 %v15680_v1  ;;  %14224 = vmatprep.subr.bf16.mxu1 %v15682_v2  ;;  %v15850_v1 = vcombine.high %v1275_v54, %v1287_v61  ;;  %v1298_v2 = vld [vmem:[%s17463_s22 + $0x1fd0] sm:$0xff]  ;;  %v1443_v58 = vld [vmem:[%s17463_s22 + $0x2458] sm:$0xff] }
 0x745   : > { %v15871_v15 = vcombine.low %v1298_v2, %v1310_v3 }
 0x747   : > { %14020 = vmatpush1.bf16.msra.mxu0 %v15679_v39  ;;  %14225 = vmatpush1.bf16.msra.mxu1 %v15681_v7  ;;  %v15849_v39 = vcombine.low %v1275_v54, %v1287_v61  ;;  %v15872_v7 = vcombine.high %v1298_v2, %v1310_v3  ;;  %v1455_v54 = vld [vmem:[%s17463_s22 + $0x24b8] sm:$0xff]  ;;  %v1478_v2 = vld [vmem:[%s17463_s22 + $0x2570] sm:$0xff] }
 0x748   : > { %14021 = vmatprep.subr.bf16.mxu0 %v15704_v8  ;;  %14226 = vmatprep.subr.bf16.mxu1 %v15706_v9  ;;  %v15874_v8 = vcombine.high %v1299_v4, %v1311_v5  ;;  %v1322_v9 = vld [vmem:[%s17463_s22 + $0x2090] sm:$0xff]  ;;  %v1467_v3 = vld [vmem:[%s17463_s22 + $0x2518] sm:$0xff] }
 0x749   : > { %v15895_v23 = vcombine.low %v1322_v9, %v1334_v12 }
 0x74b   : > { %14022 = vmatpush1.bf16.msra.mxu0 %v15703_v16  ;;  %14227 = vmatpush1.bf16.msra.mxu1 %v15705_v49  ;;  %v15873_v16 = vcombine.low %v1299_v4, %v1311_v5  ;;  %v15896_v49 = vcombine.high %v1322_v9, %v1334_v12  ;;  %v1479_v4 = vld [vmem:[%s17463_s22 + $0x2578] sm:$0xff]  ;;  %v1502_v9 = vld [vmem:[%s17463_s22 + $0x2630] sm:$0xff] }
 0x74c   : > { %14023 = vmatprep.subr.bf16.mxu0 %v15728_v17  ;;  %14228 = vmatprep.subr.bf16.mxu1 %v15730_v18  ;;  %v15898_v17 = vcombine.high %v1323_v13, %v1335_v14  ;;  %v1346_v18 = vld [vmem:[%s17463_s22 + $0x2150] sm:$0xff]  ;;  %v1491_v12 = vld [vmem:[%s17463_s22 + $0x25d8] sm:$0xff] }
 0x74d   : > { %v15919_v0 = vcombine.low %v1346_v18, %v1358_v20 }
 0x74f   : > { %14024 = vmatpush1.bf16.msra.mxu0 %v15727_v25  ;;  %14229 = vmatpush1.bf16.msra.mxu1 %v15729_v26  ;;  %v15897_v25 = vcombine.low %v1323_v13, %v1335_v14  ;;  %v15920_v26 = vcombine.high %v1346_v18, %v1358_v20  ;;  %v1503_v13 = vld [vmem:[%s17463_s22 + $0x2638] sm:$0xff]  ;;  %v1526_v18 = vld [vmem:[%s17463_s22 + $0x26f0] sm:$0xff] }
 0x750   : > { %14025 = vmatprep.subr.bf16.mxu0 %v15752_v27  ;;  %14230 = vmatprep.subr.bf16.mxu1 %v15754_v28  ;;  %v15922_v27 = vcombine.high %v1347_v21, %v1359_v22  ;;  %v1370_v28 = vld [vmem:[%s17463_s22 + $0x2210] sm:$0xff]  ;;  %v1515_v20 = vld [vmem:[%s17463_s22 + $0x2698] sm:$0xff] }
 0x751   : > { %v15943_v41 = vcombine.low %v1370_v28, %v1382_v60 }
 0x753   : > { %14026 = vmatpush1.bf16.msra.mxu0 %v15751_v34  ;;  %14231 = vmatpush1.bf16.msra.mxu1 %v15753_v35  ;;  %v15921_v34 = vcombine.low %v1347_v21, %v1359_v22  ;;  %v15944_v35 = vcombine.high %v1370_v28, %v1382_v60  ;;  %v1527_v21 = vld [vmem:[%s17463_s22 + $0x26f8] sm:$0xff]  ;;  %v16065_v22 = vcombine.low %v1491_v12, %v1503_v13 }
 0x754   : > { %14027 = vmatprep.subr.bf16.mxu0 %v15776_v10  ;;  %14232 = vmatprep.subr.bf16.mxu1 %v15778_v36  ;;  %v15946_v10 = vcombine.high %v1371_v31, %v1383_v32  ;;  %v1394_v36 = vld [vmem:[%s17463_s22 + $0x22d0] sm:$0xff]  ;;  %v1539_v28 = vld [vmem:[%s17463_s22 + $0x2758] sm:$0xff] }
 0x755   : > { %v15967_v24 = vcombine.low %v1394_v36, %v1406_v37  ;;  %v1551_v60 = vld [vmem:[%s17463_s22 + $0x27b8] sm:$0xff] }
 0x757   : > { %14028 = vmatpush1.bf16.msra.mxu0 %v15775_v42  ;;  %14233 = vmatpush1.bf16.msra.mxu1 %v15777_v43  ;;  %v15945_v42 = vcombine.low %v1371_v31, %v1383_v32  ;;  %v15968_v43 = vcombine.high %v1394_v36, %v1406_v37  ;;  %v1575_v36 = vld [vmem:[%s17463_s22 + $0x2878] sm:$0xff] }
 0x758   : > { %14029 = vmatprep.subr.bf16.mxu0 %v15800_v44  ;;  %14234 = vmatprep.subr.bf16.mxu1 %v15802_v46  ;;  %v15970_v44 = vcombine.high %v1395_v38, %v1407_v40  ;;  %v1418_v46 = vld [vmem:[%s17463_s22 + $0x2390] sm:$0xff] }
 0x759   : > { %v15991_v61 = vcombine.low %v1418_v46, %v1430_v47 }
 0x75b   : > { %14030 = vmatpush1.bf16.msra.mxu0 %v15799_v52  ;;  %14235 = vmatpush1.bf16.msra.mxu1 %v15801_v53  ;;  %v15969_v52 = vcombine.low %v1395_v38, %v1407_v40  ;;  %v15992_v53 = vcombine.high %v1418_v46, %v1430_v47  ;;  %v16113_v38 = vcombine.low %v1539_v28, %v1551_v60  ;;  %v1599_v46 = vld [vmem:[%s17463_s22 + $0x2938] sm:$0xff] }
 0x75c   : > { %14031 = vmatprep.subr.bf16.mxu0 %v15824_v55  ;;  %14236 = vmatprep.subr.bf16.mxu1 %v15826_v56  ;;  %v15994_v55 = vcombine.high %v1419_v50, %v1431_v51  ;;  %v1442_v56 = vld [vmem:[%s17463_s22 + $0x2450] sm:$0xff] }
 0x75d   : > { %v16015_v5 = vcombine.low %v1442_v56, %v1454_v57 }
 0x75f   : > { %14032 = vmatpush1.bf16.msra.mxu0 %v15823_v33  ;;  %14237 = vmatpush1.bf16.msra.mxu1 %v15825_v62  ;;  %v15993_v33 = vcombine.low %v1419_v50, %v1431_v51  ;;  %v16016_v62 = vcombine.high %v1442_v56, %v1454_v57 }
 0x760   : > { %14033 = vmatprep.subr.bf16.mxu0 %v15848_v63  ;;  %14238 = vmatprep.subr.bf16.mxu1 %v15850_v1  ;;  %v16018_v63 = vcombine.high %v1443_v58, %v1455_v54  ;;  %v1466_v1 = vld [vmem:[%s17463_s22 + $0x2510] sm:$0xff] }
 0x761   : > { %v16039_v14 = vcombine.low %v1466_v1, %v1478_v2 }
 0x763   : > { %14034 = vmatpush1.bf16.msra.mxu0 %v15847_v30  ;;  %14239 = vmatpush1.bf16.msra.mxu1 %v15849_v39  ;;  %v16017_v30 = vcombine.low %v1443_v58, %v1455_v54  ;;  %v16040_v39 = vcombine.high %v1466_v1, %v1478_v2  ;;  %v1611_v58 = vld [vmem:[%s17463_s22 + $0x2998] sm:$0xff] }
 0x764   : > { %14035 = vmatprep.subr.bf16.mxu0 %v15872_v7  ;;  %14240 = vmatprep.subr.bf16.mxu1 %v15874_v8  ;;  %v16042_v7 = vcombine.high %v1467_v3, %v1479_v4  ;;  %v1490_v8 = vld [vmem:[%s17463_s22 + $0x25d0] sm:$0xff]  ;;  %v1623_v54 = vld [vmem:[%s17463_s22 + $0x29f8] sm:$0xff] }
 0x767   : > { %14036 = vmatpush1.bf16.msra.mxu0 %v15871_v15  ;;  %14241 = vmatpush1.bf16.msra.mxu1 %v15873_v16  ;;  %v16041_v15 = vcombine.low %v1467_v3, %v1479_v4  ;;  %v16064_v16 = vcombine.high %v1490_v8, %v1502_v9 }
 0x768   : > { %14037 = vmatprep.subr.bf16.mxu0 %v15896_v49  ;;  %14242 = vmatprep.subr.bf16.mxu1 %v15898_v17  ;;  %v16066_v49 = vcombine.high %v1491_v12, %v1503_v13  ;;  %v1514_v17 = vld [vmem:[%s17463_s22 + $0x2690] sm:$0xff]  ;;  %v1635_v13 = vld [vmem:[%s17463_s22 + $0x2a58] sm:$0xff] }
 0x769   : > { %v16087_v31 = vcombine.low %v1514_v17, %v1526_v18 }
 0x76b   : > { %14038 = vmatpush1.bf16.msra.mxu0 %v15895_v23  ;;  %14243 = vmatpush1.bf16.msra.mxu1 %v15897_v25  ;;  %v16088_v23 = vcombine.high %v1514_v17, %v1526_v18  ;;  %v16090_v25 = vcombine.high %v1515_v20, %v1527_v21  ;;  %v16185_v17 = vcombine.low %v1611_v58, %v1623_v54 }
 0x76c   : > { %14039 = vmatprep.subr.bf16.mxu0 %v15920_v26  ;;  %14244 = vmatprep.subr.bf16.mxu1 %v15922_v27  ;;  %v1538_v26 = vld [vmem:[%s17463_s22 + $0x2750] sm:$0xff] }
 0x76d   : > { %v1550_v27 = vld [vmem:[%s17463_s22 + $0x27b0] sm:$0xff] }
 0x76e   : > { %v16112_v32 = vcombine.high %v1538_v26, %v1550_v27  ;;  %v16111_v37 = vcombine.low %v1538_v26, %v1550_v27 }
 0x76f   : > { %14040 = vmatpush1.bf16.msra.mxu0 %v15919_v0  ;;  %14245 = vmatpush1.bf16.msra.mxu1 %v15921_v34  ;;  %v16114_v0 = vcombine.high %v1539_v28, %v1551_v60  ;;  %v1562_v34 = vld [vmem:[%s17463_s22 + $0x2810] sm:$0xff] }
 0x770   : > { %14041 = vmatprep.subr.bf16.mxu0 %v15944_v35  ;;  %14246 = vmatprep.subr.bf16.mxu1 %v15946_v10  ;;  %v1574_v35 = vld [vmem:[%s17463_s22 + $0x2870] sm:$0xff]  ;;  %v1563_v10 = vld [vmem:[%s17463_s22 + $0x2818] sm:$0xff] }
 0x771   : > { %v16136_v40 = vcombine.high %v1562_v34, %v1574_v35  ;;  %v16135_v47 = vcombine.low %v1562_v34, %v1574_v35  ;;  %v16137_v50 = vcombine.low %v1563_v10, %v1575_v36 }
 0x773   : > { %14042 = vmatpush1.bf16.msra.mxu0 %v15943_v41  ;;  %14247 = vmatpush1.bf16.msra.mxu1 %v15945_v42  ;;  %v16138_v41 = vcombine.high %v1563_v10, %v1575_v36  ;;  %v1586_v42 = vld [vmem:[%s17463_s22 + $0x28d0] sm:$0xff] }
 0x774   : > { %14043 = vmatprep.subr.bf16.mxu0 %v15968_v43  ;;  %14248 = vmatprep.subr.bf16.mxu1 %v15970_v44  ;;  %v1598_v43 = vld [vmem:[%s17463_s22 + $0x2930] sm:$0xff]  ;;  %v1587_v44 = vld [vmem:[%s17463_s22 + $0x28d8] sm:$0xff] }
 0x775   : > { %v16160_v51 = vcombine.high %v1586_v42, %v1598_v43  ;;  %v16161_v4 = vcombine.low %v1587_v44, %v1599_v46 }
 0x777   : > { %14044 = vmatpush1.bf16.msra.mxu0 %v15967_v24  ;;  %14249 = vmatpush1.bf16.msra.mxu1 %v15969_v52  ;;  %v16162_v52 = vcombine.high %v1587_v44, %v1599_v46 }
 0x778   : > { %14045 = vmatprep.subr.bf16.mxu0 %v15992_v53  ;;  %14250 = vmatprep.subr.bf16.mxu1 %v15994_v55  ;;  %v1610_v53 = vld [vmem:[%s17463_s22 + $0x2990] sm:$0xff] }
 0x779   : > { %v1622_v55 = vld [vmem:[%s17463_s22 + $0x29f0] sm:$0xff] }
 0x77b   : > { %14046 = vmatpush1.bf16.msra.mxu0 %v15991_v61  ;;  %14251 = vmatpush1.bf16.msra.mxu1 %v15993_v33 }
 0x77c   : > { %14056 = vmatprep.subr.bf16.mxu0 %v16016_v62  ;;  %14261 = vmatprep.subr.bf16.mxu1 %v16018_v63  ;;  %v16159_v63 = vcombine.low %v1586_v42, %v1598_v43 }
 0x77e   : > { %14048 = vmatmul.mubr.bf16.vlgmr.msra.gmra.mrb[20].mxu0 %v17723_v59  ;;  %14253 = vmatmul.mubr.bf16.vlgmr.msra.gmra.mrb[20].mxu1 %v17723_v59  ;;  %v16063_v59 = vcombine.low %v1490_v8, %v1502_v9  ;;  %v1634_v8 = vld [vmem:[%s17463_s22 + $0x2a50] sm:$0xff] }
 0x77f   : > { %14057 = vmatpush1.bf16.msra.mxu0 %v16015_v5  ;;  %14262 = vmatpush1.bf16.msra.mxu1 %v16017_v30  ;;  %v16184_v5 = vcombine.high %v1610_v53, %v1622_v55  ;;  %v1646_v9 = vld [vmem:[%s17463_s22 + $0x2ab0] sm:$0xff] }
 0x780   : > { %14058 = vmatprep.subr.bf16.mxu0 %v16040_v39  ;;  %14263 = vmatprep.subr.bf16.mxu1 %v16042_v7  ;;  %v16186_v7 = vcombine.high %v1611_v58, %v1623_v54  ;;  %v16208_v18 = vcombine.high %v1634_v8, %v1646_v9  ;;  %v16207_v26 = vcombine.low %v1634_v8, %v1646_v9  ;;  %v1766_v58 = vld [vmem:[%s17463_s22 + $0x2e70] sm:$0xff]  ;;  %v1755_v54 = vld [vmem:[%s17463_s22 + $0x2e18] sm:$0xff] }
 0x781   : > { %14088 = vmatprep.mubr.bf16.mxu0 %v17731_v6  ;;  %14293 = vmatprep.mubr.bf16.mxu1 %v17731_v6  ;;  %v16089_v6 = vcombine.low %v1515_v20, %v1527_v21  ;;  %v1658_v21 = vld [vmem:[%s17463_s22 + $0x2b10] sm:$0xff] }
 0x782   : > { %v1802_v9 = vld [vmem:[%s17463_s22 + $0x2f90] sm:$0xff] }
 0x783   : > { %14059 = vmatpush1.bf16.msra.mxu0 %v16039_v14  ;;  %14264 = vmatpush1.bf16.msra.mxu1 %v16041_v15  ;;  %v1647_v14 = vld [vmem:[%s17463_s22 + $0x2ab8] sm:$0xff] }
 0x784   : > { %14060 = vmatprep.subr.bf16.mxu0 %v16064_v16  ;;  %14265 = vmatprep.subr.bf16.mxu1 %v16066_v49  ;;  %v276_v15 = vld [vmem:[#allocation2 + $0x20] sm:$0xff]  ;;  %v16183_v16 = vcombine.low %v1610_v53, %v1622_v55  ;;  %v16210_v20 = vcombine.high %v1635_v13, %v1647_v14  ;;  %v16209_v27 = vcombine.low %v1635_v13, %v1647_v14 }
 0x785   : > { %v1803_v13 = vld [vmem:[%s17463_s22 + $0x2f98] sm:$0xff] }
 0x786   : > { %v1815_v14 = vld [vmem:[%s17463_s22 + $0x2ff8] sm:$0xff] }
 0x787   : > { %14061 = vmatpush1.bf16.msra.mxu0 %v16063_v59  ;;  %14266 = vmatpush1.bf16.msra.mxu1 %v16065_v22  ;;  %v1670_v59 = vld [vmem:[%s17463_s22 + $0x2b70] sm:$0xff] }
 0x788   : > { %14062 = vmatprep.subr.bf16.mxu0 %v16088_v23  ;;  %14267 = vmatprep.subr.bf16.mxu1 %v16090_v25  ;;  %v1659_v23 = vld [vmem:[%s17463_s22 + $0x2b18] sm:$0xff]  ;;  %v16232_v28 = vcombine.high %v1658_v21, %v1670_v59  ;;  %v16231_v34 = vcombine.low %v1658_v21, %v1670_v59 }
 0x789   : > { %v1671_v25 = vld [vmem:[%s17463_s22 + $0x2b78] sm:$0xff] }
 0x78a   : > { %v16234_v60 = vcombine.high %v1659_v23, %v1671_v25  ;;  %v16233_v35 = vcombine.low %v1659_v23, %v1671_v25  ;;  %v1827_v21 = vld [vmem:[%s17463_s22 + $0x3058] sm:$0xff]  ;;  %v16377_v23 = vcombine.low %v1803_v13, %v1815_v14 }
 0x78b   : > { %14063 = vmatpush1.bf16.msra.mxu0 %v16087_v31  ;;  %14268 = vmatpush1.bf16.msra.mxu1 %v16089_v6  ;;  %v1682_v31 = vld [vmem:[%s17463_s22 + $0x2bd0] sm:$0xff]  ;;  %v1839_v59 = vld [vmem:[%s17463_s22 + $0x30b8] sm:$0xff] }
 0x78c   : > { %14064 = vmatprep.subr.bf16.mxu0 %v16112_v32  ;;  %14269 = vmatprep.subr.bf16.mxu1 %v16114_v0  ;;  %v1694_v6 = vld [vmem:[%s17463_s22 + $0x2c30] sm:$0xff]  ;;  %v1683_v32 = vld [vmem:[%s17463_s22 + $0x2bd8] sm:$0xff] }
 0x78d   : > { %v1695_v0 = vld [vmem:[%s17463_s22 + $0x2c38] sm:$0xff]  ;;  %v16256_v10 = vcombine.high %v1682_v31, %v1694_v6  ;;  %v16255_v42 = vcombine.low %v1682_v31, %v1694_v6 }
 0x78e   : > { %v16258_v36 = vcombine.high %v1683_v32, %v1695_v0  ;;  %v16257_v43 = vcombine.low %v1683_v32, %v1695_v0  ;;  %v1863_v31 = vld [vmem:[%s17463_s22 + $0x3178] sm:$0xff]  ;;  %v16401_v32 = vcombine.low %v1827_v21, %v1839_v59 }
 0x78f   : > { %14065 = vmatpush1.bf16.msra.mxu0 %v16111_v37  ;;  %14270 = vmatpush1.bf16.msra.mxu1 %v16113_v38  ;;  %v1706_v37 = vld [vmem:[%s17463_s22 + $0x2c90] sm:$0xff] }
 0x790   : > { %14066 = vmatprep.subr.bf16.mxu0 %v16136_v40  ;;  %14271 = vmatprep.subr.bf16.mxu1 %v16138_v41  ;;  %v1718_v38 = vld [vmem:[%s17463_s22 + $0x2cf0] sm:$0xff]  ;;  %v1707_v40 = vld [vmem:[%s17463_s22 + $0x2c98] sm:$0xff] }
 0x791   : > { %v13721_v24 = vpop.f32.mrb[16].mxu0  ;;  %v13926_v56 = vpop.f32.mrb[16].mxu1  ;;  %v1719_v41 = vld [vmem:[%s17463_s22 + $0x2cf8] sm:$0xff]  ;;  %v16280_v44 = vcombine.high %v1706_v37, %v1718_v38 }
 0x792   : > { %v13723_v57 = vpop.f32.mrb[17].mxu0  ;;  %v13928_v33 = vpop.f32.mrb[17].mxu1  ;;  %v16282_v46 = vcombine.high %v1707_v40, %v1719_v41  ;;  %v16281_v53 = vcombine.low %v1707_v40, %v1719_v41 }
 0x793   : > { %v14435_v61 = vcombine.low %v13721_v24, %v13723_v57  ;;  %v13725_v62 = vpop.f32.mrb[18].mxu0  ;;  %14067 = vmatpush1.bf16.msra.mxu0 %v16135_v47  ;;  %v14436_v1 = vcombine.low %v13926_v56, %v13928_v33  ;;  %v13930_v2 = vpop.f32.mrb[18].mxu1  ;;  %14272 = vmatpush1.bf16.msra.mxu1 %v16137_v50  ;;  %v1730_v47 = vld [vmem:[%s17463_s22 + $0x2d50] sm:$0xff]  ;;  %v1743_v24 = vld [vmem:[%s17463_s22 + $0x2db8] sm:$0xff] }
 0x794   : > { %v13726_v3 = vpop.f32.mrb[19].mxu0  ;;  %14068 = vmatprep.subr.bf16.mxu0 %v16160_v51  ;;  %v13931_v39 = vpop.f32.mrb[19].mxu1  ;;  %14273 = vmatprep.subr.bf16.mxu1 %v16162_v52  ;;  %v1742_v50 = vld [vmem:[%s17463_s22 + $0x2db0] sm:$0xff]  ;;  %v1731_v51 = vld [vmem:[%s17463_s22 + $0x2d58] sm:$0xff]  ;;  %v16279_v52 = vcombine.low %v1706_v37, %v1718_v38 }
 0x795   : > { %v14443_v30 = vrot.slane %v14435_v61, %v18112_v11  ;;  %v14450_v12 = vrot.slane %v14436_v1, %v18112_v11  ;;  %v16304_v55 = vcombine.high %v1730_v47, %v1742_v50  ;;  %v16306_v56 = vcombine.high %v1731_v51, %v1743_v24  ;;  %v1754_v57 = vld [vmem:[%s17463_s22 + $0x2e10] sm:$0xff]  ;;  %v1767_v61 = vld [vmem:[%s17463_s22 + $0x2e78] sm:$0xff] }
 0x796   : > { %v16303_v33 = vcombine.low %v1730_v47, %v1742_v50  ;;  %v16305_v62 = vcombine.low %v1731_v51, %v1743_v24  ;;  %v16330_v1 = vcombine.high %v1755_v54, %v1767_v61  ;;  %v1778_v2 = vld [vmem:[%s17463_s22 + $0x2ed0] sm:$0xff]  ;;  %v16329_v39 = vcombine.low %v1755_v54, %v1767_v61  ;;  %v1887_v37 = vld [vmem:[%s17463_s22 + $0x3238] sm:$0xff] }
 0x797   : > { %14069 = vmatpush1.bf16.msra.mxu0 %v16159_v63  ;;  %v14451_v49 = vcombine.low %v14443_v30, %v14450_v12  ;;  %14274 = vmatpush1.bf16.msra.mxu1 %v16161_v4  ;;  %v16328_v63 = vcombine.high %v1754_v57, %v1766_v58  ;;  %v1790_v3 = vld [vmem:[%s17463_s22 + $0x2f30] sm:$0xff]  ;;  %v1779_v4 = vld [vmem:[%s17463_s22 + $0x2ed8] sm:$0xff]  ;;  %v16327_v30 = vcombine.low %v1754_v57, %v1766_v58 }
 0x798   : > { %14070 = vmatprep.subr.bf16.mxu0 %v16184_v5  ;;  %14275 = vmatprep.subr.bf16.mxu1 %v16186_v7  ;;  %v1791_v5 = vld [vmem:[%s17463_s22 + $0x2f38] sm:$0xff]  ;;  %v16352_v7 = vcombine.high %v1778_v2, %v1790_v3  ;;  %v1814_v12 = vld [vmem:[%s17463_s22 + $0x2ff0] sm:$0xff] }
 0x799   : > { %v14479_v22 = vadd.f32 %v14451_v49, %v276_v15  ;;  %v16354_v8 = vcombine.high %v1779_v4, %v1791_v5  ;;  %v16351_v15 = vcombine.low %v1778_v2, %v1790_v3  ;;  %v16376_v49 = vcombine.high %v1802_v9, %v1814_v12  ;;  %v1911_v47 = vld [vmem:[%s17463_s22 + $0x32f8] sm:$0xff]  ;;  %v1946_v61 = vld [vmem:[%s17463_s22 + $0x3410] sm:$0xff] }
 0x79b   : > { %14071 = vmatpush1.bf16.msra.mxu0 %v16183_v16  ;;  %14485 = vst [vmem:[#allocation2 + $0x20] sm:$0xff] %v14479_v22  ;;  %14276 = vmatpush1.bf16.msra.mxu1 %v16185_v17  ;;  %v16353_v16 = vcombine.low %v1779_v4, %v1791_v5  ;;  %v16378_v17 = vcombine.high %v1803_v13, %v1815_v14  ;;  %v1970_v5 = vld [vmem:[%s17463_s22 + $0x34d0] sm:$0xff] }
 0x79c   : > { %14072 = vmatprep.subr.bf16.mxu0 %v16208_v18  ;;  %14277 = vmatprep.subr.bf16.mxu1 %v16210_v20  ;;  %v1826_v18 = vld [vmem:[%s17463_s22 + $0x3050] sm:$0xff]  ;;  %v16375_v22 = vcombine.low %v1802_v9, %v1814_v12 }
 0x79d   : > { %v1838_v20 = vld [vmem:[%s17463_s22 + $0x30b0] sm:$0xff] }
 0x79e   : > { %v16400_v25 = vcombine.high %v1826_v18, %v1838_v20  ;;  %v16399_v6 = vcombine.low %v1826_v18, %v1838_v20  ;;  %v1994_v14 = vld [vmem:[%s17463_s22 + $0x3590] sm:$0xff] }
 0x79f   : > { %14073 = vmatpush1.bf16.msra.mxu0 %v16207_v26  ;;  %14278 = vmatpush1.bf16.msra.mxu1 %v16209_v27  ;;  %v16402_v26 = vcombine.high %v1827_v21, %v1839_v59  ;;  %v1850_v27 = vld [vmem:[%s17463_s22 + $0x3110] sm:$0xff] }
 0x7a0   : > { %14074 = vmatprep.subr.bf16.mxu0 %v16232_v28  ;;  %14279 = vmatprep.subr.bf16.mxu1 %v16234_v60  ;;  %v1862_v28 = vld [vmem:[%s17463_s22 + $0x3170] sm:$0xff]  ;;  %v1851_v60 = vld [vmem:[%s17463_s22 + $0x3118] sm:$0xff] }
 0x7a1   : > { %v16424_v0 = vcombine.high %v1850_v27, %v1862_v28  ;;  %v16423_v38 = vcombine.low %v1850_v27, %v1862_v28  ;;  %v16425_v40 = vcombine.low %v1851_v60, %v1863_v31  ;;  %v2018_v59 = vld [vmem:[%s17463_s22 + $0x3650] sm:$0xff] }
 0x7a3   : > { %14075 = vmatpush1.bf16.msra.mxu0 %v16231_v34  ;;  %14280 = vmatpush1.bf16.msra.mxu1 %v16233_v35  ;;  %v16426_v34 = vcombine.high %v1851_v60, %v1863_v31  ;;  %v1874_v35 = vld [vmem:[%s17463_s22 + $0x31d0] sm:$0xff] }
 0x7a4   : > { %14076 = vmatprep.subr.bf16.mxu0 %v16256_v10  ;;  %14281 = vmatprep.subr.bf16.mxu1 %v16258_v36  ;;  %v1886_v10 = vld [vmem:[%s17463_s22 + $0x3230] sm:$0xff]  ;;  %v1875_v36 = vld [vmem:[%s17463_s22 + $0x31d8] sm:$0xff] }
 0x7a5   : > { %v16448_v41 = vcombine.high %v1874_v35, %v1886_v10  ;;  %v16449_v50 = vcombine.low %v1875_v36, %v1887_v37  ;;  %v2042_v31 = vld [vmem:[%s17463_s22 + $0x3710] sm:$0xff] }
 0x7a7   : > { %14077 = vmatpush1.bf16.msra.mxu0 %v16255_v42  ;;  %14282 = vmatpush1.bf16.msra.mxu1 %v16257_v43  ;;  %v16450_v42 = vcombine.high %v1875_v36, %v1887_v37  ;;  %v1898_v43 = vld [vmem:[%s17463_s22 + $0x3290] sm:$0xff] }
 0x7a8   : > { %14078 = vmatprep.subr.bf16.mxu0 %v16280_v44  ;;  %14283 = vmatprep.subr.bf16.mxu1 %v16282_v46  ;;  %v1910_v44 = vld [vmem:[%s17463_s22 + $0x32f0] sm:$0xff]  ;;  %v1899_v46 = vld [vmem:[%s17463_s22 + $0x3298] sm:$0xff] }
 0x7a9   : > { %v16472_v51 = vcombine.high %v1898_v43, %v1910_v44  ;;  %v16474_v24 = vcombine.high %v1899_v46, %v1911_v47  ;;  %v16471_v57 = vcombine.low %v1898_v43, %v1910_v44  ;;  %v2066_v37 = vld [vmem:[%s17463_s22 + $0x37d0] sm:$0xff] }
 0x7ab   : > { %14079 = vmatpush1.bf16.msra.mxu0 %v16279_v52  ;;  %14284 = vmatpush1.bf16.msra.mxu1 %v16281_v53  ;;  %v1922_v52 = vld [vmem:[%s17463_s22 + $0x3350] sm:$0xff] }
 0x7ac   : > { %14080 = vmatprep.subr.bf16.mxu0 %v16304_v55  ;;  %14285 = vmatprep.subr.bf16.mxu1 %v16306_v56  ;;  %v1934_v53 = vld [vmem:[%s17463_s22 + $0x33b0] sm:$0xff]  ;;  %v1923_v55 = vld [vmem:[%s17463_s22 + $0x3358] sm:$0xff] }
 0x7ad   : > { %v1935_v56 = vld [vmem:[%s17463_s22 + $0x33b8] sm:$0xff]  ;;  %v16496_v58 = vcombine.high %v1922_v52, %v1934_v53 }
 0x7ae   : > { %v16498_v54 = vcombine.high %v1923_v55, %v1935_v56  ;;  %v16497_v2 = vcombine.low %v1923_v55, %v1935_v56  ;;  %v2114_v56 = vld [vmem:[%s17463_s22 + $0x3950] sm:$0xff] }
 0x7af   : > { %14081 = vmatpush1.bf16.msra.mxu0 %v16303_v33  ;;  %14286 = vmatpush1.bf16.msra.mxu1 %v16305_v62  ;;  %v1958_v33 = vld [vmem:[%s17463_s22 + $0x3470] sm:$0xff]  ;;  %v1947_v62 = vld [vmem:[%s17463_s22 + $0x3418] sm:$0xff] }
 0x7b0   : > { %14082 = vmatprep.subr.bf16.mxu0 %v16328_v63  ;;  %14287 = vmatprep.subr.bf16.mxu1 %v16330_v1  ;;  %v1959_v63 = vld [vmem:[%s17463_s22 + $0x3478] sm:$0xff]  ;;  %v16495_v1 = vcombine.low %v1922_v52, %v1934_v53  ;;  %v16520_v3 = vcombine.high %v1946_v61, %v1958_v33 }
 0x7b1   : > { %v16522_v4 = vcombine.high %v1947_v62, %v1959_v63  ;;  %v16521_v9 = vcombine.low %v1947_v62, %v1959_v63  ;;  %v2138_v63 = vld [vmem:[%s17463_s22 + $0x3a10] sm:$0xff] }
 0x7b3   : > { %14083 = vmatpush1.bf16.msra.mxu0 %v16327_v30  ;;  %14288 = vmatpush1.bf16.msra.mxu1 %v16329_v39  ;;  %v1982_v30 = vld [vmem:[%s17463_s22 + $0x3530] sm:$0xff]  ;;  %v1971_v39 = vld [vmem:[%s17463_s22 + $0x34d8] sm:$0xff] }
 0x7b4   : > { %14084 = vmatprep.subr.bf16.mxu0 %v16352_v7  ;;  %14289 = vmatprep.subr.bf16.mxu1 %v16354_v8  ;;  %v1983_v7 = vld [vmem:[%s17463_s22 + $0x3538] sm:$0xff]  ;;  %v16519_v8 = vcombine.low %v1946_v61, %v1958_v33  ;;  %v16544_v12 = vcombine.high %v1970_v5, %v1982_v30 }
 0x7b5   : > { %v16546_v13 = vcombine.high %v1971_v39, %v1983_v7  ;;  %v16545_v18 = vcombine.low %v1971_v39, %v1983_v7  ;;  %v2162_v7 = vld [vmem:[%s17463_s22 + $0x3ad0] sm:$0xff] }
 0x7b7   : > { %14085 = vmatpush1.bf16.msra.mxu0 %v16351_v15  ;;  %14290 = vmatpush1.bf16.msra.mxu1 %v16353_v16  ;;  %v2006_v15 = vld [vmem:[%s17463_s22 + $0x35f0] sm:$0xff]  ;;  %v1995_v16 = vld [vmem:[%s17463_s22 + $0x3598] sm:$0xff] }
 0x7b8   : > { %14086 = vmatprep.subr.bf16.mxu0 %v16376_v49  ;;  %14291 = vmatprep.subr.bf16.mxu1 %v16378_v17  ;;  %v2007_v49 = vld [vmem:[%s17463_s22 + $0x35f8] sm:$0xff]  ;;  %v16543_v17 = vcombine.low %v1970_v5, %v1982_v30  ;;  %v16568_v20 = vcombine.high %v1994_v14, %v2006_v15 }
 0x7b9   : > { %v16570_v21 = vcombine.high %v1995_v16, %v2007_v49  ;;  %v16569_v27 = vcombine.low %v1995_v16, %v2007_v49  ;;  %v2186_v49 = vld [vmem:[%s17463_s22 + $0x3b90] sm:$0xff] }
 0x7bb   : > { %14087 = vmatpush1.bf16.msra.mxu0 %v16375_v22  ;;  %14292 = vmatpush1.bf16.msra.mxu1 %v16377_v23  ;;  %v2030_v22 = vld [vmem:[%s17463_s22 + $0x36b0] sm:$0xff]  ;;  %v2019_v23 = vld [vmem:[%s17463_s22 + $0x3658] sm:$0xff] }
 0x7bc   : > { %14097 = vmatprep.subr.bf16.mxu0 %v16400_v25  ;;  %14302 = vmatprep.subr.bf16.mxu1 %v16402_v26  ;;  %v2031_v25 = vld [vmem:[%s17463_s22 + $0x36b8] sm:$0xff]  ;;  %v16567_v26 = vcombine.low %v1994_v14, %v2006_v15  ;;  %v16592_v28 = vcombine.high %v2018_v59, %v2030_v22 }
 0x7bd   : > { %v16594_v60 = vcombine.high %v2019_v23, %v2031_v25 }
 0x7be   : > { %14089 = vmatmul.mubr.bf16.vlgmr.msra.gmra.mrb[20].mxu0 %v17804_v19  ;;  %14294 = vmatmul.mubr.bf16.vlgmr.msra.gmra.mrb[20].mxu1 %v17804_v19  ;;  %v16447_v19 = vcombine.low %v1874_v35, %v1886_v10  ;;  %v16593_v35 = vcombine.low %v2019_v23, %v2031_v25 }
 0x7bf   : > { %14098 = vmatpush1.bf16.msra.mxu0 %v16399_v6  ;;  %14303 = vmatpush1.bf16.msra.mxu1 %v16401_v32  ;;  %v2054_v6 = vld [vmem:[%s17463_s22 + $0x3770] sm:$0xff]  ;;  %v2043_v32 = vld [vmem:[%s17463_s22 + $0x3718] sm:$0xff] }
 0x7c0   : > { %14099 = vmatprep.subr.bf16.mxu0 %v16424_v0  ;;  %14304 = vmatprep.subr.bf16.mxu1 %v16426_v34  ;;  %v2055_v0 = vld [vmem:[%s17463_s22 + $0x3778] sm:$0xff]  ;;  %v16591_v34 = vcombine.low %v2018_v59, %v2030_v22  ;;  %v16616_v10 = vcombine.high %v2042_v31, %v2054_v6 }
 0x7c1   : > { %14129 = vmatprep.mubr.bf16.mxu0 %v17811_v29  ;;  %14334 = vmatprep.mubr.bf16.mxu1 %v17811_v29  ;;  %v16473_v29 = vcombine.low %v1899_v46, %v1911_v47  ;;  %v16618_v36 = vcombine.high %v2043_v32, %v2055_v0  ;;  %v16617_v43 = vcombine.low %v2043_v32, %v2055_v0  ;;  %v2090_v47 = vld [vmem:[%s17463_s22 + $0x3890] sm:$0xff] }
 0x7c3   : > { %14100 = vmatpush1.bf16.msra.mxu0 %v16423_v38  ;;  %14305 = vmatpush1.bf16.msra.mxu1 %v16425_v40  ;;  %v2078_v38 = vld [vmem:[%s17463_s22 + $0x3830] sm:$0xff]  ;;  %v2067_v40 = vld [vmem:[%s17463_s22 + $0x37d8] sm:$0xff] }
 0x7c4   : > { %14101 = vmatprep.subr.bf16.mxu0 %v16448_v41  ;;  %14306 = vmatprep.subr.bf16.mxu1 %v16450_v42  ;;  %v2079_v41 = vld [vmem:[%s17463_s22 + $0x3838] sm:$0xff]  ;;  %v16615_v42 = vcombine.low %v2042_v31, %v2054_v6  ;;  %v16640_v44 = vcombine.high %v2066_v37, %v2078_v38 }
 0x7c5   : > { %v16642_v46 = vcombine.high %v2067_v40, %v2079_v41  ;;  %v16641_v52 = vcombine.low %v2067_v40, %v2079_v41 }
 0x7c7   : > { %14102 = vmatpush1.bf16.msra.mxu0 %v16447_v19  ;;  %14307 = vmatpush1.bf16.msra.mxu1 %v16449_v50  ;;  %v2102_v19 = vld [vmem:[%s17463_s22 + $0x38f0] sm:$0xff]  ;;  %v2091_v50 = vld [vmem:[%s17463_s22 + $0x3898] sm:$0xff] }
 0x7c8   : > { %14103 = vmatprep.subr.bf16.mxu0 %v16472_v51  ;;  %14308 = vmatprep.subr.bf16.mxu1 %v16474_v24  ;;  %v2103_v51 = vld [vmem:[%s17463_s22 + $0x38f8] sm:$0xff]  ;;  %v16639_v24 = vcombine.low %v2066_v37, %v2078_v38  ;;  %v16664_v53 = vcombine.high %v2090_v47, %v2102_v19  ;;  %v277_v38 = vld [vmem:[#allocation2 + $0x28] sm:$0xff] }
 0x7c9   : > { %v16666_v55 = vcombine.high %v2091_v50, %v2103_v51  ;;  %v16665_v61 = vcombine.low %v2091_v50, %v2103_v51  ;;  %v19604_v50 = vsub.s32 (!%p16763_p9), 6, %v17496_v45  ;;  %v19607_v51 = vsub.s32 (!%p16763_p9), 7, %v17496_v45 }
 0x7cb   : > { %14104 = vmatpush1.bf16.msra.mxu0 %v16471_v57  ;;  %14309 = vmatpush1.bf16.msra.mxu1 %v16473_v29  ;;  %v2126_v57 = vld [vmem:[%s17463_s22 + $0x39b0] sm:$0xff]  ;;  %v2115_v29 = vld [vmem:[%s17463_s22 + $0x3958] sm:$0xff] }
 0x7cc   : > { %14105 = vmatprep.subr.bf16.mxu0 %v16496_v58  ;;  %14310 = vmatprep.subr.bf16.mxu1 %v16498_v54  ;;  %v2127_v58 = vld [vmem:[%s17463_s22 + $0x39b8] sm:$0xff]  ;;  %v16663_v54 = vcombine.low %v2090_v47, %v2102_v19  ;;  %v16688_v33 = vcombine.high %v2114_v56, %v2126_v57  ;;  %v19598_v47 = vsub.s32 (!%p16763_p9), 4, %v17496_v45  ;;  %v19601_v19 = vsub.s32 (!%p16763_p9), 5, %v17496_v45 }
 0x7cd   : > { %v16690_v62 = vcombine.high %v2115_v29, %v2127_v58  ;;  %v16689_v5 = vcombine.low %v2115_v29, %v2127_v58 }
 0x7cf   : > { %14106 = vmatpush1.bf16.msra.mxu0 %v16495_v1  ;;  %14311 = vmatpush1.bf16.msra.mxu1 %v16497_v2  ;;  %v2150_v1 = vld [vmem:[%s17463_s22 + $0x3a70] sm:$0xff]  ;;  %v2139_v2 = vld [vmem:[%s17463_s22 + $0x3a18] sm:$0xff] }
 0x7d0   : > { %14107 = vmatprep.subr.bf16.mxu0 %v16520_v3  ;;  %14312 = vmatprep.subr.bf16.mxu1 %v16522_v4  ;;  %v2151_v3 = vld [vmem:[%s17463_s22 + $0x3a78] sm:$0xff]  ;;  %v16687_v4 = vcombine.low %v2114_v56, %v2126_v57  ;;  %v16712_v30 = vcombine.high %v2138_v63, %v2150_v1  ;;  %v14498_v56 = vld [vmem:[#allocation8 + $0x8] sm:$0xff] (!%p16763_p9) }
 0x7d1   : > { %v16714_v39 = vcombine.high %v2139_v2, %v2151_v3  ;;  %v16713_v14 = vcombine.low %v2139_v2, %v2151_v3 }
 0x7d3   : > { %14108 = vmatpush1.bf16.msra.mxu0 %v16519_v8  ;;  %14313 = vmatpush1.bf16.msra.mxu1 %v16521_v9  ;;  %v2174_v8 = vld [vmem:[%s17463_s22 + $0x3b30] sm:$0xff]  ;;  %v2163_v9 = vld [vmem:[%s17463_s22 + $0x3ad8] sm:$0xff] }
 0x7d4   : > { %14109 = vmatprep.subr.bf16.mxu0 %v16544_v12  ;;  %14314 = vmatprep.subr.bf16.mxu1 %v16546_v13  ;;  %v2175_v12 = vld [vmem:[%s17463_s22 + $0x3b38] sm:$0xff]  ;;  %v16711_v13 = vcombine.low %v2138_v63, %v2150_v1  ;;  %v16736_v15 = vcombine.high %v2162_v7, %v2174_v8 }
 0x7d5   : > { %v16738_v16 = vcombine.high %v2163_v9, %v2175_v12  ;;  %v16737_v59 = vcombine.low %v2163_v9, %v2175_v12 }
 0x7d7   : > { %14110 = vmatpush1.bf16.msra.mxu0 %v16543_v17  ;;  %14315 = vmatpush1.bf16.msra.mxu1 %v16545_v18  ;;  %v2198_v17 = vld [vmem:[%s17463_s22 + $0x3bf0] sm:$0xff]  ;;  %v2187_v18 = vld [vmem:[%s17463_s22 + $0x3b98] sm:$0xff] }
 0x7d8   : > { %14111 = vmatprep.subr.bf16.mxu0 %v16568_v20  ;;  %14316 = vmatprep.subr.bf16.mxu1 %v16570_v21  ;;  %v2199_v20 = vld [vmem:[%s17463_s22 + $0x3bf8] sm:$0xff]  ;;  %v16735_v21 = vcombine.low %v2162_v7, %v2174_v8  ;;  %v16760_v22 = vcombine.high %v2186_v49, %v2198_v17  ;;  %v16759_v25 = vcombine.low %v2186_v49, %v2198_v17  ;;  %v14499_v7 = vld [vmem:[#allocation8 + $0x10] sm:$0xff] (!%p16763_p9) }
 0x7d9   : > { %v16762_v23 = vcombine.high %v2187_v18, %v2199_v20  ;;  %v14491_v8 = vld [vmem:[#allocation2] sm:$0xff] (!%p16763_p9)  ;;  %v14562_v17 = vrot.slane (!%p16763_p9), %v14498_v56, %v19604_v50 }
 0x7db   : > { %14112 = vmatpush1.bf16.msra.mxu0 %v16567_v26  ;;  %14317 = vmatpush1.bf16.msra.mxu1 %v16569_v27  ;;  %v16761_v26 = vcombine.low %v2187_v18, %v2199_v20  ;;  %v14566_v18 = vrot.slane (!%p16763_p9), %v14498_v56, %v19607_v51 }
 0x7dc   : > { %14113 = vmatprep.subr.bf16.mxu0 %v16592_v28  ;;  %14318 = vmatprep.subr.bf16.mxu1 %v16594_v60 }
 0x7df   : > { %14114 = vmatpush1.bf16.msra.mxu0 %v16591_v34  ;;  %14319 = vmatpush1.bf16.msra.mxu1 %v16593_v35 }
 0x7e0   : > { %14115 = vmatprep.subr.bf16.mxu0 %v16616_v10  ;;  %14320 = vmatprep.subr.bf16.mxu1 %v16618_v36 }
 0x7e3   : > { %14116 = vmatpush1.bf16.msra.mxu0 %v16615_v42  ;;  %14321 = vmatpush1.bf16.msra.mxu1 %v16617_v43  ;;  %v14505_v42 = vsub.s32 (!%p16763_p9), 0, %v17496_v45  ;;  %v14509_v43 = vsub.s32 (!%p16763_p9), 1, %v17496_v45 }
 0x7e4   : > { %14117 = vmatprep.subr.bf16.mxu0 %v16640_v44  ;;  %14322 = vmatprep.subr.bf16.mxu1 %v16642_v46  ;;  %v14513_v44 = vsub.s32 (!%p16763_p9), 2, %v17496_v45  ;;  %v14517_v46 = vsub.s32 (!%p16763_p9), 3, %v17496_v45 }
 0x7e5   : > { %v14542_v63 = vrot.slane (!%p16763_p9), %v14498_v56, %v14509_v43 }
 0x7e6   : > { %v14546_v2 = vrot.slane (!%p16763_p9), %v14498_v56, %v14513_v44  ;;  %v14550_v3 = vrot.slane (!%p16763_p9), %v14498_v56, %v14517_v46 }
 0x7e7   : > { %14118 = vmatpush1.bf16.msra.mxu0 %v16639_v24  ;;  %14323 = vmatpush1.bf16.msra.mxu1 %v16641_v52 }
 0x7e8   : > { %14119 = vmatprep.subr.bf16.mxu0 %v16664_v53  ;;  %14324 = vmatprep.subr.bf16.mxu1 %v16666_v55 }
 0x7eb   : > { %14120 = vmatpush1.bf16.msra.mxu0 %v16663_v54  ;;  %14325 = vmatpush1.bf16.msra.mxu1 %v16665_v61 }
 0x7ec   : > { %14121 = vmatprep.subr.bf16.mxu0 %v16688_v33  ;;  %14326 = vmatprep.subr.bf16.mxu1 %v16690_v62  ;;  %v14538_v62 = vrot.slane (!%p16763_p9), %v14498_v56, %v14505_v42 }
 0x7ef   : > { %14122 = vmatpush1.bf16.msra.mxu0 %v16687_v4  ;;  %14327 = vmatpush1.bf16.msra.mxu1 %v16689_v5 }
 0x7f0   : > { %14123 = vmatprep.subr.bf16.mxu0 %v16712_v30  ;;  %14328 = vmatprep.subr.bf16.mxu1 %v16714_v39  ;;  %v14633_v30 = vcombine.low (!%p16763_p9), %v14538_v62, %v14542_v63  ;;  %v14554_v39 = vrot.slane (!%p16763_p9), %v14498_v56, %v19598_v47 }
 0x7f2   : > { %v14641_v49 = vrot.slane (!%p16763_p9), %v14633_v30, %v18112_v11 }
 0x7f3   : > { %14124 = vmatpush1.bf16.msra.mxu0 %v16711_v13  ;;  %14329 = vmatpush1.bf16.msra.mxu1 %v16713_v14  ;;  %v14634_v13 = vcombine.low (!%p16763_p9), %v14546_v2, %v14550_v3  ;;  %v14558_v14 = vrot.slane (!%p16763_p9), %v14498_v56, %v19601_v19 }
 0x7f4   : > { %14125 = vmatprep.subr.bf16.mxu0 %v16736_v15  ;;  %14330 = vmatprep.subr.bf16.mxu1 %v16738_v16  ;;  %v14492_v16 = vld [vmem:[#allocation2 + $0x8] sm:$0xff] (!%p16763_p9) }
 0x7f7   : > { %14126 = vmatpush1.bf16.msra.mxu0 %v16735_v21  ;;  %14331 = vmatpush1.bf16.msra.mxu1 %v16737_v59  ;;  %v14648_v21 = vrot.slane (!%p16763_p9), %v14634_v13, %v18112_v11  ;;  %v14650_v59 = vcombine.low (!%p16763_p9), %v14554_v39, %v14558_v14 }
 0x7f8   : > { %14127 = vmatprep.subr.bf16.mxu0 %v16760_v22  ;;  %14332 = vmatprep.subr.bf16.mxu1 %v16762_v23  ;;  %v14570_v22 = vrot.slane (!%p16763_p9), %v14499_v7, %v14505_v42 }
 0x7fb   : > { %14128 = vmatpush1.bf16.msra.mxu0 %v16759_v25  ;;  %14333 = vmatpush1.bf16.msra.mxu1 %v16761_v26  ;;  %v14493_v25 = vld [vmem:[#allocation2 + $0x10] sm:$0xff] (!%p16763_p9)  ;;  %v14651_v26 = vcombine.low (!%p16763_p9), %v14562_v17, %v14566_v18 }
 0x7fe   : > { %14130 = vmatmul.mubr.bf16.vlgmr.msra.gmra.mrb[20].mxu0 %v17879_v48  ;;  %14335 = vmatmul.mubr.bf16.vlgmr.msra.gmra.mrb[20].mxu1 %v17879_v48  ;;  %v14497_v48 = vld [vmem:[#allocation8] sm:$0xff] (!%p16763_p9) }
 0x7ff   : > { %v14506_v24 = vrot.slane (!%p16763_p9), %v14497_v48, %v14505_v42  ;;  %v14510_v52 = vrot.slane (!%p16763_p9), %v14497_v48, %v14509_v43  ;;  %v14514_v53 = vrot.slane (!%p16763_p9), %v14497_v48, %v14513_v44  ;;  %v14518_v55 = vrot.slane (!%p16763_p9), %v14497_v48, %v14517_v46 }
 0x800   : > { %v14522_v57 = vrot.slane (!%p16763_p9), %v14497_v48, %v19598_v47  ;;  %v14526_v29 = vrot.slane (!%p16763_p9), %v14497_v48, %v19601_v19  ;;  %v14530_v58 = vrot.slane (!%p16763_p9), %v14497_v48, %v19604_v50  ;;  %v14534_v54 = vrot.slane (!%p16763_p9), %v14497_v48, %v19607_v51 }
 0x801   : > { %v14599_v61 = vcombine.low (!%p16763_p9), %v14506_v24, %v14510_v52  ;;  %v14600_v33 = vcombine.low (!%p16763_p9), %v14514_v53, %v14518_v55  ;;  %v14594_v48 = vrot.slane (!%p16763_p9), %v14499_v7, %v19604_v50  ;;  %v14598_v42 = vrot.slane (!%p16763_p9), %v14499_v7, %v19607_v51  ;;  %v14495_v24 = vld [vmem:[#allocation2 + $0x20] sm:$0xff] (!%p16763_p9) }
 0x802   : > { %v14616_v1 = vcombine.low (!%p16763_p9), %v14522_v57, %v14526_v29  ;;  %v14617_v45 = vcombine.low (!%p16763_p9), %v14530_v58, %v14534_v54 }
 0x803   : > { %v14607_v4 = vrot.slane (!%p16763_p9), %v14599_v61, %v18112_v11  ;;  %v14614_v5 = vrot.slane (!%p16763_p9), %v14600_v33, %v18112_v11 }
 0x804   : > { %v14624_v9 = vrot.slane (!%p16763_p9), %v14616_v1, %v18112_v11  ;;  %v14631_v12 = vrot.slane (!%p16763_p9), %v14617_v45, %v18112_v11 }
 0x805   : > { %v14615_v15 = vcombine.low (!%p16763_p9), %v14607_v4, %v14614_v5 }
 0x806   : > { %v14632_v20 = vcombine.low (!%p16763_p9), %v14624_v9, %v14631_v12 }
 0x807   : > { %v14707_v23 = vadd.f32 (!%p16763_p9), %v14615_v15, %v14491_v8 }
 0x809   : > { %17051 = vtanh.f32 (!%p16763_p9), %v14707_v23 }
 0x813   : > { %v17052_v50 = vpop.eup (!%p16763_p9), %17051 }
 0x814   : > { %14719 = vst [vmem:[#allocation9] sm:$0xff] (!%p16763_p9), %v17052_v50 }
 0x8d1   : > { %v14131_v27 = vpop.f32.mrb[20].mxu0  ;;  %v14336_v28 = vpop.f32.mrb[20].mxu1 }
 0x8d2   : > { %v14133_v60 = vpop.f32.mrb[21].mxu0  ;;  %v14338_v6 = vpop.f32.mrb[21].mxu1 }
 0x8d3   : > { %v14452_v31 = vcombine.low %v14131_v27, %v14133_v60  ;;  %v14135_v32 = vpop.f32.mrb[22].mxu0  ;;  %v14453_v0 = vcombine.low %v14336_v28, %v14338_v6  ;;  %v14340_v34 = vpop.f32.mrb[22].mxu1  ;;  %v14574_v27 = vrot.slane (!%p16763_p9), %v14499_v7, %v14509_v43  ;;  %v14578_v28 = vrot.slane (!%p16763_p9), %v14499_v7, %v14513_v44 }
 0x8d4   : > { %v14136_v35 = vpop.f32.mrb[23].mxu0  ;;  %v14341_v36 = vpop.f32.mrb[23].mxu1  ;;  %v14708_v60 = vadd.f32 (!%p16763_p9), %v14632_v20, %v14492_v16  ;;  %v14658_v6 = vrot.slane (!%p16763_p9), %v14650_v59, %v18112_v11  ;;  %v14582_v32 = vrot.slane (!%p16763_p9), %v14499_v7, %v14517_v46 }
 0x8d5   : > { %v14460_v10 = vrot.slane %v14452_v31, %v18112_v11  ;;  %v14467_v37 = vrot.slane %v14453_v0, %v18112_v11  ;;  %14490 = sbr.rel (%p16763_p9) target bundleno = 2289 (0x8f1), region = 52  ;;  %v14649_v31 = vcombine.low (!%p16763_p9), %v14641_v49, %v14648_v21  ;;  %v14665_v0 = vrot.slane (!%p16763_p9), %v14651_v26, %v18112_v11  ;;  %v14494_v36 = vld [vmem:[#allocation2 + $0x18] sm:$0xff] (!%p16763_p9) }
 0x8d6   : > { %v14667_v34 = vcombine.low (!%p16763_p9), %v14570_v22, %v14574_v27  ;;  %v14586_v35 = vrot.slane (!%p16763_p9), %v14499_v7, %v19598_v47  ;;  %17053 = vtanh.f32 (!%p16763_p9), %v14708_v60  ;;  %v14685_v47 = vcombine.low (!%p16763_p9), %v14594_v48, %v14598_v42 }
 0x8d7   : > { %v14468_v40 = vcombine.low %v14460_v10, %v14467_v37  ;;  %v14709_v10 = vadd.f32 (!%p16763_p9), %v14649_v31, %v14493_v25  ;;  %v14668_v37 = vcombine.low (!%p16763_p9), %v14578_v28, %v14582_v32 }
 0x8d9   : > { %v14480_v41 = vadd.f32 %v14468_v40, %v277_v38  ;;  %v14590_v38 = vrot.slane (!%p16763_p9), %v14499_v7, %v19601_v19  ;;  %v14666_v40 = vcombine.low (!%p16763_p9), %v14658_v6, %v14665_v0  ;;  %17055 = vtanh.f32 (!%p16763_p9), %v14709_v10 }
 0x8da   : > { %v14682_v43 = vrot.slane (!%p16763_p9), %v14668_v37, %v18112_v11  ;;  %v14699_v19 = vrot.slane (!%p16763_p9), %v14685_v47, %v18112_v11 }
 0x8db   : > { %14486 = vst [vmem:[#allocation2 + $0x28] sm:$0xff] %v14480_v41  ;;  %v14675_v41 = vrot.slane (!%p16763_p9), %v14667_v34, %v18112_v11  ;;  %v14684_v44 = vcombine.low (!%p16763_p9), %v14586_v35, %v14590_v38  ;;  %v14710_v46 = vadd.f32 (!%p16763_p9), %v14666_v40, %v14494_v36 }
 0x8dd   : > { %v14683_v52 = vcombine.low %v14675_v41, %v14682_v43  ;;  %v14692_v53 = vrot.slane %v14684_v44, %v18112_v11  ;;  %17057 = vtanh.f32 %v14710_v46 }
 0x8df   : > { %v14711_v55 = vadd.f32 %v14683_v52, %v14495_v24  ;;  %v14700_v57 = vcombine.low %v14692_v53, %v14699_v19 }
 0x8e0   : > { %v17054_v51 = vpop.eup %17053 }
 0x8e1   : > { %17059 = vtanh.f32 %v14711_v55  ;;  %14720 = vst [vmem:[#allocation9 + $0x8] sm:$0xff] %v17054_v51 }
 0x8e2   : > { %v14496_v56 = vld [vmem:[#allocation2 + $0x28] sm:$0xff] }
 0x8e3   : > { %v14712_v29 = vadd.f32 %v14700_v57, %v14496_v56  ;;  %v17056_v58 = vpop.eup %17055 }
 0x8e4   : > { %14721 = vst [vmem:[#allocation9 + $0x10] sm:$0xff] %v17056_v58 }
 0x8e5   : > { %17061 = vtanh.f32 %v14712_v29 }
 0x8e7   : > { %v17058_v54 = vpop.eup %17057 }
 0x8e8   : > { %14722 = vst [vmem:[#allocation9 + $0x18] sm:$0xff] %v17058_v54 }
 0x8eb   : > { %v17060_v61 = vpop.eup %17059 }
 0x8ec   : > { %14723 = vst [vmem:[#allocation9 + $0x20] sm:$0xff] %v17060_v61 }
 0x8ef   : > { %v17062_v33 = vpop.eup %17061 }
 0x8f0   : > { %14724 = vst [vmem:[#allocation9 + $0x28] sm:$0xff] %v17062_v33 }
 0x8f1 PF: > { %p16993_p11 = scmp.eq.s32.totalorder %s17299_s18, 11  ;;  %s17249_s15 = smov [#allocation9]  }
 0x8f2   : > { %s14735_s20 = sshll.u32 %s17249_s15, 4  ;;  %s14736_s20 = int_to_ptr.vmem [resolvable:$true] %s14735_s20 }
 0x8f3   : > { %s17151_s21 = scalar_lea.vmem %s14736_s20, 768  ;;  %p17158_p1 = scmp.lt.s32.totalorder %s14736_s20, %s14736_s20 }
 0x8f4   : > { %p17152_p13 = scmp.ne.s32.totalorder %s14736_s20, %s17151_s21  ;;  %p17159_p0 = scmp.lt.s32.totalorder %s17151_s21, %s17151_s21 }
 0x8f6   : > { %p17153_p3 = pnand %p17152_p13, %p16993_p11  ;;  %p17160_p8 = por %p17159_p0, %p17158_p1 }
 0x8f8   : > { %p17154_p4 = pneg %p17153_p3 }
 0x8fa   : > { %p17161_p2 = pnand %p17160_p8, %p17154_p4 }
 0x8fc   : > { %17164 = shalt.err (!%p17161_p2)
}
 0x8fd   : > { %s17165_s7 = scalar_lea.hbm %s19677_s3, 768 }
 0x8fe   : > { %p17166_p12 = scmp.ne.s32.totalorder %s19677_s3, %s17165_s7  ;;  %p17171_p5 = scmp.lt.u32.totalorder %s17165_s7, %s19677_s3 }
 0x900   : > { %p17167_p7 = pnand %p17166_p12, %p16993_p11 }
 0x902   : > { %p17168_p10 = pneg %p17167_p7 }
 0x904   : > { %p17173_p6 = pnand %p17171_p5, %p17168_p10 }
 0x906   : > { %17176 = shalt.err (!%p17173_p6)
}
 0x907   : > { %16975 = dma.vmem_to_hbm [thread:$0]  (%p16993_p11), %s14736_s20, 768, %s19677_s3, [#allocation5]  }
 0x908   : > { %17214 = dma.done.wait (%p16993_p11), [#allocation5], 768  }
 0x909   : > { %17216 = vsyncadd (%p16993_p11), [#allocation5], 4294966528 }
 0x90a PF: > { %s20_s17 = sadd.s32 1, %s17239_s17   ;;  %s19694_s12 = smov %s17223_s13 }
 0x90b   : > { %p17_p9 = scmp.ge.s32.totalorder %s20_s17, 14   ;;  %s19695_s13 = smov %s17227_s14 }
 0x90c   : > { %s19696_s14 = smov %s17383_s26  ;;  %s19697_s15 = smov %s17235_s16 }
 0x90d   : > { %s19698_s16 = smov %s19700_s25  ;;  %19 = sbr.rel (!%p17_p9) target bundleno = 7 (0x7), region = 96 }
 0x914   :  { %14748 = vsyncpa [#allocation4], 1 }
 0x915   :  { %14750 = vsyncpa [#allocation4 + $0x1], 1 }
 0x916   :  { %14751 = vsyncpa [#allocation7], 1 }
 0x917   :  { %14753 = vsyncpa [#allocation7 + $0x1], 1 }
 0x918   :  { %14754 = vsyncpa [#allocation5], 1 }
 0x919   :  { %14756 = vsyncpa [#allocation5 + $0x1], 1 }

</bundles_post_ra>
